<compile_context>
chip_gen: v7x
topology: tpu7x:2x2x1
jax: 0.10.0
libtpu: 0.0.40
codegen_flags: <defaults>
</compile_context>

<pallas_src>
import functools

import jax
import jax.numpy as jnp
from jax import lax
from jax.experimental import pallas as pl
from jax.experimental.pallas import tpu as pltpu

EPS = 1e-6


def l2_normalize(a, eps=EPS):
    """Matches the PyTorch `norm`: a / max(||a||, eps)."""
    n = jnp.linalg.norm(a, axis=-1, keepdims=True)
    return a / jnp.maximum(n, eps)


def mug_head_kernel(text_ref, video_ref, out_ref, *, tau, num_tokens, num_frames):
    # text_ref : (TA*T, D)    bf16, L2-normalized, masked token rows are zero
    # video_ref: (1, V*TB, D) bf16, L2-normalized, frame-major (V outer, video inner)
    # out_ref  : (TA, TB)     f32 retrieval logits for this (text, video) tile
    T, V = num_tokens, num_frames
    TA = text_ref.shape[0] // T
    TB = video_ref.shape[1] // V
    neg_inf = jnp.float32(-jnp.inf)

    t2 = text_ref[...]                                   # (TA*T, D) bf16
    v2 = video_ref[0]                                    # (V*TB, D) bf16

    # One MXU matmul for the whole tile (bf16 x bf16, f32 accumulate).
    s = lax.dot_general(t2, v2, (((1,), (1,)), ((), ())),
                        preferred_element_type=jnp.float32)   # (TA*T, V*TB)
    # tau-scaled scores; every softmax below consumes these directly and the
    # pooled outputs are rescaled by 1/tau at the very end.
    s = (s * tau).reshape(TA, T, V, TB)

    # ---- level 1: token -> frame pooling (softmax over frames, axis 2) ----
    e_v = jnp.exp(s - jnp.max(s, axis=2, keepdims=True))
    p_v = e_v * pl.reciprocal(jnp.sum(e_v, axis=2, keepdims=True), approx=True)
    t2v = jnp.sum(s * p_v, axis=2)                       # (TA, T, TB), tau-scaled

    # ---- level 1: frame -> token pooling (softmax over tokens, axis 1) ----
    # NOTE: zero scores (masked tokens, or any exact-zero similarity) are
    # filled with -inf, matching the PyTorch reference's `where(logits == 0)`.
    # A fully-masked clip yields NaN here, exactly like the reference.
    s_fill = jnp.where(s == 0.0, neg_inf, s)
    e_t = jnp.exp(s_fill - jnp.max(s_fill, axis=1, keepdims=True))
    p_t = e_t * pl.reciprocal(jnp.sum(e_t, axis=1, keepdims=True), approx=True)
    v2t = jnp.sum(s * p_t, axis=1)                       # (TA, V, TB), tau-scaled

    # ---- level 2: pool t2v over tokens (exact division, small tensor) ----
    t2v_fill = jnp.where(t2v == 0.0, neg_inf, t2v)
    e2 = jnp.exp(t2v_fill - jnp.max(t2v_fill, axis=1, keepdims=True))
    t2v_s = jnp.sum(t2v * (e2 / jnp.sum(e2, axis=1, keepdims=True)), axis=1)

    # ---- level 2: pool v2t over frames ----
    e3 = jnp.exp(v2t - jnp.max(v2t, axis=1, keepdims=True))
    v2t_s = jnp.sum(v2t * (e3 / jnp.sum(e3, axis=1, keepdims=True)), axis=1)

    # Single lane-dense (TA, TB) store; undo the tau scaling here.
    out_ref[...] = ((t2v_s + v2t_s) * (0.5 / tau)).astype(out_ref.dtype)


def _pick_video_block(B, V, D):
    """Video-batch tile. The (TA, TB) output block requires TB % 128 == 0 or TB == B."""
    video_tile_budget = 8 * 1024 * 1024          # double-buffered bf16 video tile
    for tb in (1024, 512, 256, 128):
        if B % tb == 0 and tb < B and 2 * tb * V * D * 2 <= video_tile_budget:
            return tb
    if B > 128 and B % 128 == 0:
        return 128
    return B


def _pick_text_block(A_pad, T, D, V, TB):
    """Largest text tile (multiple of 8, divides A_pad) fitting a VMEM budget."""
    budget = 20 * 1024 * 1024
    for ta in (512, 256, 128, 64, 32, 16, 8):
        if A_pad % ta:
            continue
        est = (2 * ta * T * D * 2            # double-buffered bf16 text block
               + 2 * TB * V * D * 2          # double-buffered bf16 video tile
               + 5 * ta * T * V * TB * 4     # live f32 score-sized intermediates
               + 2 * ta * TB * 4)            # output block
        if est <= budget:
            return ta
    return 8


def mug_head_forward(text_feat, video_feat, text_mask, tau=100.0):
    """Mug_head forward (mode='mug_frame_token_simple'). Returns (A, B) logits."""
    if text_mask.ndim >= 3:
        text_mask = text_mask.reshape((-1,) + text_mask.shape[2:])
    A, T, D = text_feat.shape
    B, V, _ = video_feat.shape

    # Hoisted prep (plain JAX, once): normalize in f32, fold the token mask into
    # the text features, cast both operands to bf16 for the MXU.
    t_norm = l2_normalize(text_feat.astype(jnp.float32))
    t_norm = (t_norm * text_mask.reshape(A, T, 1).astype(jnp.float32)).astype(jnp.bfloat16)
    v_norm = l2_normalize(video_feat.astype(jnp.float32)).astype(jnp.bfloat16)

    # Pad A up to a multiple of 8 (sublane alignment of the text/output blocks).
    A_pad = -(-A // 8) * 8
    if A_pad != A:
        t_norm = jnp.pad(t_norm, ((0, A_pad - A), (0, 0), (0, 0)))

    TB = _pick_video_block(B, V, D)
    nb = B // TB
    TA = _pick_text_block(A_pad, T, D, V, TB)
    na = A_pad // TA

    # Text flattened to (A_pad*T, D) so the kernel needs no lhs reshape.
    t_flat = t_norm.reshape(A_pad * T, D)
    # Video laid out frame-major within each B-tile: (nb, V*TB, D).
    v_tiles = (v_norm.reshape(nb, TB, V, D)
                     .transpose(0, 2, 1, 3)
                     .reshape(nb, V * TB, D))

    est = (2 * TA * T * D * 2 + 2 * TB * V * D * 2
           + 5 * TA * T * V * TB * 4 + 2 * TA * TB * 4)
    vmem_limit = int(min(48 * 1024 * 1024, max(24 * 1024 * 1024, 2 * est)))

    kernel = functools.partial(mug_head_kernel, tau=float(tau),
                               num_tokens=T, num_frames=V)

    out = pl.pallas_call(
        kernel,
        out_shape=jax.ShapeDtypeStruct((A_pad, B), jnp.float32),
        grid=(nb, na),                       # video tiles outer, text tiles inner
        in_specs=[
            pl.BlockSpec((TA * T, D), lambda b, a: (a, 0)),      # text tile
            pl.BlockSpec((1, V * TB, D), lambda b, a: (b, 0, 0)),  # video tile
        ],
        out_specs=pl.BlockSpec((TA, TB), lambda b, a: (a, b)),
        compiler_params=pltpu.CompilerParams(
            dimension_semantics=("parallel", "parallel"),
            vmem_limit_bytes=vmem_limit),
    )(t_flat, v_tiles)
    return out[:A]


def mug_head_reference(text_feat, video_feat, text_mask, tau=100.0,
                       operand_dtype=jnp.float32):
    """Pure-JAX reference replicating the PyTorch forward (default mode)."""
    t = l2_normalize(text_feat.astype(jnp.float32)).astype(operand_dtype).astype(jnp.float32)
    v = l2_normalize(video_feat.astype(jnp.float32)).astype(operand_dtype).astype(jnp.float32)
    hp = jax.lax.Precision.HIGHEST
    s = jnp.einsum('atd,bvd->abtv', t, v, precision=hp)
    s = jnp.einsum('abtv,at->abtv', s, text_mask.astype(jnp.float32), precision=hp)
    p1 = jax.nn.softmax(s * tau, axis=-1)
    t2v = jnp.sum(s * p1, axis=-1)
    p2 = jax.nn.softmax(jnp.where(s == 0, -jnp.inf, s) * tau, axis=-2)
    v2t = jnp.sum(s * p2, axis=-2)
    p3 = jax.nn.softmax(jnp.where(t2v == 0, -jnp.inf, t2v) * tau, axis=-1)
    t2v = jnp.sum(t2v * p3, axis=2)
    p4 = jax.nn.softmax(v2t * tau, axis=-1)
    v2t = jnp.sum(v2t * p4, axis=2)
    return (t2v + v2t) / 2.0


if __name__ == "__main__":
    A, T = 4, 8      # num text clips, tokens per text
    B, V = 4, 8      # num video clips, frames per video
    D = 32           # feature dim

    key = jax.random.PRNGKey(0)
    k_text, k_video = jax.random.split(key)
    text_feat = jax.random.normal(k_text, (A, T, D), dtype=jnp.float32)
    video_feat = jax.random.normal(k_video, (B, V, D), dtype=jnp.float32)

    # Variable-length text masks (at least one valid token per clip — fully
    # masked clips produce NaN, matching the PyTorch reference).
    lengths = jnp.array([8, 5, 3, 6], dtype=jnp.int32)
    text_mask = (jnp.arange(T)[None, :] < lengths[:, None]).astype(jnp.float32)

    out = jax.block_until_ready(
        mug_head_forward(text_feat, video_feat, text_mask, tau=100.0))

    # Primary check: reference fed the same bf16-quantized operands as the
    # kernel (isolates kernel error from the intended bf16 cast).
    ref_bf16 = jax.block_until_ready(
        mug_head_reference(text_feat, video_feat, text_mask, tau=100.0,
                           operand_dtype=jnp.bfloat16))
    # Secondary sanity check against the full-f32 reference (bounds the bf16
    # quantization effect itself).
    ref_f32 = jax.block_until_ready(
        mug_head_reference(text_feat, video_feat, text_mask, tau=100.0))

    assert out.shape == (A, B), f"bad output shape {out.shape}"
    assert bool(jnp.all(jnp.isfinite(out))), "non-finite output"
    err = float(jnp.max(jnp.abs(out - ref_bf16)))
    assert jnp.allclose(out, ref_bf16, atol=3e-3, rtol=3e-3), (
        f"mismatch vs bf16-operand reference, max abs diff={err}")
    assert jnp.allclose(out, ref_f32, atol=5e-2, rtol=5e-2), (
        "mismatch vs f32 reference beyond bf16-quantization bound")

    print("KERNEL_OK")
</pallas_src>

<mosaic_0001>
module attributes {stable_mosaic.version = 11 : i64} {
  func.func @mug_head_kernel(%arg0: i32, %arg1: i32, %arg2: memref<64x32xbf16, #tpu.memory_space<vmem>>, %arg3: memref<1x32x32xbf16, #tpu.memory_space<vmem>>, %arg4: memref<8x4xf32, #tpu.memory_space<vmem>>) attributes {dimension_semantics = [#tpu.dimension_semantics<parallel>, #tpu.dimension_semantics<parallel>], iteration_bounds = array<i64: 1, 1>, scalar_prefetch = 0 : i64, scratch_operands = 0 : i64, tpu.core_type = #tpu.core_type<tc>, window_params = [{transform_indices = @transform_0, window_bounds = array<i64: 64, 32>}, {transform_indices = @transform_1, window_bounds = array<i64: 1, 32, 32>}, {transform_indices = @transform_2, window_bounds = array<i64: 8, 4>}]} {
    %c0 = arith.constant 0 : index
    %c0_0 = arith.constant 0 : index
    %0 = vector.load %arg2[%c0, %c0_0] : memref<64x32xbf16, #tpu.memory_space<vmem>>, vector<64x32xbf16>
    %c0_1 = arith.constant 0 : index
    %c0_2 = arith.constant 0 : index
    %c0_3 = arith.constant 0 : index
    %1 = vector.load %arg3[%c0_1, %c0_2, %c0_3] : memref<1x32x32xbf16, #tpu.memory_space<vmem>>, vector<1x32x32xbf16>
    %2 = vector.shape_cast %1 : vector<1x32x32xbf16> to vector<32x32xbf16>
    %cst = arith.constant dense<0.000000e+00> : vector<64x32xf32>
    %3 = tpu.matmul %0, %2, %cst {dimension_numbers = #tpu.dot_dimension_numbers<[1], [1], [0], [0], [0, 0, 1, 0], [], []>} : vector<64x32xbf16>, vector<32x32xbf16>, vector<64x32xf32> -> vector<64x32xf32>
    %cst_4 = arith.constant 1.000000e+02 : f32
    %4 = vector.broadcast %cst_4 : f32 to vector<64x32xf32>
    %5 = arith.mulf %3, %4 : vector<64x32xf32>
    %6 = vector.shape_cast %5 : vector<64x32xf32> to vector<8x8x8x4xf32>
    %cst_5 = arith.constant dense<0xFF800000> : vector<8x8x4xf32>
    %7 = vector.multi_reduction <maximumf>, %6, %cst_5 [2] : vector<8x8x8x4xf32> to vector<8x8x4xf32>
    %8 = vector.shape_cast %7 : vector<8x8x4xf32> to vector<8x8x1x4xf32>
    %9 = vector.broadcast %8 : vector<8x8x1x4xf32> to vector<8x8x8x4xf32>
    %10 = arith.subf %6, %9 : vector<8x8x8x4xf32>
    %11 = math.exp %10 : vector<8x8x8x4xf32>
    %cst_6 = arith.constant dense<0.000000e+00> : vector<8x8x4xf32>
    %12 = vector.multi_reduction <add>, %11, %cst_6 [2] : vector<8x8x8x4xf32> to vector<8x8x4xf32>
    %13 = vector.shape_cast %12 : vector<8x8x4xf32> to vector<8x8x1x4xf32>
    %14 = tpu.reciprocal %13 {approx = true} : vector<8x8x1x4xf32> -> vector<8x8x1x4xf32>
    %15 = vector.broadcast %14 : vector<8x8x1x4xf32> to vector<8x8x8x4xf32>
    %16 = arith.mulf %11, %15 : vector<8x8x8x4xf32>
    %17 = arith.mulf %6, %16 : vector<8x8x8x4xf32>
    %cst_7 = arith.constant dense<0.000000e+00> : vector<8x8x4xf32>
    %18 = vector.multi_reduction <add>, %17, %cst_7 [2] : vector<8x8x8x4xf32> to vector<8x8x4xf32>
    %cst_8 = arith.constant 0.000000e+00 : f32
    %19 = vector.broadcast %cst_8 : f32 to vector<8x8x8x4xf32>
    %20 = arith.cmpf oeq, %6, %19 : vector<8x8x8x4xf32>
    %cst_9 = arith.constant 0xFF800000 : f32
    %21 = vector.broadcast %cst_9 : f32 to vector<8x8x8x4xf32>
    %22 = arith.select %20, %21, %6 : vector<8x8x8x4xi1>, vector<8x8x8x4xf32>
    %cst_10 = arith.constant dense<0xFF800000> : vector<8x8x4xf32>
    %23 = vector.multi_reduction <maximumf>, %22, %cst_10 [1] : vector<8x8x8x4xf32> to vector<8x8x4xf32>
    %24 = vector.shape_cast %23 : vector<8x8x4xf32> to vector<8x1x8x4xf32>
    %25 = vector.broadcast %24 : vector<8x1x8x4xf32> to vector<8x8x8x4xf32>
    %26 = arith.subf %22, %25 : vector<8x8x8x4xf32>
    %27 = math.exp %26 : vector<8x8x8x4xf32>
    %cst_11 = arith.constant dense<0.000000e+00> : vector<8x8x4xf32>
    %28 = vector.multi_reduction <add>, %27, %cst_11 [1] : vector<8x8x8x4xf32> to vector<8x8x4xf32>
    %29 = vector.shape_cast %28 : vector<8x8x4xf32> to vector<8x1x8x4xf32>
    %30 = tpu.reciprocal %29 {approx = true} : vector<8x1x8x4xf32> -> vector<8x1x8x4xf32>
    %31 = vector.broadcast %30 : vector<8x1x8x4xf32> to vector<8x8x8x4xf32>
    %32 = arith.mulf %27, %31 : vector<8x8x8x4xf32>
    %33 = arith.mulf %6, %32 : vector<8x8x8x4xf32>
    %cst_12 = arith.constant dense<0.000000e+00> : vector<8x8x4xf32>
    %34 = vector.multi_reduction <add>, %33, %cst_12 [1] : vector<8x8x8x4xf32> to vector<8x8x4xf32>
    %cst_13 = arith.constant 0.000000e+00 : f32
    %35 = vector.broadcast %cst_13 : f32 to vector<8x8x4xf32>
    %36 = arith.cmpf oeq, %18, %35 : vector<8x8x4xf32>
    %cst_14 = arith.constant 0xFF800000 : f32
    %37 = vector.broadcast %cst_14 : f32 to vector<8x8x4xf32>
    %38 = arith.select %36, %37, %18 : vector<8x8x4xi1>, vector<8x8x4xf32>
    %cst_15 = arith.constant dense<0xFF800000> : vector<8x4xf32>
    %39 = vector.multi_reduction <maximumf>, %38, %cst_15 [1] : vector<8x8x4xf32> to vector<8x4xf32>
    %40 = vector.shape_cast %39 : vector<8x4xf32> to vector<8x1x4xf32>
    %41 = vector.broadcast %40 : vector<8x1x4xf32> to vector<8x8x4xf32>
    %42 = arith.subf %38, %41 : vector<8x8x4xf32>
    %43 = math.exp %42 : vector<8x8x4xf32>
    %cst_16 = arith.constant dense<0.000000e+00> : vector<8x4xf32>
    %44 = vector.multi_reduction <add>, %43, %cst_16 [1] : vector<8x8x4xf32> to vector<8x4xf32>
    %45 = vector.shape_cast %44 : vector<8x4xf32> to vector<8x1x4xf32>
    %46 = vector.broadcast %45 : vector<8x1x4xf32> to vector<8x8x4xf32>
    %47 = arith.divf %43, %46 : vector<8x8x4xf32>
    %48 = arith.mulf %18, %47 : vector<8x8x4xf32>
    %cst_17 = arith.constant dense<0.000000e+00> : vector<8x4xf32>
    %49 = vector.multi_reduction <add>, %48, %cst_17 [1] : vector<8x8x4xf32> to vector<8x4xf32>
    %cst_18 = arith.constant dense<0xFF800000> : vector<8x4xf32>
    %50 = vector.multi_reduction <maximumf>, %34, %cst_18 [1] : vector<8x8x4xf32> to vector<8x4xf32>
    %51 = vector.shape_cast %50 : vector<8x4xf32> to vector<8x1x4xf32>
    %52 = vector.broadcast %51 : vector<8x1x4xf32> to vector<8x8x4xf32>
    %53 = arith.subf %34, %52 : vector<8x8x4xf32>
    %54 = math.exp %53 : vector<8x8x4xf32>
    %cst_19 = arith.constant dense<0.000000e+00> : vector<8x4xf32>
    %55 = vector.multi_reduction <add>, %54, %cst_19 [1] : vector<8x8x4xf32> to vector<8x4xf32>
    %56 = vector.shape_cast %55 : vector<8x4xf32> to vector<8x1x4xf32>
    %57 = vector.broadcast %56 : vector<8x1x4xf32> to vector<8x8x4xf32>
    %58 = arith.divf %54, %57 : vector<8x8x4xf32>
    %59 = arith.mulf %34, %58 : vector<8x8x4xf32>
    %cst_20 = arith.constant dense<0.000000e+00> : vector<8x4xf32>
    %60 = vector.multi_reduction <add>, %59, %cst_20 [1] : vector<8x8x4xf32> to vector<8x4xf32>
    %61 = arith.addf %49, %60 : vector<8x4xf32>
    %cst_21 = arith.constant 5.000000e-03 : f32
    %62 = vector.broadcast %cst_21 : f32 to vector<8x4xf32>
    %63 = arith.mulf %61, %62 : vector<8x4xf32>
    %c0_22 = arith.constant 0 : index
    %c0_23 = arith.constant 0 : index
    %64 = vector.load %arg4[%c0_22, %c0_23] : memref<8x4xf32, #tpu.memory_space<vmem>>, vector<8x4xf32>
    tpu.vector_store %arg4[%c0_22, %c0_23], %63 {strides = array<i32>} : memref<8x4xf32, #tpu.memory_space<vmem>>, vector<8x4xf32>,
    return
  }
  func.func @transform_0(%arg0: i32, %arg1: i32) -> (i32, i32) {
    %c0_i32 = arith.constant 0 : i32
    %c0_i32_0 = arith.constant 0 : i32
    return %arg1, %c0_i32 : i32, i32
  }
  func.func @transform_1(%arg0: i32, %arg1: i32) -> (i32, i32, i32) {
    %c0_i32 = arith.constant 0 : i32
    %c0_i32_0 = arith.constant 0 : i32
    %c0_i32_1 = arith.constant 0 : i32
    return %arg0, %c0_i32, %c0_i32_0 : i32, i32, i32
  }
  func.func @transform_2(%arg0: i32, %arg1: i32) -> (i32, i32) {
    %c0_i32 = arith.constant 0 : i32
    return %arg1, %arg0 : i32, i32
  }
}

</mosaic_0001>

<bundles_post_ra>
// kernel: tpu_custom_call.1
= control target key start
LH: loop header
LB: loop body
LE: loop exit
PB: predicated region body
PF: predicated region fallthrough
CT: control target
= control target key end

     0   :  { %vm54_vm0 = vcmask 261120   ;;  %s5937_s20 = smov 120   ;;  %s5938_s21 = smov 124   ;;  %v5944_v24 = vmov 1983009808   ;;  %v327_v26 = vlaneseq  ;;  %vm1410_vm1 = vcmask 31744   ;;  %s9851_s1 = inlined_call_operand.vmem [shape: bf16[1,32,32], index: 1, kind: input, shape index: {}]   ;;  %s9852_s0 = inlined_call_operand.vmem [shape: bf16[64,32], index: 0, kind: input, shape index: {}]   ;;  %s9853_s2 = inlined_call_operand.vmem [shape: f32[8,4], index: 2, kind: output, shape index: {}]  }
   0x1   :  { %v5355_v0 = vld [vmem:[%s9851_s1] sm:$0xff]   ;;  %v5356_v1 = vld [vmem:[%s9851_s1 + $0x8] sm:$0xff]   ;;  %v5359_v4 = vld [vmem:[%s9852_s0 + $0x10] sm:$0xff]   ;;  %s5940_s22 = smov 116   ;;  %s5941_s23 = smov 104   ;;  %v325_v25 = vunpack.c.l.s4 %v5944_v24 }
   0x2   :  { %5342 = vmatprep.subr.msk.bf16.mxu0 %vm54_vm0, %v5355_v0  ;;  %v68_v2 = vsel %vm54_vm0, %v5355_v0, 0  ;;  %5343 = vmatprep.subr.msk.bf16.mxu1 %vm54_vm0, %v5355_v0  ;;  %v5357_v3 = vld [vmem:[%s9852_s0] sm:$0xff]   ;;  %v71_v5 = vsel %vm54_vm0, %v5356_v1, 0  ;;  %v5358_v6 = vld [vmem:[%s9852_s0 + $0x8] sm:$0xff]   ;;  %v5360_v7 = vld [vmem:[%s9852_s0 + $0x18] sm:$0xff]   ;;  %s5939_s0 = smov 112  }
   0x3   :  { %5327 = vmatpush3.bf16.xpose.msra.mxu0 %v68_v2  ;;  %5340 = vmatpush3.bf16.xpose.msra.mxu1 %v68_v2  ;;  %s5942_s24 = smov 108   ;;  %s5943_s25 = smov 100   ;;  %v326_v27 = vunpack.c.0.s8 %v325_v25  ;;  %v6117_v28 = vshrl.u32 %v327_v26, 7  ;;  %v5945_v35 = vmov 1934713408  }
   0x4   :  { %5344 = vmatprep.subr.msk.bf16.mxu0 %vm54_vm0, %v5356_v1  ;;  %5330 = vmatprep.mubr.msk.bf16.mxu0 %vm54_vm0, %v5357_v3  ;;  %v389_v36 = vunpack.c.l.s4 %v5945_v35 }
   0x5   :  { %5345 = vmatprep.subr.msk.bf16.mxu1 %vm54_vm0, %v5356_v1  ;;  %5334 = vmatprep.mubr.msk.bf16.mxu1 %vm54_vm0, %v5359_v4  ;;  %9955 = vst [vmem:[#allocation8_spill] sm:$0xff] %v6117_v28  ;;  %v6120_v31 = vsub.s32 %v326_v27, %v6117_v28 }
   0x6   :  { %v390_v44 = vunpack.c.0.s8 %v389_v36 }
   0x7   :  { %9956 = vst [vmem:[#allocation9_spill] sm:$0xff] %v6120_v31 }
   0x8   :  { %v6129_v53 = vsub.s32 %v390_v44, %v6117_v28 }
   0xa   :  { %9957 = vst [vmem:[#allocation10_spill] sm:$0xff] %v6129_v53 }
   0xb   :  { %5329 = vmatpush3.bf16.xpose.msra.mxu0 %v71_v5  ;;  %5341 = vmatpush3.bf16.xpose.msra.mxu1 %v71_v5 }
  0x12   :  { %5331 = vmatmul.mubr.msk.bf16.vlgmr.msra.gmra.mrb[0].mxu0 %vm54_vm0, %v5358_v6  ;;  %5335 = vmatmul.mubr.msk.bf16.vlgmr.msra.gmra.mrb[0].mxu1 %vm54_vm0, %v5360_v7 }
  0xe5   :  { %v5332_v8 = vpop.f32.mrb[0].mxu0  ;;  %v5336_v9 = vpop.f32.mrb[0].mxu1 }
  0xe6   :  { %v5989_v10 = vmul.f32 100.0, %v5332_v8  ;;  %v107_v11 = vpop.f32.mrb[1].mxu0  ;;  %v123_v12 = vpop.f32.mrb[1].mxu1  ;;  %v5999_v17 = vmul.f32 100.0, %v5336_v9 }
  0xe7   :  { %v5333_v13 = vpop.f32.mrb[2].mxu0  ;;  %v5337_v14 = vpop.f32.mrb[2].mxu1  ;;  %v6021_v18 = vmul.f32 100.0, %v107_v11  ;;  %v6023_v19 = vmul.f32 100.0, %v123_v12 }
  0xe8   :  { %182 = vrot.lane.b32.xlu0 %v5989_v10, %s5937_s20  ;;  %158 = vrot.lane.b32.xlu1 %v5989_v10, %s5938_s21  ;;  %v110_v15 = vpop.f32.mrb[3].mxu0  ;;  %v126_v16 = vpop.f32.mrb[3].mxu1  ;;  %v6037_v20 = vmul.f32 100.0, %v5333_v13  ;;  %v6067_v21 = vmul.f32 100.0, %v5337_v14 }
  0xe9   :  { %9949 = vst [vmem:[#allocation2_spill] sm:$0xff] %v6021_v18  ;;  %9950 = vst [vmem:[#allocation3_spill] sm:$0xff] %v6023_v19  ;;  %v6081_v22 = vmul.f32 100.0, %v110_v15  ;;  %v6095_v23 = vmul.f32 100.0, %v126_v16 }
  0xea   :  { %9951 = vst [vmem:[#allocation4_spill] sm:$0xff] %v6037_v20  ;;  %9952 = vst [vmem:[#allocation5_spill] sm:$0xff] %v6067_v21 }
  0xeb   :  { %9953 = vst [vmem:[#allocation6_spill] sm:$0xff] %v6081_v22  ;;  %9954 = vst [vmem:[#allocation7_spill] sm:$0xff] %v6095_v23 }
  0xec   :  { %230 = vrot.lane.b32.xlu0 %v5989_v10, %s5939_s0  ;;  %206 = vrot.lane.b32.xlu1 %v5989_v10, %s5940_s22 }
  0xf0   :  { %278 = vrot.lane.b32.xlu0 %v5989_v10, %s5941_s23  ;;  %254 = vrot.lane.b32.xlu1 %v5989_v10, %s5942_s24 }
  0xf4   :  { %166 = vrot.lane.b32.xlu0 %v5999_v17, %s5938_s21  ;;  %302 = vrot.lane.b32.xlu1 %v5989_v10, %s5943_s25 }
  0xf8   :  { %214 = vrot.lane.b32.xlu0 %v5999_v17, %s5940_s22  ;;  %190 = vrot.lane.b32.xlu1 %v5999_v17, %s5937_s20 }
  0xfc   :  { %262 = vrot.lane.b32.xlu0 %v5999_v17, %s5942_s24  ;;  %238 = vrot.lane.b32.xlu1 %v5999_v17, %s5939_s0 }
 0x100   :  { %310 = vrot.lane.b32.xlu0 %v5999_v17, %s5943_s25  ;;  %286 = vrot.lane.b32.xlu1 %v5999_v17, %s5941_s23 }
 0x104   :  { %186 = vrot.lane.b32.xlu1 %v6023_v19, %s5937_s20  ;;  %154 = vrot.lane.b32.xlu0 %v6021_v18, %s5938_s21 }
 0x108   :  { %234 = vrot.lane.b32.xlu1 %v6023_v19, %s5939_s0  ;;  %178 = vrot.lane.b32.xlu0 %v6021_v18, %s5937_s20 }
 0x10c   :  { %282 = vrot.lane.b32.xlu1 %v6023_v19, %s5941_s23  ;;  %202 = vrot.lane.b32.xlu0 %v6021_v18, %s5940_s22 }
 0x110   :  { %226 = vrot.lane.b32.xlu0 %v6021_v18, %s5939_s0  ;;  %160 = vrot.lane.b32.xlu1 %v6037_v20, %s5938_s21 }
 0x114   :  { %250 = vrot.lane.b32.xlu0 %v6021_v18, %s5942_s24  ;;  %184 = vrot.lane.b32.xlu1 %v6037_v20, %s5937_s20 }
 0x118   :  { %274 = vrot.lane.b32.xlu0 %v6021_v18, %s5941_s23  ;;  %208 = vrot.lane.b32.xlu1 %v6037_v20, %s5940_s22 }
 0x11c   :  { %298 = vrot.lane.b32.xlu0 %v6021_v18, %s5943_s25  ;;  %232 = vrot.lane.b32.xlu1 %v6037_v20, %s5939_s0 }
 0x120   :  { %162 = vrot.lane.b32.xlu0 %v6023_v19, %s5938_s21  ;;  %256 = vrot.lane.b32.xlu1 %v6037_v20, %s5942_s24 }
 0x124   :  { %210 = vrot.lane.b32.xlu0 %v6023_v19, %s5940_s22  ;;  %280 = vrot.lane.b32.xlu1 %v6037_v20, %s5941_s23 }
 0x128   :  { %258 = vrot.lane.b32.xlu0 %v6023_v19, %s5942_s24  ;;  %304 = vrot.lane.b32.xlu1 %v6037_v20, %s5943_s25 }
 0x12c   :  { %306 = vrot.lane.b32.xlu0 %v6023_v19, %s5943_s25  ;;  %168 = vrot.lane.b32.xlu1 %v6067_v21, %s5938_s21 }
 0x130   :  { %192 = vrot.lane.b32.xlu0 %v6067_v21, %s5937_s20  ;;  %216 = vrot.lane.b32.xlu1 %v6067_v21, %s5940_s22 }
 0x134   :  { %240 = vrot.lane.b32.xlu0 %v6067_v21, %s5939_s0  ;;  %264 = vrot.lane.b32.xlu1 %v6067_v21, %s5942_s24 }
 0x138   :  { %204 = vrot.lane.b32.xlu1 %v6081_v22, %s5940_s22  ;;  %156 = vrot.lane.b32.xlu0 %v6081_v22, %s5938_s21 }
 0x13c   :  { %228 = vrot.lane.b32.xlu1 %v6081_v22, %s5939_s0  ;;  %180 = vrot.lane.b32.xlu0 %v6081_v22, %s5937_s20 }
 0x140   :  { %276 = vrot.lane.b32.xlu1 %v6081_v22, %s5941_s23  ;;  %252 = vrot.lane.b32.xlu0 %v6081_v22, %s5942_s24 }
 0x144   :  { %164 = vrot.lane.b32.xlu1 %v6095_v23, %s5938_s21  ;;  %300 = vrot.lane.b32.xlu0 %v6081_v22, %s5943_s25 }
 0x148   :  { %212 = vrot.lane.b32.xlu1 %v6095_v23, %s5940_s22  ;;  %188 = vrot.lane.b32.xlu0 %v6095_v23, %s5937_s20 }
 0x14c   :  { %260 = vrot.lane.b32.xlu1 %v6095_v23, %s5942_s24  ;;  %236 = vrot.lane.b32.xlu0 %v6095_v23, %s5939_s0 }
 0x150   :  { %308 = vrot.lane.b32.xlu1 %v6095_v23, %s5943_s25  ;;  %284 = vrot.lane.b32.xlu0 %v6095_v23, %s5941_s23 }
 0x154   :  { %312 = vrot.lane.b32.xlu1 %v6067_v21, %s5943_s25  ;;  %288 = vrot.lane.b32.xlu0 %v6067_v21, %s5941_s23 }
 0x15a   :  { %v183_v29 = vpop.permute.xlu0 %182  ;;  %v159_v30 = vpop.permute.xlu1 %158 }
 0x15b   :  { %v594_v32 = vcombine.low %v5989_v10, %v183_v29  ;;  %v595_v33 = vcombine.high %v5989_v10, %v183_v29 }
 0x15d   :  { %v602_v40 = vrot.slane %v594_v32, %v6120_v31  ;;  %v609_v41 = vrot.slane %v595_v33, %v6120_v31 }
 0x15e   :  { %v231_v34 = vpop.permute.xlu0 %230  ;;  %v207_v37 = vpop.permute.xlu1 %206 }
 0x15f   :  { %v610_v38 = vcombine.low %v159_v30, %v207_v37  ;;  %v611_v39 = vcombine.high %v159_v30, %v207_v37 }
 0x161   :  { %v618_v42 = vrot.slane %v610_v38, %v6120_v31  ;;  %v625_v43 = vrot.slane %v611_v39, %v6120_v31 }
 0x162   :  { %v279_v45 = vpop.permute.xlu0 %278  ;;  %v255_v46 = vpop.permute.xlu1 %254 }
 0x163   :  { %v658_v47 = vcombine.low %v602_v40, %v618_v42  ;;  %v659_v48 = vcombine.high %v602_v40, %v618_v42  ;;  %v674_v49 = vcombine.low %v609_v41, %v625_v43  ;;  %v675_v50 = vcombine.high %v609_v41, %v625_v43 }
 0x164   :  { %v626_v51 = vcombine.low %v231_v34, %v279_v45  ;;  %v627_v52 = vcombine.high %v231_v34, %v279_v45 }
 0x165   :  { %v666_v62 = vrot.slane %v658_v47, %v6129_v53  ;;  %v673_v63 = vrot.slane %v659_v48, %v6129_v53  ;;  %v682_v0 = vrot.slane %v674_v49, %v6129_v53  ;;  %v689_v7 = vrot.slane %v675_v50, %v6129_v53 }
 0x166   :  { %v167_v54 = vpop.permute.xlu0 %166  ;;  %v303_v55 = vpop.permute.xlu1 %302  ;;  %v634_v58 = vrot.slane %v626_v51, %v6120_v31  ;;  %v641_v59 = vrot.slane %v627_v52, %v6120_v31 }
 0x167   :  { %v642_v56 = vcombine.low %v255_v46, %v303_v55  ;;  %v643_v57 = vcombine.high %v255_v46, %v303_v55 }
 0x169   :  { %v650_v60 = vrot.slane %v642_v56, %v6120_v31  ;;  %v657_v61 = vrot.slane %v643_v57, %v6120_v31 }
 0x16a   :  { %v215_v1 = vpop.permute.xlu0 %214  ;;  %v6138_v2 = vpop.permute.xlu1 %190 }
 0x16b   :  { %v690_v3 = vcombine.low %v634_v58, %v650_v60  ;;  %v691_v4 = vcombine.high %v634_v58, %v650_v60  ;;  %v706_v5 = vcombine.low %v641_v59, %v657_v61  ;;  %v707_v6 = vcombine.high %v641_v59, %v657_v61 }
 0x16c   :  { %v1154_v8 = vcombine.low %v167_v54, %v215_v1  ;;  %v1155_v9 = vcombine.high %v167_v54, %v215_v1  ;;  %v1138_v10 = vcombine.low %v5999_v17, %v6138_v2  ;;  %v1139_v24 = vcombine.high %v5999_v17, %v6138_v2 }
 0x16d   :  { %v698_v11 = vrot.slane %v690_v3, %v6129_v53  ;;  %v705_v12 = vrot.slane %v691_v4, %v6129_v53  ;;  %v714_v13 = vrot.slane %v706_v5, %v6129_v53  ;;  %v721_v14 = vrot.slane %v707_v6, %v6129_v53 }
 0x16e   :  { %v6148_v15 = vrot.slane %v1154_v8, %v6120_v31  ;;  %v6151_v16 = vrot.slane %v1155_v9, %v6120_v31  ;;  %v6156_v25 = vrot.slane %v1138_v10, %v6120_v31 }
 0x16f   :  { %v6158_v26 = vcombine.low %v666_v62, %v698_v11  ;;  %v6160_v27 = vcombine.high %v666_v62, %v698_v11  ;;  %v6162_v29 = vcombine.low %v673_v63, %v705_v12  ;;  %v6164_v30 = vcombine.high %v673_v63, %v705_v12 }
 0x170   :  { %v6166_v32 = vcombine.low %v682_v0, %v714_v13  ;;  %v6168_v33 = vcombine.high %v682_v0, %v714_v13  ;;  %v6170_v34 = vcombine.low %v689_v7, %v721_v14  ;;  %v6172_v35 = vcombine.high %v689_v7, %v721_v14 }
 0x171   :  { %v1523_v36 = vsel %vm1410_vm1, %v6158_v26, -inf  ;;  %v1530_v37 = vsel %vm1410_vm1, %v6160_v27, -inf  ;;  %v1537_v38 = vsel %vm1410_vm1, %v6162_v29, -inf  ;;  %v1544_v39 = vsel %vm1410_vm1, %v6164_v30, -inf }
 0x172   :  { %9958 = vst [vmem:[#allocation11_spill] sm:$0xff] %v6170_v34  ;;  %9959 = vst [vmem:[#allocation12_spill] sm:$0xff] %v6172_v35  ;;  %v1524_v40 = vrot.slane %v1523_v36, 4  ;;  %v1531_v41 = vrot.slane %v1530_v37, 4  ;;  %v1538_v42 = vrot.slane %v1537_v38, 4  ;;  %v1545_v43 = vrot.slane %v1544_v39, 4 }
 0x173   :  { %v1551_v44 = vsel %vm1410_vm1, %v6166_v32, -inf  ;;  %v1558_v45 = vsel %vm1410_vm1, %v6168_v33, -inf  ;;  %v1565_v46 = vsel %vm1410_vm1, %v6170_v34, -inf  ;;  %v1572_v47 = vsel %vm1410_vm1, %v6172_v35, -inf }
 0x174   :  { %v1525_v48 = vmax.f32 %v1523_v36, %v1524_v40  ;;  %v1532_v49 = vmax.f32 %v1530_v37, %v1531_v41  ;;  %v1539_v50 = vmax.f32 %v1537_v38, %v1538_v42  ;;  %v1546_v51 = vmax.f32 %v1544_v39, %v1545_v43 }
 0x175   :  { %v1552_v52 = vrot.slane %v1551_v44, 4  ;;  %v1559_v54 = vrot.slane %v1558_v45, 4  ;;  %v1566_v55 = vrot.slane %v1565_v46, 4  ;;  %v1573_v56 = vrot.slane %v1572_v47, 4 }
 0x176   :  { %v1526_v57 = vrot.slane %v1525_v48, 2  ;;  %v1533_v58 = vrot.slane %v1532_v49, 2  ;;  %v1540_v59 = vrot.slane %v1539_v50, 2  ;;  %v1547_v60 = vrot.slane %v1546_v51, 2 }
 0x177   :  { %v1553_v61 = vmax.f32 %v1551_v44, %v1552_v52  ;;  %v1560_v62 = vmax.f32 %v1558_v45, %v1559_v54  ;;  %v1567_v63 = vmax.f32 %v1565_v46, %v1566_v55  ;;  %v1574_v0 = vmax.f32 %v1572_v47, %v1573_v56 }
 0x178   :  { %v1527_v1 = vmax.f32 %v1525_v48, %v1526_v57  ;;  %v1534_v3 = vmax.f32 %v1532_v49, %v1533_v58  ;;  %v1541_v4 = vmax.f32 %v1539_v50, %v1540_v59  ;;  %v1548_v5 = vmax.f32 %v1546_v51, %v1547_v60 }
 0x179   :  { %v1554_v6 = vrot.slane %v1553_v61, 2  ;;  %v1561_v7 = vrot.slane %v1560_v62, 2  ;;  %v1568_v8 = vrot.slane %v1567_v63, 2  ;;  %v1575_v9 = vrot.slane %v1574_v0, 2 }
 0x17a   :  { %v1528_v10 = vrot.slane %v1527_v1, 1  ;;  %v1535_v11 = vrot.slane %v1534_v3, 1  ;;  %v1542_v12 = vrot.slane %v1541_v4, 1  ;;  %v1549_v13 = vrot.slane %v1548_v5, 1 }
 0x17b   :  { %v1555_v14 = vmax.f32 %v1553_v61, %v1554_v6  ;;  %v1562_v36 = vmax.f32 %v1560_v62, %v1561_v7  ;;  %v1569_v37 = vmax.f32 %v1567_v63, %v1568_v8  ;;  %v1576_v38 = vmax.f32 %v1574_v0, %v1575_v9  ;;  %v6206_v7 = vpop.permute.xlu1 %238 }
 0x17c   :  { %v1529_v39 = vmax.f32 %v1527_v1, %v1528_v10  ;;  %v1536_v40 = vmax.f32 %v1534_v3, %v1535_v11  ;;  %v1543_v41 = vmax.f32 %v1541_v4, %v1542_v12  ;;  %v1550_v42 = vmax.f32 %v1548_v5, %v1549_v13  ;;  %v6202_v5 = vpop.permute.xlu0 %262 }
 0x17d   :  { %v1556_v43 = vrot.slane %v1555_v14, 1  ;;  %v1563_v44 = vrot.slane %v1562_v36, 1  ;;  %v1570_v45 = vrot.slane %v1569_v37, 1  ;;  %v1577_v46 = vrot.slane %v1576_v38, 1 }
 0x17e   :  { %v1875_v47 = vsub.f32 %v6158_v26, %v1529_v39  ;;  %v1876_v48 = vsub.f32 %v6160_v27, %v1536_v40  ;;  %v1877_v49 = vsub.f32 %v6162_v29, %v1543_v41  ;;  %v1878_v50 = vsub.f32 %v6164_v30, %v1550_v42 }
 0x17f   :  { %v1557_v51 = vmax.f32 %v1555_v14, %v1556_v43  ;;  %v1564_v52 = vmax.f32 %v1562_v36, %v1563_v44  ;;  %v1571_v54 = vmax.f32 %v1569_v37, %v1570_v45  ;;  %v1578_v55 = vmax.f32 %v1576_v38, %v1577_v46  ;;  %v6254_v41 = vpop.permute.xlu1 %286 }
 0x180   :  { %v1955_v56 = vmul.f32 1.442695, %v1875_v47  ;;  %v1957_v57 = vmul.f32 1.442695, %v1876_v48  ;;  %v1959_v58 = vmul.f32 1.442695, %v1877_v49  ;;  %v1202_v59 = vcombine.low %v6156_v25, %v6148_v15  ;;  %v311_v36 = vpop.permute.xlu0 %310 }
 0x181   :  { %v1879_v60 = vsub.f32 %v6166_v32, %v1557_v51  ;;  %v1880_v61 = vsub.f32 %v6168_v33, %v1564_v52  ;;  %v1881_v62 = vsub.f32 %v6170_v34, %v1571_v54  ;;  %v1882_v63 = vsub.f32 %v6172_v35, %v1578_v55 }
 0x182   :  { %5361 = vpow2.f32 %v1955_v56  ;;  %v1961_v0 = vmul.f32 1.442695, %v1878_v50  ;;  %vm3155_vm2 = vcmp.eq.f32.partialorder %v6158_v26, 0.0  ;;  %vm3156_vm3 = vcmp.eq.f32.partialorder %v6160_v27, 0.0 }
 0x183   :  { %5363 = vpow2.f32 %v1957_v57  ;;  %v1963_v1 = vmul.f32 1.442695, %v1879_v60  ;;  %v1965_v3 = vmul.f32 1.442695, %v1880_v61  ;;  %v1967_v4 = vmul.f32 1.442695, %v1881_v62 }
 0x184   :  { %5365 = vpow2.f32 %v1959_v58  ;;  %v1969_v6 = vmul.f32 1.442695, %v1882_v63  ;;  %vm3157_vm4 = vcmp.eq.f32.partialorder %v6162_v29, 0.0  ;;  %vm3158_vm5 = vcmp.eq.f32.partialorder %v6164_v30, 0.0 }
 0x185   :  { %5367 = vpow2.f32 %v1961_v0  ;;  %vm3159_vm6 = vcmp.eq.f32.partialorder %v6166_v32, 0.0  ;;  %vm3160_vm7 = vcmp.eq.f32.partialorder %v6168_v33, 0.0  ;;  %vm3161_vm8 = vcmp.eq.f32.partialorder %v6170_v34, 0.0 }
 0x186   :  { %5369 = vpow2.f32 %v1963_v1  ;;  %v6214_v8 = vsel %vm3155_vm2, -inf, %v6158_v26  ;;  %v6219_v9 = vsel %vm3156_vm3, -inf, %v6160_v27  ;;  %v6225_v10 = vrot.slane %v1139_v24, %v6120_v31 }
 0x187   :  { %5371 = vpow2.f32 %v1965_v3  ;;  %vm3162_vm9 = vcmp.eq.f32.partialorder %v6172_v35, 0.0  ;;  %v6229_v11 = vsel %vm3157_vm4, -inf, %v6162_v29  ;;  %v6232_v12 = vsel %vm3158_vm5, -inf, %v6164_v30 }
 0x188   :  { %5373 = vpow2.f32 %v1967_v4  ;;  %v6235_v13 = vsel %vm3159_vm6, -inf, %v6166_v32  ;;  %v6238_v14 = vsel %vm3160_vm7, -inf, %v6168_v33  ;;  %v6241_v17 = vsel %vm3161_vm8, -inf, %v6170_v34 }
 0x189   :  { %5375 = vpow2.f32 %v1969_v6  ;;  %v3297_v2 = vsel %vm1410_vm1, %v6214_v8, -inf  ;;  %v3298_v24 = vsel %vm1410_vm1, %v6219_v9, -inf  ;;  %v6248_v37 = vsel %vm3162_vm9, -inf, %v6172_v35 }
 0x18a   :  { %v3299_v38 = vmax.f32 %v3297_v2, %v3298_v24  ;;  %v3300_v39 = vsel %vm1410_vm1, %v6229_v11, -inf  ;;  %v3302_v40 = vsel %vm1410_vm1, %v6232_v12, -inf  ;;  %v3304_v42 = vsel %vm1410_vm1, %v6235_v13, -inf }
 0x18b   :  { %v6260_v43 = vsel %vm1410_vm1, %v6238_v14, -inf  ;;  %v6264_v44 = vsel %vm1410_vm1, %v6241_v17, -inf  ;;  %v1203_v45 = vcombine.high %v6156_v25, %v6148_v15  ;;  %v1186_v50 = vcombine.low %v6202_v5, %v311_v36 }
 0x18c   :  { %v6268_v46 = vpop.eup %5361  ;;  %v3301_v47 = vmax.f32 %v3299_v38, %v3300_v39  ;;  %v6281_v54 = vsel %vm1410_vm1, %v6248_v37, -inf  ;;  %v1187_v15 = vcombine.high %v6202_v5, %v311_v36  ;;  %v6291_v60 = vrot.slane %v1202_v59, %v6129_v53 }
 0x18d   :  { %v6275_v51 = vpop.eup %5363  ;;  %v2163_v52 = vsel %vm1410_vm1, %v6268_v46, 0.0  ;;  %v6298_v0 = vrot.slane %v1203_v45, %v6129_v53  ;;  %v6301_v1 = vrot.slane %v1186_v50, %v6120_v31  ;;  %vm4460_vm3 = vcmask 1041409  }
 0x18e   :  { %v6286_v55 = vpop.eup %5365  ;;  %v2164_v56 = vrot.slane %v2163_v52, 4  ;;  %v2170_v57 = vsel %vm1410_vm1, %v6275_v51, 0.0  ;;  %v3303_v58 = vmax.f32 %v3301_v47, %v3302_v40  ;;  %9960 = vst [vmem:[#allocation13_spill] sm:$0xff] %v6291_v60  ;;  %v6312_v39 = vrot.slane %v1187_v15, %v6120_v31 }
 0x18f   :  { %v6293_v61 = vpop.eup %5367  ;;  %v2171_v62 = vrot.slane %v2170_v57, 4  ;;  %v2177_v63 = vsel %vm1410_vm1, %v6286_v55, 0.0  ;;  %9961 = vst [vmem:[#allocation14_spill] sm:$0xff] %v6298_v0  ;;  %vm4463_vm4 = vcmask 1042434   ;;  %vm4466_vm5 = vcmask 1043459  }
 0x190   :  { %v6303_v3 = vpop.eup %5369  ;;  %v2165_v4 = vadd.f32 %v2164_v56, %v2163_v52  ;;  %v2178_v5 = vrot.slane %v2177_v63, 4  ;;  %v2184_v59 = vsel %vm1410_vm1, %v6293_v61, 0.0  ;;  %v3305_v6 = vmax.f32 %v3303_v58, %v3304_v42 }
 0x191   :  { %v6307_v2 = vpop.eup %5371  ;;  %v2172_v24 = vadd.f32 %v2171_v62, %v2170_v57  ;;  %v2185_v36 = vrot.slane %v2184_v59, 4  ;;  %v2191_v38 = vsel %vm1410_vm1, %v6303_v3, 0.0  ;;  %vm4469_vm6 = vcmask 1044484  }
 0x192   :  { %v6314_v40 = vpop.eup %5373  ;;  %v2166_v45 = vrot.slane %v2165_v4, 2  ;;  %v2179_v47 = vadd.f32 %v2178_v5, %v2177_v63  ;;  %v2192_v50 = vrot.slane %v2191_v38, 4  ;;  %v2198_v52 = vsel %vm1410_vm1, %v6307_v2, 0.0 }
 0x193   :  { %v6318_v56 = vpop.eup %5375  ;;  %v2173_v42 = vrot.slane %v2172_v24, 2  ;;  %v2186_v58 = vadd.f32 %v2185_v36, %v2184_v59  ;;  %v2199_v57 = vrot.slane %v2198_v52, 4  ;;  %v2205_v62 = vsel %vm1410_vm1, %v6314_v40, 0.0 }
 0x194   :  { %9962 = vst [vmem:[#allocation15_spill] sm:$0xff] %v6318_v56  ;;  %v2167_v49 = vadd.f32 %v2166_v45, %v2165_v4  ;;  %v2180_v48 = vrot.slane %v2179_v47, 2  ;;  %v2193_v15 = vadd.f32 %v2192_v50, %v2191_v38  ;;  %v2206_v25 = vrot.slane %v2205_v62, 4 }
 0x195   :  { %v2174_v23 = vadd.f32 %v2173_v42, %v2172_v24  ;;  %v2187_v22 = vrot.slane %v2186_v58, 2  ;;  %v2200_v21 = vadd.f32 %v2199_v57, %v2198_v52  ;;  %v2212_v63 = vsel %vm1410_vm1, %v6318_v56, 0.0 }
 0x196   :  { %v2168_v5 = vrot.slane %v2167_v49, 1  ;;  %v2181_v20 = vadd.f32 %v2180_v48, %v2179_v47  ;;  %v2194_v18 = vrot.slane %v2193_v15, 2  ;;  %v2207_v19 = vadd.f32 %v2206_v25, %v2205_v62 }
 0x197   :  { %v2175_v28 = vrot.slane %v2174_v23, 1  ;;  %v2188_v59 = vadd.f32 %v2187_v22, %v2186_v58  ;;  %v2201_v36 = vrot.slane %v2200_v21, 2  ;;  %v2213_v0 = vrot.slane %v2212_v63, 4 }
 0x198   :  { %v2169_v60 = vadd.f32 %v2168_v5, %v2167_v49  ;;  %v2182_v35 = vrot.slane %v2181_v20, 1  ;;  %v2195_v4 = vadd.f32 %v2194_v18, %v2193_v15  ;;  %v2208_v45 = vrot.slane %v2207_v19, 2 }
 0x199   :  { %v2176_v38 = vadd.f32 %v2175_v28, %v2174_v23  ;;  %v2189_v50 = vrot.slane %v2188_v59, 1  ;;  %v2202_v24 = vadd.f32 %v2201_v36, %v2200_v21  ;;  %v2214_v42 = vadd.f32 %v2213_v0, %v2212_v63 }
 0x19a   :  { %v2183_v52 = vadd.f32 %v2182_v35, %v2181_v20  ;;  %v2196_v57 = vrot.slane %v2195_v4, 1  ;;  %v2209_v34 = vadd.f32 %v2208_v45, %v2207_v19  ;;  %5377 = vrcp.f32 %v2169_v60 }
 0x19b   :  { %v2190_v56 = vadd.f32 %v2189_v50, %v2188_v59  ;;  %v2203_v48 = vrot.slane %v2202_v24, 1  ;;  %v2215_v47 = vrot.slane %v2214_v42, 2  ;;  %5379 = vrcp.f32 %v2176_v38 }
 0x19c   :  { %v2197_v25 = vadd.f32 %v2196_v57, %v2195_v4  ;;  %v2210_v22 = vrot.slane %v2209_v34, 1  ;;  %5381 = vrcp.f32 %v2183_v52  ;;  %v3307_v49 = vmax.f32 %v3305_v6, %v6260_v43 }
 0x19d   :  { %v2204_v58 = vadd.f32 %v2203_v48, %v2202_v24  ;;  %v2216_v18 = vadd.f32 %v2215_v47, %v2214_v42  ;;  %5383 = vrcp.f32 %v2190_v56  ;;  %v1171_v21 = vcombine.high %v6206_v7, %v6254_v41 }
 0x19e   :  { %v2211_v23 = vadd.f32 %v2210_v22, %v2209_v34  ;;  %5385 = vrcp.f32 %v2197_v25  ;;  %v3309_v19 = vmax.f32 %v3307_v49, %v6264_v44  ;;  %v9963_v20 = vcombine.low %v6206_v7, %v6254_v41 }
 0x19f   :  { %v2217_v35 = vrot.slane %v2216_v18, 1  ;;  %5387 = vrcp.f32 %v2204_v58  ;;  %v9964_v43 = vcombine.low %v6225_v10, %v6151_v16  ;;  %v6339_v0 = vrot.slane %v1171_v21, %v6120_v31 }
 0x1a0   :  { %v1178_v28 = vrot.slane %v9963_v20, %v6120_v31  ;;  %5389 = vrcp.f32 %v2211_v23  ;;  %v3311_v34 = vmax.f32 %v3309_v19, %v6281_v54  ;;  %v9965_v41 = vcombine.high %v6225_v10, %v6151_v16 }
 0x1a1   :  { %v6336_v60 = vrot.slane %v9964_v43, %v6129_v53  ;;  %v2218_v7 = vadd.f32 %v2217_v35, %v2216_v18  ;;  %v1250_v62 = vcombine.low %v6339_v0, %v6312_v39  ;;  %v1251_v15 = vcombine.high %v6339_v0, %v6312_v39 }
 0x1a2   :  { %v1234_v44 = vcombine.low %v1178_v28, %v6301_v1  ;;  %v1235_v6 = vcombine.high %v1178_v28, %v6301_v1  ;;  %v6348_v56 = vrot.slane %v9965_v41, %v6129_v53  ;;  %v3403_v63 = vsub.f32 %v6214_v8, %v3311_v34 }
 0x1a3   :  { %v3404_v54 = vsub.f32 %v6219_v9, %v3311_v34  ;;  %v3405_v5 = vsub.f32 %v6229_v11, %v3311_v34  ;;  %v3406_v1 = vsub.f32 %v6232_v12, %v3311_v34  ;;  %5391 = vrcp.f32 %v2218_v7 }
 0x1a4   :  { %v3407_v59 = vsub.f32 %v6235_v13, %v3311_v34  ;;  %v3408_v16 = vsub.f32 %v6238_v14, %v3311_v34  ;;  %v3409_v10 = vsub.f32 %v6241_v17, %v3311_v34  ;;  %v5378_v36 = vpop.eup %5377  ;;  %v3410_v4 = vsub.f32 %v6248_v37, %v3311_v34 }
 0x1a5   :  { %v3483_v45 = vmul.f32 1.442695, %v3403_v63  ;;  %v3485_v38 = vmul.f32 1.442695, %v3404_v54  ;;  %v3487_v50 = vmul.f32 1.442695, %v3405_v5  ;;  %v5380_v8 = vpop.eup %5379  ;;  %v2579_v9 = vmul.f32 %v5378_v36, %v6268_v46 }
 0x1a6   :  { %v3489_v24 = vmul.f32 1.442695, %v3406_v1  ;;  %v6363_v11 = vmul.f32 1.442695, %v3407_v59  ;;  %v6365_v12 = vmul.f32 1.442695, %v3408_v16  ;;  %v5382_v42 = vpop.eup %5381  ;;  %v2580_v13 = vmul.f32 %v5380_v8, %v6275_v51 }
 0x1a7   :  { %5393 = vpow2.f32 %v3483_v45  ;;  %v6368_v14 = vmul.f32 1.442695, %v3409_v10  ;;  %v6370_v17 = vmul.f32 1.442695, %v3410_v4  ;;  %v5384_v37 = vpop.eup %5383  ;;  %v2581_v52 = vmul.f32 %v5382_v42, %v6286_v55  ;;  %v9967_v1 = vld [vmem:[#allocation15_spill] sm:$0xff]  ;;  %v9968_v8 = vld [vmem:[#allocation12_spill] sm:$0xff] }
 0x1a8   :  { %v2643_v57 = vmul.f32 %v2579_v9, %v6158_v26  ;;  %5395 = vpow2.f32 %v3485_v38  ;;  %v6375_v46 = vrot.slane %v1234_v44, %v6129_v53  ;;  %v5386_v48 = vpop.eup %5385  ;;  %v2582_v47 = vmul.f32 %v5384_v37, %v6293_v61 }
 0x1a9   :  { %v2644_v25 = vmul.f32 %v2580_v13, %v6160_v27  ;;  %5397 = vpow2.f32 %v3487_v50  ;;  %v6380_v51 = vrot.slane %v1235_v6, %v6129_v53  ;;  %v5388_v22 = vpop.eup %5387  ;;  %v2583_v49 = vmul.f32 %v5386_v48, %v6303_v3 }
 0x1aa   :  { %v2645_v55 = vmul.f32 %v2581_v52, %v6162_v29  ;;  %v2803_v58 = vsel %vm1410_vm1, %v2643_v57, 0.0  ;;  %5399 = vpow2.f32 %v3489_v24  ;;  %v5390_v18 = vpop.eup %5389  ;;  %v2584_v21 = vmul.f32 %v5388_v22, %v6307_v2  ;;  %v9966_v2 = vld [vmem:[#allocation11_spill] sm:$0xff] }
 0x1ab   :  { %v2646_v23 = vmul.f32 %v2582_v47, %v6164_v30  ;;  %v2804_v61 = vrot.slane %v2803_v58, 4  ;;  %v2810_v19 = vsel %vm1410_vm1, %v2644_v25, 0.0  ;;  %v2585_v20 = vmul.f32 %v5390_v18, %v6314_v40 }
 0x1ac   :  { %v2647_v28 = vmul.f32 %v2583_v49, %v6166_v32  ;;  %v2811_v35 = vrot.slane %v2810_v19, 4  ;;  %v2817_v3 = vsel %vm1410_vm1, %v2645_v55, 0.0  ;;  %v2648_v43 = vmul.f32 %v2584_v21, %v6168_v33 }
 0x1ad   :  { %v2805_v34 = vadd.f32 %v2804_v61, %v2803_v58  ;;  %v2818_v44 = vrot.slane %v2817_v3, 4  ;;  %v2824_v6 = vsel %vm1410_vm1, %v2646_v23, 0.0  ;;  %v5392_v7 = vpop.eup %5391  ;;  %v2649_v41 = vmul.f32 %v2585_v20, %v9966_v2 }
 0x1ae   :  { %v2812_v63 = vadd.f32 %v2811_v35, %v2810_v19  ;;  %v2825_v54 = vrot.slane %v2824_v6, 4  ;;  %v2831_v5 = vsel %vm1410_vm1, %v2647_v28, 0.0  ;;  %v2586_v40 = vmul.f32 %v5392_v7, %v9967_v1 }
 0x1af   :  { %v2806_v59 = vrot.slane %v2805_v34, 2  ;;  %v2819_v16 = vadd.f32 %v2818_v44, %v2817_v3  ;;  %v2832_v10 = vrot.slane %v2831_v5, 4  ;;  %v2838_v45 = vsel %vm1410_vm1, %v2648_v43, 0.0 }
 0x1b0   :  { %v2813_v36 = vrot.slane %v2812_v63, 2  ;;  %v2826_v4 = vadd.f32 %v2825_v54, %v2824_v6  ;;  %v2845_v38 = vsel %vm1410_vm1, %v2649_v41, 0.0  ;;  %v2650_v9 = vmul.f32 %v2586_v40, %v9968_v8 }
 0x1b1   :  { %v6398_v50 = vpop.eup %5393  ;;  %v2807_v24 = vadd.f32 %v2806_v59, %v2805_v34  ;;  %v2820_v42 = vrot.slane %v2819_v16, 2  ;;  %v2833_v13 = vadd.f32 %v2832_v10, %v2831_v5  ;;  %v2839_v48 = vrot.slane %v2838_v45, 4 }
 0x1b2   :  { %v6401_v37 = vpop.eup %5395  ;;  %v2814_v52 = vadd.f32 %v2813_v36, %v2812_v63  ;;  %v2827_v57 = vrot.slane %v2826_v4, 2  ;;  %v2846_v47 = vrot.slane %v2845_v38, 4  ;;  %v2852_v58 = vsel %vm1410_vm1, %v2650_v9, 0.0 }
 0x1b3   :  { %v6403_v25 = vpop.eup %5397  ;;  %v2808_v22 = vrot.slane %v2807_v24, 1  ;;  %v2821_v49 = vadd.f32 %v2820_v42, %v2819_v16  ;;  %v2834_v55 = vrot.slane %v2833_v13, 2  ;;  %v2840_v61 = vadd.f32 %v2839_v48, %v2838_v45 }
 0x1b4   :  { %v6406_v18 = vpop.eup %5399  ;;  %v2815_v21 = vrot.slane %v2814_v52, 1  ;;  %v2828_v23 = vadd.f32 %v2827_v57, %v2826_v4  ;;  %v2847_v19 = vadd.f32 %v2846_v47, %v2845_v38  ;;  %v2853_v3 = vrot.slane %v2852_v58, 4 }
 0x1b5   :  { %v6408_v20 = vadd.f32 %v2808_v22, %v2807_v24  ;;  %v2822_v28 = vrot.slane %v2821_v49, 1  ;;  %v2835_v35 = vadd.f32 %v2834_v55, %v2833_v13  ;;  %v2841_v44 = vrot.slane %v2840_v61, 2 }
 0x1b6   :  { %v6410_v43 = vadd.f32 %v2815_v21, %v2814_v52  ;;  %v2829_v34 = vrot.slane %v2828_v23, 1  ;;  %v2848_v6 = vrot.slane %v2847_v19, 2  ;;  %v2854_v63 = vadd.f32 %v2853_v3, %v2852_v58 }
 0x1b7   :  { %v6412_v7 = vadd.f32 %v2822_v28, %v2821_v49  ;;  %v2836_v41 = vrot.slane %v2835_v35, 1  ;;  %5401 = vpow2.f32 %v6363_v11  ;;  %v2842_v5 = vadd.f32 %v2841_v44, %v2840_v61 }
 0x1b8   :  { %v6415_v54 = vadd.f32 %v2829_v34, %v2828_v23  ;;  %v2849_v1 = vadd.f32 %v2848_v6, %v2847_v19  ;;  %5403 = vpow2.f32 %v6365_v12  ;;  %v2855_v59 = vrot.slane %v2854_v63, 2 }
 0x1b9   :  { %v6418_v40 = vadd.f32 %v2836_v41, %v2835_v35  ;;  %5405 = vpow2.f32 %v6368_v14  ;;  %v3609_v16 = vsel %vm1410_vm1, %v6398_v50, 0.0  ;;  %v2843_v10 = vrot.slane %v2842_v5, 1 }
 0x1ba   :  { %v2850_v36 = vrot.slane %v2849_v1, 1  ;;  %5407 = vpow2.f32 %v6370_v17  ;;  %v3610_v11 = vsel %vm1410_vm1, %v6401_v37, 0.0  ;;  %v2856_v4 = vadd.f32 %v2855_v59, %v2854_v63 }
 0x1bb   :  { %9969 = vst [vmem:[#allocation11_spill] sm:$0xff] %v6418_v40  ;;  %v3611_v45 = vadd.f32 %v3610_v11, %v3609_v16  ;;  %v3612_v12 = vsel %vm1410_vm1, %v6403_v25, 0.0  ;;  %v3614_v38 = vsel %vm1410_vm1, %v6406_v18, 0.0  ;;  %v6430_v9 = vadd.f32 %v2843_v10, %v2842_v5 }
 0x1bc   :  { %v6432_v14 = vadd.f32 %v2850_v36, %v2849_v1  ;;  %vm3971_vm10 = vcmp.eq.f32.partialorder %v6408_v20, 0.0  ;;  %vm3972_vm11 = vcmp.eq.f32.partialorder %v6410_v43, 0.0  ;;  %v2857_v17 = vrot.slane %v2856_v4, 1 }
 0x1bd   :  { %9970 = vst [vmem:[#allocation15_spill] sm:$0xff] %v6430_v9  ;;  %v3613_v24 = vadd.f32 %v3612_v12, %v3611_v45  ;;  %vm3973_vm12 = vcmp.eq.f32.partialorder %v6412_v7, 0.0  ;;  %vm3974_vm13 = vcmp.eq.f32.partialorder %v6415_v54, 0.0  ;;  %vm3975_vm14 = vcmp.eq.f32.partialorder %v6418_v40, 0.0 }
 0x1be   :  { %9971 = vst [vmem:[#allocation12_spill] sm:$0xff] %v6432_v14  ;;  %vm3976_vm15 = vcmp.eq.f32.partialorder %v6430_v9, 0.0  ;;  %vm3977_vm0 = vcmp.eq.f32.partialorder %v6432_v14, 0.0  ;;  %v6442_v42 = vsel %vm3971_vm10, -inf, %v6408_v20  ;;  %v6444_v13 = vadd.f32 %v2857_v17, %v2856_v4  ;;  %v9973_v17 = vld [vmem:[#allocation13_spill] sm:$0xff] }
 0x1bf   :  { %v3615_v52 = vadd.f32 %v3614_v38, %v3613_v24  ;;  %v6447_v57 = vsel %vm3972_vm11, -inf, %v6410_v43  ;;  %v6450_v48 = vsel %vm3973_vm12, -inf, %v6412_v7  ;;  %v6453_v47 = vsel %vm3974_vm13, -inf, %v6415_v54 }
 0x1c0   :  { %9972 = vst [vmem:[#allocation16_spill] sm:$0xff] %v6444_v13  ;;  %v6456_v22 = vsel %vm3975_vm14, -inf, %v6418_v40  ;;  %v6459_v49 = vsel %vm3976_vm15, -inf, %v6430_v9  ;;  %v6462_v55 = vsel %vm3977_vm0, -inf, %v6432_v14  ;;  %vm3978_vm2 = vcmp.eq.f32.partialorder %v6444_v13, 0.0 }
 0x1c1   :  { %v6464_v58 = vpop.eup %5401  ;;  %v4113_v21 = vsel %vm1410_vm1, %v6442_v42, -inf  ;;  %v4114_v23 = vsel %vm1410_vm1, %v6447_v57, -inf  ;;  %v4116_v61 = vsel %vm1410_vm1, %v6450_v48, -inf  ;;  %v6478_v35 = vsel %vm3978_vm2, -inf, %v6444_v13 }
 0x1c2   :  { %v6473_v19 = vpop.eup %5403  ;;  %v3616_v28 = vsel %vm1410_vm1, %v6464_v58, 0.0  ;;  %v4115_v3 = vmax.f32 %v4113_v21, %v4114_v23  ;;  %v4118_v34 = vsel %vm1410_vm1, %v6453_v47, -inf  ;;  %v4120_v63 = vsel %vm1410_vm1, %v6456_v22, -inf  ;;  %v9974_v21 = vld [vmem:[#allocation14_spill] sm:$0xff] }
 0x1c3   :  { %v6482_v44 = vpop.eup %5405  ;;  %v3617_v6 = vadd.f32 %v3616_v28, %v3615_v52  ;;  %v3618_v41 = vsel %vm1410_vm1, %v6473_v19, 0.0  ;;  %v4122_v5 = vsel %vm1410_vm1, %v6459_v49, -inf  ;;  %v4124_v10 = vsel %vm1410_vm1, %v6462_v55, -inf }
 0x1c4   :  { %v6490_v1 = vpop.eup %5407  ;;  %v3620_v59 = vsel %vm1410_vm1, %v6482_v44, 0.0  ;;  %v4117_v16 = vmax.f32 %v4115_v3, %v4116_v61  ;;  %v4126_v36 = vsel %vm1410_vm1, %v6478_v35, -inf  ;;  %v1258_v45 = vrot.slane %v1250_v62, %v6129_v53 }
 0x1c5   :  { %v3619_v11 = vadd.f32 %v3618_v41, %v3617_v6  ;;  %v3622_v4 = vsel %vm1410_vm1, %v6490_v1, 0.0  ;;  %v1265_v12 = vrot.slane %v1251_v15, %v6129_v53  ;;  %v6510_v24 = vcombine.low %v9973_v17, %v6375_v46 }
 0x1c6   :  { %v4119_v38 = vmax.f32 %v4117_v16, %v4118_v34  ;;  %v6514_v52 = vcombine.high %v9973_v17, %v6375_v46  ;;  %v6518_v23 = vcombine.low %v9974_v21, %v6380_v51  ;;  %v6522_v62 = vcombine.high %v9974_v21, %v6380_v51 }
 0x1c7   :  { %v3621_v61 = vadd.f32 %v3620_v59, %v3619_v11  ;;  %v6525_v39 = vcombine.low %v6336_v60, %v1258_v45  ;;  %v6528_v0 = vcombine.high %v6336_v60, %v1258_v45  ;;  %v6531_v28 = vcombine.low %v6348_v56, %v1265_v12 }
 0x1c8   :  { %v4121_v15 = vmax.f32 %v4119_v38, %v4120_v63  ;;  %v6534_v46 = vcombine.high %v6348_v56, %v1265_v12  ;;  %v1747_v3 = vsel %vm1410_vm1, %v6510_v24, -inf  ;;  %v1754_v51 = vsel %vm1410_vm1, %v6514_v52, -inf }
 0x1c9   :  { %v3623_v34 = vadd.f32 %v3622_v4, %v3621_v61  ;;  %v1748_v6 = vrot.slane %v1747_v3, 4  ;;  %v1761_v41 = vsel %vm1410_vm1, %v6518_v23, -inf  ;;  %v1755_v59 = vrot.slane %v1754_v51, 4 }
 0x1ca   :  { %v4123_v60 = vmax.f32 %v4121_v15, %v4122_v5  ;;  %v1762_v63 = vrot.slane %v1761_v41, 4  ;;  %v1768_v16 = vsel %vm1410_vm1, %v6522_v62, -inf  ;;  %v1775_v45 = vsel %vm1410_vm1, %v6525_v39, -inf }
 0x1cb   :  { %5409 = vrcp.f32 %v3623_v34  ;;  %v1749_v56 = vmax.f32 %v1747_v3, %v1748_v6  ;;  %v1769_v11 = vrot.slane %v1768_v16, 4  ;;  %v1756_v12 = vmax.f32 %v1754_v51, %v1755_v59 }
 0x1cc   :  { %v4125_v4 = vmax.f32 %v4123_v60, %v4124_v10  ;;  %v1763_v38 = vmax.f32 %v1761_v41, %v1762_v63  ;;  %v1776_v17 = vrot.slane %v1775_v45, 4  ;;  %v6548_v5 = vsel %vm1410_vm1, %v6528_v0, -inf }
 0x1cd   :  { %v1750_v21 = vrot.slane %v1749_v56, 2  ;;  %v1770_v61 = vmax.f32 %v1768_v16, %v1769_v11  ;;  %v6552_v15 = vsel %vm1410_vm1, %v6531_v28, -inf  ;;  %v1757_v3 = vrot.slane %v1756_v12, 2 }
 0x1ce   :  { %v4127_v34 = vmax.f32 %v4125_v4, %v4126_v36  ;;  %v1764_v6 = vrot.slane %v1763_v38, 2  ;;  %v6554_v53 = vmax.f32 %v1775_v45, %v1776_v17  ;;  %vm4472_vm7 = vcmask 1045509  }
 0x1cf   :  { %v1751_v31 = vmax.f32 %v1749_v56, %v1750_v21  ;;  %v1771_v10 = vrot.slane %v1770_v61, 2  ;;  %v1758_v41 = vmax.f32 %v1756_v12, %v1757_v3  ;;  %vm4475_vm8 = vcmask 1046534  }
 0x1d0   :  { %v4219_v60 = vsub.f32 %v6442_v42, %v4127_v34  ;;  %v4220_v59 = vsub.f32 %v6447_v57, %v4127_v34  ;;  %v4221_v63 = vsub.f32 %v6450_v48, %v4127_v34  ;;  %v4222_v16 = vsub.f32 %v6453_v47, %v4127_v34 }
 0x1d1   :  { %v4223_v36 = vsub.f32 %v6456_v22, %v4127_v34  ;;  %v4224_v11 = vsub.f32 %v6459_v49, %v4127_v34  ;;  %v4225_v45 = vsub.f32 %v6462_v55, %v4127_v34  ;;  %v4226_v56 = vsub.f32 %v6478_v35, %v4127_v34 }
 0x1d2   :  { %v4299_v4 = vmul.f32 1.442695, %v4219_v60  ;;  %v4301_v17 = vmul.f32 1.442695, %v4220_v59  ;;  %v4303_v21 = vmul.f32 1.442695, %v4221_v63  ;;  %v1765_v57 = vmax.f32 %v1763_v38, %v1764_v6 }
 0x1d3   :  { %v4305_v51 = vmul.f32 1.442695, %v4222_v16  ;;  %v4307_v42 = vmul.f32 1.442695, %v4223_v36  ;;  %v4309_v13 = vmul.f32 1.442695, %v4224_v11  ;;  %v1772_v40 = vmax.f32 %v1770_v61, %v1771_v10 }
 0x1d4   :  { %5411 = vpow2.f32 %v4299_v4  ;;  %v4311_v48 = vmul.f32 1.442695, %v4225_v45  ;;  %v4313_v14 = vmul.f32 1.442695, %v4226_v56  ;;  %v1752_v47 = vrot.slane %v1751_v31, 1 }
 0x1d5   :  { %v5410_v9 = vpop.eup %5409  ;;  %5413 = vpow2.f32 %v4301_v17  ;;  %v1759_v22 = vrot.slane %v1758_v41, 1  ;;  %v1766_v49 = vrot.slane %v1765_v57, 1  ;;  %v1773_v16 = vrot.slane %v1772_v40, 1 }
 0x1d6   :  { %v3723_v55 = vmul.f32 %v5410_v9, %v6398_v50  ;;  %v3724_v35 = vmul.f32 %v5410_v9, %v6401_v37  ;;  %v3725_v34 = vmul.f32 %v5410_v9, %v6403_v25  ;;  %v3726_v12 = vmul.f32 %v5410_v9, %v6406_v18 }
 0x1d7   :  { %v3727_v38 = vmul.f32 %v5410_v9, %v6464_v58  ;;  %v3728_v3 = vmul.f32 %v5410_v9, %v6473_v19  ;;  %v3729_v6 = vmul.f32 %v5410_v9, %v6482_v44  ;;  %v3730_v60 = vmul.f32 %v5410_v9, %v6490_v1 }
 0x1d8   :  { %v3787_v59 = vmul.f32 %v3723_v55, %v6158_v26  ;;  %v3788_v61 = vmul.f32 %v3724_v35, %v6160_v27  ;;  %v3789_v50 = vmul.f32 %v3725_v34, %v6162_v29  ;;  %v3790_v37 = vmul.f32 %v3726_v12, %v6164_v30 }
 0x1d9   :  { %v3791_v25 = vmul.f32 %v3727_v38, %v6166_v32  ;;  %v3792_v18 = vmul.f32 %v3728_v3, %v6168_v33  ;;  %v3793_v58 = vmul.f32 %v3729_v6, %v9966_v2  ;;  %v3794_v19 = vmul.f32 %v3730_v60, %v9968_v8 }
 0x1da   :  { %v3865_v44 = vsel %vm1410_vm1, %v3787_v59, 0.0  ;;  %v3866_v9 = vsel %vm1410_vm1, %v3788_v61, 0.0  ;;  %v3868_v26 = vsel %vm1410_vm1, %v3789_v50, 0.0  ;;  %v3870_v27 = vsel %vm1410_vm1, %v3790_v37, 0.0 }
 0x1db   :  { %v3867_v1 = vadd.f32 %v3866_v9, %v3865_v44  ;;  %v3872_v29 = vsel %vm1410_vm1, %v3791_v25, 0.0  ;;  %v3874_v30 = vsel %vm1410_vm1, %v3792_v18, 0.0  ;;  %v3876_v32 = vsel %vm1410_vm1, %v3793_v58, 0.0 }
 0x1dc   :  { %v3878_v33 = vsel %vm1410_vm1, %v3794_v19, 0.0  ;;  %5415 = vpow2.f32 %v4303_v21  ;;  %v1753_v2 = vmax.f32 %v1751_v31, %v1752_v47  ;;  %v1760_v8 = vmax.f32 %v1758_v41, %v1759_v22 }
 0x1dd   :  { %v3869_v10 = vadd.f32 %v3868_v26, %v3867_v1  ;;  %5417 = vpow2.f32 %v4305_v51  ;;  %v1767_v63 = vmax.f32 %v1765_v57, %v1766_v49  ;;  %v1778_v11 = vrot.slane %v6554_v53, 2 }
 0x1de   :  { %v6590_v36 = vpop.eup %5411  ;;  %5419 = vpow2.f32 %v4307_v42  ;;  %v9975_v45 = vrot.slane %v6548_v5, 4  ;;  %v9976_v4 = vrot.slane %v6552_v15, 4  ;;  %v1774_v41 = vmax.f32 %v1772_v40, %v1773_v16 }
 0x1df   :  { %v6599_v31 = vpop.eup %5413  ;;  %v3871_v51 = vadd.f32 %v3870_v27, %v3869_v10  ;;  %5421 = vpow2.f32 %v4309_v13  ;;  %v1796_v21 = vsel %vm1410_vm1, %v6534_v46, -inf  ;;  %v1779_v57 = vmax.f32 %v6554_v53, %v1778_v11 }
 0x1e0   :  { %v1784_v56 = vmax.f32 %v6548_v5, %v9975_v45  ;;  %v1791_v17 = vmax.f32 %v6552_v15, %v9976_v4  ;;  %5423 = vpow2.f32 %v4311_v48  ;;  %v4494_v42 = vrot.slane %v6599_v31, 7 }
 0x1e1   :  { %v3873_v47 = vadd.f32 %v3872_v29, %v3871_v51  ;;  %5425 = vpow2.f32 %v4313_v14  ;;  %v1797_v22 = vrot.slane %v1796_v21, 4  ;;  %v1780_v40 = vrot.slane %v1779_v57, 1 }
 0x1e2   :  { %v1785_v5 = vrot.slane %v1784_v56, 2  ;;  %v1792_v15 = vrot.slane %v1791_v17, 2  ;;  %v4495_v13 = vsel %vm4460_vm3, %v4494_v42, %v6590_v36  ;;  %v1907_v55 = vsub.f32 %v6510_v24, %v1753_v2 }
 0x1e3   :  { %vm4478_vm9 = vcmask 1047559   ;;  %v3875_v48 = vadd.f32 %v3874_v30, %v3873_v47  ;;  %v1798_v34 = vmax.f32 %v1796_v21, %v1797_v22  ;;  %v1908_v53 = vsub.f32 %v6514_v52, %v1760_v8 }
 0x1e4   :  { %v1786_v49 = vmax.f32 %v1784_v56, %v1785_v5  ;;  %v1793_v35 = vmax.f32 %v1791_v17, %v1792_v15  ;;  %v1781_v12 = vmax.f32 %v1779_v57, %v1780_v40  ;;  %v1909_v14 = vsub.f32 %v6518_v23, %v1767_v63 }
 0x1e5   :  { %v1910_v3 = vsub.f32 %v6522_v62, %v1774_v41  ;;  %v3877_v6 = vadd.f32 %v3876_v32, %v3875_v48  ;;  %v1799_v59 = vrot.slane %v1798_v34, 2  ;;  %v2019_v61 = vmul.f32 1.442695, %v1907_v55 }
 0x1e6   :  { %v1787_v38 = vrot.slane %v1786_v49, 1  ;;  %v1794_v60 = vrot.slane %v1793_v35, 1  ;;  %v6611_v50 = vpop.eup %5415  ;;  %v1911_v25 = vsub.f32 %v6525_v39, %v1781_v12  ;;  %v2021_v18 = vmul.f32 1.442695, %v1908_v53 }
 0x1e7   :  { %v2023_v58 = vmul.f32 1.442695, %v1909_v14  ;;  %v6614_v19 = vpop.eup %5417  ;;  %v6616_v44 = vadd.f32 %v3878_v33, %v3877_v6  ;;  %v4496_v9 = vrot.slane %v6611_v50, 6  ;;  %v1800_v27 = vmax.f32 %v1798_v34, %v1799_v59 }
 0x1e8   :  { %v1788_v37 = vmax.f32 %v1786_v49, %v1787_v38  ;;  %v1795_v26 = vmax.f32 %v1793_v35, %v1794_v60  ;;  %v6619_v1 = vpop.eup %5419  ;;  %v4498_v29 = vrot.slane %v6614_v19, 5  ;;  %5427 = vpow2.f32 %v2019_v61 }
 0x1e9   :  { %v2025_v32 = vmul.f32 1.442695, %v1910_v3  ;;  %v6623_v2 = vpop.eup %5421  ;;  %v4497_v8 = vsel %vm4463_vm4, %v4496_v9, %v4495_v13  ;;  %v4500_v10 = vrot.slane %v6619_v1, 4  ;;  %v5064_v33 = vsel %vm1410_vm1, %v6616_v44, -inf }
 0x1ea   :  { %v1912_v30 = vsub.f32 %v6528_v0, %v1788_v37  ;;  %v1801_v63 = vrot.slane %v1800_v27, 1  ;;  %v6629_v16 = vpop.eup %5423  ;;  %v4499_v11 = vsel %vm4466_vm5, %v4498_v29, %v4497_v8  ;;  %v4502_v45 = vrot.slane %v6623_v2, 3 }
 0x1eb   :  { %v5065_v56 = vrot.slane %v5064_v33, 4  ;;  %v1913_v4 = vsub.f32 %v6531_v28, %v1795_v26  ;;  %v6634_v17 = vpop.eup %5425  ;;  %v4501_v51 = vsel %vm4469_vm6, %v4500_v10, %v4499_v11  ;;  %v4504_v41 = vrot.slane %v6629_v16, 2 }
 0x1ec   :  { %v1802_v21 = vmax.f32 %v1800_v27, %v1801_v63  ;;  %5429 = vpow2.f32 %v2021_v18  ;;  %v4503_v42 = vsel %vm4472_vm7, %v4502_v45, %v4501_v51  ;;  %v4506_v57 = vrot.slane %v6634_v17, 1  ;;  %v9977_v27 = vld [vmem:[#allocation8_spill] sm:$0xff] }
 0x1ed   :  { %v5066_v5 = vmax.f32 %v5064_v33, %v5065_v56  ;;  %5431 = vpow2.f32 %v2023_v58  ;;  %v4505_v47 = vsel %vm4475_vm8, %v4504_v41, %v4503_v42  ;;  %v2027_v22 = vmul.f32 1.442695, %v1911_v25 }
 0x1ee   :  { %v1914_v15 = vsub.f32 %v6534_v46, %v1802_v21  ;;  %5433 = vpow2.f32 %v2025_v32  ;;  %v4507_v13 = vsel %vm4478_vm9, %v4506_v57, %v4505_v47  ;;  %v2029_v49 = vmul.f32 1.442695, %v1912_v30 }
 0x1ef   :  { %v5067_v40 = vrot.slane %v5066_v5, 2  ;;  %v2031_v55 = vmul.f32 1.442695, %v1913_v4  ;;  %v4600_v48 = vsel %vm1410_vm1, %v4507_v13, 0.0  ;;  %5435 = vpow2.f32 %v2027_v22 }
 0x1f0   :  { %v2033_v35 = vmul.f32 1.442695, %v1914_v15  ;;  %v4601_v34 = vrot.slane %v4600_v48, 4  ;;  %5437 = vpow2.f32 %v2029_v49  ;;  %vm3187_vm10 = vcmp.eq.f32.partialorder %v6510_v24, 0.0 }
 0x1f1   :  { %v5068_v53 = vmax.f32 %v5066_v5, %v5067_v40  ;;  %5439 = vpow2.f32 %v2031_v55  ;;  %vm3188_vm11 = vcmp.eq.f32.partialorder %v6514_v52, 0.0  ;;  %v6660_v29 = vsub.s32 0, %v9977_v27 }
 0x1f2   :  { %v6644_v12 = vpop.eup %5427  ;;  %v4602_v38 = vadd.f32 %v4601_v34, %v4600_v48  ;;  %5441 = vpow2.f32 %v2033_v35  ;;  %v6671_v4 = vsel %vm3187_vm10, -inf, %v6510_v24  ;;  %v6676_v51 = vsel %vm3188_vm11, -inf, %v6514_v52 }
 0x1f3   :  { %v5069_v14 = vrot.slane %v5068_v53, 1  ;;  %v2387_v3 = vsel %vm1410_vm1, %v6644_v12, 0.0  ;;  %9978 = vst [vmem:[#allocation13_spill] sm:$0xff] %v6660_v29  ;;  %vm3189_vm12 = vcmp.eq.f32.partialorder %v6518_v23, 0.0  ;;  %vm3190_vm13 = vcmp.eq.f32.partialorder %v6522_v62, 0.0 }
 0x1f4   :  { %v4603_v6 = vrot.slane %v4602_v38, 2  ;;  %v2388_v59 = vrot.slane %v2387_v3, 4  ;;  %vm3191_vm14 = vcmp.eq.f32.partialorder %v6525_v39, 0.0  ;;  %vm3192_vm15 = vcmp.eq.f32.partialorder %v6528_v0, 0.0 }
 0x1f5   :  { %v5070_v60 = vmax.f32 %v5068_v53, %v5069_v14  ;;  %vm3193_vm0 = vcmp.eq.f32.partialorder %v6531_v28, 0.0  ;;  %vm3194_vm2 = vcmp.eq.f32.partialorder %v6534_v46, 0.0 }
 0x1f6   :  { %v6648_v61 = vpop.eup %5429  ;;  %v4604_v25 = vadd.f32 %v4603_v6, %v4602_v38  ;;  %v2389_v58 = vadd.f32 %v2388_v59, %v2387_v3 }
 0x1f7   :  { %v6652_v37 = vpop.eup %5431  ;;  %v5108_v18 = vsub.f32 %v6616_v44, %v5070_v60  ;;  %v2394_v9 = vsel %vm1410_vm1, %v6648_v61, 0.0 }
 0x1f8   :  { %v6657_v26 = vpop.eup %5433  ;;  %v2395_v30 = vrot.slane %v2394_v9, 4  ;;  %v2401_v32 = vsel %vm1410_vm1, %v6652_v37, 0.0  ;;  %v4605_v8 = vrot.slane %v4604_v25, 1  ;;  %v2390_v33 = vrot.slane %v2389_v58, 2 }
 0x1f9   :  { %v5118_v10 = vmul.f32 1.442695, %v5108_v18  ;;  %v2402_v63 = vrot.slane %v2401_v32, 4  ;;  %v6664_v11 = vpop.eup %5435  ;;  %v2408_v56 = vsel %vm1410_vm1, %v6657_v26, 0.0 }
 0x1fa   :  { %v2396_v45 = vadd.f32 %v2395_v30, %v2394_v9  ;;  %v6678_v41 = vpop.eup %5437  ;;  %v4606_v21 = vadd.f32 %v4605_v8, %v4604_v25  ;;  %v2391_v42 = vadd.f32 %v2390_v33, %v2389_v58  ;;  %v2409_v15 = vrot.slane %v2408_v56, 4 }
 0x1fb   :  { %5443 = vpow2.f32 %v5118_v10  ;;  %v2403_v57 = vadd.f32 %v2402_v63, %v2401_v32  ;;  %v6680_v5 = vpop.eup %5439  ;;  %v2415_v22 = vsel %vm1410_vm1, %v6664_v11, 0.0  ;;  %v2422_v13 = vsel %vm1410_vm1, %v6678_v41, 0.0 }
 0x1fc   :  { %v2397_v47 = vrot.slane %v2396_v45, 2  ;;  %v4653_v40 = vrot.slane %v4606_v21, %v6660_v29  ;;  %v2392_v49 = vrot.slane %v2391_v42, 1  ;;  %v2416_v48 = vrot.slane %v2415_v22, 4  ;;  %v6689_v35 = vpop.eup %5441 }
 0x1fd   :  { %v2404_v55 = vrot.slane %v2403_v57, 2  ;;  %v2410_v53 = vadd.f32 %v2409_v15, %v2408_v56  ;;  %v2423_v38 = vrot.slane %v2422_v13, 4  ;;  %v2429_v14 = vsel %vm1410_vm1, %v6680_v5, 0.0 }
 0x1fe   :  { %v2398_v34 = vadd.f32 %v2397_v47, %v2396_v45  ;;  %5445 = vrcp.f32 %v4653_v40  ;;  %v2393_v3 = vadd.f32 %v2392_v49, %v2391_v42  ;;  %v2417_v60 = vadd.f32 %v2416_v48, %v2415_v22 }
 0x1ff   :  { %v2405_v6 = vadd.f32 %v2404_v55, %v2403_v57  ;;  %v2411_v25 = vrot.slane %v2410_v53, 2  ;;  %v2424_v18 = vadd.f32 %v2423_v38, %v2422_v13  ;;  %v2430_v58 = vrot.slane %v2429_v14, 4 }
 0x200   :  { %v2399_v59 = vrot.slane %v2398_v34, 1  ;;  %v2418_v27 = vrot.slane %v2417_v60, 2  ;;  %v2436_v30 = vsel %vm1410_vm1, %v6689_v35, 0.0  ;;  %v6697_v32 = vsel %vm1410_vm1, %v6671_v4, -inf }
 0x201   :  { %v2406_v9 = vrot.slane %v2405_v6, 1  ;;  %v2412_v10 = vadd.f32 %v2411_v25, %v2410_v53  ;;  %v2425_v33 = vrot.slane %v2424_v18, 2  ;;  %v2431_v63 = vadd.f32 %v2430_v58, %v2429_v14 }
 0x202   :  { %v2400_v8 = vadd.f32 %v2399_v59, %v2398_v34  ;;  %v2419_v56 = vadd.f32 %v2418_v27, %v2417_v60  ;;  %v2437_v21 = vrot.slane %v2436_v30, 4  ;;  %5447 = vrcp.f32 %v2393_v3 }
 0x203   :  { %v2407_v45 = vadd.f32 %v2406_v9, %v2405_v6  ;;  %v2413_v42 = vrot.slane %v2412_v10, 1  ;;  %v2426_v57 = vadd.f32 %v2425_v33, %v2424_v18  ;;  %v2432_v47 = vrot.slane %v2431_v63, 2 }
 0x204   :  { %5449 = vrcp.f32 %v2400_v8  ;;  %v2420_v22 = vrot.slane %v2419_v56, 1  ;;  %v2438_v13 = vadd.f32 %v2437_v21, %v2436_v30  ;;  %v6703_v40 = vsel %vm1410_vm1, %v6676_v51, -inf }
 0x205   :  { %v6699_v15 = vpop.eup %5443  ;;  %5451 = vrcp.f32 %v2407_v45  ;;  %v2414_v55 = vadd.f32 %v2413_v42, %v2412_v10  ;;  %v2427_v48 = vrot.slane %v2426_v57, 1  ;;  %v2433_v34 = vadd.f32 %v2432_v47, %v2431_v63 }
 0x206   :  { %v5144_v49 = vsel %vm1410_vm1, %v6699_v15, 0.0  ;;  %v2421_v38 = vadd.f32 %v2420_v22, %v2419_v56  ;;  %v2439_v14 = vrot.slane %v2438_v13, 2  ;;  %v6710_v3 = vsel %vm3189_vm12, -inf, %v6518_v23 }
 0x207   :  { %v5145_v53 = vrot.slane %v5144_v49, 4  ;;  %v2428_v6 = vadd.f32 %v2427_v48, %v2426_v57  ;;  %5453 = vrcp.f32 %v2414_v55  ;;  %v6715_v60 = vsel %vm3190_vm13, -inf, %v6522_v62 }
 0x208   :  { %v3359_v59 = vmax.f32 %v6697_v32, %v6703_v40  ;;  %v5446_v25 = vpop.eup %5445  ;;  %v2434_v58 = vrot.slane %v2433_v34, 1  ;;  %v2440_v9 = vadd.f32 %v2439_v14, %v2438_v13  ;;  %5455 = vrcp.f32 %v2421_v38 }
 0x209   :  { %v5146_v18 = vadd.f32 %v5145_v53, %v5144_v49  ;;  %v4693_v27 = vmul.f32 %v5446_v25, %v6590_v36  ;;  %v4694_v30 = vmul.f32 %v5446_v25, %v6599_v31  ;;  %v4695_v8 = vmul.f32 %v5446_v25, %v6611_v50  ;;  %v9979_v50 = vld [vmem:[#allocation11_spill] sm:$0xff] }
 0x20a   :  { %v4696_v10 = vmul.f32 %v5446_v25, %v6614_v19  ;;  %v4697_v33 = vmul.f32 %v5446_v25, %v6619_v1  ;;  %v4698_v63 = vmul.f32 %v5446_v25, %v6623_v2  ;;  %v4699_v45 = vmul.f32 %v5446_v25, %v6629_v16  ;;  %v9980_v19 = vld [vmem:[#allocation15_spill] sm:$0xff]  ;;  %v9981_v1 = vld [vmem:[#allocation12_spill] sm:$0xff] }
 0x20b   :  { %v4700_v56 = vmul.f32 %v5446_v25, %v6634_v17  ;;  %v4762_v21 = vmul.f32 %v4693_v27, %v6408_v20  ;;  %v4763_v42 = vmul.f32 %v4694_v30, %v6410_v43  ;;  %v4764_v36 = vmul.f32 %v4695_v8, %v6412_v7  ;;  %v9982_v2 = vld [vmem:[#allocation16_spill] sm:$0xff] }
 0x20c   :  { %v4765_v31 = vmul.f32 %v4696_v10, %v6415_v54  ;;  %v5448_v57 = vpop.eup %5447  ;;  %v4766_v47 = vmul.f32 %v4697_v33, %v9979_v50  ;;  %v4767_v22 = vmul.f32 %v4698_v63, %v9980_v19  ;;  %v4768_v13 = vmul.f32 %v4699_v45, %v9981_v1 }
 0x20d   :  { %v4769_v49 = vmul.f32 %v4700_v56, %v9982_v2  ;;  %v4902_v55 = vrot.slane %v4763_v42, 7  ;;  %v4904_v17 = vrot.slane %v4764_v36, 6  ;;  %v5147_v20 = vrot.slane %v5146_v18, 2 }
 0x20e   :  { %v5450_v16 = vpop.eup %5449  ;;  %v4906_v48 = vrot.slane %v4765_v31, 5  ;;  %v4908_v43 = vrot.slane %v4766_v47, 4  ;;  %v4910_v38 = vrot.slane %v4767_v22, 3  ;;  %v4912_v7 = vrot.slane %v4768_v13, 2 }
 0x20f   :  { %v5452_v53 = vpop.eup %5451  ;;  %v4914_v14 = vrot.slane %v4769_v49, 1  ;;  %v4903_v54 = vsel %vm4460_vm3, %v4902_v55, %v4762_v21  ;;  %v5148_v25 = vadd.f32 %v5147_v20, %v5146_v18  ;;  %v2435_v27 = vadd.f32 %v2434_v58, %v2433_v34 }
 0x210   :  { %v2441_v30 = vrot.slane %v2440_v9, 1  ;;  %v4905_v8 = vsel %vm4463_vm4, %v4904_v17, %v4903_v54  ;;  %5457 = vrcp.f32 %v2428_v6  ;;  %v2611_v10 = vmul.f32 %v5448_v57, %v6644_v12 }
 0x211   :  { %v2612_v33 = vmul.f32 %v5450_v16, %v6648_v61  ;;  %v5454_v63 = vpop.eup %5453  ;;  %v4907_v45 = vsel %vm4466_vm5, %v4906_v48, %v4905_v8  ;;  %v5149_v56 = vrot.slane %v5148_v25, 1  ;;  %5459 = vrcp.f32 %v2435_v27 }
 0x212   :  { %v2442_v42 = vadd.f32 %v2441_v30, %v2440_v9  ;;  %v5456_v36 = vpop.eup %5455  ;;  %v4909_v31 = vsel %vm4469_vm6, %v4908_v43, %v4907_v45  ;;  %v2613_v18 = vmul.f32 %v5452_v53, %v6652_v37  ;;  %v2614_v34 = vmul.f32 %v5454_v63, %v6657_v26 }
 0x213   :  { %v2675_v58 = vmul.f32 %v2611_v10, %v6510_v24  ;;  %v4911_v6 = vsel %vm4472_vm7, %v4910_v38, %v4909_v31  ;;  %v5150_v12 = vadd.f32 %v5149_v56, %v5148_v25  ;;  %v2615_v61 = vmul.f32 %v5456_v36, %v6664_v11 }
 0x214   :  { %5461 = vrcp.f32 %v2442_v42  ;;  %v4913_v21 = vsel %vm4475_vm8, %v4912_v7, %v4911_v6  ;;  %v2676_v9 = vmul.f32 %v2612_v33, %v6514_v52  ;;  %v2677_v57 = vmul.f32 %v2613_v18, %v6518_v23 }
 0x215   :  { %v2678_v50 = vmul.f32 %v2614_v34, %v6522_v62  ;;  %v4915_v37 = vsel %vm4478_vm9, %v4914_v14, %v4913_v21  ;;  %5463 = vrcp.f32 %v5150_v12  ;;  %v2679_v26 = vmul.f32 %v2615_v61, %v6525_v39 }
 0x216   :  { %v3027_v47 = vsel %vm1410_vm1, %v2675_v58, 0.0  ;;  %v5008_v19 = vsel %vm1410_vm1, %v4915_v37, 0.0  ;;  %v3034_v11 = vsel %vm1410_vm1, %v2676_v9, 0.0  ;;  %v3041_v1 = vsel %vm1410_vm1, %v2677_v57, 0.0 }
 0x217   :  { %v3028_v22 = vrot.slane %v3027_v47, 4  ;;  %v3035_v13 = vrot.slane %v3034_v11, 4  ;;  %v3042_v2 = vrot.slane %v3041_v1, 4  ;;  %v3048_v49 = vsel %vm1410_vm1, %v2678_v50, 0.0 }
 0x218   :  { %v3360_v16 = vsel %vm1410_vm1, %v6710_v3, -inf  ;;  %v3049_v17 = vrot.slane %v3048_v49, 4  ;;  %v3055_v48 = vsel %vm1410_vm1, %v2679_v26, 0.0  ;;  %v5009_v53 = vrot.slane %v5008_v19, 4 }
 0x219   :  { %v3029_v55 = vadd.f32 %v3028_v22, %v3027_v47  ;;  %v3361_v20 = vmax.f32 %v3359_v59, %v3360_v16  ;;  %v3036_v43 = vadd.f32 %v3035_v13, %v3034_v11  ;;  %v3043_v38 = vadd.f32 %v3042_v2, %v3041_v1 }
 0x21a   :  { %v5458_v7 = vpop.eup %5457  ;;  %v3056_v54 = vrot.slane %v3055_v48, 4  ;;  %v3050_v30 = vadd.f32 %v3049_v17, %v3048_v49  ;;  %v3362_v32 = vsel %vm1410_vm1, %v6715_v60, -inf  ;;  %v6772_v8 = vsel %vm3191_vm14, -inf, %v6525_v39  ;;  %v6800_v49 = vpop.permute.xlu0 %154 }
 0x21b   :  { %v3030_v14 = vrot.slane %v3029_v55, 2  ;;  %v5460_v25 = vpop.eup %5459  ;;  %v2616_v27 = vmul.f32 %v5458_v7, %v6678_v41  ;;  %v3037_v59 = vrot.slane %v3036_v43, 2  ;;  %v3363_v10 = vmax.f32 %v3361_v20, %v3362_v32 }
 0x21c   :  { %v2617_v40 = vmul.f32 %v5460_v25, %v6680_v5  ;;  %v5010_v63 = vadd.f32 %v5009_v53, %v5008_v19  ;;  %v3044_v56 = vrot.slane %v3043_v38, 2  ;;  %v6775_v42 = vsel %vm3192_vm15, -inf, %v6528_v0 }
 0x21d   :  { %v3031_v45 = vadd.f32 %v3030_v14, %v3029_v55  ;;  %v2680_v36 = vmul.f32 %v2616_v27, %v6528_v0  ;;  %v3057_v18 = vadd.f32 %v3056_v54, %v3055_v48  ;;  %v3051_v34 = vrot.slane %v3050_v30, 2 }
 0x21e   :  { %v5462_v33 = vpop.eup %5461  ;;  %v2681_v31 = vmul.f32 %v2617_v40, %v6531_v28  ;;  %v6783_v58 = vsel %vm3193_vm0, -inf, %v6531_v28  ;;  %v6788_v6 = vsel %vm3194_vm2, -inf, %v6534_v46  ;;  %v3038_v21 = vadd.f32 %v3037_v59, %v3036_v43 }
 0x21f   :  { %v2618_v41 = vmul.f32 %v5462_v33, %v6689_v35  ;;  %v5464_v5 = vpop.eup %5463  ;;  %v3364_v35 = vsel %vm1410_vm1, %v6772_v8, -inf  ;;  %v5011_v57 = vrot.slane %v5010_v63, 2  ;;  %v3032_v50 = vrot.slane %v3031_v45, 1 }
 0x220   :  { %v5191_v12 = vmul.f32 %v5464_v5, %v6699_v15  ;;  %v3365_v9 = vmax.f32 %v3363_v10, %v3364_v35  ;;  %v3045_v37 = vadd.f32 %v3044_v56, %v3043_v38  ;;  %v3366_v26 = vsel %vm1410_vm1, %v6775_v42, -inf }
 0x221   :  { %v2682_v61 = vmul.f32 %v2618_v41, %v6534_v46  ;;  %v3058_v19 = vrot.slane %v3057_v18, 2  ;;  %v3062_v22 = vsel %vm1410_vm1, %v2680_v36, 0.0  ;;  %v3069_v11 = vsel %vm1410_vm1, %v2681_v31, 0.0  ;;  %v6811_v36 = vpop.permute.xlu0 %178 }
 0x222   :  { %v5204_v47 = vmul.f32 %v5191_v12, %v6616_v44  ;;  %v3052_v1 = vadd.f32 %v3051_v34, %v3050_v30  ;;  %v3063_v13 = vrot.slane %v3062_v22, 4  ;;  %v3070_v15 = vrot.slane %v3069_v11, 4 }
 0x223   :  { %v3076_v2 = vsel %vm1410_vm1, %v2682_v61, 0.0  ;;  %v3039_v55 = vrot.slane %v3038_v21, 1  ;;  %v3367_v48 = vmax.f32 %v3365_v9, %v3366_v26  ;;  %v3368_v43 = vsel %vm1410_vm1, %v6783_v58, -inf }
 0x224   :  { %v5224_v16 = vsel %vm1410_vm1, %v5204_v47, 0.0  ;;  %v3077_v17 = vrot.slane %v3076_v2, 4  ;;  %v3064_v53 = vadd.f32 %v3063_v13, %v3062_v22  ;;  %v3071_v44 = vadd.f32 %v3070_v15, %v3069_v11 }
 0x225   :  { %v5225_v20 = vrot.slane %v5224_v16, 4  ;;  %v5012_v38 = vadd.f32 %v5011_v57, %v5010_v63  ;;  %v3059_v7 = vadd.f32 %v3058_v19, %v3057_v18  ;;  %v3369_v14 = vmax.f32 %v3367_v48, %v3368_v43  ;;  %v6827_v22 = vpop.permute.xlu0 %202 }
 0x226   :  { %v3065_v25 = vrot.slane %v3064_v53, 2  ;;  %v3078_v27 = vadd.f32 %v3077_v17, %v3076_v2  ;;  %v3370_v30 = vsel %vm1410_vm1, %v6788_v6, -inf  ;;  %v3046_v32 = vrot.slane %v3045_v37, 1 }
 0x227   :  { %v5226_v54 = vadd.f32 %v5225_v20, %v5224_v16  ;;  %v3053_v40 = vrot.slane %v3052_v1, 1  ;;  %v3072_v59 = vrot.slane %v3071_v44, 2  ;;  %v3371_v10 = vmax.f32 %v3369_v14, %v3370_v30  ;;  %v6843_v16 = vpop.permute.xlu1 %186 }
 0x228   :  { %v6807_v56 = vadd.f32 %v3032_v50, %v3031_v45  ;;  %v6809_v41 = vadd.f32 %v3039_v55, %v3038_v21  ;;  %v3060_v63 = vrot.slane %v3059_v7, 1  ;;  %v3066_v34 = vadd.f32 %v3065_v25, %v3064_v53 }
 0x229   :  { %v5227_v33 = vrot.slane %v5226_v54, 2  ;;  %v3435_v31 = vsub.f32 %v6671_v4, %v3371_v10  ;;  %v3436_v18 = vsub.f32 %v6676_v51, %v3371_v10  ;;  %v3437_v5 = vsub.f32 %v6710_v3, %v3371_v10 }
 0x22a   :  { %v3079_v35 = vrot.slane %v3078_v27, 2  ;;  %v3438_v12 = vsub.f32 %v6715_v60, %v3371_v10  ;;  %v5013_v61 = vrot.slane %v5012_v38, 1  ;;  %v6817_v9 = vadd.f32 %v3046_v32, %v3045_v37 }
 0x22b   :  { %v6819_v45 = vadd.f32 %v3053_v40, %v3052_v1  ;;  %v3073_v21 = vadd.f32 %v3072_v59, %v3071_v44  ;;  %v5228_v57 = vadd.f32 %v5227_v33, %v5226_v54  ;;  %v3439_v50 = vsub.f32 %v6772_v8, %v3371_v10 }
 0x22c   :  { %vm4003_vm10 = vcmp.eq.f32.partialorder %v6807_v56, 0.0  ;;  %vm4004_vm11 = vcmp.eq.f32.partialorder %v6809_v41, 0.0  ;;  %v6824_v4 = vadd.f32 %v3060_v63, %v3059_v7  ;;  %v3547_v51 = vmul.f32 1.442695, %v3435_v31  ;;  %v6859_v7 = vpop.permute.xlu0 %226 }
 0x22d   :  { %v3549_v3 = vmul.f32 1.442695, %v3436_v18  ;;  %v3551_v26 = vmul.f32 1.442695, %v3437_v5  ;;  %v3067_v47 = vrot.slane %v3066_v34, 1  ;;  %v3080_v60 = vadd.f32 %v3079_v35, %v3078_v27 }
 0x22e   :  { %v3440_v37 = vsub.f32 %v6775_v42, %v3371_v10  ;;  %v3553_v19 = vmul.f32 1.442695, %v3438_v12  ;;  %v3074_v11 = vrot.slane %v3073_v21, 1  ;;  %5465 = vpow2.f32 %v3547_v51 }
 0x22f   :  { %vm4005_vm12 = vcmp.eq.f32.partialorder %v6817_v9, 0.0  ;;  %vm4006_vm13 = vcmp.eq.f32.partialorder %v6819_v45, 0.0  ;;  %v5229_v8 = vrot.slane %v5228_v57, 1  ;;  %v3441_v1 = vsub.f32 %v6783_v58, %v3371_v10 }
 0x230   :  { %5467 = vpow2.f32 %v3549_v3  ;;  %v3555_v13 = vmul.f32 1.442695, %v3439_v50  ;;  %v3442_v15 = vsub.f32 %v6788_v6, %v3371_v10  ;;  %v6836_v42 = vsel %vm4003_vm10, -inf, %v6807_v56  ;;  %v6876_v10 = vpop.permute.xlu1 %234  ;;  %v6893_v12 = vpop.permute.xlu0 %250 }
 0x231   :  { %5469 = vpow2.f32 %v3551_v26  ;;  %v6841_v2 = vsel %vm4004_vm11, -inf, %v6809_v41  ;;  %v6845_v55 = vadd.f32 %v3067_v47, %v3066_v34  ;;  %v3081_v58 = vrot.slane %v3080_v60, 1 }
 0x232   :  { %5471 = vpow2.f32 %v3553_v19  ;;  %v3557_v17 = vmul.f32 1.442695, %v3440_v37  ;;  %v5014_v48 = vadd.f32 %v5013_v61, %v5012_v38  ;;  %v6847_v6 = vadd.f32 %v3074_v11, %v3073_v21  ;;  %v9986_v11 = vld [vmem:[#allocation3_spill] sm:$0xff] }
 0x233   :  { %vm4007_vm14 = vcmp.eq.f32.partialorder %v6824_v4, 0.0  ;;  %v6853_v20 = vsel %vm4005_vm12, -inf, %v6817_v9  ;;  %5473 = vpow2.f32 %v3555_v13  ;;  %v3559_v53 = vmul.f32 1.442695, %v3441_v1 }
 0x234   :  { %9983 = vst [vmem:[#allocation14_spill] sm:$0xff] %v6847_v6  ;;  %v4173_v44 = vsel %vm1410_vm1, %v6836_v42, -inf  ;;  %v4174_v43 = vsel %vm1410_vm1, %v6841_v2, -inf  ;;  %v5230_v38 = vadd.f32 %v5229_v8, %v5228_v57  ;;  %v3561_v14 = vmul.f32 1.442695, %v3442_v15  ;;  %v6915_v1 = vpop.permute.xlu1 %282 }
 0x235   :  { %v6864_v54 = vsel %vm4006_vm13, -inf, %v6819_v45  ;;  %v4175_v25 = vmax.f32 %v4173_v44, %v4174_v43  ;;  %v6866_v27 = vadd.f32 %v3081_v58, %v3080_v60  ;;  %5475 = vpow2.f32 %v3557_v17  ;;  %v9987_v17 = vld [vmem:[#allocation2_spill] sm:$0xff] }
 0x236   :  { %vm4008_vm15 = vcmp.eq.f32.partialorder %v6845_v55, 0.0  ;;  %v4176_v30 = vsel %vm1410_vm1, %v6853_v20, -inf  ;;  %v5268_v32 = vadd.f32 %v5230_v38, %v5014_v48  ;;  %v6874_v40 = vsel %vm4007_vm14, -inf, %v6824_v4 }
 0x237   :  { %9984 = vst [vmem:[#allocation8_spill] sm:$0xff] %v6866_v27  ;;  %v4177_v59 = vmax.f32 %v4175_v25, %v4176_v30  ;;  %5477 = vpow2.f32 %v3559_v53  ;;  %vm4009_vm0 = vcmp.eq.f32.partialorder %v6847_v6, 0.0  ;;  %v4178_v33 = vsel %vm1410_vm1, %v6864_v54, -inf }
 0x238   :  { %v6881_v63 = vpop.eup %5465  ;;  %5479 = vpow2.f32 %v3561_v14  ;;  %v6884_v31 = vsel %vm4008_vm15, -inf, %v6845_v55  ;;  %vm4010_vm2 = vcmp.eq.f32.partialorder %v6866_v27, 0.0  ;;  %v4180_v35 = vsel %vm1410_vm1, %v6874_v40, -inf }
 0x239   :  { %v4179_v18 = vmax.f32 %v4177_v59, %v4178_v33  ;;  %v3669_v34 = vsel %vm1410_vm1, %v6881_v63, 0.0  ;;  %v6897_v21 = vmul.f32 0.005, %v5268_v32  ;;  %v6902_v50 = vsel %vm4009_vm0, -inf, %v6847_v6 }
 0x23a   :  { %v6886_v5 = vpop.eup %5467  ;;  %v4182_v47 = vsel %vm1410_vm1, %v6884_v31, -inf  ;;  %v6911_v37 = vsel %vm4010_vm2, -inf, %v6866_v27  ;;  %v866_v8 = vcombine.low %v9986_v11, %v6843_v16  ;;  %v4184_v58 = vsel %vm1410_vm1, %v6902_v50, -inf }
 0x23b   :  { %v6895_v61 = vpop.eup %5469  ;;  %9985 = vst [vmem:[#allocation11_spill] sm:$0xff] %v6897_v21  ;;  %v3670_v57 = vsel %vm1410_vm1, %v6886_v5, 0.0  ;;  %v4181_v51 = vmax.f32 %v4179_v18, %v4180_v35  ;;  %v322_v48 = vcombine.low %v9987_v17, %v6811_v36  ;;  %v338_v53 = vcombine.low %v6800_v49, %v6827_v22  ;;  %v275_v18 = vpop.permute.xlu0 %274 }
 0x23c   :  { %v6904_v3 = vpop.eup %5471  ;;  %v3671_v26 = vadd.f32 %v3670_v57, %v3669_v34  ;;  %v3672_v60 = vsel %vm1410_vm1, %v6895_v61, 0.0  ;;  %v4186_v32 = vsel %vm1410_vm1, %v6911_v37, -inf  ;;  %v323_v59 = vcombine.high %v9987_v17, %v6811_v36  ;;  %v9988_v57 = vld [vmem:[#allocation9_spill] sm:$0xff] }
 0x23d   :  { %v4183_v19 = vmax.f32 %v4181_v51, %v4182_v47  ;;  %v6917_v13 = vpop.eup %5473  ;;  %v3674_v43 = vsel %vm1410_vm1, %v6904_v3, 0.0  ;;  %v339_v33 = vcombine.high %v6800_v49, %v6827_v22  ;;  %v6941_v51 = vrot.slane %v866_v8, %v9988_v57 }
 0x23e   :  { %v3673_v15 = vadd.f32 %v3672_v60, %v3671_v26  ;;  %v3676_v34 = vsel %vm1410_vm1, %v6917_v13, 0.0  ;;  %v346_v49 = vrot.slane %v338_v53, %v9988_v57  ;;  %v355_v26 = vcombine.high %v6859_v7, %v275_v18 }
 0x23f   :  { %v4185_v38 = vmax.f32 %v4183_v19, %v4184_v58  ;;  %v6930_v25 = vpop.eup %5475  ;;  %9989 = vst [vmem:[#allocation15_spill] sm:$0xff] %v6941_v51  ;;  %v330_v19 = vrot.slane %v322_v48, %v9988_v57  ;;  %v353_v53 = vrot.slane %v339_v33, %v9988_v57  ;;  %v354_v33 = vcombine.low %v6859_v7, %v275_v18 }
 0x240   :  { %v3675_v30 = vadd.f32 %v3674_v43, %v3673_v15  ;;  %v3678_v15 = vsel %vm1410_vm1, %v6930_v25, 0.0  ;;  %v6958_v43 = vpop.permute.xlu1 %160 }
 0x241   :  { %v4187_v35 = vmax.f32 %v4185_v38, %v4186_v32  ;;  %v6945_v47 = vpop.eup %5477  ;;  %v362_v7 = vrot.slane %v354_v33, %v9988_v57 }
 0x242   :  { %v3677_v60 = vadd.f32 %v3676_v34, %v3675_v30  ;;  %v6951_v22 = vpop.eup %5479  ;;  %v337_v30 = vrot.slane %v323_v59, %v9988_v57  ;;  %v3680_v32 = vsel %vm1410_vm1, %v6945_v47, 0.0 }
 0x243   :  { %v4251_v8 = vsub.f32 %v6836_v42, %v4187_v35  ;;  %v4252_v58 = vsub.f32 %v6841_v2, %v4187_v35  ;;  %v4253_v17 = vsub.f32 %v6853_v20, %v4187_v35  ;;  %v4254_v48 = vsub.f32 %v6864_v54, %v4187_v35 }
 0x244   :  { %v3679_v38 = vadd.f32 %v3678_v15, %v3677_v60  ;;  %v4255_v34 = vsub.f32 %v6874_v40, %v4187_v35  ;;  %v3682_v2 = vsel %vm1410_vm1, %v6951_v22, 0.0  ;;  %v4256_v20 = vsub.f32 %v6884_v31, %v4187_v35  ;;  %v299_v15 = vpop.permute.xlu0 %298 }
 0x245   :  { %v4365_v44 = vmul.f32 1.442695, %v4252_v58  ;;  %v4367_v42 = vmul.f32 1.442695, %v4253_v17  ;;  %v386_v60 = vcombine.low %v330_v19, %v346_v49  ;;  %v4257_v54 = vsub.f32 %v6902_v50, %v4187_v35 }
 0x246   :  { %v3681_v36 = vadd.f32 %v3680_v32, %v3679_v38  ;;  %v4363_v59 = vmul.f32 1.442695, %v4251_v8  ;;  %v4258_v40 = vsub.f32 %v6911_v37, %v4187_v35  ;;  %v4369_v58 = vmul.f32 1.442695, %v4254_v48  ;;  %v6973_v38 = vpop.permute.xlu1 %184 }
 0x247   :  { %5481 = vpow2.f32 %v4365_v44  ;;  %v4371_v17 = vmul.f32 1.442695, %v4255_v34  ;;  %v370_v31 = vcombine.low %v6893_v12, %v299_v15  ;;  %v371_v32 = vcombine.high %v6893_v12, %v299_v15 }
 0x248   :  { %v3683_v14 = vadd.f32 %v3682_v2, %v3681_v36  ;;  %5483 = vpow2.f32 %v4367_v42  ;;  %v4373_v50 = vmul.f32 1.442695, %v4256_v20  ;;  %v387_v8 = vcombine.high %v330_v19, %v346_v49  ;;  %v9990_v36 = vld [vmem:[#allocation4_spill] sm:$0xff]  ;;  %v9991_v19 = vld [vmem:[#allocation10_spill] sm:$0xff] }
 0x249   :  { %v402_v21 = vcombine.low %v337_v30, %v353_v53  ;;  %v4375_v51 = vmul.f32 1.442695, %v4257_v54  ;;  %v378_v37 = vrot.slane %v370_v31, %v9988_v57  ;;  %v4377_v44 = vmul.f32 1.442695, %v4258_v40 }
 0x24a   :  { %5485 = vrcp.f32 %v3683_v14  ;;  %v403_v18 = vcombine.high %v337_v30, %v353_v53  ;;  %v385_v35 = vrot.slane %v371_v32, %v9988_v57  ;;  %v369_v12 = vrot.slane %v355_v26, %v9988_v57  ;;  %v6985_v2 = vpop.permute.xlu1 %208 }
 0x24b   :  { %5487 = vpow2.f32 %v4363_v59  ;;  %v418_v14 = vcombine.low %v362_v7, %v378_v37  ;;  %v394_v49 = vrot.slane %v386_v60, %v9991_v19  ;;  %v401_v34 = vrot.slane %v387_v8, %v9991_v19 }
 0x24c   :  { %5489 = vpow2.f32 %v4369_v58  ;;  %v419_v42 = vcombine.high %v362_v7, %v378_v37  ;;  %v434_v53 = vcombine.low %v369_v12, %v385_v35  ;;  %v435_v20 = vcombine.high %v369_v12, %v385_v35 }
 0x24d   :  { %5491 = vpow2.f32 %v4371_v17  ;;  %v426_v30 = vrot.slane %v418_v14, %v9991_v19  ;;  %v410_v15 = vrot.slane %v402_v21, %v9991_v19  ;;  %v417_v54 = vrot.slane %v403_v18, %v9991_v19 }
 0x24e   :  { %5493 = vpow2.f32 %v4373_v50  ;;  %v433_v26 = vrot.slane %v419_v42, %v9991_v19  ;;  %v442_v59 = vrot.slane %v434_v53, %v9991_v19  ;;  %v449_v60 = vrot.slane %v435_v20, %v9991_v19 }
 0x24f   :  { %5495 = vpow2.f32 %v4375_v51  ;;  %v6993_v33 = vcombine.low %v394_v49, %v426_v30  ;;  %v6995_v51 = vcombine.high %v394_v49, %v426_v30 }
 0x250   :  { %5497 = vpow2.f32 %v4377_v44  ;;  %v7003_v17 = vcombine.low %v401_v34, %v433_v26  ;;  %v7005_v31 = vcombine.high %v401_v34, %v433_v26  ;;  %v7010_v8 = vcombine.low %v410_v15, %v442_v59 }
 0x251   :  { %v6997_v40 = vpop.eup %5481  ;;  %v7012_v7 = vcombine.high %v410_v15, %v442_v59  ;;  %v7014_v37 = vcombine.low %v417_v54, %v449_v60  ;;  %v7017_v35 = vcombine.high %v417_v54, %v449_v60  ;;  %v1411_v12 = vsel %vm1410_vm1, %v6993_v33, -inf }
 0x252   :  { %v7007_v32 = vpop.eup %5483  ;;  %v4550_v50 = vrot.slane %v6997_v40, 7  ;;  %v1418_v14 = vsel %vm1410_vm1, %v6995_v51, -inf  ;;  %vm3139_vm10 = vcmp.eq.f32.partialorder %v6993_v33, 0.0  ;;  %vm3140_vm11 = vcmp.eq.f32.partialorder %v6995_v51, 0.0 }
 0x253   :  { %v4552_v18 = vrot.slane %v7007_v32, 6  ;;  %vm3141_vm12 = vcmp.eq.f32.partialorder %v7003_v17, 0.0  ;;  %vm3142_vm13 = vcmp.eq.f32.partialorder %v7005_v31, 0.0  ;;  %vm3143_vm14 = vcmp.eq.f32.partialorder %v7010_v8, 0.0 }
 0x254   :  { %v5486_v44 = vpop.eup %5485  ;;  %vm3144_vm15 = vcmp.eq.f32.partialorder %v7012_v7, 0.0  ;;  %vm3145_vm0 = vcmp.eq.f32.partialorder %v7014_v37, 0.0  ;;  %vm3146_vm2 = vcmp.eq.f32.partialorder %v7017_v35, 0.0 }
 0x255   :  { %v7023_v49 = vpop.eup %5487  ;;  %v3755_v34 = vmul.f32 %v5486_v44, %v6881_v63  ;;  %v3756_v42 = vmul.f32 %v5486_v44, %v6886_v5  ;;  %v3757_v30 = vmul.f32 %v5486_v44, %v6895_v61  ;;  %v3758_v53 = vmul.f32 %v5486_v44, %v6904_v3 }
 0x256   :  { %v7029_v20 = vpop.eup %5489  ;;  %v3759_v15 = vmul.f32 %v5486_v44, %v6917_v13  ;;  %v3760_v54 = vmul.f32 %v5486_v44, %v6930_v25  ;;  %v3761_v26 = vmul.f32 %v5486_v44, %v6945_v47  ;;  %v3762_v59 = vmul.f32 %v5486_v44, %v6951_v22 }
 0x257   :  { %v7035_v60 = vpop.eup %5491  ;;  %v3819_v63 = vmul.f32 %v3755_v34, %v6510_v24  ;;  %v3820_v5 = vmul.f32 %v3756_v42, %v6514_v52  ;;  %v3821_v61 = vmul.f32 %v3757_v30, %v6518_v23  ;;  %v3822_v3 = vmul.f32 %v3758_v53, %v6522_v62 }
 0x258   :  { %v7041_v21 = vpop.eup %5493  ;;  %v3823_v13 = vmul.f32 %v3759_v15, %v6525_v39  ;;  %v3824_v25 = vmul.f32 %v3760_v54, %v6528_v0  ;;  %v3825_v47 = vmul.f32 %v3761_v26, %v6531_v28  ;;  %v3826_v22 = vmul.f32 %v3762_v59, %v6534_v46 }
 0x259   :  { %v7047_v44 = vpop.eup %5495  ;;  %v3925_v24 = vsel %vm1410_vm1, %v3819_v63, 0.0  ;;  %v3926_v52 = vsel %vm1410_vm1, %v3820_v5, 0.0  ;;  %v3928_v23 = vsel %vm1410_vm1, %v3821_v61, 0.0  ;;  %v3930_v62 = vsel %vm1410_vm1, %v3822_v3, 0.0 }
 0x25a   :  { %v7053_v34 = vpop.eup %5497  ;;  %v3927_v42 = vadd.f32 %v3926_v52, %v3925_v24  ;;  %v3932_v39 = vsel %vm1410_vm1, %v3823_v13, 0.0  ;;  %v3934_v0 = vsel %vm1410_vm1, %v3824_v25, 0.0  ;;  %v3936_v28 = vsel %vm1410_vm1, %v3825_v47, 0.0 }
 0x25b   :  { %v3938_v46 = vsel %vm1410_vm1, %v3826_v22, 0.0  ;;  %v4551_v30 = vsel %vm4460_vm3, %v4550_v50, %v7023_v49  ;;  %v4554_v53 = vrot.slane %v7029_v20, 5  ;;  %v4556_v15 = vrot.slane %v7035_v60, 4 }
 0x25c   :  { %v3929_v54 = vadd.f32 %v3928_v23, %v3927_v42  ;;  %v4553_v26 = vsel %vm4463_vm4, %v4552_v18, %v4551_v30  ;;  %v4558_v59 = vrot.slane %v7041_v21, 3  ;;  %v4560_v63 = vrot.slane %v7047_v44, 2 }
 0x25d   :  { %v4555_v5 = vsel %vm4466_vm5, %v4554_v53, %v4553_v26  ;;  %v4562_v61 = vrot.slane %v7053_v34, 1  ;;  %v1412_v3 = vrot.slane %v1411_v12, 4  ;;  %v1419_v13 = vrot.slane %v1418_v14, 4 }
 0x25e   :  { %v3931_v25 = vadd.f32 %v3930_v62, %v3929_v54  ;;  %v4557_v50 = vsel %vm4469_vm6, %v4556_v15, %v4555_v5  ;;  %v1425_v47 = vsel %vm1410_vm1, %v7003_v17, -inf  ;;  %v1432_v22 = vsel %vm1410_vm1, %v7005_v31, -inf }
 0x25f   :  { %v4559_v18 = vsel %vm4472_vm7, %v4558_v59, %v4557_v50  ;;  %v1413_v24 = vmax.f32 %v1411_v12, %v1412_v3  ;;  %v1420_v52 = vmax.f32 %v1418_v14, %v1419_v13  ;;  %v1426_v23 = vrot.slane %v1425_v47, 4 }
 0x260   :  { %v3933_v42 = vadd.f32 %v3932_v39, %v3931_v25  ;;  %v4561_v30 = vsel %vm4475_vm8, %v4560_v63, %v4559_v18  ;;  %v1433_v53 = vrot.slane %v1432_v22, 4  ;;  %v1439_v62 = vsel %vm1410_vm1, %v7010_v8, -inf }
 0x261   :  { %v4563_v15 = vsel %vm4478_vm9, %v4562_v61, %v4561_v30  ;;  %v1414_v54 = vrot.slane %v1413_v24, 2  ;;  %v1421_v26 = vrot.slane %v1420_v52, 2  ;;  %v1427_v5 = vmax.f32 %v1425_v47, %v1426_v23 }
 0x262   :  { %v3935_v48 = vadd.f32 %v3934_v0, %v3933_v42  ;;  %v4628_v58 = vsel %vm1410_vm1, %v4563_v15, 0.0  ;;  %v1434_v27 = vmax.f32 %v1432_v22, %v1433_v53  ;;  %v1440_v59 = vrot.slane %v1439_v62, 4 }
 0x263   :  { %v4629_v12 = vrot.slane %v4628_v58, 4  ;;  %v1415_v14 = vmax.f32 %v1413_v24, %v1414_v54  ;;  %v1422_v3 = vmax.f32 %v1420_v52, %v1421_v26  ;;  %v1428_v39 = vrot.slane %v1427_v5, 2 }
 0x264   :  { %v3937_v13 = vadd.f32 %v3936_v28, %v3935_v48  ;;  %v1435_v63 = vrot.slane %v1434_v27, 2  ;;  %v1441_v25 = vmax.f32 %v1439_v62, %v1440_v59  ;;  %v1446_v50 = vsel %vm1410_vm1, %v7012_v7, -inf }
 0x265   :  { %v4630_v18 = vadd.f32 %v4629_v12, %v4628_v58  ;;  %v1416_v61 = vrot.slane %v1415_v14, 1  ;;  %v1423_v30 = vrot.slane %v1422_v3, 1  ;;  %v1429_v6 = vmax.f32 %v1427_v5, %v1428_v39 }
 0x266   :  { %v7081_v47 = vadd.f32 %v3938_v46, %v3937_v13  ;;  %v1436_v0 = vmax.f32 %v1434_v27, %v1435_v63  ;;  %v1442_v23 = vrot.slane %v1441_v25, 2  ;;  %v1447_v22 = vrot.slane %v1446_v50, 4 }
 0x267   :  { %v4631_v42 = vrot.slane %v4630_v18, 2  ;;  %v1417_v53 = vmax.f32 %v1415_v14, %v1416_v61  ;;  %v1424_v24 = vmax.f32 %v1422_v3, %v1423_v30  ;;  %v1430_v52 = vrot.slane %v1429_v6, 1 }
 0x268   :  { %v5092_v48 = vsel %vm1410_vm1, %v7081_v47, -inf  ;;  %v1437_v28 = vrot.slane %v1436_v0, 1  ;;  %v1443_v62 = vmax.f32 %v1441_v25, %v1442_v23  ;;  %v1448_v15 = vmax.f32 %v1446_v50, %v1447_v22 }
 0x269   :  { %v4632_v54 = vadd.f32 %v4631_v42, %v4630_v18  ;;  %v5093_v58 = vrot.slane %v5092_v48, 4  ;;  %v1431_v26 = vmax.f32 %v1429_v6, %v1430_v52  ;;  %v1453_v46 = vsel %vm1410_vm1, %v7014_v37, -inf }
 0x26a   :  { %v1438_v5 = vmax.f32 %v1436_v0, %v1437_v28  ;;  %v1444_v27 = vrot.slane %v1443_v62, 1  ;;  %v1449_v59 = vrot.slane %v1448_v15, 2  ;;  %v1454_v12 = vrot.slane %v1453_v46, 4 }
 0x26b   :  { %v4633_v39 = vrot.slane %v4632_v54, 1  ;;  %v5094_v14 = vmax.f32 %v5092_v48, %v5093_v58  ;;  %v1460_v3 = vsel %vm1410_vm1, %v7017_v35, -inf  ;;  %v1859_v13 = vsub.f32 %v6993_v33, %v1417_v53  ;;  %v7093_v48 = vpop.permute.xlu0 %162 }
 0x26c   :  { %v1445_v63 = vmax.f32 %v1443_v62, %v1444_v27  ;;  %v1450_v25 = vmax.f32 %v1448_v15, %v1449_v59  ;;  %v1455_v50 = vmax.f32 %v1453_v46, %v1454_v12  ;;  %v1461_v18 = vrot.slane %v1460_v3, 4 }
 0x26d   :  { %v4634_v61 = vadd.f32 %v4633_v39, %v4632_v54  ;;  %v5095_v6 = vrot.slane %v5094_v14, 2  ;;  %v1860_v30 = vsub.f32 %v6995_v51, %v1424_v24  ;;  %v1861_v0 = vsub.f32 %v7003_v17, %v1431_v26 }
 0x26e   :  { %v1451_v23 = vrot.slane %v1450_v25, 1  ;;  %v1456_v22 = vrot.slane %v1455_v50, 2  ;;  %v1462_v42 = vmax.f32 %v1460_v3, %v1461_v18  ;;  %v1862_v52 = vsub.f32 %v7005_v31, %v1438_v5 }
 0x26f   :  { %v4669_v28 = vrot.slane %v4634_v61, %v6660_v29  ;;  %v5096_v53 = vmax.f32 %v5094_v14, %v5095_v6  ;;  %v1863_v62 = vsub.f32 %v7010_v8, %v1445_v63  ;;  %v1923_v15 = vmul.f32 1.442695, %v1859_v13 }
 0x270   :  { %v1452_v58 = vmax.f32 %v1450_v25, %v1451_v23  ;;  %v1457_v54 = vmax.f32 %v1455_v50, %v1456_v22  ;;  %v1463_v46 = vrot.slane %v1462_v42, 2  ;;  %v1925_v27 = vmul.f32 1.442695, %v1860_v30  ;;  %v7108_v30 = vpop.permute.xlu0 %210 }
 0x271   :  { %5499 = vrcp.f32 %v4669_v28  ;;  %v5097_v24 = vrot.slane %v5096_v53, 1  ;;  %v9992_v26 = vcombine.low %v6958_v43, %v6985_v2  ;;  %v1927_v5 = vmul.f32 1.442695, %v1861_v0 }
 0x272   :  { %v1458_v12 = vrot.slane %v1457_v54, 1  ;;  %v1464_v39 = vmax.f32 %v1462_v42, %v1463_v46  ;;  %v1864_v3 = vsub.f32 %v7012_v7, %v1452_v58  ;;  %v1929_v14 = vmul.f32 1.442695, %v1862_v52 }
 0x273   :  { %v754_v59 = vrot.slane %v9992_v26, %v9988_v57  ;;  %v5098_v18 = vmax.f32 %v5096_v53, %v5097_v24  ;;  %v9993_v13 = vcombine.low %v9990_v36, %v6973_v38  ;;  %5501 = vpow2.f32 %v1923_v15 }
 0x274   :  { %v1931_v25 = vmul.f32 1.442695, %v1863_v62  ;;  %v731_v50 = vcombine.high %v9990_v36, %v6973_v38  ;;  %v1459_v61 = vmax.f32 %v1457_v54, %v1458_v12  ;;  %v1465_v6 = vrot.slane %v1464_v39, 1 }
 0x275   :  { %v738_v63 = vrot.slane %v9993_v13, %v9988_v57  ;;  %5503 = vpow2.f32 %v1925_v27  ;;  %v5112_v0 = vsub.f32 %v7081_v47, %v5098_v18  ;;  %v9994_v23 = vcombine.high %v6958_v43, %v6985_v2 }
 0x276   :  { %5505 = vpow2.f32 %v1927_v5  ;;  %v1466_v52 = vmax.f32 %v1464_v39, %v1465_v6  ;;  %v1865_v28 = vsub.f32 %v7014_v37, %v1459_v61  ;;  %v1933_v38 = vmul.f32 1.442695, %v1864_v3 }
 0x277   :  { %v7115_v22 = vrot.slane %v9994_v23, %v9988_v57  ;;  %v794_v42 = vcombine.low %v738_v63, %v754_v59  ;;  %5507 = vpow2.f32 %v1929_v14  ;;  %v5126_v36 = vmul.f32 1.442695, %v5112_v0 }
 0x278   :  { %v795_v53 = vcombine.high %v738_v63, %v754_v59  ;;  %5509 = vpow2.f32 %v1931_v25  ;;  %v882_v62 = vcombine.low %v7093_v48, %v7108_v30  ;;  %v9995_v15 = vcombine.high %v9986_v11, %v6843_v16 }
 0x279   :  { %v7127_v2 = vrot.slane %v731_v50, %v9988_v57  ;;  %v1866_v58 = vsub.f32 %v7017_v35, %v1466_v52  ;;  %v1935_v54 = vmul.f32 1.442695, %v1865_v28  ;;  %5511 = vpow2.f32 %v5126_v36 }
 0x27a   :  { %v7124_v43 = vrot.slane %v9995_v15, %v9988_v57  ;;  %v9997_v46 = vcombine.low %v6876_v10, %v6915_v1  ;;  %v9999_v24 = vcombine.high %v6876_v10, %v6915_v1  ;;  %v7145_v26 = vrot.slane %v794_v42, %v9991_v19  ;;  %v10002_v42 = vld [vmem:[#allocation8_spill] sm:$0xff] }
 0x27b   :  { %5513 = vpow2.f32 %v1933_v38  ;;  %v5500_v12 = vpop.eup %5499  ;;  %v7152_v39 = vrot.slane %v795_v53, %v9991_v19  ;;  %v1937_v10 = vmul.f32 1.442695, %v1866_v58  ;;  %v7155_v1 = vrot.slane %v882_v62, %v9988_v57 }
 0x27c   :  { %9996 = vst [vmem:[#allocation12_spill] sm:$0xff] %v7124_v43  ;;  %v7134_v27 = vrot.slane %v9997_v46, %v9988_v57  ;;  %v7140_v16 = vrot.slane %v9999_v24, %v9988_v57  ;;  %5515 = vpow2.f32 %v1935_v54  ;;  %v4729_v3 = vmul.f32 %v5500_v12, %v7023_v49 }
 0x27d   :  { %v4730_v14 = vmul.f32 %v5500_v12, %v6997_v40  ;;  %v4731_v18 = vmul.f32 %v5500_v12, %v7007_v32  ;;  %v4732_v13 = vmul.f32 %v5500_v12, %v7029_v20  ;;  %v7161_v63 = vpop.eup %5501  ;;  %v4733_v25 = vmul.f32 %v5500_v12, %v7035_v60 }
 0x27e   :  { %9998 = vst [vmem:[#allocation16_spill] sm:$0xff] %v7134_v27  ;;  %10000 = vst [vmem:[#allocation3_spill] sm:$0xff] %v7140_v16  ;;  %v4734_v50 = vmul.f32 %v5500_v12, %v7041_v21  ;;  %v4735_v61 = vmul.f32 %v5500_v12, %v7047_v44  ;;  %v4736_v6 = vmul.f32 %v5500_v12, %v7053_v34  ;;  %v10001_v44 = vld [vmem:[#allocation14_spill] sm:$0xff]  ;;  %5517 = vpow2.f32 %v1937_v10 }
 0x27f   :  { %v7167_v0 = vpop.eup %5503  ;;  %v4794_v49 = vmul.f32 %v4729_v3, %v6807_v56  ;;  %v4795_v40 = vmul.f32 %v4730_v14, %v6809_v41  ;;  %v4796_v32 = vmul.f32 %v4731_v18, %v6817_v9  ;;  %v4797_v20 = vmul.f32 %v4732_v13, %v6819_v45 }
 0x280   :  { %v7174_v23 = vpop.eup %5505  ;;  %v4798_v21 = vmul.f32 %v4733_v25, %v6824_v4  ;;  %v4799_v60 = vmul.f32 %v4734_v50, %v6845_v55  ;;  %v4800_v34 = vmul.f32 %v4735_v61, %v10001_v44  ;;  %v4801_v52 = vmul.f32 %v4736_v6, %v10002_v42 }
 0x281   :  { %v7181_v56 = vpop.eup %5507  ;;  %v4958_v41 = vrot.slane %v4795_v40, 7  ;;  %v4960_v9 = vrot.slane %v4796_v32, 6  ;;  %v4962_v28 = vrot.slane %v4797_v20, 5  ;;  %v2051_v62 = vsel %vm1410_vm1, %v7161_v63, 0.0 }
 0x282   :  { %v7183_v45 = vpop.eup %5509  ;;  %v4964_v38 = vrot.slane %v4798_v21, 4  ;;  %v4966_v36 = vrot.slane %v4799_v60, 3  ;;  %v4968_v53 = vrot.slane %v4800_v34, 2  ;;  %v4970_v4 = vrot.slane %v4801_v52, 1 }
 0x283   :  { %v4959_v55 = vsel %vm4460_vm3, %v4958_v41, %v4794_v49  ;;  %v2058_v15 = vsel %vm1410_vm1, %v7167_v0, 0.0  ;;  %v2065_v58 = vsel %vm1410_vm1, %v7174_v23, 0.0  ;;  %v7194_v54 = vpop.eup %5511  ;;  %v2052_v24 = vrot.slane %v2051_v62, 4 }
 0x284   :  { %v4961_v46 = vsel %vm4463_vm4, %v4960_v9, %v4959_v55  ;;  %v2059_v12 = vrot.slane %v2058_v15, 4  ;;  %v2066_v10 = vrot.slane %v2065_v58, 4  ;;  %v5172_v18 = vsel %vm1410_vm1, %v7194_v54, 0.0 }
 0x285   :  { %v7197_v3 = vpop.eup %5513  ;;  %v4963_v14 = vsel %vm4466_vm5, %v4962_v28, %v4961_v46  ;;  %v2072_v13 = vsel %vm1410_vm1, %v7181_v56, 0.0  ;;  %v2079_v25 = vsel %vm1410_vm1, %v7183_v45, 0.0  ;;  %v5173_v6 = vrot.slane %v5172_v18, 4 }
 0x286   :  { %v7206_v50 = vpop.eup %5515  ;;  %v4965_v61 = vsel %vm4469_vm6, %v4964_v38, %v4963_v14  ;;  %v2053_v49 = vadd.f32 %v2052_v24, %v2051_v62  ;;  %v2060_v40 = vadd.f32 %v2059_v12, %v2058_v15  ;;  %v2067_v20 = vadd.f32 %v2066_v10, %v2065_v58 }
 0x287   :  { %v4967_v32 = vsel %vm4472_vm7, %v4966_v36, %v4965_v61  ;;  %v2073_v21 = vrot.slane %v2072_v13, 4  ;;  %v2080_v60 = vrot.slane %v2079_v25, 4  ;;  %v5174_v34 = vadd.f32 %v5173_v6, %v5172_v18 }
 0x288   :  { %v4969_v44 = vsel %vm4475_vm8, %v4968_v53, %v4967_v32  ;;  %v2054_v42 = vrot.slane %v2053_v49, 2  ;;  %v2061_v52 = vrot.slane %v2060_v40, 2  ;;  %v2068_v9 = vrot.slane %v2067_v20, 2  ;;  %v7217_v62 = vpop.eup %5517 }
 0x289   :  { %v4971_v41 = vsel %vm4478_vm9, %v4970_v4, %v4969_v44  ;;  %v2074_v28 = vadd.f32 %v2073_v21, %v2072_v13  ;;  %v2081_v55 = vadd.f32 %v2080_v60, %v2079_v25  ;;  %v5175_v46 = vrot.slane %v5174_v34, 2 }
 0x28a   :  { %v2055_v38 = vadd.f32 %v2054_v42, %v2053_v49  ;;  %v2062_v14 = vadd.f32 %v2061_v52, %v2060_v40  ;;  %v7215_v36 = vsel %vm3139_vm10, -inf, %v6993_v33  ;;  %v2069_v15 = vadd.f32 %v2068_v9, %v2067_v20  ;;  %v7231_v49 = vpop.permute.xlu1 %232 }
 0x28b   :  { %v2075_v53 = vrot.slane %v2074_v28, 2  ;;  %v2082_v58 = vrot.slane %v2081_v55, 2  ;;  %v7222_v4 = vsel %vm3140_vm11, -inf, %v6995_v51  ;;  %v5176_v24 = vadd.f32 %v5175_v46, %v5174_v34 }
 0x28c   :  { %v2056_v12 = vrot.slane %v2055_v38, 1  ;;  %v2063_v10 = vrot.slane %v2062_v14, 1  ;;  %v2086_v18 = vsel %vm1410_vm1, %v7197_v3, 0.0  ;;  %v2070_v13 = vrot.slane %v2069_v15, 1 }
 0x28d   :  { %v2076_v25 = vadd.f32 %v2075_v53, %v2074_v28  ;;  %v2083_v61 = vadd.f32 %v2082_v58, %v2081_v55  ;;  %v7229_v6 = vsel %vm3141_vm12, -inf, %v7003_v17  ;;  %v5177_v40 = vrot.slane %v5176_v24, 1 }
 0x28e   :  { %v2087_v32 = vrot.slane %v2086_v18, 4  ;;  %v7236_v20 = vsel %vm3142_vm13, -inf, %v7005_v31  ;;  %v3267_v21 = vsel %vm1410_vm1, %v7215_v36, -inf  ;;  %v2057_v60 = vadd.f32 %v2056_v12, %v2055_v38 }
 0x28f   :  { %v2064_v44 = vadd.f32 %v2063_v10, %v2062_v14  ;;  %v2077_v34 = vrot.slane %v2076_v25, 1  ;;  %v2084_v42 = vrot.slane %v2083_v61, 1  ;;  %v5178_v52 = vadd.f32 %v5177_v40, %v5176_v24  ;;  %v7247_v10 = vpop.permute.xlu1 %256 }
 0x290   :  { %v2088_v9 = vadd.f32 %v2087_v32, %v2086_v18  ;;  %v2093_v28 = vsel %vm1410_vm1, %v7206_v50, 0.0  ;;  %v2100_v55 = vsel %vm1410_vm1, %v7217_v62, 0.0  ;;  %v5036_v46 = vsel %vm1410_vm1, %v4971_v41, 0.0 }
 0x291   :  { %v2071_v53 = vadd.f32 %v2070_v13, %v2069_v15  ;;  %v2078_v58 = vadd.f32 %v2077_v34, %v2076_v25  ;;  %v2094_v5 = vrot.slane %v2093_v28, 4  ;;  %5519 = vrcp.f32 %v5178_v52 }
 0x292   :  { %v2089_v11 = vrot.slane %v2088_v9, 2  ;;  %v2101_v59 = vrot.slane %v2100_v55, 4  ;;  %v3268_v38 = vsel %vm1410_vm1, %v7222_v4, -inf  ;;  %v2085_v14 = vadd.f32 %v2084_v42, %v2083_v61 }
 0x293   :  { %v2095_v24 = vadd.f32 %v2094_v5, %v2093_v28  ;;  %5521 = vrcp.f32 %v2057_v60  ;;  %v3269_v12 = vmax.f32 %v3267_v21, %v3268_v38  ;;  %v3270_v41 = vsel %vm1410_vm1, %v7229_v6, -inf }
 0x294   :  { %v2090_v18 = vadd.f32 %v2089_v11, %v2088_v9  ;;  %v2102_v40 = vadd.f32 %v2101_v59, %v2100_v55  ;;  %5523 = vrcp.f32 %v2064_v44  ;;  %v5037_v25 = vrot.slane %v5036_v46, 4  ;;  %v281_v9 = vpop.permute.xlu1 %280 }
 0x295   :  { %v2096_v15 = vrot.slane %v2095_v24, 2  ;;  %5525 = vrcp.f32 %v2071_v53  ;;  %v3271_v13 = vmax.f32 %v3269_v12, %v3270_v41  ;;  %v3272_v11 = vsel %vm1410_vm1, %v7236_v20, -inf }
 0x296   :  { %v2091_v32 = vrot.slane %v2090_v18, 1  ;;  %v2103_v34 = vrot.slane %v2102_v40, 2  ;;  %5527 = vrcp.f32 %v2078_v58  ;;  %v7256_v21 = vsel %vm3143_vm14, -inf, %v7010_v8 }
 0x297   :  { %v2097_v5 = vadd.f32 %v2096_v15, %v2095_v24  ;;  %5529 = vrcp.f32 %v2085_v14  ;;  %v3273_v60 = vmax.f32 %v3271_v13, %v3272_v11  ;;  %v10003_v44 = vcombine.low %v7127_v2, %v7115_v22 }
 0x298   :  { %v2092_v59 = vadd.f32 %v2091_v32, %v2090_v18  ;;  %v2104_v61 = vadd.f32 %v2103_v34, %v2102_v40  ;;  %v7266_v28 = vadd.f32 %v5037_v25, %v5036_v46  ;;  %v10005_v53 = vcombine.high %v7093_v48, %v7108_v30  ;;  %v10006_v46 = vld [vmem:[#allocation15_spill] sm:$0xff] }
 0x299   :  { %v7262_v42 = vrot.slane %v10003_v44, %v9991_v19  ;;  %v2098_v52 = vrot.slane %v2097_v5, 1  ;;  %v7277_v14 = vsel %vm3144_vm15, -inf, %v7012_v7  ;;  %v3274_v24 = vsel %vm1410_vm1, %v7256_v21, -inf }
 0x29a   :  { %10004 = vst [vmem:[#allocation2_spill] sm:$0xff] %v7266_v28  ;;  %v2105_v55 = vrot.slane %v2104_v61, 1  ;;  %5531 = vrcp.f32 %v2092_v59  ;;  %v7272_v58 = vrot.slane %v10005_v53, %v9988_v57  ;;  %v930_v12 = vcombine.low %v10006_v46, %v7155_v1 }
 0x29b   :  { %v2099_v38 = vadd.f32 %v2098_v52, %v2097_v5  ;;  %v5520_v18 = vpop.eup %5519  ;;  %v7284_v41 = vsel %vm3145_vm0, -inf, %v7014_v37  ;;  %v7287_v48 = vsel %vm3146_vm2, -inf, %v7017_v35  ;;  %v3275_v30 = vmax.f32 %v3273_v60, %v3274_v24 }
 0x29c   :  { %v2106_v40 = vadd.f32 %v2105_v55, %v2104_v61  ;;  %v10007_v13 = vcombine.high %v7127_v2, %v7115_v22  ;;  %v762_v34 = vcombine.low %v7231_v49, %v281_v9  ;;  %v3276_v61 = vsel %vm1410_vm1, %v7277_v14, -inf  ;;  %v305_v55 = vpop.permute.xlu1 %304 }
 0x29d   :  { %v5522_v15 = vpop.eup %5521  ;;  %5533 = vrcp.f32 %v2099_v38  ;;  %v3278_v2 = vsel %vm1410_vm1, %v7284_v41, -inf  ;;  %v3280_v44 = vsel %vm1410_vm1, %v7287_v48, -inf  ;;  %v7308_v52 = vrot.slane %v930_v12, %v9991_v19 }
 0x29e   :  { %v7293_v25 = vrot.slane %v10007_v13, %v9991_v19  ;;  %v5524_v5 = vpop.eup %5523  ;;  %5535 = vrcp.f32 %v2106_v40  ;;  %v2563_v59 = vmul.f32 %v5522_v15, %v7161_v63  ;;  %v3277_v24 = vmax.f32 %v3275_v30, %v3276_v61 }
 0x29f   :  { %v5526_v60 = vpop.eup %5525  ;;  %v2564_v22 = vmul.f32 %v5524_v5, %v7167_v0  ;;  %10008 = vst [vmem:[#allocation4_spill] sm:$0xff] %v7308_v52  ;;  %v763_v5 = vcombine.high %v7231_v49, %v281_v9  ;;  %v7318_v12 = vrot.slane %v762_v34, %v9988_v57  ;;  %v778_v30 = vcombine.low %v7247_v10, %v305_v55 }
 0x2a0   :  { %v5528_v53 = vpop.eup %5527  ;;  %v2565_v38 = vmul.f32 %v5526_v60, %v7174_v23  ;;  %v2627_v63 = vmul.f32 %v2563_v59, %v6993_v33  ;;  %v7325_v61 = vmul.f32 %v5520_v18, %v7194_v54 }
 0x2a1   :  { %v5530_v0 = vpop.eup %5529  ;;  %v2566_v15 = vmul.f32 %v5528_v53, %v7181_v56  ;;  %v2628_v13 = vmul.f32 %v2564_v22, %v6995_v51  ;;  %v3279_v53 = vmax.f32 %v3277_v24, %v3278_v2  ;;  %v7335_v32 = vrot.slane %v763_v5, %v9988_v57 }
 0x2a2   :  { %v2567_v11 = vmul.f32 %v5530_v0, %v7183_v45  ;;  %v2629_v23 = vmul.f32 %v2565_v38, %v7003_v17  ;;  %v2691_v59 = vsel %vm1410_vm1, %v2627_v63, 0.0 }
 0x2a3   :  { %v2630_v56 = vmul.f32 %v2566_v15, %v7005_v31  ;;  %v2692_v60 = vrot.slane %v2691_v59, 4  ;;  %v2698_v22 = vsel %vm1410_vm1, %v2628_v13, 0.0 }
 0x2a4   :  { %v5532_v49 = vpop.eup %5531  ;;  %v2631_v9 = vmul.f32 %v2567_v11, %v7010_v8  ;;  %v2699_v34 = vrot.slane %v2698_v22, 4  ;;  %v2705_v45 = vsel %vm1410_vm1, %v2629_v23, 0.0  ;;  %v779_v23 = vcombine.high %v7247_v10, %v305_v55 }
 0x2a5   :  { %v2568_v38 = vmul.f32 %v5532_v49, %v7197_v3  ;;  %v2693_v63 = vadd.f32 %v2692_v60, %v2691_v59  ;;  %v2706_v0 = vrot.slane %v2705_v45, 4  ;;  %v2712_v40 = vsel %vm1410_vm1, %v2630_v56, 0.0 }
 0x2a6   :  { %v2700_v54 = vadd.f32 %v2699_v34, %v2698_v22  ;;  %v2713_v18 = vrot.slane %v2712_v40, 4  ;;  %v2719_v15 = vsel %vm1410_vm1, %v2631_v9, 0.0  ;;  %v7343_v55 = vrot.slane %v778_v30, %v9988_v57 }
 0x2a7   :  { %v5534_v13 = vpop.eup %5533  ;;  %v2694_v28 = vrot.slane %v2693_v63, 2  ;;  %v2707_v11 = vadd.f32 %v2706_v0, %v2705_v45  ;;  %v2720_v52 = vrot.slane %v2719_v15, 4  ;;  %v2632_v24 = vmul.f32 %v2568_v38, %v7012_v7 }
 0x2a8   :  { %v5536_v2 = vpop.eup %5535  ;;  %v2569_v3 = vmul.f32 %v5534_v13, %v7206_v50  ;;  %v2701_v59 = vrot.slane %v2700_v54, 2  ;;  %v2714_v56 = vadd.f32 %v2713_v18, %v2712_v40  ;;  %v3281_v45 = vmax.f32 %v3279_v53, %v3280_v44 }
 0x2a9   :  { %v2570_v60 = vmul.f32 %v5536_v2, %v7217_v62  ;;  %v2695_v22 = vadd.f32 %v2694_v28, %v2693_v63  ;;  %v2708_v49 = vrot.slane %v2707_v11, 2  ;;  %v2721_v9 = vadd.f32 %v2720_v52, %v2719_v15 }
 0x2aa   :  { %v2633_v5 = vmul.f32 %v2569_v3, %v7014_v37  ;;  %v2702_v34 = vadd.f32 %v2701_v59, %v2700_v54  ;;  %v2715_v16 = vrot.slane %v2714_v56, 2  ;;  %v2726_v62 = vsel %vm1410_vm1, %v2632_v24, 0.0 }
 0x2ab   :  { %v2696_v0 = vrot.slane %v2695_v22, 1  ;;  %v2709_v27 = vadd.f32 %v2708_v49, %v2707_v11  ;;  %v2722_v10 = vrot.slane %v2721_v9, 2  ;;  %v2634_v50 = vmul.f32 %v2570_v60, %v7017_v35 }
 0x2ac   :  { %v2703_v38 = vrot.slane %v2702_v34, 1  ;;  %v2716_v40 = vadd.f32 %v2715_v16, %v2714_v56  ;;  %v2727_v52 = vrot.slane %v2726_v62, 4  ;;  %v7348_v18 = vrot.slane %v779_v23, %v9988_v57 }
 0x2ad   :  { %v2710_v28 = vrot.slane %v2709_v27, 1  ;;  %v2723_v63 = vadd.f32 %v2722_v10, %v2721_v9  ;;  %v2733_v44 = vsel %vm1410_vm1, %v2633_v5, 0.0  ;;  %v3387_v53 = vsub.f32 %v7215_v36, %v3281_v45 }
 0x2ae   :  { %v2717_v54 = vrot.slane %v2716_v40, 1  ;;  %v3388_v30 = vsub.f32 %v7222_v4, %v3281_v45  ;;  %v7353_v15 = vadd.f32 %v2696_v0, %v2695_v22  ;;  %v2728_v11 = vadd.f32 %v2727_v52, %v2726_v62 }
 0x2af   :  { %v2724_v13 = vrot.slane %v2723_v63, 1  ;;  %v2734_v16 = vrot.slane %v2733_v44, 4  ;;  %v7355_v2 = vadd.f32 %v2703_v38, %v2702_v34  ;;  %v7357_v3 = vadd.f32 %v2710_v28, %v2709_v27 }
 0x2b0   :  { %10009 = vst [vmem:[#allocation14_spill] sm:$0xff] %v7353_v15  ;;  %v2740_v24 = vsel %vm1410_vm1, %v2634_v50, 0.0  ;;  %v3389_v23 = vsub.f32 %v7229_v6, %v3281_v45  ;;  %v7361_v59 = vadd.f32 %v2717_v54, %v2716_v40  ;;  %v2729_v56 = vrot.slane %v2728_v11, 2 }
 0x2b1   :  { %10010 = vst [vmem:[#allocation8_spill] sm:$0xff] %v7355_v2  ;;  %10011 = vst [vmem:[#allocation15_spill] sm:$0xff] %v7357_v3  ;;  %v2735_v60 = vadd.f32 %v2734_v16, %v2733_v44  ;;  %v2741_v36 = vrot.slane %v2740_v24, 4  ;;  %v7363_v49 = vadd.f32 %v2724_v13, %v2723_v63  ;;  %v3390_v4 = vsub.f32 %v7236_v20, %v3281_v45 }
 0x2b2   :  { %10012 = vst [vmem:[#allocation17_spill] sm:$0xff] %v7361_v59  ;;  %v3391_v22 = vsub.f32 %v7256_v21, %v3281_v45  ;;  %v3392_v9 = vsub.f32 %v7277_v14, %v3281_v45  ;;  %v2730_v5 = vadd.f32 %v2729_v56, %v2728_v11  ;;  %v3393_v0 = vsub.f32 %v7284_v41, %v3281_v45 }
 0x2b3   :  { %10013 = vst [vmem:[#allocation18_spill] sm:$0xff] %v7363_v49  ;;  %v2736_v27 = vrot.slane %v2735_v60, 2  ;;  %v2742_v34 = vadd.f32 %v2741_v36, %v2740_v24  ;;  %v3394_v6 = vsub.f32 %v7287_v48, %v3281_v45  ;;  %v3451_v10 = vmul.f32 1.442695, %v3387_v53 }
 0x2b4   :  { %v3453_v50 = vmul.f32 1.442695, %v3388_v30  ;;  %v3455_v38 = vmul.f32 1.442695, %v3389_v23  ;;  %v2731_v40 = vrot.slane %v2730_v5, 1  ;;  %vm3955_vm10 = vcmp.eq.f32.partialorder %v7353_v15, 0.0 }
 0x2b5   :  { %v2737_v62 = vadd.f32 %v2736_v27, %v2735_v60  ;;  %v2743_v28 = vrot.slane %v2742_v34, 2  ;;  %v3457_v63 = vmul.f32 1.442695, %v3390_v4  ;;  %5537 = vpow2.f32 %v3451_v10 }
 0x2b6   :  { %v3459_v20 = vmul.f32 1.442695, %v3391_v22  ;;  %v3461_v52 = vmul.f32 1.442695, %v3392_v9  ;;  %v3463_v21 = vmul.f32 1.442695, %v3393_v0  ;;  %v7370_v54 = vadd.f32 %v2731_v40, %v2730_v5 }
 0x2b7   :  { %v2738_v14 = vrot.slane %v2737_v62, 1  ;;  %v2744_v44 = vadd.f32 %v2743_v28, %v2742_v34  ;;  %5539 = vpow2.f32 %v3453_v50  ;;  %v3465_v41 = vmul.f32 1.442695, %v3394_v6 }
 0x2b8   :  { %10014 = vst [vmem:[#allocation19_spill] sm:$0xff] %v7370_v54  ;;  %5541 = vpow2.f32 %v3455_v38  ;;  %vm3956_vm11 = vcmp.eq.f32.partialorder %v7355_v2, 0.0  ;;  %vm3957_vm12 = vcmp.eq.f32.partialorder %v7357_v3, 0.0  ;;  %vm3958_vm13 = vcmp.eq.f32.partialorder %v7361_v59, 0.0 }
 0x2b9   :  { %v7374_v48 = vadd.f32 %v2738_v14, %v2737_v62  ;;  %v2745_v45 = vrot.slane %v2744_v44, 1  ;;  %5543 = vpow2.f32 %v3457_v63  ;;  %vm3959_vm14 = vcmp.eq.f32.partialorder %v7363_v49, 0.0 }
 0x2ba   :  { %5545 = vpow2.f32 %v3459_v20  ;;  %vm3960_vm15 = vcmp.eq.f32.partialorder %v7370_v54, 0.0  ;;  %v7384_v30 = vsel %vm3955_vm10, -inf, %v7353_v15  ;;  %v7387_v13 = vsel %vm3956_vm11, -inf, %v7355_v2 }
 0x2bb   :  { %10015 = vst [vmem:[#allocation20_spill] sm:$0xff] %v7374_v48  ;;  %v7380_v53 = vadd.f32 %v2745_v45, %v2744_v44  ;;  %5547 = vpow2.f32 %v3461_v52  ;;  %vm3961_vm0 = vcmp.eq.f32.partialorder %v7374_v48, 0.0  ;;  %v7390_v11 = vsel %vm3957_vm12, -inf, %v7357_v3 }
 0x2bc   :  { %5549 = vpow2.f32 %v3463_v21  ;;  %v7393_v16 = vsel %vm3958_vm13, -inf, %v7361_v59  ;;  %v7397_v24 = vsel %vm3959_vm14, -inf, %v7363_v49  ;;  %v7400_v23 = vsel %vm3960_vm15, -inf, %v7370_v54 }
 0x2bd   :  { %10016 = vst [vmem:[#allocation21_spill] sm:$0xff] %v7380_v53  ;;  %5551 = vpow2.f32 %v3465_v41  ;;  %vm3962_vm2 = vcmp.eq.f32.partialorder %v7380_v53, 0.0  ;;  %v7404_v56 = vmul.f32 %v7325_v61, %v7081_v47  ;;  %v7407_v60 = vsel %vm3961_vm0, -inf, %v7374_v48 }
 0x2be   :  { %v4083_v36 = vsel %vm1410_vm1, %v7384_v30, -inf  ;;  %v4084_v4 = vsel %vm1410_vm1, %v7387_v13, -inf  ;;  %v7414_v22 = vsel %vm3962_vm2, -inf, %v7380_v53  ;;  %v4086_v5 = vsel %vm1410_vm1, %v7390_v11, -inf }
 0x2bf   :  { %10017 = vst [vmem:[#allocation22_spill] sm:$0xff] %v7404_v56  ;;  %v4085_v9 = vmax.f32 %v4083_v36, %v4084_v4  ;;  %v4088_v47 = vsel %vm1410_vm1, %v7393_v16, -inf  ;;  %v7420_v61 = vpop.eup %5537  ;;  %v4090_v27 = vsel %vm1410_vm1, %v7397_v24, -inf  ;;  %v4092_v34 = vsel %vm1410_vm1, %v7400_v23, -inf }
 0x2c0   :  { %v4094_v0 = vsel %vm1410_vm1, %v7407_v60, -inf  ;;  %v826_v6 = vcombine.low %v7318_v12, %v7343_v55  ;;  %v3579_v50 = vsel %vm1410_vm1, %v7420_v61, 0.0  ;;  %v827_v40 = vcombine.high %v7318_v12, %v7343_v55 }
 0x2c1   :  { %v7430_v10 = vpop.eup %5539  ;;  %v4087_v38 = vmax.f32 %v4085_v9, %v4086_v5  ;;  %v842_v62 = vcombine.low %v7335_v32, %v7348_v18  ;;  %v4096_v20 = vsel %vm1410_vm1, %v7414_v22, -inf  ;;  %v843_v21 = vcombine.high %v7335_v32, %v7348_v18 }
 0x2c2   :  { %v7438_v28 = vpop.eup %5541  ;;  %v3580_v63 = vsel %vm1410_vm1, %v7430_v10, 0.0  ;;  %v834_v52 = vrot.slane %v826_v6, %v9991_v19  ;;  %v841_v41 = vrot.slane %v827_v40, %v9991_v19 }
 0x2c3   :  { %v7447_v14 = vpop.eup %5543  ;;  %v3581_v44 = vadd.f32 %v3580_v63, %v3579_v50  ;;  %v3582_v12 = vsel %vm1410_vm1, %v7438_v28, 0.0  ;;  %v4089_v55 = vmax.f32 %v4087_v38, %v4088_v47  ;;  %v850_v4 = vrot.slane %v842_v62, %v9991_v19 }
 0x2c4   :  { %v7452_v45 = vpop.eup %5545  ;;  %v3584_v36 = vsel %vm1410_vm1, %v7447_v14, 0.0  ;;  %v857_v9 = vrot.slane %v843_v21, %v9991_v19  ;;  %v7459_v32 = vcombine.low %v7145_v26, %v834_v52  ;;  %v7466_v50 = vcombine.high %v7145_v26, %v834_v52 }
 0x2c5   :  { %v7461_v18 = vpop.eup %5547  ;;  %v3583_v5 = vadd.f32 %v3582_v12, %v3581_v44  ;;  %v3586_v47 = vsel %vm1410_vm1, %v7452_v45, 0.0  ;;  %v4091_v6 = vmax.f32 %v4089_v55, %v4090_v27  ;;  %v7473_v62 = vcombine.low %v7152_v39, %v841_v41 }
 0x2c6   :  { %v7468_v38 = vpop.eup %5549  ;;  %v3588_v40 = vsel %vm1410_vm1, %v7461_v18, 0.0  ;;  %v7476_v63 = vcombine.high %v7152_v39, %v841_v41  ;;  %v7479_v21 = vcombine.low %v7262_v42, %v850_v4  ;;  %v7486_v12 = vcombine.high %v7262_v42, %v850_v4 }
 0x2c7   :  { %v7481_v44 = vpop.eup %5551  ;;  %v3585_v27 = vadd.f32 %v3584_v36, %v3583_v5  ;;  %v3590_v26 = vsel %vm1410_vm1, %v7468_v38, 0.0  ;;  %v4093_v52 = vmax.f32 %v4091_v6, %v4092_v34  ;;  %v7491_v57 = vcombine.low %v7293_v25, %v857_v9 }
 0x2c8   :  { %10018 = vst [vmem:[#allocation23_spill] sm:$0xff] %v7479_v21  ;;  %v3592_v55 = vsel %vm1410_vm1, %v7481_v44, 0.0  ;;  %v7494_v39 = vcombine.high %v7293_v25, %v857_v9  ;;  %v1579_v41 = vsel %vm1410_vm1, %v7459_v32, -inf  ;;  %v1586_v34 = vsel %vm1410_vm1, %v7466_v50, -inf }
 0x2c9   :  { %v3587_v36 = vadd.f32 %v3586_v47, %v3585_v27  ;;  %v4095_v5 = vmax.f32 %v4093_v52, %v4094_v0  ;;  %v1580_v53 = vrot.slane %v1579_v41, 4  ;;  %v1587_v42 = vrot.slane %v1586_v34, 4 }
 0x2ca   :  { %v1593_v4 = vsel %vm1410_vm1, %v7473_v62, -inf  ;;  %v1600_v6 = vsel %vm1410_vm1, %v7476_v63, -inf  ;;  %v1607_v25 = vsel %vm1410_vm1, %v7479_v21, -inf  ;;  %v1614_v52 = vsel %vm1410_vm1, %v7486_v12, -inf }
 0x2cb   :  { %v3589_v9 = vadd.f32 %v3588_v40, %v3587_v36  ;;  %v4097_v48 = vmax.f32 %v4095_v5, %v4096_v20  ;;  %v1581_v54 = vmax.f32 %v1579_v41, %v1580_v53  ;;  %v1594_v49 = vrot.slane %v1593_v4, 4 }
 0x2cc   :  { %v1588_v47 = vmax.f32 %v1586_v34, %v1587_v42  ;;  %v1601_v0 = vrot.slane %v1600_v6, 4  ;;  %v1608_v27 = vrot.slane %v1607_v25, 4  ;;  %vm3163_vm10 = vcmp.eq.f32.partialorder %v7459_v32, 0.0 }
 0x2cd   :  { %v3591_v59 = vadd.f32 %v3590_v26, %v3589_v9  ;;  %v4203_v3 = vsub.f32 %v7384_v30, %v4097_v48  ;;  %v4204_v2 = vsub.f32 %v7387_v13, %v4097_v48  ;;  %v4205_v15 = vsub.f32 %v7390_v11, %v4097_v48 }
 0x2ce   :  { %v4206_v29 = vsub.f32 %v7393_v16, %v4097_v48  ;;  %v4207_v40 = vsub.f32 %v7397_v24, %v4097_v48  ;;  %v4208_v53 = vsub.f32 %v7400_v23, %v4097_v48  ;;  %v4209_v20 = vsub.f32 %v7407_v60, %v4097_v48 }
 0x2cf   :  { %v3593_v41 = vadd.f32 %v3592_v55, %v3591_v59  ;;  %v4210_v36 = vsub.f32 %v7414_v22, %v4097_v48  ;;  %v4267_v5 = vmul.f32 1.442695, %v4203_v3  ;;  %v4269_v34 = vmul.f32 1.442695, %v4204_v2 }
 0x2d0   :  { %v4271_v26 = vmul.f32 1.442695, %v4205_v15  ;;  %v4273_v42 = vmul.f32 1.442695, %v4206_v29  ;;  %v4275_v30 = vmul.f32 1.442695, %v4207_v40  ;;  %v1595_v9 = vmax.f32 %v1593_v4, %v1594_v49 }
 0x2d1   :  { %5553 = vrcp.f32 %v3593_v41  ;;  %v4277_v13 = vmul.f32 1.442695, %v4208_v53  ;;  %v4279_v11 = vmul.f32 1.442695, %v4209_v20  ;;  %v4281_v56 = vmul.f32 1.442695, %v4210_v36 }
 0x2d2   :  { %5555 = vpow2.f32 %v4267_v5  ;;  %v1582_v16 = vrot.slane %v1581_v54, 2  ;;  %v1589_v24 = vrot.slane %v1588_v47, 2  ;;  %v1596_v43 = vrot.slane %v1595_v9, 2 }
 0x2d3   :  { %5557 = vpow2.f32 %v4269_v34  ;;  %v1602_v23 = vmax.f32 %v1600_v6, %v1601_v0  ;;  %v1609_v60 = vmax.f32 %v1607_v25, %v1608_v27  ;;  %v1615_v59 = vrot.slane %v1614_v52, 4 }
 0x2d4   :  { %5559 = vpow2.f32 %v4271_v26  ;;  %v1583_v48 = vmax.f32 %v1581_v54, %v1582_v16  ;;  %v1590_v3 = vmax.f32 %v1588_v47, %v1589_v24  ;;  %v1597_v2 = vmax.f32 %v1595_v9, %v1596_v43 }
 0x2d5   :  { %5561 = vpow2.f32 %v4273_v42  ;;  %v1603_v29 = vrot.slane %v1602_v23, 2  ;;  %v1610_v15 = vrot.slane %v1609_v60, 2  ;;  %v1616_v49 = vmax.f32 %v1614_v52, %v1615_v59 }
 0x2d6   :  { %5563 = vpow2.f32 %v4275_v30  ;;  %v1584_v22 = vrot.slane %v1583_v48, 1  ;;  %v1591_v55 = vrot.slane %v1590_v3, 1  ;;  %v1598_v4 = vrot.slane %v1597_v2, 1 }
 0x2d7   :  { %5565 = vpow2.f32 %v4277_v13  ;;  %v1604_v40 = vmax.f32 %v1602_v23, %v1603_v29  ;;  %v1611_v53 = vmax.f32 %v1609_v60, %v1610_v15  ;;  %v1617_v20 = vrot.slane %v1616_v49, 2 }
 0x2d8   :  { %5567 = vpow2.f32 %v4279_v11  ;;  %v7516_v6 = vmax.f32 %v1583_v48, %v1584_v22  ;;  %v7518_v25 = vmax.f32 %v1590_v3, %v1591_v55  ;;  %v7520_v54 = vmax.f32 %v1597_v2, %v1598_v4 }
 0x2d9   :  { %5569 = vpow2.f32 %v4281_v56  ;;  %v1605_v43 = vrot.slane %v1604_v40, 1  ;;  %v1612_v47 = vrot.slane %v1611_v53, 1  ;;  %v1618_v0 = vmax.f32 %v1616_v49, %v1617_v20 }
 0x2da   :  { %v1621_v27 = vsel %vm1410_vm1, %v7491_v57, -inf  ;;  %v7526_v52 = vsel %vm1410_vm1, %v7494_v39, -inf  ;;  %v1883_v41 = vsub.f32 %v7459_v32, %v7516_v6  ;;  %v1884_v36 = vsub.f32 %v7466_v50, %v7518_v25 }
 0x2db   :  { %v5554_v5 = vpop.eup %5553  ;;  %v7532_v34 = vmax.f32 %v1604_v40, %v1605_v43  ;;  %v7534_v56 = vmax.f32 %v1611_v53, %v1612_v47  ;;  %v1619_v26 = vrot.slane %v1618_v0, 1  ;;  %v1622_v42 = vrot.slane %v1621_v27, 4 }
 0x2dc   :  { %v7536_v30 = vpop.eup %5555  ;;  %v3707_v9 = vmul.f32 %v5554_v5, %v7420_v61  ;;  %v3708_v13 = vmul.f32 %v5554_v5, %v7430_v10  ;;  %v3709_v11 = vmul.f32 %v5554_v5, %v7438_v28  ;;  %v3710_v16 = vmul.f32 %v5554_v5, %v7447_v14 }
 0x2dd   :  { %v7542_v24 = vpop.eup %5557  ;;  %v3711_v23 = vmul.f32 %v5554_v5, %v7452_v45  ;;  %v3712_v60 = vmul.f32 %v5554_v5, %v7461_v18  ;;  %v3713_v59 = vmul.f32 %v5554_v5, %v7468_v38  ;;  %v3714_v48 = vmul.f32 %v5554_v5, %v7481_v44 }
 0x2de   :  { %v7548_v3 = vpop.eup %5559  ;;  %v3771_v61 = vmul.f32 %v3707_v9, %v6993_v33  ;;  %v3772_v10 = vmul.f32 %v3708_v13, %v6995_v51  ;;  %v3773_v28 = vmul.f32 %v3709_v11, %v7003_v17  ;;  %v3774_v14 = vmul.f32 %v3710_v16, %v7005_v31 }
 0x2df   :  { %v7554_v2 = vpop.eup %5561  ;;  %v3775_v45 = vmul.f32 %v3711_v23, %v7010_v8  ;;  %v3776_v18 = vmul.f32 %v3712_v60, %v7012_v7  ;;  %v3777_v38 = vmul.f32 %v3713_v59, %v7014_v37  ;;  %v3778_v44 = vmul.f32 %v3714_v48, %v7017_v35 }
 0x2e0   :  { %v7560_v29 = vpop.eup %5563  ;;  %v3835_v33 = vsel %vm1410_vm1, %v3771_v61, 0.0  ;;  %v3836_v51 = vsel %vm1410_vm1, %v3772_v10, 0.0  ;;  %v3838_v17 = vsel %vm1410_vm1, %v3773_v28, 0.0  ;;  %v3840_v31 = vsel %vm1410_vm1, %v3774_v14, 0.0 }
 0x2e1   :  { %v7566_v15 = vpop.eup %5565  ;;  %v3837_v49 = vadd.f32 %v3836_v51, %v3835_v33  ;;  %v3842_v8 = vsel %vm1410_vm1, %v3775_v45, 0.0  ;;  %v3844_v7 = vsel %vm1410_vm1, %v3776_v18, 0.0  ;;  %v3846_v37 = vsel %vm1410_vm1, %v3777_v38, 0.0  ;;  %v7606_v51 = vpop.permute.xlu0 %258 }
 0x2e2   :  { %v7571_v35 = vpop.eup %5567  ;;  %v3848_v22 = vsel %vm1410_vm1, %v3778_v44, 0.0  ;;  %v4459_v55 = vrot.slane %v7542_v24, 7  ;;  %v4462_v4 = vrot.slane %v7548_v3, 6  ;;  %v4465_v40 = vrot.slane %v7554_v2, 5 }
 0x2e3   :  { %v7577_v53 = vpop.eup %5569  ;;  %v3839_v20 = vadd.f32 %v3838_v17, %v3837_v49  ;;  %v4468_v43 = vrot.slane %v7560_v29, 4  ;;  %v4471_v47 = vrot.slane %v7566_v15, 3  ;;  %v4474_v5 = vrot.slane %v7571_v35, 2 }
 0x2e4   :  { %v4461_v9 = vsel %vm4460_vm3, %v4459_v55, %v7536_v30  ;;  %v4477_v13 = vrot.slane %v7577_v53, 1  ;;  %v1620_v11 = vmax.f32 %v1618_v0, %v1619_v26  ;;  %v1623_v16 = vmax.f32 %v1621_v27, %v1622_v42 }
 0x2e5   :  { %v3841_v23 = vadd.f32 %v3840_v31, %v3839_v20  ;;  %v4464_v60 = vsel %vm4463_vm4, %v4462_v4, %v4461_v9  ;;  %v1629_v59 = vrot.slane %v7526_v52, 4  ;;  %v1885_v48 = vsub.f32 %v7473_v62, %v7520_v54 }
 0x2e6   :  { %v4467_v61 = vsel %vm4466_vm5, %v4465_v40, %v4464_v60  ;;  %v1624_v10 = vrot.slane %v1623_v16, 2  ;;  %v1886_v28 = vsub.f32 %v7476_v63, %v7532_v34  ;;  %v1887_v14 = vsub.f32 %v7479_v21, %v7534_v56 }
 0x2e7   :  { %v3843_v45 = vadd.f32 %v3842_v8, %v3841_v23  ;;  %v4470_v0 = vsel %vm4469_vm6, %v4468_v43, %v4467_v61  ;;  %v1630_v27 = vmax.f32 %v7526_v52, %v1629_v59  ;;  %v1888_v26 = vsub.f32 %v7486_v12, %v1620_v11 }
 0x2e8   :  { %v4473_v42 = vsel %vm4472_vm7, %v4471_v47, %v4470_v0  ;;  %v1625_v18 = vmax.f32 %v1623_v16, %v1624_v10  ;;  %v1971_v54 = vmul.f32 1.442695, %v1883_v41  ;;  %v1973_v34 = vmul.f32 1.442695, %v1884_v36 }
 0x2e9   :  { %v3845_v38 = vadd.f32 %v3844_v7, %v3843_v45  ;;  %v4476_v56 = vsel %vm4475_vm8, %v4474_v5, %v4473_v42  ;;  %v1631_v44 = vrot.slane %v1630_v27, 2  ;;  %v1975_v33 = vmul.f32 1.442695, %v1885_v48  ;;  %v10022_v5 = vld [vmem:[#allocation12_spill] sm:$0xff] }
 0x2ea   :  { %v4479_v52 = vsel %vm4478_vm9, %v4477_v13, %v4476_v56  ;;  %v1626_v17 = vrot.slane %v1625_v18, 1  ;;  %5571 = vpow2.f32 %v1971_v54  ;;  %v1977_v31 = vmul.f32 1.442695, %v1886_v28  ;;  %v10023_v13 = vld [vmem:[#allocation22_spill] sm:$0xff] }
 0x2eb   :  { %v3847_v49 = vadd.f32 %v3846_v37, %v3845_v38  ;;  %v4586_v6 = vsel %vm1410_vm1, %v4479_v52, 0.0  ;;  %v1632_v41 = vmax.f32 %v1630_v27, %v1631_v44  ;;  %5573 = vpow2.f32 %v1973_v34 }
 0x2ec   :  { %v4587_v8 = vrot.slane %v4586_v6, 4  ;;  %v1627_v25 = vmax.f32 %v1625_v18, %v1626_v17  ;;  %5575 = vpow2.f32 %v1975_v33  ;;  %v1979_v36 = vmul.f32 1.442695, %v1887_v14 }
 0x2ed   :  { %v7609_v7 = vadd.f32 %v3848_v22, %v3847_v49  ;;  %v1633_v55 = vrot.slane %v1632_v41, 1  ;;  %5577 = vpow2.f32 %v1977_v31  ;;  %v1981_v4 = vmul.f32 1.442695, %v1888_v26 }
 0x2ee   :  { %v4588_v40 = vadd.f32 %v4587_v8, %v4586_v6  ;;  %v10020_v20 = vcombine.high %v10006_v46, %v7155_v1  ;;  %v1889_v37 = vsub.f32 %v7491_v57, %v1627_v25  ;;  %5579 = vpow2.f32 %v1979_v36  ;;  %v7626_v46 = vpop.permute.xlu0 %306  ;;  %v10029_v36 = vld [vmem:[#allocation13_spill] sm:$0xff] }
 0x2ef   :  { %10019 = vst [vmem:[#allocation24_spill] sm:$0xff] %v7609_v7  ;;  %v5050_v47 = vsel %vm1410_vm1, %v7609_v7, -inf  ;;  %v1634_v9 = vmax.f32 %v1632_v41, %v1633_v55  ;;  %5581 = vpow2.f32 %v1981_v4  ;;  %v7624_v11 = vsel %vm1410_vm1, %v10023_v13, 0.0 }
 0x2f0   :  { %v7615_v43 = vrot.slane %v10020_v20, %v9991_v19  ;;  %v4589_v16 = vrot.slane %v4588_v40, 2  ;;  %v5051_v23 = vrot.slane %v5050_v47, 4  ;;  %v1983_v1 = vmul.f32 1.442695, %v1889_v37 }
 0x2f1   :  { %v10024_v60 = vcombine.low %v10022_v5, %v7272_v58  ;;  %v1890_v48 = vsub.f32 %v7494_v39, %v1634_v9  ;;  %vm3164_vm11 = vcmp.eq.f32.partialorder %v7466_v50, 0.0  ;;  %vm3165_vm12 = vcmp.eq.f32.partialorder %v7473_v62, 0.0 }
 0x2f2   :  { %10021 = vst [vmem:[#allocation25_spill] sm:$0xff] %v7615_v43  ;;  %v4590_v61 = vadd.f32 %v4589_v16, %v4588_v40  ;;  %v5052_v10 = vmax.f32 %v5050_v47, %v5051_v23  ;;  %5583 = vpow2.f32 %v1983_v1  ;;  %vm3166_vm13 = vcmp.eq.f32.partialorder %v7476_v63, 0.0 }
 0x2f3   :  { %v7632_v59 = vrot.slane %v10024_v60, %v9991_v19  ;;  %v1985_v14 = vmul.f32 1.442695, %v1890_v48  ;;  %vm3167_vm14 = vcmp.eq.f32.partialorder %v7479_v21, 0.0  ;;  %v7646_v42 = vsel %vm3163_vm10, -inf, %v7459_v32 }
 0x2f4   :  { %v7642_v0 = vpop.eup %5571  ;;  %v4591_v27 = vrot.slane %v4590_v61, 1  ;;  %v5053_v26 = vrot.slane %v5052_v10, 2  ;;  %10026 = vst [vmem:[#allocation22_spill] sm:$0xff] %v7646_v42  ;;  %v7655_v34 = vsel %vm3164_vm11, -inf, %v7466_v50  ;;  %v7658_v38 = vsel %vm3165_vm12, -inf, %v7473_v62 }
 0x2f5   :  { %10025 = vst [vmem:[#allocation12_spill] sm:$0xff] %v7632_v59  ;;  %v7648_v18 = vpop.eup %5573  ;;  %5585 = vpow2.f32 %v1985_v14  ;;  %v2219_v54 = vsel %vm1410_vm1, %v7642_v0, 0.0  ;;  %10027 = vst [vmem:[#allocation26_spill] sm:$0xff] %v7655_v34  ;;  %v7671_v41 = vsel %vm3166_vm13, -inf, %v7476_v63  ;;  %v7676_v8 = vsel %vm3167_vm14, -inf, %v7479_v21 }
 0x2f6   :  { %10028 = vst [vmem:[#allocation27_spill] sm:$0xff] %v7658_v38  ;;  %v7660_v56 = vpop.eup %5575  ;;  %v4592_v44 = vadd.f32 %v4591_v27, %v4590_v61  ;;  %v5054_v33 = vmax.f32 %v5052_v10, %v5053_v26  ;;  %v2220_v52 = vrot.slane %v2219_v54, 4  ;;  %v2226_v17 = vsel %vm1410_vm1, %v7648_v18, 0.0 }
 0x2f7   :  { %v7664_v31 = vpop.eup %5577  ;;  %v2227_v49 = vrot.slane %v2226_v17, 4  ;;  %v2233_v6 = vsel %vm1410_vm1, %v7660_v56, 0.0  ;;  %v7689_v16 = vsel %vm1410_vm1, %v7646_v42, -inf  ;;  %vm3168_vm15 = vcmp.eq.f32.partialorder %v7486_v12, 0.0 }
 0x2f8   :  { %v7678_v25 = vpop.eup %5579  ;;  %v4645_v55 = vrot.slane %v4592_v44, %v10029_v36  ;;  %v5055_v4 = vrot.slane %v5054_v33, 1  ;;  %v2221_v40 = vadd.f32 %v2220_v52, %v2219_v54  ;;  %v2234_v20 = vrot.slane %v2233_v6, 4 }
 0x2f9   :  { %v7681_v37 = vpop.eup %5581  ;;  %v2228_v47 = vadd.f32 %v2227_v49, %v2226_v17  ;;  %v2240_v9 = vsel %vm1410_vm1, %v7664_v31, 0.0  ;;  %v2247_v13 = vsel %vm1410_vm1, %v7678_v25, 0.0  ;;  %vm3169_vm0 = vcmp.eq.f32.partialorder %v7491_v57, 0.0 }
 0x2fa   :  { %5587 = vrcp.f32 %v4645_v55  ;;  %v5056_v23 = vmax.f32 %v5054_v33, %v5055_v4  ;;  %v2222_v1 = vrot.slane %v2221_v40, 2  ;;  %v2235_v60 = vadd.f32 %v2234_v20, %v2233_v6 }
 0x2fb   :  { %v2229_v48 = vrot.slane %v2228_v47, 2  ;;  %v2241_v61 = vrot.slane %v2240_v9, 4  ;;  %v2248_v10 = vrot.slane %v2247_v13, 4  ;;  %v2254_v14 = vsel %vm1410_vm1, %v7681_v37, 0.0 }
 0x2fc   :  { %v7693_v27 = vpop.eup %5583  ;;  %v5106_v26 = vsub.f32 %v7609_v7, %v5056_v23  ;;  %v2223_v54 = vadd.f32 %v2222_v1, %v2221_v40  ;;  %v2236_v44 = vrot.slane %v2235_v60, 2  ;;  %v2255_v52 = vrot.slane %v2254_v14, 4 }
 0x2fd   :  { %10030 = vst [vmem:[#allocation28_spill] sm:$0xff] %v7693_v27  ;;  %v2230_v17 = vadd.f32 %v2229_v48, %v2228_v47  ;;  %v2242_v49 = vadd.f32 %v2241_v61, %v2240_v9  ;;  %v2249_v45 = vadd.f32 %v2248_v10, %v2247_v13  ;;  %v2261_v33 = vsel %vm1410_vm1, %v7693_v27, 0.0 }
 0x2fe   :  { %v5114_v6 = vmul.f32 1.442695, %v5106_v26  ;;  %v2224_v55 = vrot.slane %v2223_v54, 1  ;;  %v2237_v4 = vadd.f32 %v2236_v44, %v2235_v60  ;;  %v2256_v20 = vadd.f32 %v2255_v52, %v2254_v14 }
 0x2ff   :  { %v7698_v22 = vpop.eup %5585  ;;  %v2231_v28 = vrot.slane %v2230_v17, 1  ;;  %v2243_v36 = vrot.slane %v2242_v49, 2  ;;  %v2250_v59 = vrot.slane %v2249_v45, 2  ;;  %v2262_v43 = vrot.slane %v2261_v33, 4 }
 0x300   :  { %10031 = vst [vmem:[#allocation29_spill] sm:$0xff] %v7698_v22  ;;  %5589 = vpow2.f32 %v5114_v6  ;;  %v2225_v40 = vadd.f32 %v2224_v55, %v2223_v54  ;;  %v2238_v23 = vrot.slane %v2237_v4, 1  ;;  %v2257_v1 = vrot.slane %v2256_v20, 2  ;;  %v10032_v55 = vld [vmem:[#allocation14_spill] sm:$0xff] }
 0x301   :  { %v2232_v47 = vadd.f32 %v2231_v28, %v2230_v17  ;;  %v2244_v9 = vadd.f32 %v2243_v36, %v2242_v49  ;;  %v2251_v13 = vadd.f32 %v2250_v59, %v2249_v45  ;;  %v2263_v48 = vadd.f32 %v2262_v43, %v2261_v33 }
 0x302   :  { %v2239_v61 = vadd.f32 %v2238_v23, %v2237_v4  ;;  %v2258_v10 = vadd.f32 %v2257_v1, %v2256_v20  ;;  %v2268_v60 = vsel %vm1410_vm1, %v7698_v22, 0.0  ;;  %5591 = vrcp.f32 %v2225_v40  ;;  %v10033_v20 = vld [vmem:[#allocation8_spill] sm:$0xff]  ;;  %v10034_v23 = vld [vmem:[#allocation15_spill] sm:$0xff]  ;;  %v10035_v1 = vld [vmem:[#allocation17_spill] sm:$0xff] }
 0x303   :  { %v2245_v14 = vrot.slane %v2244_v9, 1  ;;  %v2252_v26 = vrot.slane %v2251_v13, 1  ;;  %v2264_v44 = vrot.slane %v2263_v48, 2  ;;  %v2269_v52 = vrot.slane %v2268_v60, 4  ;;  %v10039_v22 = vld [vmem:[#allocation21_spill] sm:$0xff] }
 0x304   :  { %v5588_v42 = vpop.eup %5587  ;;  %v2259_v7 = vrot.slane %v2258_v10, 1  ;;  %5593 = vrcp.f32 %v2232_v47  ;;  %v7704_v54 = vsel %vm1410_vm1, %v7655_v34, -inf  ;;  %v7708_v43 = vsel %vm1410_vm1, %v7658_v38, -inf  ;;  %v10036_v47 = vld [vmem:[#allocation18_spill] sm:$0xff]  ;;  %v10037_v38 = vld [vmem:[#allocation19_spill] sm:$0xff]  ;;  %v10038_v34 = vld [vmem:[#allocation20_spill] sm:$0xff] }
 0x305   :  { %v4675_v59 = vmul.f32 %v5588_v42, %v7536_v30  ;;  %v4676_v28 = vmul.f32 %v5588_v42, %v7542_v24  ;;  %v4677_v45 = vmul.f32 %v5588_v42, %v7548_v3  ;;  %v4678_v36 = vmul.f32 %v5588_v42, %v7554_v2 }
 0x306   :  { %v4679_v17 = vmul.f32 %v5588_v42, %v7560_v29  ;;  %v4680_v49 = vmul.f32 %v5588_v42, %v7566_v15  ;;  %v4681_v33 = vmul.f32 %v5588_v42, %v7571_v35  ;;  %v4682_v6 = vmul.f32 %v5588_v42, %v7577_v53 }
 0x307   :  { %v4746_v4 = vmul.f32 %v4675_v59, %v10032_v55  ;;  %v4747_v40 = vmul.f32 %v4676_v28, %v10033_v20  ;;  %v4748_v30 = vmul.f32 %v4677_v45, %v10034_v23  ;;  %v4749_v24 = vmul.f32 %v4678_v36, %v10035_v1 }
 0x308   :  { %v4750_v3 = vmul.f32 %v4679_v17, %v10036_v47  ;;  %v4751_v2 = vmul.f32 %v4680_v49, %v10037_v38  ;;  %v4752_v29 = vmul.f32 %v4681_v33, %v10038_v34  ;;  %v4753_v15 = vmul.f32 %v4682_v6, %v10039_v22 }
 0x309   :  { %v4874_v21 = vrot.slane %v4747_v40, 7  ;;  %v4876_v35 = vrot.slane %v4748_v30, 6  ;;  %v4878_v27 = vrot.slane %v4749_v24, 5  ;;  %v2246_v53 = vadd.f32 %v2245_v14, %v2244_v9 }
 0x30a   :  { %v7726_v42 = vpop.eup %5589  ;;  %v4880_v59 = vrot.slane %v4750_v3, 4  ;;  %v4882_v28 = vrot.slane %v4751_v2, 3  ;;  %v4884_v55 = vrot.slane %v4752_v29, 2  ;;  %v4886_v45 = vrot.slane %v4753_v15, 1 }
 0x30b   :  { %v4875_v36 = vsel %vm4460_vm3, %v4874_v21, %v4746_v4  ;;  %v5130_v38 = vsel %vm1410_vm1, %v7726_v42, 0.0  ;;  %v2253_v34 = vadd.f32 %v2252_v26, %v2251_v13  ;;  %v2260_v17 = vadd.f32 %v2259_v7, %v2258_v10 }
 0x30c   :  { %v5592_v22 = vpop.eup %5591  ;;  %v4877_v49 = vsel %vm4463_vm4, %v4876_v35, %v4875_v36  ;;  %v5131_v33 = vrot.slane %v5130_v38, 4  ;;  %v2265_v9 = vadd.f32 %v2264_v44, %v2263_v48  ;;  %v2270_v14 = vadd.f32 %v2269_v52, %v2268_v60 }
 0x30d   :  { %v4879_v6 = vsel %vm4466_vm5, %v4878_v27, %v4877_v49  ;;  %5595 = vrcp.f32 %v2239_v61  ;;  %v2587_v20 = vmul.f32 %v5592_v22, %v7642_v0  ;;  %v3314_v21 = vmax.f32 %v7689_v16, %v7704_v54 }
 0x30e   :  { %v5594_v4 = vpop.eup %5593  ;;  %v4881_v13 = vsel %vm4469_vm6, %v4880_v59, %v4879_v6  ;;  %v5132_v7 = vadd.f32 %v5131_v33, %v5130_v38  ;;  %v2266_v10 = vrot.slane %v2265_v9, 1  ;;  %v2271_v26 = vrot.slane %v2270_v14, 2 }
 0x30f   :  { %v4883_v40 = vsel %vm4472_vm7, %v4882_v28, %v4881_v13  ;;  %5597 = vrcp.f32 %v2246_v53  ;;  %v2588_v48 = vmul.f32 %v5594_v4, %v7648_v18  ;;  %v2651_v60 = vmul.f32 %v2587_v20, %v7459_v32 }
 0x310   :  { %vm3170_vm2 = vcmp.eq.f32.partialorder %v7494_v39, 0.0  ;;  %v4885_v0 = vsel %vm4475_vm8, %v4884_v55, %v4883_v40  ;;  %v5133_v27 = vrot.slane %v5132_v7, 2  ;;  %v2267_v61 = vadd.f32 %v2266_v10, %v2265_v9 }
 0x311   :  { %v2272_v16 = vadd.f32 %v2271_v26, %v2270_v14  ;;  %v4887_v44 = vsel %vm4478_vm9, %v4886_v45, %v4885_v0  ;;  %5599 = vrcp.f32 %v2253_v34  ;;  %v2652_v52 = vmul.f32 %v2588_v48, %v7466_v50 }
 0x312   :  { %v2859_v54 = vsel %vm1410_vm1, %v2651_v60, 0.0  ;;  %v4994_v23 = vsel %vm1410_vm1, %v4887_v44, 0.0  ;;  %v5134_v30 = vadd.f32 %v5133_v27, %v5132_v7  ;;  %5601 = vrcp.f32 %v2260_v17  ;;  %v10042_v60 = vld [vmem:[#allocation9_spill] sm:$0xff] }
 0x313   :  { %v2273_v18 = vrot.slane %v2272_v16, 1  ;;  %v4995_v1 = vrot.slane %v4994_v23, 4  ;;  %5603 = vrcp.f32 %v2267_v61  ;;  %v2860_v24 = vrot.slane %v2859_v54, 4 }
 0x314   :  { %v2866_v47 = vsel %vm1410_vm1, %v2652_v52, 0.0  ;;  %v5135_v3 = vrot.slane %v5134_v30, 1  ;;  %v3316_v15 = vmax.f32 %v3314_v21, %v7708_v43  ;;  %v7753_v59 = vsel %vm3168_vm15, -inf, %v7486_v12 }
 0x315   :  { %v2274_v2 = vadd.f32 %v2273_v18, %v2272_v16  ;;  %v2867_v29 = vrot.slane %v2866_v47, 4  ;;  %v4996_v35 = vadd.f32 %v4995_v1, %v4994_v23  ;;  %v2861_v53 = vadd.f32 %v2860_v24, %v2859_v54  ;;  %v10044_v24 = vld [vmem:[#allocation28_spill] sm:$0xff] }
 0x316   :  { %v3317_v28 = vsel %vm1410_vm1, %v7671_v41, -inf  ;;  %v5136_v55 = vadd.f32 %v5135_v3, %v5134_v30  ;;  %v7760_v43 = vsel %vm3169_vm0, -inf, %v7491_v57  ;;  %v3319_v22 = vsel %vm1410_vm1, %v7676_v8, -inf }
 0x317   :  { %5605 = vrcp.f32 %v2274_v2  ;;  %v2868_v45 = vadd.f32 %v2867_v29, %v2866_v47  ;;  %v3318_v36 = vmax.f32 %v3316_v15, %v3317_v28  ;;  %v5596_v38 = vpop.eup %5595  ;;  %v4997_v34 = vrot.slane %v4996_v35, 2 }
 0x318   :  { %v2862_v17 = vrot.slane %v2861_v53, 2  ;;  %5607 = vrcp.f32 %v5136_v55  ;;  %v2589_v49 = vmul.f32 %v5596_v38, %v7660_v56  ;;  %v10040_v6 = vrot.slane %v7624_v11, 4  ;;  %v10047_v38 = vld [vmem:[#allocation29_spill] sm:$0xff] }
 0x319   :  { %v2869_v33 = vrot.slane %v2868_v45, 2  ;;  %v3320_v9 = vmax.f32 %v3318_v36, %v3319_v22  ;;  %v5598_v14 = vpop.eup %5597  ;;  %v10041_v21 = vcombine.high %v10022_v5, %v7272_v58  ;;  %v915_v7 = vcombine.high %v7606_v51, %v7626_v46 }
 0x31a   :  { %v7768_v20 = vadd.f32 %v10040_v6, %v7624_v11  ;;  %v2863_v13 = vadd.f32 %v2862_v17, %v2861_v53  ;;  %v2590_v56 = vmul.f32 %v5598_v14, %v7664_v31  ;;  %v2653_v10 = vmul.f32 %v2589_v49, %v7473_v62 }
 0x31b   :  { %v7774_v4 = vrot.slane %v10041_v21, %v9991_v19  ;;  %v7783_v26 = vsel %vm3170_vm2, -inf, %v7494_v39  ;;  %v3321_v11 = vsel %vm1410_vm1, %v7753_v59, -inf  ;;  %v5600_v40 = vpop.eup %5599  ;;  %v7787_v58 = vadd.f32 %v4997_v34, %v4996_v35 }
 0x31c   :  { %v3322_v5 = vmax.f32 %v3320_v9, %v3321_v11  ;;  %v3323_v48 = vsel %vm1410_vm1, %v7760_v43, -inf  ;;  %v10043_v31 = vcombine.low %v7606_v51, %v7626_v46  ;;  %v5602_v27 = vpop.eup %5601  ;;  %v2591_v61 = vmul.f32 %v5600_v40, %v7678_v25  ;;  %v10045_v46 = vld [vmem:[#allocation23_spill] sm:$0xff] }
 0x31d   :  { %v2654_v16 = vmul.f32 %v2590_v56, %v7476_v63  ;;  %v2870_v44 = vadd.f32 %v2869_v33, %v2868_v45  ;;  %v2873_v52 = vsel %vm1410_vm1, %v2653_v10, 0.0  ;;  %v5604_v54 = vpop.eup %5603  ;;  %v2592_v23 = vmul.f32 %v5602_v27, %v7681_v37  ;;  %v10046_v45 = vld [vmem:[#allocation16_spill] sm:$0xff] }
 0x31e   :  { %v7795_v0 = vrot.slane %v10043_v31, %v10042_v60  ;;  %v2864_v30 = vrot.slane %v2863_v13, 1  ;;  %v2874_v18 = vrot.slane %v2873_v52, 4  ;;  %v3325_v1 = vsel %vm1410_vm1, %v7783_v26, -inf  ;;  %v10050_v27 = vld [vmem:[#allocation24_spill] sm:$0xff] }
 0x31f   :  { %v2593_v51 = vmul.f32 %v5604_v54, %v10044_v24  ;;  %v2655_v47 = vmul.f32 %v2591_v61, %v10045_v46  ;;  %v2880_v3 = vsel %vm1410_vm1, %v2654_v16, 0.0  ;;  %v7807_v25 = vrot.slane %v915_v7, %v10042_v60 }
 0x320   :  { %v2656_v2 = vmul.f32 %v2592_v23, %v7486_v12  ;;  %v2875_v29 = vadd.f32 %v2874_v18, %v2873_v52  ;;  %v2881_v15 = vrot.slane %v2880_v3, 4  ;;  %v3324_v35 = vmax.f32 %v3322_v5, %v3323_v48 }
 0x321   :  { %v5606_v37 = vpop.eup %5605  ;;  %v2657_v53 = vmul.f32 %v2593_v51, %v7491_v57  ;;  %v2871_v28 = vrot.slane %v2870_v44, 1  ;;  %v2887_v55 = vsel %vm1410_vm1, %v2655_v47, 0.0  ;;  %v962_v36 = vcombine.low %v10046_v45, %v7795_v0 }
 0x322   :  { %v2594_v34 = vmul.f32 %v5606_v37, %v10047_v38  ;;  %v2876_v17 = vrot.slane %v2875_v29, 2  ;;  %v2882_v22 = vadd.f32 %v2881_v15, %v2880_v3  ;;  %v2888_v49 = vrot.slane %v2887_v55, 4  ;;  %v5608_v33 = vpop.eup %5607  ;;  %v10054_v37 = vld [vmem:[#allocation26_spill] sm:$0xff] }
 0x323   :  { %v7815_v9 = vadd.f32 %v2864_v30, %v2863_v13  ;;  %v2894_v14 = vsel %vm1410_vm1, %v2656_v2, 0.0  ;;  %v2901_v6 = vsel %vm1410_vm1, %v2657_v53, 0.0  ;;  %v7819_v21 = vmax.f32 %v3324_v35, %v3325_v1 }
 0x324   :  { %v5187_v7 = vmul.f32 %v5608_v33, %v7726_v42  ;;  %v2658_v56 = vmul.f32 %v2594_v34, %v7494_v39  ;;  %v2877_v10 = vadd.f32 %v2876_v17, %v2875_v29  ;;  %v2883_v11 = vrot.slane %v2882_v22, 2 }
 0x325   :  { %10048 = vst [vmem:[#allocation14_spill] sm:$0xff] %v7815_v9  ;;  %v7823_v40 = vadd.f32 %v2871_v28, %v2870_v44  ;;  %v2889_v5 = vadd.f32 %v2888_v49, %v2887_v55  ;;  %v2895_v48 = vrot.slane %v2894_v14, 4  ;;  %v2902_v31 = vrot.slane %v2901_v6, 4  ;;  %v10052_v44 = vld [vmem:[#allocation22_spill] sm:$0xff]  ;;  %v10055_v28 = vld [vmem:[#allocation27_spill] sm:$0xff] }
 0x326   :  { %v5202_v13 = vmul.f32 %v5187_v7, %v10050_v27  ;;  %v2878_v61 = vrot.slane %v2877_v10, 1  ;;  %v2884_v16 = vadd.f32 %v2883_v11, %v2882_v22  ;;  %v2908_v52 = vsel %vm1410_vm1, %v2658_v56, 0.0 }
 0x327   :  { %10049 = vst [vmem:[#allocation8_spill] sm:$0xff] %v7823_v40  ;;  %v2890_v54 = vrot.slane %v2889_v5, 2  ;;  %v2896_v23 = vadd.f32 %v2895_v48, %v2894_v14  ;;  %v2903_v30 = vadd.f32 %v2902_v31, %v2901_v6  ;;  %v2909_v18 = vrot.slane %v2908_v52, 4 }
 0x328   :  { %v5210_v42 = vsel %vm1410_vm1, %v5202_v13, 0.0  ;;  %v7828_v1 = vadd.f32 %v2878_v61, %v2877_v10  ;;  %v2885_v24 = vrot.slane %v2884_v16, 1  ;;  %v3411_v51 = vsub.f32 %v10052_v44, %v7819_v21 }
 0x329   :  { %v5211_v47 = vrot.slane %v5210_v42, 4  ;;  %v2891_v3 = vadd.f32 %v2890_v54, %v2889_v5  ;;  %v2897_v2 = vrot.slane %v2896_v23, 2  ;;  %v2904_v29 = vrot.slane %v2903_v30, 2 }
 0x32a   :  { %10051 = vst [vmem:[#allocation15_spill] sm:$0xff] %v7828_v1  ;;  %vm3979_vm10 = vcmp.eq.f32.partialorder %v7815_v9, 0.0  ;;  %v7833_v15 = vadd.f32 %v2885_v24, %v2884_v16  ;;  %v2910_v35 = vadd.f32 %v2909_v18, %v2908_v52  ;;  %v3412_v53 = vsub.f32 %v10054_v37, %v7819_v21 }
 0x32b   :  { %v3413_v55 = vsub.f32 %v10055_v28, %v7819_v21  ;;  %v5212_v38 = vadd.f32 %v5211_v47, %v5210_v42  ;;  %v2892_v34 = vrot.slane %v2891_v3, 1  ;;  %v2898_v17 = vadd.f32 %v2897_v2, %v2896_v23 }
 0x32c   :  { %10053 = vst [vmem:[#allocation17_spill] sm:$0xff] %v7833_v15  ;;  %v2905_v22 = vadd.f32 %v2904_v29, %v2903_v30  ;;  %v2911_v49 = vrot.slane %v2910_v35, 2  ;;  %v3414_v33 = vsub.f32 %v7671_v41, %v7819_v21  ;;  %v3415_v14 = vsub.f32 %v7676_v8, %v7819_v21 }
 0x32d   :  { %v3416_v6 = vsub.f32 %v7753_v59, %v7819_v21  ;;  %v5213_v7 = vrot.slane %v5212_v38, 2  ;;  %v2899_v56 = vrot.slane %v2898_v17, 1  ;;  %v3417_v11 = vsub.f32 %v7760_v43, %v7819_v21 }
 0x32e   :  { %v2906_v10 = vrot.slane %v2905_v22, 1  ;;  %v7847_v5 = vadd.f32 %v2892_v34, %v2891_v3  ;;  %v2912_v48 = vadd.f32 %v2911_v49, %v2910_v35  ;;  %v3499_v31 = vmul.f32 1.442695, %v3411_v51 }
 0x32f   :  { %v3501_v27 = vmul.f32 1.442695, %v3412_v53  ;;  %v7849_v13 = vadd.f32 %v2899_v56, %v2898_v17  ;;  %v3418_v8 = vsub.f32 %v7783_v26, %v7819_v21  ;;  %v3503_v61 = vmul.f32 1.442695, %v3413_v55 }
 0x330   :  { %10056 = vst [vmem:[#allocation18_spill] sm:$0xff] %v7847_v5  ;;  %v7851_v41 = vadd.f32 %v2906_v10, %v2905_v22  ;;  %v2913_v59 = vrot.slane %v2912_v48, 1  ;;  %5609 = vpow2.f32 %v3499_v31  ;;  %v3505_v16 = vmul.f32 1.442695, %v3414_v33 }
 0x331   :  { %10057 = vst [vmem:[#allocation19_spill] sm:$0xff] %v7849_v13  ;;  %v3507_v52 = vmul.f32 1.442695, %v3415_v14  ;;  %v7855_v54 = vadd.f32 %v5213_v7, %v5212_v38  ;;  %5611 = vpow2.f32 %v3501_v27  ;;  %v3509_v43 = vmul.f32 1.442695, %v3416_v6  ;;  %v10060_v14 = vld [vmem:[#allocation3_spill] sm:$0xff] }
 0x332   :  { %10058 = vst [vmem:[#allocation20_spill] sm:$0xff] %v7851_v41  ;;  %vm3980_vm11 = vcmp.eq.f32.partialorder %v7823_v40, 0.0  ;;  %v7858_v23 = vadd.f32 %v2913_v59, %v2912_v48  ;;  %5613 = vpow2.f32 %v3503_v61  ;;  %v3511_v30 = vmul.f32 1.442695, %v3417_v11  ;;  %v10061_v27 = vld [vmem:[#allocation4_spill] sm:$0xff] }
 0x333   :  { %vm3981_vm12 = vcmp.eq.f32.partialorder %v7828_v1, 0.0  ;;  %5615 = vpow2.f32 %v3505_v16  ;;  %v3513_v18 = vmul.f32 1.442695, %v3418_v8  ;;  %vm3982_vm13 = vcmp.eq.f32.partialorder %v7833_v15, 0.0 }
 0x334   :  { %10059 = vst [vmem:[#allocation21_spill] sm:$0xff] %v7858_v23  ;;  %vm3983_vm14 = vcmp.eq.f32.partialorder %v7847_v5, 0.0  ;;  %5617 = vpow2.f32 %v3507_v52  ;;  %vm3984_vm15 = vcmp.eq.f32.partialorder %v7849_v13, 0.0  ;;  %vm3985_vm0 = vcmp.eq.f32.partialorder %v7851_v41, 0.0 }
 0x335   :  { %v7868_v26 = vsel %vm3979_vm10, -inf, %v7815_v9  ;;  %5619 = vpow2.f32 %v3509_v43  ;;  %vm3986_vm2 = vcmp.eq.f32.partialorder %v7858_v23, 0.0  ;;  %v7872_v21 = vsel %vm3980_vm11, -inf, %v7823_v40 }
 0x336   :  { %v7875_v42 = vsel %vm3981_vm12, -inf, %v7828_v1  ;;  %5621 = vpow2.f32 %v3511_v30  ;;  %v7878_v24 = vsel %vm3982_vm13, -inf, %v7833_v15  ;;  %v7881_v44 = vsel %vm3983_vm14, -inf, %v7847_v5 }
 0x337   :  { %v7884_v51 = vsel %vm3984_vm15, -inf, %v7849_v13  ;;  %5623 = vpow2.f32 %v3513_v18  ;;  %v7889_v2 = vsel %vm3985_vm0, -inf, %v7851_v41  ;;  %v7892_v29 = vsel %vm3986_vm2, -inf, %v7858_v23 }
 0x338   :  { %v4128_v35 = vsel %vm1410_vm1, %v7868_v26, -inf  ;;  %v4129_v37 = vsel %vm1410_vm1, %v7872_v21, -inf  ;;  %v4131_v53 = vsel %vm1410_vm1, %v7875_v42, -inf  ;;  %v4133_v55 = vsel %vm1410_vm1, %v7878_v24, -inf }
 0x339   :  { %v4130_v28 = vmax.f32 %v4128_v35, %v4129_v37  ;;  %v4135_v38 = vsel %vm1410_vm1, %v7881_v44, -inf  ;;  %v4137_v34 = vsel %vm1410_vm1, %v7884_v51, -inf  ;;  %v4139_v22 = vsel %vm1410_vm1, %v7889_v2, -inf  ;;  %v10062_v35 = vld [vmem:[#allocation25_spill] sm:$0xff] }
 0x33a   :  { %v7906_v17 = vpop.eup %5609  ;;  %v963_v49 = vcombine.high %v10046_v45, %v7795_v0  ;;  %v970_v33 = vrot.slane %v962_v36, %v9991_v19  ;;  %v978_v6 = vcombine.low %v10060_v14, %v7807_v25  ;;  %v4141_v11 = vsel %vm1410_vm1, %v7892_v29, -inf }
 0x33b   :  { %v7918_v7 = vpop.eup %5611  ;;  %v3624_v56 = vsel %vm1410_vm1, %v7906_v17, 0.0  ;;  %v4132_v10 = vmax.f32 %v4130_v28, %v4131_v53  ;;  %v979_v48 = vcombine.high %v10060_v14, %v7807_v25 }
 0x33c   :  { %v7926_v31 = vpop.eup %5613  ;;  %v3625_v0 = vsel %vm1410_vm1, %v7918_v7, 0.0  ;;  %v977_v45 = vrot.slane %v963_v49, %v9991_v19  ;;  %v986_v36 = vrot.slane %v978_v6, %v9991_v19  ;;  %v7933_v8 = vcombine.low %v10061_v27, %v970_v33  ;;  %v10063_v6 = vld [vmem:[#allocation12_spill] sm:$0xff] }
 0x33d   :  { %v7935_v61 = vpop.eup %5615  ;;  %v3626_v59 = vadd.f32 %v3625_v0, %v3624_v56  ;;  %v3627_v16 = vsel %vm1410_vm1, %v7926_v31, 0.0  ;;  %v4134_v52 = vmax.f32 %v4132_v10, %v4133_v55  ;;  %v993_v25 = vrot.slane %v979_v48, %v9991_v19 }
 0x33e   :  { %v7940_v43 = vpop.eup %5617  ;;  %v3629_v30 = vsel %vm1410_vm1, %v7935_v61, 0.0  ;;  %v7945_v18 = vcombine.high %v10061_v27, %v970_v33  ;;  %v7948_v37 = vcombine.low %v10062_v35, %v977_v45  ;;  %v7951_v53 = vcombine.high %v10062_v35, %v977_v45 }
 0x33f   :  { %v7953_v28 = vpop.eup %5619  ;;  %v3628_v49 = vadd.f32 %v3627_v16, %v3626_v59  ;;  %v3631_v55 = vsel %vm1410_vm1, %v7940_v43, 0.0  ;;  %v4136_v14 = vmax.f32 %v4134_v52, %v4135_v38  ;;  %v7958_v56 = vcombine.low %v10063_v6, %v986_v36 }
 0x340   :  { %v7960_v10 = vpop.eup %5621  ;;  %v3633_v33 = vsel %vm1410_vm1, %v7953_v28, 0.0  ;;  %v7965_v48 = vcombine.high %v10063_v6, %v986_v36  ;;  %v7968_v0 = vcombine.low %v7774_v4, %v993_v25  ;;  %v7971_v45 = vcombine.high %v7774_v4, %v993_v25 }
 0x341   :  { %v7973_v27 = vpop.eup %5623  ;;  %v3630_v38 = vadd.f32 %v3629_v30, %v3628_v49  ;;  %v3635_v59 = vsel %vm1410_vm1, %v7960_v10, 0.0  ;;  %v4138_v16 = vmax.f32 %v4136_v14, %v4137_v34  ;;  %v1635_v52 = vsel %vm1410_vm1, %v7933_v8, -inf }
 0x342   :  { %v3637_v36 = vsel %vm1410_vm1, %v7973_v27, 0.0  ;;  %v1636_v35 = vrot.slane %v1635_v52, 4  ;;  %v1642_v6 = vsel %vm1410_vm1, %v7945_v18, -inf  ;;  %v1649_v4 = vsel %vm1410_vm1, %v7948_v37, -inf }
 0x343   :  { %v3632_v25 = vadd.f32 %v3631_v55, %v3630_v38  ;;  %v4140_v3 = vmax.f32 %v4138_v16, %v4139_v22  ;;  %v1643_v30 = vrot.slane %v1642_v6, 4  ;;  %v1650_v49 = vrot.slane %v1649_v4, 4 }
 0x344   :  { %v1637_v47 = vmax.f32 %v1635_v52, %v1636_v35  ;;  %v1656_v34 = vsel %vm1410_vm1, %v7951_v53, -inf  ;;  %v1663_v14 = vsel %vm1410_vm1, %v7958_v56, -inf  ;;  %v1670_v19 = vsel %vm1410_vm1, %v7965_v48, -inf }
 0x345   :  { %v3634_v60 = vadd.f32 %v3633_v33, %v3632_v25  ;;  %v4142_v23 = vmax.f32 %v4140_v3, %v4141_v11  ;;  %v1644_v41 = vmax.f32 %v1642_v6, %v1643_v30  ;;  %v1651_v13 = vmax.f32 %v1649_v4, %v1650_v49 }
 0x346   :  { %v1638_v5 = vrot.slane %v1637_v47, 2  ;;  %v1657_v15 = vrot.slane %v1656_v34, 4  ;;  %v1664_v55 = vrot.slane %v1663_v14, 4  ;;  %v1671_v22 = vrot.slane %v1670_v19, 4 }
 0x347   :  { %v3636_v38 = vadd.f32 %v3635_v59, %v3634_v60  ;;  %v4227_v16 = vsub.f32 %v7868_v26, %v4142_v23  ;;  %v4228_v52 = vsub.f32 %v7872_v21, %v4142_v23  ;;  %v4229_v35 = vsub.f32 %v7875_v42, %v4142_v23 }
 0x348   :  { %v4230_v1 = vsub.f32 %v7878_v24, %v4142_v23  ;;  %v4231_v40 = vsub.f32 %v7881_v44, %v4142_v23  ;;  %v4232_v33 = vsub.f32 %v7884_v51, %v4142_v23  ;;  %v4233_v3 = vsub.f32 %v7889_v2, %v4142_v23 }
 0x349   :  { %v3638_v11 = vadd.f32 %v3637_v36, %v3636_v38  ;;  %v4234_v6 = vsub.f32 %v7892_v29, %v4142_v23  ;;  %v4315_v4 = vmul.f32 1.442695, %v4227_v16  ;;  %v4317_v25 = vmul.f32 1.442695, %v4228_v52 }
 0x34a   :  { %v4319_v60 = vmul.f32 1.442695, %v4229_v35  ;;  %v4321_v59 = vmul.f32 1.442695, %v4230_v1  ;;  %v4323_v26 = vmul.f32 1.442695, %v4231_v40  ;;  %v1639_v30 = vmax.f32 %v1637_v47, %v1638_v5 }
 0x34b   :  { %5625 = vrcp.f32 %v3638_v11  ;;  %v4325_v21 = vmul.f32 1.442695, %v4232_v33  ;;  %v4327_v42 = vmul.f32 1.442695, %v4233_v3  ;;  %v4329_v49 = vmul.f32 1.442695, %v4234_v6 }
 0x34c   :  { %5627 = vpow2.f32 %v4315_v4  ;;  %v1640_v24 = vrot.slane %v1639_v30, 1  ;;  %v1645_v44 = vrot.slane %v1644_v41, 2  ;;  %v1652_v9 = vrot.slane %v1651_v13, 2 }
 0x34d   :  { %5629 = vpow2.f32 %v4317_v25  ;;  %v1658_v51 = vmax.f32 %v1656_v34, %v1657_v15  ;;  %v1665_v2 = vmax.f32 %v1663_v14, %v1664_v55  ;;  %v1672_v36 = vmax.f32 %v1670_v19, %v1671_v22 }
 0x34e   :  { %5631 = vpow2.f32 %v4319_v60  ;;  %v7999_v23 = vmax.f32 %v1639_v30, %v1640_v24  ;;  %v1646_v29 = vmax.f32 %v1644_v41, %v1645_v44  ;;  %v1653_v38 = vmax.f32 %v1651_v13, %v1652_v9 }
 0x34f   :  { %5633 = vpow2.f32 %v4321_v59  ;;  %v1659_v40 = vrot.slane %v1658_v51, 2  ;;  %v1666_v1 = vrot.slane %v1665_v2, 2  ;;  %v1673_v5 = vrot.slane %v1672_v36, 2 }
 0x350   :  { %5635 = vpow2.f32 %v4323_v26  ;;  %v1647_v47 = vrot.slane %v1646_v29, 1  ;;  %v1654_v16 = vrot.slane %v1653_v38, 1  ;;  %v1677_v52 = vsel %vm1410_vm1, %v7968_v0, -inf }
 0x351   :  { %5637 = vpow2.f32 %v4325_v21  ;;  %v1660_v35 = vmax.f32 %v1658_v51, %v1659_v40  ;;  %v1667_v15 = vmax.f32 %v1665_v2, %v1666_v1  ;;  %v1674_v34 = vmax.f32 %v1672_v36, %v1673_v5 }
 0x352   :  { %5639 = vpow2.f32 %v4327_v42  ;;  %v8003_v19 = vmax.f32 %v1646_v29, %v1647_v47  ;;  %v8005_v14 = vmax.f32 %v1653_v38, %v1654_v16  ;;  %v1678_v9 = vrot.slane %v1677_v52, 4 }
 0x353   :  { %5641 = vpow2.f32 %v4329_v49  ;;  %v1661_v13 = vrot.slane %v1660_v35, 1  ;;  %v1668_v41 = vrot.slane %v1667_v15, 1  ;;  %v1675_v55 = vrot.slane %v1674_v34, 1 }
 0x354   :  { %v1679_v22 = vmax.f32 %v1677_v52, %v1678_v9  ;;  %v1684_v33 = vsel %vm1410_vm1, %v7971_v45, -inf  ;;  %v1891_v3 = vsub.f32 %v7933_v8, %v7999_v23  ;;  %v1892_v11 = vsub.f32 %v7945_v18, %v8003_v19 }
 0x355   :  { %v5626_v6 = vpop.eup %5625  ;;  %v8013_v4 = vmax.f32 %v1660_v35, %v1661_v13  ;;  %v8015_v25 = vmax.f32 %v1667_v15, %v1668_v41  ;;  %v8017_v60 = vmax.f32 %v1674_v34, %v1675_v55  ;;  %v1685_v59 = vrot.slane %v1684_v33, 4 }
 0x356   :  { %v8019_v26 = vpop.eup %5627  ;;  %v3731_v30 = vmul.f32 %v5626_v6, %v7906_v17  ;;  %v3732_v21 = vmul.f32 %v5626_v6, %v7918_v7  ;;  %v3733_v42 = vmul.f32 %v5626_v6, %v7926_v31  ;;  %v3734_v49 = vmul.f32 %v5626_v6, %v7935_v61 }
 0x357   :  { %v8025_v24 = vpop.eup %5629  ;;  %v3735_v44 = vmul.f32 %v5626_v6, %v7940_v43  ;;  %v3736_v51 = vmul.f32 %v5626_v6, %v7953_v28  ;;  %v3737_v2 = vmul.f32 %v5626_v6, %v7960_v10  ;;  %v3738_v36 = vmul.f32 %v5626_v6, %v7973_v27 }
 0x358   :  { %v8031_v23 = vpop.eup %5631  ;;  %v3795_v17 = vmul.f32 %v3731_v30, %v7459_v32  ;;  %v3796_v7 = vmul.f32 %v3732_v21, %v7466_v50  ;;  %v3797_v31 = vmul.f32 %v3733_v42, %v7473_v62  ;;  %v3798_v61 = vmul.f32 %v3734_v49, %v7476_v63 }
 0x359   :  { %v8037_v29 = vpop.eup %5633  ;;  %v3799_v43 = vmul.f32 %v3735_v44, %v10045_v46  ;;  %v3800_v28 = vmul.f32 %v3736_v51, %v7486_v12  ;;  %v3801_v10 = vmul.f32 %v3737_v2, %v7491_v57  ;;  %v3802_v27 = vmul.f32 %v3738_v36, %v7494_v39 }
 0x35a   :  { %v8043_v38 = vpop.eup %5635  ;;  %v3880_v32 = vsel %vm1410_vm1, %v3795_v17, 0.0  ;;  %v3881_v50 = vsel %vm1410_vm1, %v3796_v7, 0.0  ;;  %v3883_v62 = vsel %vm1410_vm1, %v3797_v31, 0.0  ;;  %v3885_v63 = vsel %vm1410_vm1, %v3798_v61, 0.0 }
 0x35b   :  { %v8049_v40 = vpop.eup %5637  ;;  %v3882_v1 = vadd.f32 %v3881_v50, %v3880_v32  ;;  %v3887_v46 = vsel %vm1410_vm1, %v3799_v43, 0.0  ;;  %v3889_v12 = vsel %vm1410_vm1, %v3800_v28, 0.0  ;;  %v3891_v57 = vsel %vm1410_vm1, %v3801_v10, 0.0 }
 0x35c   :  { %v8054_v39 = vpop.eup %5639  ;;  %v3893_v5 = vsel %vm1410_vm1, %v3802_v27, 0.0  ;;  %v4508_v47 = vrot.slane %v8025_v24, 7  ;;  %v4510_v16 = vrot.slane %v8031_v23, 6  ;;  %v4512_v52 = vrot.slane %v8037_v29, 5 }
 0x35d   :  { %v8060_v35 = vpop.eup %5641  ;;  %v3884_v15 = vadd.f32 %v3883_v62, %v3882_v1  ;;  %v4514_v34 = vrot.slane %v8043_v38, 4  ;;  %v4516_v9 = vrot.slane %v8049_v40, 3  ;;  %v4518_v13 = vrot.slane %v8054_v39, 2 }
 0x35e   :  { %v4509_v41 = vsel %vm4460_vm3, %v4508_v47, %v8019_v26  ;;  %v4520_v55 = vrot.slane %v8060_v35, 1  ;;  %v1680_v6 = vrot.slane %v1679_v22, 2  ;;  %v1686_v30 = vmax.f32 %v1684_v33, %v1685_v59 }
 0x35f   :  { %v3886_v21 = vadd.f32 %v3885_v63, %v3884_v15  ;;  %v4511_v42 = vsel %vm4463_vm4, %v4510_v16, %v4509_v41  ;;  %v1893_v49 = vsub.f32 %v7948_v37, %v8005_v14  ;;  %v1894_v44 = vsub.f32 %v7951_v53, %v8013_v4  ;;  %v8099_v41 = vpop.permute.xlu0 %192 }
 0x360   :  { %v4513_v51 = vsel %vm4466_vm5, %v4512_v52, %v4511_v42  ;;  %v1681_v2 = vmax.f32 %v1679_v22, %v1680_v6  ;;  %v1687_v36 = vrot.slane %v1686_v30, 2  ;;  %v1895_v17 = vsub.f32 %v7958_v56, %v8015_v25 }
 0x361   :  { %v3888_v7 = vadd.f32 %v3887_v46, %v3886_v21  ;;  %v4515_v31 = vsel %vm4469_vm6, %v4514_v34, %v4513_v51  ;;  %v1896_v33 = vsub.f32 %v7965_v48, %v8017_v60  ;;  %v1987_v59 = vmul.f32 1.442695, %v1891_v3 }
 0x362   :  { %v4517_v61 = vsel %vm4472_vm7, %v4516_v9, %v4515_v31  ;;  %v1682_v14 = vrot.slane %v1681_v2, 1  ;;  %v1688_v43 = vmax.f32 %v1686_v30, %v1687_v36  ;;  %v1989_v4 = vmul.f32 1.442695, %v1892_v11 }
 0x363   :  { %v3890_v22 = vadd.f32 %v3889_v12, %v3888_v7  ;;  %v4519_v28 = vsel %vm4475_vm8, %v4518_v13, %v4517_v61  ;;  %5643 = vpow2.f32 %v1987_v59  ;;  %v1991_v25 = vmul.f32 1.442695, %v1893_v49 }
 0x364   :  { %v4521_v10 = vsel %vm4478_vm9, %v4520_v55, %v4519_v28  ;;  %v1683_v27 = vmax.f32 %v1681_v2, %v1682_v14  ;;  %v1689_v32 = vrot.slane %v1688_v43, 1  ;;  %5645 = vpow2.f32 %v1989_v4  ;;  %v10066_v55 = vld [vmem:[#allocation2_spill] sm:$0xff]  ;;  %v10069_v2 = vld [vmem:[#allocation5_spill] sm:$0xff] }
 0x365   :  { %v3892_v60 = vadd.f32 %v3891_v57, %v3890_v22  ;;  %v4607_v3 = vsel %vm1410_vm1, %v4521_v10, 0.0  ;;  %5647 = vpow2.f32 %v1991_v25  ;;  %v1993_v50 = vmul.f32 1.442695, %v1894_v44 }
 0x366   :  { %v4608_v62 = vrot.slane %v4607_v3, 4  ;;  %v1690_v63 = vmax.f32 %v1688_v43, %v1689_v32  ;;  %v1897_v19 = vsub.f32 %v7968_v0, %v1683_v27  ;;  %v1995_v11 = vmul.f32 1.442695, %v1895_v17 }
 0x367   :  { %v10064_v1 = vrot.slane %v7787_v58, 1  ;;  %v8090_v12 = vadd.f32 %v3893_v5, %v3892_v60  ;;  %5649 = vpow2.f32 %v1993_v50  ;;  %v1997_v47 = vmul.f32 1.442695, %v1896_v33 }
 0x368   :  { %v4609_v16 = vadd.f32 %v4608_v62, %v4607_v3  ;;  %v1898_v57 = vsub.f32 %v7971_v45, %v1690_v63  ;;  %5651 = vpow2.f32 %v1995_v11  ;;  %v1999_v52 = vmul.f32 1.442695, %v1897_v19  ;;  %v10070_v19 = vld [vmem:[#allocation13_spill] sm:$0xff] }
 0x369   :  { %v5000_v46 = vadd.f32 %v10064_v1, %v7787_v58  ;;  %v10065_v15 = vrot.slane %v7855_v54, 1  ;;  %v5071_v9 = vsel %vm1410_vm1, %v8090_v12, -inf  ;;  %5653 = vpow2.f32 %v1997_v47 }
 0x36a   :  { %vm3171_vm10 = vcmp.eq.f32.partialorder %v7933_v8, 0.0  ;;  %v4610_v58 = vrot.slane %v4609_v16, 2  ;;  %v5072_v5 = vrot.slane %v5071_v9, 4  ;;  %5655 = vpow2.f32 %v1999_v52 }
 0x36b   :  { %v5216_v34 = vadd.f32 %v10065_v15, %v7855_v54  ;;  %v2001_v13 = vmul.f32 1.442695, %v1898_v57  ;;  %v10067_v6 = vrot.slane %v10066_v55, 2  ;;  %vm3172_vm11 = vcmp.eq.f32.partialorder %v7945_v18, 0.0 }
 0x36c   :  { %v4611_v42 = vadd.f32 %v4610_v58, %v4609_v16  ;;  %v5073_v49 = vmax.f32 %v5071_v9, %v5072_v5  ;;  %vm3173_vm12 = vcmp.eq.f32.partialorder %v7948_v37, 0.0  ;;  %vm3174_vm13 = vcmp.eq.f32.partialorder %v7951_v53, 0.0 }
 0x36d   :  { %v8104_v30 = vadd.f32 %v10067_v6, %v10066_v55  ;;  %v8107_v54 = vadd.f32 %v5216_v34, %v5000_v46  ;;  %v8112_v44 = vpop.eup %5643  ;;  %5657 = vpow2.f32 %v2001_v13  ;;  %vm3175_vm14 = vcmp.eq.f32.partialorder %v7958_v56, 0.0 }
 0x36e   :  { %v8118_v51 = vsel %vm3171_vm10, -inf, %v7933_v8  ;;  %v8122_v17 = vpop.eup %5645  ;;  %v4612_v7 = vrot.slane %v4611_v42, 1  ;;  %v5074_v31 = vrot.slane %v5073_v49, 2  ;;  %v2275_v33 = vsel %vm1410_vm1, %v8112_v44, 0.0 }
 0x36f   :  { %10068 = vst [vmem:[#allocation28_spill] sm:$0xff] %v8104_v30  ;;  %v8127_v59 = vsel %vm3172_vm11, -inf, %v7945_v18  ;;  %v8129_v61 = vpop.eup %5647  ;;  %v2276_v14 = vrot.slane %v2275_v33, 4  ;;  %v2282_v43 = vsel %vm1410_vm1, %v8122_v17, 0.0  ;;  %v8134_v4 = vsel %vm3173_vm12, -inf, %v7948_v37 }
 0x370   :  { %v8137_v22 = vsel %vm3174_vm13, -inf, %v7951_v53  ;;  %v4613_v28 = vadd.f32 %v4612_v7, %v4611_v42  ;;  %v5075_v25 = vmax.f32 %v5073_v49, %v5074_v31  ;;  %v2283_v10 = vrot.slane %v2282_v43, 4 }
 0x371   :  { %v2289_v27 = vsel %vm1410_vm1, %v8129_v61, 0.0  ;;  %v8141_v32 = vpop.eup %5649  ;;  %v2277_v60 = vadd.f32 %v2276_v14, %v2275_v33  ;;  %v8146_v50 = vsel %vm3175_vm14, -inf, %v7958_v56  ;;  %v8150_v62 = vsel %vm1410_vm1, %v8118_v51, -inf }
 0x372   :  { %v2290_v3 = vrot.slane %v2289_v27, 4  ;;  %v8152_v63 = vpop.eup %5651  ;;  %v4657_v11 = vrot.slane %v4613_v28, %v10070_v19  ;;  %v5076_v1 = vrot.slane %v5075_v25, 1  ;;  %v2284_v46 = vadd.f32 %v2283_v10, %v2282_v43 }
 0x373   :  { %v2296_v47 = vsel %vm1410_vm1, %v8141_v32, 0.0  ;;  %v8157_v16 = vpop.eup %5653  ;;  %v2278_v57 = vrot.slane %v2277_v60, 2  ;;  %v2303_v34 = vsel %vm1410_vm1, %v8152_v63, 0.0  ;;  %vm3176_vm15 = vcmp.eq.f32.partialorder %v7965_v48, 0.0 }
 0x374   :  { %v2291_v52 = vadd.f32 %v2290_v3, %v2289_v27  ;;  %v2297_v15 = vrot.slane %v2296_v47, 4  ;;  %v8161_v9 = vpop.eup %5655  ;;  %5659 = vrcp.f32 %v4657_v11  ;;  %v5077_v58 = vmax.f32 %v5075_v25, %v5076_v1 }
 0x375   :  { %v2285_v5 = vrot.slane %v2284_v46, 2  ;;  %v2304_v13 = vrot.slane %v2303_v34, 4  ;;  %v2279_v55 = vadd.f32 %v2278_v57, %v2277_v60  ;;  %v2310_v49 = vsel %vm1410_vm1, %v8157_v16, 0.0 }
 0x376   :  { %v2292_v6 = vrot.slane %v2291_v52, 2  ;;  %v2298_v42 = vadd.f32 %v2297_v15, %v2296_v47  ;;  %v5109_v7 = vsub.f32 %v8090_v12, %v5077_v58  ;;  %v2311_v14 = vrot.slane %v2310_v49, 4 }
 0x377   :  { %v2286_v31 = vadd.f32 %v2285_v5, %v2284_v46  ;;  %v2305_v33 = vadd.f32 %v2304_v13, %v2303_v34  ;;  %v8166_v43 = vpop.eup %5657  ;;  %v2280_v28 = vrot.slane %v2279_v55, 1  ;;  %v2317_v25 = vsel %vm1410_vm1, %v8161_v9, 0.0 }
 0x378   :  { %v2293_v10 = vadd.f32 %v2292_v6, %v2291_v52  ;;  %v2299_v27 = vrot.slane %v2298_v42, 2  ;;  %v5120_v3 = vmul.f32 1.442695, %v5109_v7  ;;  %v2312_v1 = vadd.f32 %v2311_v14, %v2310_v49 }
 0x379   :  { %v2287_v60 = vrot.slane %v2286_v31, 1  ;;  %v2306_v11 = vrot.slane %v2305_v33, 2  ;;  %v2281_v47 = vadd.f32 %v2280_v28, %v2279_v55  ;;  %v2318_v36 = vrot.slane %v2317_v25, 4 }
 0x37a   :  { %v2294_v57 = vrot.slane %v2293_v10, 1  ;;  %v2300_v15 = vadd.f32 %v2299_v27, %v2298_v42  ;;  %5661 = vpow2.f32 %v5120_v3  ;;  %v2313_v58 = vrot.slane %v2312_v1, 2 }
 0x37b   :  { %v2288_v46 = vadd.f32 %v2287_v60, %v2286_v31  ;;  %v2307_v34 = vadd.f32 %v2306_v11, %v2305_v33  ;;  %v2319_v21 = vadd.f32 %v2318_v36, %v2317_v25  ;;  %v2324_v52 = vsel %vm1410_vm1, %v8166_v43, 0.0 }
 0x37c   :  { %v2295_v5 = vadd.f32 %v2294_v57, %v2293_v10  ;;  %v2301_v13 = vrot.slane %v2300_v15, 1  ;;  %v2314_v30 = vadd.f32 %v2313_v58, %v2312_v1  ;;  %v2325_v7 = vrot.slane %v2324_v52, 4  ;;  %v10071_v1 = vld [vmem:[#allocation14_spill] sm:$0xff]  ;;  %v10072_v57 = vld [vmem:[#allocation8_spill] sm:$0xff] }
 0x37d   :  { %v2308_v6 = vrot.slane %v2307_v34, 1  ;;  %5663 = vrcp.f32 %v2281_v47  ;;  %v2320_v49 = vrot.slane %v2319_v21, 2  ;;  %v8174_v55 = vsel %vm1410_vm1, %v8127_v59, -inf  ;;  %v10075_v58 = vld [vmem:[#allocation18_spill] sm:$0xff] }
 0x37e   :  { %v2302_v19 = vadd.f32 %v2301_v13, %v2300_v15  ;;  %5665 = vrcp.f32 %v2288_v46  ;;  %v5660_v42 = vpop.eup %5659  ;;  %v2315_v33 = vrot.slane %v2314_v30, 1  ;;  %v2326_v14 = vadd.f32 %v2325_v7, %v2324_v52  ;;  %v10073_v46 = vld [vmem:[#allocation15_spill] sm:$0xff]  ;;  %v10077_v13 = vld [vmem:[#allocation20_spill] sm:$0xff]  ;;  %v10078_v52 = vld [vmem:[#allocation21_spill] sm:$0xff] }
 0x37f   :  { %v2309_v31 = vadd.f32 %v2308_v6, %v2307_v34  ;;  %5667 = vrcp.f32 %v2295_v5  ;;  %v4702_v36 = vmul.f32 %v5660_v42, %v8019_v26  ;;  %v4703_v28 = vmul.f32 %v5660_v42, %v8025_v24  ;;  %v10074_v34 = vld [vmem:[#allocation17_spill] sm:$0xff]  ;;  %v10076_v5 = vld [vmem:[#allocation19_spill] sm:$0xff] }
 0x380   :  { %v4704_v10 = vmul.f32 %v5660_v42, %v8031_v23  ;;  %v4705_v27 = vmul.f32 %v5660_v42, %v8037_v29  ;;  %v4706_v25 = vmul.f32 %v5660_v42, %v8043_v38  ;;  %v4707_v3 = vmul.f32 %v5660_v42, %v8049_v40 }
 0x381   :  { %v4708_v60 = vmul.f32 %v5660_v42, %v8054_v39  ;;  %v4709_v11 = vmul.f32 %v5660_v42, %v8060_v35  ;;  %v4770_v47 = vmul.f32 %v4702_v36, %v10071_v1  ;;  %v4771_v15 = vmul.f32 %v4703_v28, %v10072_v57 }
 0x382   :  { %v4772_v26 = vmul.f32 %v4704_v10, %v10073_v46  ;;  %v4773_v24 = vmul.f32 %v4705_v27, %v10074_v34  ;;  %v4774_v23 = vmul.f32 %v4706_v25, %v10075_v58  ;;  %v4775_v29 = vmul.f32 %v4707_v3, %v10076_v5 }
 0x383   :  { %v4776_v38 = vmul.f32 %v4708_v60, %v10077_v13  ;;  %v4777_v40 = vmul.f32 %v4709_v11, %v10078_v52  ;;  %v4916_v6 = vrot.slane %v4771_v15, 7  ;;  %v2316_v35 = vadd.f32 %v2315_v33, %v2314_v30 }
 0x384   :  { %v4918_v39 = vrot.slane %v4772_v26, 6  ;;  %v4920_v7 = vrot.slane %v4773_v24, 5  ;;  %v8192_v42 = vpop.eup %5661  ;;  %v4922_v36 = vrot.slane %v4774_v23, 4  ;;  %v4924_v28 = vrot.slane %v4775_v29, 3 }
 0x385   :  { %v4926_v1 = vrot.slane %v4776_v38, 2  ;;  %v4928_v10 = vrot.slane %v4777_v40, 1  ;;  %v4917_v27 = vsel %vm4460_vm3, %v4916_v6, %v4770_v47  ;;  %v5151_v25 = vsel %vm1410_vm1, %v8192_v42, 0.0 }
 0x386   :  { %v2321_v3 = vadd.f32 %v2320_v49, %v2319_v21  ;;  %v2327_v57 = vrot.slane %v2326_v14, 2  ;;  %v4919_v11 = vsel %vm4463_vm4, %v4918_v39, %v4917_v27  ;;  %v5152_v15 = vrot.slane %v5151_v25, 4 }
 0x387   :  { %v5664_v60 = vpop.eup %5663  ;;  %5669 = vrcp.f32 %v2302_v19  ;;  %v3329_v30 = vmax.f32 %v8150_v62, %v8174_v55  ;;  %v4921_v46 = vsel %vm4466_vm5, %v4920_v7, %v4919_v11  ;;  %vm3177_vm0 = vcmp.eq.f32.partialorder %v7968_v0, 0.0 }
 0x388   :  { %v5666_v33 = vpop.eup %5665  ;;  %v2322_v26 = vrot.slane %v2321_v3, 1  ;;  %v2328_v47 = vadd.f32 %v2327_v57, %v2326_v14  ;;  %5671 = vrcp.f32 %v2309_v31  ;;  %v4923_v21 = vsel %vm4469_vm6, %v4922_v36, %v4921_v46 }
 0x389   :  { %v5668_v34 = vpop.eup %5667  ;;  %v5153_v49 = vadd.f32 %v5152_v15, %v5151_v25  ;;  %5673 = vrcp.f32 %v2316_v35  ;;  %v2595_v24 = vmul.f32 %v5664_v60, %v8112_v44  ;;  %v4925_v58 = vsel %vm4472_vm7, %v4924_v28, %v4923_v21 }
 0x38a   :  { %v2323_v23 = vadd.f32 %v2322_v26, %v2321_v3  ;;  %v2329_v19 = vrot.slane %v2328_v47, 1  ;;  %v2596_v5 = vmul.f32 %v5666_v33, %v8122_v17  ;;  %v4927_v62 = vsel %vm4475_vm8, %v4926_v1, %v4925_v58 }
 0x38b   :  { %v5154_v55 = vrot.slane %v5153_v49, 2  ;;  %v2597_v31 = vmul.f32 %v5668_v34, %v8129_v61  ;;  %v2659_v14 = vmul.f32 %v2595_v24, %v7933_v8  ;;  %v4929_v29 = vsel %vm4478_vm9, %v4928_v10, %v4927_v62 }
 0x38c   :  { %v2330_v13 = vadd.f32 %v2329_v19, %v2328_v47  ;;  %5675 = vrcp.f32 %v2323_v23  ;;  %v2660_v44 = vmul.f32 %v2596_v5, %v7945_v18  ;;  %v5015_v38 = vsel %vm1410_vm1, %v4929_v29, 0.0 }
 0x38d   :  { %v5155_v52 = vadd.f32 %v5154_v55, %v5153_v49  ;;  %v2661_v17 = vmul.f32 %v2597_v31, %v7948_v37  ;;  %v2915_v40 = vsel %vm1410_vm1, %v2659_v14, 0.0  ;;  %vm3178_vm2 = vcmp.eq.f32.partialorder %v7971_v45, 0.0 }
 0x38e   :  { %v5016_v6 = vrot.slane %v5015_v38, 4  ;;  %5677 = vrcp.f32 %v2330_v13  ;;  %v2916_v61 = vrot.slane %v2915_v40, 4  ;;  %v2922_v39 = vsel %vm1410_vm1, %v2660_v44, 0.0 }
 0x38f   :  { %v5156_v7 = vrot.slane %v5155_v52, 1  ;;  %v2923_v35 = vrot.slane %v2922_v39, 4  ;;  %v2929_v36 = vsel %vm1410_vm1, %v2661_v17, 0.0  ;;  %v3330_v28 = vsel %vm1410_vm1, %v8134_v4, -inf }
 0x390   :  { %v5017_v1 = vadd.f32 %v5016_v6, %v5015_v38  ;;  %v2917_v10 = vadd.f32 %v2916_v61, %v2915_v40  ;;  %v2930_v27 = vrot.slane %v2929_v36, 4  ;;  %v3331_v25 = vmax.f32 %v3329_v30, %v3330_v28 }
 0x391   :  { %v5670_v3 = vpop.eup %5669  ;;  %v5157_v57 = vadd.f32 %v5156_v7, %v5155_v52  ;;  %v2924_v60 = vadd.f32 %v2923_v35, %v2922_v39  ;;  %v8223_v11 = vsel %vm3176_vm15, -inf, %v7965_v48  ;;  %v3332_v15 = vsel %vm1410_vm1, %v8137_v22, -inf }
 0x392   :  { %v5672_v33 = vpop.eup %5671  ;;  %v5018_v46 = vrot.slane %v5017_v1, 2  ;;  %v2598_v26 = vmul.f32 %v5670_v3, %v8141_v32  ;;  %v2918_v47 = vrot.slane %v2917_v10, 2  ;;  %v2931_v34 = vadd.f32 %v2930_v27, %v2929_v36 }
 0x393   :  { %v5674_v21 = vpop.eup %5673  ;;  %5679 = vrcp.f32 %v5157_v57  ;;  %v2599_v30 = vmul.f32 %v5672_v33, %v8152_v63  ;;  %v2925_v49 = vrot.slane %v2924_v60, 2  ;;  %v3333_v24 = vmax.f32 %v3331_v25, %v3332_v15 }
 0x394   :  { %v5019_v58 = vadd.f32 %v5018_v46, %v5017_v1  ;;  %v2600_v23 = vmul.f32 %v5674_v21, %v8157_v16  ;;  %v2662_v19 = vmul.f32 %v2598_v26, %v7951_v53  ;;  %v2919_v5 = vadd.f32 %v2918_v47, %v2917_v10 }
 0x395   :  { %v2663_v62 = vmul.f32 %v2599_v30, %v7958_v56  ;;  %v2926_v55 = vadd.f32 %v2925_v49, %v2924_v60  ;;  %v2932_v31 = vrot.slane %v2931_v34, 2  ;;  %v8235_v32 = vsel %vm3177_vm0, -inf, %v7968_v0 }
 0x396   :  { %v5676_v14 = vpop.eup %5675  ;;  %v5020_v29 = vrot.slane %v5019_v58, 1  ;;  %v2664_v63 = vmul.f32 %v2600_v23, %v7965_v48  ;;  %v2936_v13 = vsel %vm1410_vm1, %v2662_v19, 0.0  ;;  %v3334_v16 = vsel %vm1410_vm1, %v8146_v50, -inf }
 0x397   :  { %v2601_v44 = vmul.f32 %v5676_v14, %v8161_v9  ;;  %v2920_v38 = vrot.slane %v2919_v5, 1  ;;  %v2937_v52 = vrot.slane %v2936_v13, 4  ;;  %v3335_v17 = vmax.f32 %v3333_v24, %v3334_v16  ;;  %v8264_v24 = vpop.permute.xlu1 %168 }
 0x398   :  { %v5678_v40 = vpop.eup %5677  ;;  %v2927_v6 = vrot.slane %v2926_v55, 1  ;;  %v2943_v61 = vsel %vm1410_vm1, %v2663_v62, 0.0  ;;  %v2950_v39 = vsel %vm1410_vm1, %v2664_v63, 0.0  ;;  %v8247_v7 = vsel %vm3178_vm2, -inf, %v7971_v45 }
 0x399   :  { %v8249_v35 = vadd.f32 %v5020_v29, %v5019_v58  ;;  %v2602_v36 = vmul.f32 %v5678_v40, %v8166_v43  ;;  %v2665_v9 = vmul.f32 %v2601_v44, %v7968_v0  ;;  %v2933_v28 = vadd.f32 %v2932_v31, %v2931_v34 }
 0x39a   :  { %v2938_v1 = vadd.f32 %v2937_v52, %v2936_v13  ;;  %v2944_v10 = vrot.slane %v2943_v61, 4  ;;  %v2951_v27 = vrot.slane %v2950_v39, 4  ;;  %v3336_v25 = vsel %vm1410_vm1, %v8223_v11, -inf }
 0x39b   :  { %v2666_v3 = vmul.f32 %v2602_v36, %v7971_v45  ;;  %v8256_v57 = vadd.f32 %v2920_v38, %v2919_v5  ;;  %v2957_v60 = vsel %vm1410_vm1, %v2665_v9, 0.0  ;;  %v3337_v15 = vmax.f32 %v3335_v17, %v3336_v25  ;;  %v8276_v36 = vpop.permute.xlu1 %216  ;;  %v8278_v9 = vpop.permute.xlu0 %240 }
 0x39c   :  { %v2939_v33 = vrot.slane %v2938_v1, 2  ;;  %v2945_v46 = vadd.f32 %v2944_v10, %v2943_v61  ;;  %v2952_v26 = vadd.f32 %v2951_v27, %v2950_v39  ;;  %v2958_v43 = vrot.slane %v2957_v60, 4  ;;  %10079 = vst [vmem:[#allocation23_spill] sm:$0xff] %v8278_v9 }
 0x39d   :  { %v5680_v47 = vpop.eup %5679  ;;  %v8259_v21 = vadd.f32 %v2927_v6, %v2926_v55  ;;  %v2934_v34 = vrot.slane %v2933_v28, 1  ;;  %v2964_v30 = vsel %vm1410_vm1, %v2666_v3, 0.0  ;;  %v3338_v49 = vsel %vm1410_vm1, %v8235_v32, -inf }
 0x39e   :  { %v5193_v58 = vmul.f32 %v5680_v47, %v8192_v42  ;;  %v2940_v23 = vadd.f32 %v2939_v33, %v2938_v1  ;;  %v2946_v19 = vrot.slane %v2945_v46, 2  ;;  %v2953_v5 = vrot.slane %v2952_v26, 2 }
 0x39f   :  { %v2959_v62 = vadd.f32 %v2958_v43, %v2957_v60  ;;  %v2965_v31 = vrot.slane %v2964_v30, 4  ;;  %v3339_v14 = vmax.f32 %v3337_v15, %v3338_v49  ;;  %v3340_v55 = vsel %vm1410_vm1, %v8247_v7, -inf }
 0x3a0   :  { %v5205_v29 = vmul.f32 %v5193_v58, %v8090_v12  ;;  %v2941_v63 = vrot.slane %v2940_v23, 1  ;;  %v2947_v13 = vadd.f32 %v2946_v19, %v2945_v46  ;;  %v2954_v16 = vadd.f32 %v2953_v5, %v2952_v26 }
 0x3a1   :  { %v8270_v44 = vadd.f32 %v2934_v34, %v2933_v28  ;;  %v2960_v38 = vrot.slane %v2959_v62, 2  ;;  %v2966_v52 = vadd.f32 %v2965_v31, %v2964_v30  ;;  %v3341_v17 = vmax.f32 %v3339_v14, %v3340_v55 }
 0x3a2   :  { %v5231_v42 = vsel %vm1410_vm1, %v5205_v29, 0.0  ;;  %v2948_v40 = vrot.slane %v2947_v13, 1  ;;  %vm3987_vm10 = vcmp.eq.f32.partialorder %v8256_v57, 0.0  ;;  %vm3988_vm11 = vcmp.eq.f32.partialorder %v8259_v21, 0.0 }
 0x3a3   :  { %v5232_v6 = vrot.slane %v5231_v42, 4  ;;  %v2961_v61 = vadd.f32 %v2960_v38, %v2959_v62  ;;  %v2967_v39 = vrot.slane %v2966_v52, 2  ;;  %v3419_v12 = vsub.f32 %v8118_v51, %v3341_v17 }
 0x3a4   :  { %v8280_v28 = vadd.f32 %v2941_v63, %v2940_v23  ;;  %v2955_v1 = vrot.slane %v2954_v16, 1  ;;  %v3420_v10 = vsub.f32 %v8127_v59, %v3341_v17  ;;  %v3421_v27 = vsub.f32 %v8134_v4, %v3341_v17 }
 0x3a5   :  { %v5233_v25 = vadd.f32 %v5232_v6, %v5231_v42  ;;  %v8284_v3 = vadd.f32 %v2948_v40, %v2947_v13  ;;  %v2968_v60 = vadd.f32 %v2967_v39, %v2966_v52  ;;  %v3422_v15 = vsub.f32 %v8137_v22, %v3341_v17 }
 0x3a6   :  { %v2962_v33 = vrot.slane %v2961_v61, 1  ;;  %v3423_v51 = vsub.f32 %v8146_v50, %v3341_v17  ;;  %v3424_v46 = vsub.f32 %v8223_v11, %v3341_v17  ;;  %v3425_v26 = vsub.f32 %v8235_v32, %v3341_v17  ;;  %v8294_v50 = vpop.permute.xlu1 %264  ;;  %v8296_v11 = vpop.permute.xlu0 %156 }
 0x3a7   :  { %v5234_v43 = vrot.slane %v5233_v25, 2  ;;  %v2969_v47 = vrot.slane %v2968_v60, 1  ;;  %v3426_v34 = vsub.f32 %v8247_v7, %v3341_v17  ;;  %v3515_v59 = vmul.f32 1.442695, %v3419_v12  ;;  %10080 = vst [vmem:[#allocation16_spill] sm:$0xff] %v8294_v50 }
 0x3a8   :  { %v8291_v30 = vadd.f32 %v2955_v1, %v2954_v16  ;;  %v3517_v4 = vmul.f32 1.442695, %v3420_v10  ;;  %v3519_v49 = vmul.f32 1.442695, %v3421_v27  ;;  %v3521_v58 = vmul.f32 1.442695, %v3422_v15 }
 0x3a9   :  { %v5235_v23 = vadd.f32 %v5234_v43, %v5233_v25  ;;  %5681 = vpow2.f32 %v3515_v59  ;;  %v3523_v22 = vmul.f32 1.442695, %v3423_v51  ;;  %vm3989_vm12 = vcmp.eq.f32.partialorder %v8270_v44, 0.0  ;;  %v10085_v43 = vld [vmem:[#allocation9_spill] sm:$0xff] }
 0x3aa   :  { %v8298_v32 = vadd.f32 %v2962_v33, %v2961_v61  ;;  %v8300_v19 = vadd.f32 %v2969_v47, %v2968_v60  ;;  %5683 = vpow2.f32 %v3517_v4  ;;  %v3525_v7 = vmul.f32 1.442695, %v3424_v46  ;;  %v205_v52 = vpop.permute.xlu1 %204  ;;  %v8329_v17 = vpop.permute.xlu0 %180 }
 0x3ab   :  { %v5236_v5 = vrot.slane %v5235_v23, 1  ;;  %5685 = vpow2.f32 %v3519_v49  ;;  %v3527_v62 = vmul.f32 1.442695, %v3425_v26  ;;  %v3529_v31 = vmul.f32 1.442695, %v3426_v34 }
 0x3ac   :  { %5687 = vpow2.f32 %v3521_v58  ;;  %vm3990_vm13 = vcmp.eq.f32.partialorder %v8280_v28, 0.0  ;;  %vm3991_vm14 = vcmp.eq.f32.partialorder %v8284_v3, 0.0  ;;  %vm3992_vm15 = vcmp.eq.f32.partialorder %v8291_v30, 0.0 }
 0x3ad   :  { %v5237_v14 = vadd.f32 %v5236_v5, %v5235_v23  ;;  %5689 = vpow2.f32 %v3523_v22  ;;  %v8308_v55 = vsel %vm3987_vm10, -inf, %v8256_v57  ;;  %v8313_v29 = vsel %vm3988_vm11, -inf, %v8259_v21 }
 0x3ae   :  { %5691 = vpow2.f32 %v3525_v7  ;;  %vm3993_vm0 = vcmp.eq.f32.partialorder %v8298_v32, 0.0  ;;  %vm3994_vm2 = vcmp.eq.f32.partialorder %v8300_v19, 0.0  ;;  %v8320_v63 = vsel %vm3989_vm12, -inf, %v8270_v44  ;;  %v8392_v5 = vpop.permute.xlu1 %228 }
 0x3af   :  { %v5269_v13 = vadd.f32 %v5237_v14, %v8249_v35  ;;  %5693 = vpow2.f32 %v3527_v62  ;;  %v8324_v16 = vsel %vm3990_vm13, -inf, %v8280_v28  ;;  %v8327_v38 = vsel %vm3991_vm14, -inf, %v8284_v3 }
 0x3b0   :  { %5695 = vpow2.f32 %v3529_v31  ;;  %v8334_v42 = vsel %vm3992_vm15, -inf, %v8291_v30  ;;  %v4143_v40 = vsel %vm1410_vm1, %v8308_v55, -inf  ;;  %v4144_v35 = vsel %vm1410_vm1, %v8313_v29, -inf }
 0x3b1   :  { %v10081_v6 = vrot.slane %v7768_v20, 2  ;;  %v8346_v39 = vmul.f32 0.005, %v8107_v54  ;;  %v4145_v12 = vmax.f32 %v4143_v40, %v4144_v35  ;;  %v1275_v1 = vcombine.high %v10069_v2, %v8099_v41 }
 0x3b2   :  { %v8350_v10 = vmul.f32 0.005, %v5269_v13  ;;  %v8355_v27 = vsel %vm3993_vm0, -inf, %v8298_v32  ;;  %v8360_v25 = vsel %vm3994_vm2, -inf, %v8300_v19  ;;  %v4148_v15 = vsel %vm1410_vm1, %v8324_v16, -inf }
 0x3b3   :  { %v8343_v61 = vadd.f32 %v10081_v6, %v7768_v20  ;;  %10083 = vst [vmem:[#allocation24_spill] sm:$0xff] %v8346_v39  ;;  %v4146_v20 = vsel %vm1410_vm1, %v8320_v63, -inf  ;;  %v8364_v54 = vpop.eup %5681  ;;  %v4150_v33 = vsel %vm1410_vm1, %v8327_v38, -inf  ;;  %v4152_v51 = vsel %vm1410_vm1, %v8334_v42, -inf }
 0x3b4   :  { %10084 = vst [vmem:[#allocation22_spill] sm:$0xff] %v8350_v10  ;;  %v4147_v60 = vmax.f32 %v4145_v12, %v4146_v20  ;;  %v8372_v46 = vpop.eup %5683  ;;  %v3639_v26 = vsel %vm1410_vm1, %v8364_v54, 0.0  ;;  %v10086_v47 = vcombine.low %v10069_v2, %v8099_v41  ;;  %v1290_v59 = vcombine.low %v8264_v24, %v8276_v36  ;;  %v8394_v41 = vpop.permute.xlu0 %252 }
 0x3b5   :  { %10082 = vst [vmem:[#allocation29_spill] sm:$0xff] %v8343_v61  ;;  %v1291_v4 = vcombine.high %v8264_v24, %v8276_v36  ;;  %v8384_v49 = vpop.eup %5685  ;;  %v3640_v58 = vsel %vm1410_vm1, %v8372_v46, 0.0  ;;  %v8389_v22 = vrot.slane %v1275_v1, %v10085_v43  ;;  %v474_v7 = vcombine.low %v8296_v11, %v205_v52  ;;  %v277_v1 = vpop.permute.xlu1 %276 }
 0x3b6   :  { %v1282_v34 = vrot.slane %v10086_v47, %v10085_v43  ;;  %v4149_v23 = vmax.f32 %v4147_v60, %v4148_v15  ;;  %v8396_v2 = vpop.eup %5687  ;;  %v3641_v62 = vadd.f32 %v3640_v58, %v3639_v26  ;;  %v1298_v24 = vrot.slane %v1290_v59, %v10085_v43  ;;  %v10089_v47 = vld [vmem:[#allocation6_spill] sm:$0xff] }
 0x3b7   :  { %10087 = vst [vmem:[#allocation26_spill] sm:$0xff] %v8389_v22  ;;  %v8400_v36 = vrot.slane %v1291_v4, %v10085_v43  ;;  %v475_v31 = vcombine.high %v8296_v11, %v205_v52  ;;  %v8403_v14 = vpop.eup %5689  ;;  %v3642_v13 = vsel %vm1410_vm1, %v8384_v49, 0.0  ;;  %v4154_v35 = vsel %vm1410_vm1, %v8355_v27, -inf }
 0x3b8   :  { %v4151_v40 = vmax.f32 %v4149_v23, %v4150_v33  ;;  %v4156_v6 = vsel %vm1410_vm1, %v8360_v25, -inf  ;;  %v8411_v12 = vpop.eup %5691  ;;  %v3643_v20 = vadd.f32 %v3642_v13, %v3641_v62  ;;  %v1338_v60 = vcombine.low %v1282_v34, %v1298_v24 }
 0x3b9   :  { %10088 = vst [vmem:[#allocation27_spill] sm:$0xff] %v8400_v36  ;;  %v1339_v15 = vcombine.high %v1282_v34, %v1298_v24  ;;  %v8414_v11 = vpop.eup %5693  ;;  %v3644_v52 = vsel %vm1410_vm1, %v8396_v2, 0.0  ;;  %v1354_v33 = vcombine.low %v8389_v22, %v8400_v36  ;;  %v458_v59 = vcombine.low %v10089_v47, %v8329_v17 }
 0x3ba   :  { %v4153_v26 = vmax.f32 %v4151_v40, %v4152_v51  ;;  %v8422_v4 = vpop.eup %5695  ;;  %v3645_v58 = vadd.f32 %v3644_v52, %v3643_v20  ;;  %v3646_v23 = vsel %vm1410_vm1, %v8403_v14, 0.0  ;;  %v482_v34 = vrot.slane %v474_v7, %v10085_v43  ;;  %v301_v20 = vpop.permute.xlu0 %300  ;;  %v10090_v7 = vld [vmem:[#allocation10_spill] sm:$0xff] }
 0x3bb   :  { %v8428_v62 = vrot.slane %v475_v31, %v10085_v43  ;;  %v3648_v51 = vsel %vm1410_vm1, %v8411_v12, 0.0  ;;  %v3650_v24 = vsel %vm1410_vm1, %v8414_v11, 0.0  ;;  %v3652_v61 = vsel %vm1410_vm1, %v8422_v4, 0.0 }
 0x3bc   :  { %v4155_v13 = vmax.f32 %v4153_v26, %v4154_v35  ;;  %v3647_v52 = vadd.f32 %v3646_v23, %v3645_v58  ;;  %v8439_v10 = vrot.slane %v1338_v60, %v10090_v7  ;;  %v8442_v31 = vrot.slane %v1339_v15, %v10090_v7 }
 0x3bd   :  { %v8445_v9 = vrot.slane %v1354_v33, %v10090_v7  ;;  %v459_v35 = vcombine.high %v10089_v47, %v8329_v17  ;;  %v466_v26 = vrot.slane %v458_v59, %v10085_v43  ;;  %v490_v58 = vcombine.low %v8392_v5, %v277_v1 }
 0x3be   :  { %10091 = vst [vmem:[#allocation3_spill] sm:$0xff] %v8439_v10  ;;  %10092 = vst [vmem:[#allocation4_spill] sm:$0xff] %v8442_v31  ;;  %v4157_v39 = vmax.f32 %v4155_v13, %v4156_v6  ;;  %v3649_v40 = vadd.f32 %v3648_v51, %v3647_v52  ;;  %v491_v23 = vcombine.high %v8392_v5, %v277_v1 }
 0x3bf   :  { %10093 = vst [vmem:[#allocation25_spill] sm:$0xff] %v8445_v9  ;;  %v506_v60 = vcombine.low %v8394_v41, %v301_v20  ;;  %v473_v52 = vrot.slane %v459_v35, %v10085_v43 }
 0x3c0   :  { %v4235_v10 = vsub.f32 %v8308_v55, %v4157_v39  ;;  %v4236_v15 = vsub.f32 %v8313_v29, %v4157_v39  ;;  %v4237_v6 = vsub.f32 %v8320_v63, %v4157_v39  ;;  %v4238_v33 = vsub.f32 %v8324_v16, %v4157_v39 }
 0x3c1   :  { %v3651_v13 = vadd.f32 %v3650_v24, %v3649_v40  ;;  %v4239_v17 = vsub.f32 %v8327_v38, %v4157_v39  ;;  %v4240_v47 = vsub.f32 %v8334_v42, %v4157_v39  ;;  %v4241_v59 = vsub.f32 %v8355_v27, %v4157_v39 }
 0x3c2   :  { %v4242_v51 = vsub.f32 %v8360_v25, %v4157_v39  ;;  %v4331_v5 = vmul.f32 1.442695, %v4235_v10  ;;  %v4333_v1 = vmul.f32 1.442695, %v4236_v15  ;;  %v4335_v9 = vmul.f32 1.442695, %v4237_v6 }
 0x3c3   :  { %v3653_v55 = vadd.f32 %v3652_v61, %v3651_v13  ;;  %v522_v29 = vcombine.low %v466_v26, %v482_v34  ;;  %v507_v63 = vcombine.high %v8394_v41, %v301_v20  ;;  %v4337_v16 = vmul.f32 1.442695, %v4238_v33 }
 0x3c4   :  { %5697 = vpow2.f32 %v4331_v5  ;;  %v4339_v24 = vmul.f32 1.442695, %v4239_v17  ;;  %v523_v40 = vcombine.high %v466_v26, %v482_v34  ;;  %v4341_v38 = vmul.f32 1.442695, %v4240_v47 }
 0x3c5   :  { %5699 = vrcp.f32 %v3653_v55  ;;  %v4343_v42 = vmul.f32 1.442695, %v4241_v59  ;;  %v4345_v31 = vmul.f32 1.442695, %v4242_v51  ;;  %v538_v39 = vcombine.low %v473_v52, %v8428_v62 }
 0x3c6   :  { %5701 = vpow2.f32 %v4333_v1  ;;  %v498_v10 = vrot.slane %v490_v58, %v10085_v43  ;;  %v514_v27 = vrot.slane %v506_v60, %v10085_v43  ;;  %v539_v61 = vcombine.high %v473_v52, %v8428_v62 }
 0x3c7   :  { %5703 = vpow2.f32 %v4335_v9  ;;  %v505_v25 = vrot.slane %v491_v23, %v10085_v43  ;;  %v521_v41 = vrot.slane %v507_v63, %v10085_v43  ;;  %v530_v34 = vrot.slane %v522_v29, %v10090_v7 }
 0x3c8   :  { %5705 = vpow2.f32 %v4337_v16  ;;  %v554_v20 = vcombine.low %v498_v10, %v514_v27  ;;  %v555_v35 = vcombine.high %v498_v10, %v514_v27  ;;  %v537_v26 = vrot.slane %v523_v40, %v10090_v7 }
 0x3c9   :  { %5707 = vpow2.f32 %v4339_v24  ;;  %v570_v15 = vcombine.low %v505_v25, %v521_v41  ;;  %v571_v6 = vcombine.high %v505_v25, %v521_v41  ;;  %v546_v58 = vrot.slane %v538_v39, %v10090_v7 }
 0x3ca   :  { %5709 = vpow2.f32 %v4341_v38  ;;  %v562_v9 = vrot.slane %v554_v20, %v10090_v7  ;;  %v569_v62 = vrot.slane %v555_v35, %v10090_v7  ;;  %v553_v23 = vrot.slane %v539_v61, %v10090_v7 }
 0x3cb   :  { %5711 = vpow2.f32 %v4343_v42  ;;  %v578_v60 = vrot.slane %v570_v15, %v10090_v7  ;;  %v585_v33 = vrot.slane %v571_v6, %v10090_v7 }
 0x3cc   :  { %5713 = vpow2.f32 %v4345_v31  ;;  %v8477_v13 = vcombine.low %v530_v34, %v562_v9  ;;  %v8479_v17 = vcombine.high %v530_v34, %v562_v9  ;;  %v8481_v47 = vcombine.low %v537_v26, %v569_v62 }
 0x3cd   :  { %v8483_v59 = vcombine.high %v537_v26, %v569_v62  ;;  %v8485_v51 = vcombine.low %v546_v58, %v578_v60  ;;  %v8487_v5 = vcombine.high %v546_v58, %v578_v60  ;;  %v8489_v1 = vcombine.low %v553_v23, %v585_v33 }
 0x3ce   :  { %v8491_v52 = vpop.eup %5697  ;;  %v8493_v55 = vcombine.high %v553_v23, %v585_v33  ;;  %v1467_v31 = vsel %vm1410_vm1, %v8477_v13, -inf  ;;  %v1474_v29 = vsel %vm1410_vm1, %v8479_v17, -inf  ;;  %v1481_v63 = vsel %vm1410_vm1, %v8481_v47, -inf }
 0x3cf   :  { %10094 = vst [vmem:[#allocation12_spill] sm:$0xff] %v8489_v1  ;;  %v5700_v16 = vpop.eup %5699  ;;  %v1468_v24 = vrot.slane %v1467_v31, 4  ;;  %v1475_v40 = vrot.slane %v1474_v29, 4  ;;  %v1482_v38 = vrot.slane %v1481_v63, 4  ;;  %v1488_v42 = vsel %vm1410_vm1, %v8483_v59, -inf }
 0x3d0   :  { %v8503_v39 = vpop.eup %5701  ;;  %v3739_v10 = vmul.f32 %v5700_v16, %v8364_v54  ;;  %v3740_v27 = vmul.f32 %v5700_v16, %v8372_v46  ;;  %v3741_v61 = vmul.f32 %v5700_v16, %v8384_v49  ;;  %v3742_v25 = vmul.f32 %v5700_v16, %v8396_v2 }
 0x3d1   :  { %v8509_v41 = vpop.eup %5703  ;;  %v3743_v34 = vmul.f32 %v5700_v16, %v8403_v14  ;;  %v3744_v20 = vmul.f32 %v5700_v16, %v8411_v12  ;;  %v3745_v35 = vmul.f32 %v5700_v16, %v8414_v11  ;;  %v3746_v26 = vmul.f32 %v5700_v16, %v8422_v4 }
 0x3d2   :  { %v8515_v15 = vpop.eup %5705  ;;  %v3803_v54 = vmul.f32 %v3739_v10, %v7933_v8  ;;  %v3804_v46 = vmul.f32 %v3740_v27, %v7945_v18  ;;  %v3805_v49 = vmul.f32 %v3741_v61, %v7948_v37  ;;  %v3806_v2 = vmul.f32 %v3742_v25, %v7951_v53 }
 0x3d3   :  { %v8521_v6 = vpop.eup %5707  ;;  %v3807_v14 = vmul.f32 %v3743_v34, %v7958_v56  ;;  %v3808_v12 = vmul.f32 %v3744_v20, %v7965_v48  ;;  %v3809_v11 = vmul.f32 %v3745_v35, %v7968_v0  ;;  %v3810_v4 = vmul.f32 %v3746_v26, %v7971_v45 }
 0x3d4   :  { %v8527_v58 = vpop.eup %5709  ;;  %v3895_v8 = vsel %vm1410_vm1, %v3803_v54, 0.0  ;;  %v3896_v18 = vsel %vm1410_vm1, %v3804_v46, 0.0  ;;  %v3898_v37 = vsel %vm1410_vm1, %v3805_v49, 0.0  ;;  %v3900_v53 = vsel %vm1410_vm1, %v3806_v2, 0.0 }
 0x3d5   :  { %v8533_v9 = vpop.eup %5711  ;;  %v3897_v62 = vadd.f32 %v3896_v18, %v3895_v8  ;;  %v3902_v56 = vsel %vm1410_vm1, %v3807_v14, 0.0  ;;  %v3904_v48 = vsel %vm1410_vm1, %v3808_v12, 0.0  ;;  %v3906_v0 = vsel %vm1410_vm1, %v3809_v11, 0.0 }
 0x3d6   :  { %v8538_v45 = vpop.eup %5713  ;;  %v3908_v23 = vsel %vm1410_vm1, %v3810_v4, 0.0  ;;  %v4522_v60 = vrot.slane %v8503_v39, 7  ;;  %v4524_v33 = vrot.slane %v8509_v41, 6  ;;  %v4526_v16 = vrot.slane %v8515_v15, 5 }
 0x3d7   :  { %v3899_v10 = vadd.f32 %v3898_v37, %v3897_v62  ;;  %v4528_v27 = vrot.slane %v8521_v6, 4  ;;  %v4530_v61 = vrot.slane %v8527_v58, 3  ;;  %v4532_v25 = vrot.slane %v8533_v9, 2 }
 0x3d8   :  { %v4523_v34 = vsel %vm4460_vm3, %v4522_v60, %v8491_v52  ;;  %v4534_v20 = vrot.slane %v8538_v45, 1  ;;  %v1469_v35 = vmax.f32 %v1467_v31, %v1468_v24  ;;  %v1476_v26 = vmax.f32 %v1474_v29, %v1475_v40 }
 0x3d9   :  { %v3901_v54 = vadd.f32 %v3900_v53, %v3899_v10  ;;  %v4525_v46 = vsel %vm4463_vm4, %v4524_v33, %v4523_v34  ;;  %v1483_v49 = vmax.f32 %v1481_v63, %v1482_v38  ;;  %v1489_v2 = vrot.slane %v1488_v42, 4 }
 0x3da   :  { %v4527_v14 = vsel %vm4466_vm5, %v4526_v16, %v4525_v46  ;;  %v1470_v12 = vrot.slane %v1469_v35, 2  ;;  %v1477_v11 = vrot.slane %v1476_v26, 2  ;;  %v1495_v4 = vsel %vm1410_vm1, %v8485_v51, -inf }
 0x3db   :  { %v3903_v8 = vadd.f32 %v3902_v56, %v3901_v54  ;;  %v4529_v18 = vsel %vm4469_vm6, %v4528_v27, %v4527_v14  ;;  %v1484_v37 = vrot.slane %v1483_v49, 2  ;;  %v1490_v62 = vmax.f32 %v1488_v42, %v1489_v2 }
 0x3dc   :  { %v4531_v31 = vsel %vm4472_vm7, %v4530_v61, %v4529_v18  ;;  %v1471_v29 = vmax.f32 %v1469_v35, %v1470_v12  ;;  %v1478_v24 = vmax.f32 %v1476_v26, %v1477_v11  ;;  %v1496_v40 = vrot.slane %v1495_v4, 4 }
 0x3dd   :  { %v3905_v53 = vadd.f32 %v3904_v48, %v3903_v8  ;;  %v4533_v63 = vsel %vm4475_vm8, %v4532_v25, %v4531_v31  ;;  %v1485_v38 = vmax.f32 %v1483_v49, %v1484_v37  ;;  %v1491_v60 = vrot.slane %v1490_v62, 2 }
 0x3de   :  { %v4535_v33 = vsel %vm4478_vm9, %v4534_v20, %v4533_v63  ;;  %v1472_v16 = vrot.slane %v1471_v29, 1  ;;  %v1479_v10 = vrot.slane %v1478_v24, 1  ;;  %v1497_v34 = vmax.f32 %v1495_v4, %v1496_v40 }
 0x3df   :  { %v3907_v56 = vadd.f32 %v3906_v0, %v3905_v53  ;;  %v4614_v27 = vsel %vm1410_vm1, %v4535_v33, 0.0  ;;  %v1486_v54 = vrot.slane %v1485_v38, 1  ;;  %v1492_v42 = vmax.f32 %v1490_v62, %v1491_v60 }
 0x3e0   :  { %v4615_v46 = vrot.slane %v4614_v27, 4  ;;  %v1473_v61 = vmax.f32 %v1471_v29, %v1472_v16  ;;  %v1480_v35 = vmax.f32 %v1478_v24, %v1479_v10  ;;  %v1498_v26 = vrot.slane %v1497_v34, 2  ;;  %v8569_v29 = vpop.permute.xlu1 %164 }
 0x3e1   :  { %v8559_v2 = vadd.f32 %v3908_v23, %v3907_v56  ;;  %v1487_v48 = vmax.f32 %v1485_v38, %v1486_v54  ;;  %v1493_v25 = vrot.slane %v1492_v42, 1  ;;  %v1502_v49 = vsel %vm1410_vm1, %v8487_v5, -inf }
 0x3e2   :  { %v4616_v20 = vadd.f32 %v4615_v46, %v4614_v27  ;;  %v1499_v14 = vmax.f32 %v1497_v34, %v1498_v26  ;;  %v1503_v12 = vrot.slane %v1502_v49, 4  ;;  %v1509_v0 = vsel %vm1410_vm1, %v8489_v1, -inf }
 0x3e3   :  { %v5078_v11 = vsel %vm1410_vm1, %v8559_v2, -inf  ;;  %v1494_v4 = vmax.f32 %v1492_v42, %v1493_v25  ;;  %v1510_v8 = vrot.slane %v1509_v0, 4  ;;  %v1516_v23 = vsel %vm1410_vm1, %v8493_v55, -inf }
 0x3e4   :  { %v4617_v18 = vrot.slane %v4616_v20, 2  ;;  %v5079_v37 = vrot.slane %v5078_v11, 4  ;;  %v1500_v62 = vrot.slane %v1499_v14, 1  ;;  %v1504_v31 = vmax.f32 %v1502_v49, %v1503_v12 }
 0x3e5   :  { %v1511_v24 = vmax.f32 %v1509_v0, %v1510_v8  ;;  %v1517_v40 = vrot.slane %v1516_v23, 4  ;;  %v1867_v53 = vsub.f32 %v8477_v13, %v1473_v61  ;;  %v1868_v63 = vsub.f32 %v8479_v17, %v1480_v35 }
 0x3e6   :  { %v4618_v38 = vadd.f32 %v4617_v18, %v4616_v20  ;;  %v5080_v60 = vmax.f32 %v5078_v11, %v5079_v37  ;;  %v1501_v33 = vmax.f32 %v1499_v14, %v1500_v62  ;;  %v1505_v16 = vrot.slane %v1504_v31, 2 }
 0x3e7   :  { %v1512_v10 = vrot.slane %v1511_v24, 2  ;;  %v1518_v34 = vmax.f32 %v1516_v23, %v1517_v40  ;;  %v1869_v56 = vsub.f32 %v8481_v47, %v1487_v48  ;;  %v1870_v27 = vsub.f32 %v8483_v59, %v1494_v4  ;;  %v8576_v48 = vpop.permute.xlu1 %212  ;;  %v10095_v4 = vld [vmem:[#allocation13_spill] sm:$0xff] }
 0x3e8   :  { %v4619_v54 = vrot.slane %v4618_v38, 1  ;;  %v5081_v42 = vrot.slane %v5080_v60, 2  ;;  %v1506_v46 = vmax.f32 %v1504_v31, %v1505_v16  ;;  %v1871_v26 = vsub.f32 %v8485_v51, %v1501_v33 }
 0x3e9   :  { %v1513_v25 = vmax.f32 %v1511_v24, %v1512_v10  ;;  %v1519_v49 = vrot.slane %v1518_v34, 2  ;;  %v1939_v61 = vmul.f32 1.442695, %v1867_v53  ;;  %v1941_v12 = vmul.f32 1.442695, %v1868_v63 }
 0x3ea   :  { %v4620_v35 = vadd.f32 %v4619_v54, %v4618_v38  ;;  %v5082_v20 = vmax.f32 %v5080_v60, %v5081_v42  ;;  %v1507_v0 = vrot.slane %v1506_v46, 1  ;;  %v1943_v14 = vmul.f32 1.442695, %v1869_v56 }
 0x3eb   :  { %v1514_v11 = vrot.slane %v1513_v25, 1  ;;  %v1520_v8 = vmax.f32 %v1518_v34, %v1519_v49  ;;  %5715 = vpow2.f32 %v1939_v61  ;;  %v1945_v23 = vmul.f32 1.442695, %v1870_v27 }
 0x3ec   :  { %v4661_v18 = vrot.slane %v4620_v35, %v10095_v4  ;;  %v5083_v37 = vrot.slane %v5082_v20, 1  ;;  %v1508_v62 = vmax.f32 %v1506_v46, %v1507_v0  ;;  %5717 = vpow2.f32 %v1941_v12 }
 0x3ed   :  { %v1515_v31 = vmax.f32 %v1513_v25, %v1514_v11  ;;  %v1521_v24 = vrot.slane %v1520_v8, 1  ;;  %5719 = vpow2.f32 %v1943_v14  ;;  %v1947_v40 = vmul.f32 1.442695, %v1871_v26 }
 0x3ee   :  { %5721 = vrcp.f32 %v4661_v18  ;;  %v5084_v53 = vmax.f32 %v5082_v20, %v5083_v37  ;;  %v1872_v63 = vsub.f32 %v8487_v5, %v1508_v62  ;;  %v1018_v38 = vcombine.low %v8569_v29, %v8576_v48 }
 0x3ef   :  { %v1522_v60 = vmax.f32 %v1520_v8, %v1521_v24  ;;  %v1873_v33 = vsub.f32 %v8489_v1, %v1515_v31  ;;  %vm3147_vm10 = vcmp.eq.f32.partialorder %v8477_v13, 0.0  ;;  %5723 = vpow2.f32 %v1945_v23 }
 0x3f0   :  { %v5110_v10 = vsub.f32 %v8559_v2, %v5084_v53  ;;  %v1949_v34 = vmul.f32 1.442695, %v1872_v63  ;;  %vm3148_vm11 = vcmp.eq.f32.partialorder %v8479_v17, 0.0  ;;  %5725 = vpow2.f32 %v1947_v40 }
 0x3f1   :  { %v1874_v56 = vsub.f32 %v8493_v55, %v1522_v60  ;;  %v1951_v27 = vmul.f32 1.442695, %v1873_v33  ;;  %vm3149_vm12 = vcmp.eq.f32.partialorder %v8481_v47, 0.0  ;;  %vm3150_vm13 = vcmp.eq.f32.partialorder %v8483_v59, 0.0 }
 0x3f2   :  { %v5122_v54 = vmul.f32 1.442695, %v5110_v10  ;;  %5727 = vpow2.f32 %v1949_v34  ;;  %vm3151_vm14 = vcmp.eq.f32.partialorder %v8485_v51, 0.0  ;;  %vm3152_vm15 = vcmp.eq.f32.partialorder %v8487_v5, 0.0 }
 0x3f3   :  { %5729 = vpow2.f32 %v1951_v27  ;;  %v1953_v42 = vmul.f32 1.442695, %v1874_v56  ;;  %v8596_v46 = vsel %vm3147_vm10, -inf, %v8477_v13  ;;  %vm3153_vm0 = vcmp.eq.f32.partialorder %v8489_v1, 0.0 }
 0x3f4   :  { %5731 = vpow2.f32 %v5122_v54  ;;  %v8600_v26 = vsel %vm3148_vm11, -inf, %v8479_v17  ;;  %v8603_v25 = vrot.slane %v1018_v38, %v10085_v43  ;;  %v8608_v61 = vsel %vm3149_vm12, -inf, %v8481_v47 }
 0x3f5   :  { %v8605_v49 = vpop.eup %5715  ;;  %5733 = vpow2.f32 %v1953_v42  ;;  %v8611_v12 = vsel %vm3150_vm13, -inf, %v8483_v59  ;;  %v8614_v35 = vsel %vm3151_vm14, -inf, %v8485_v51  ;;  %v8621_v14 = vsel %vm3152_vm15, -inf, %v8487_v5 }
 0x3f6   :  { %v8616_v20 = vpop.eup %5717  ;;  %v2107_v0 = vsel %vm1410_vm1, %v8605_v49, 0.0  ;;  %v8625_v11 = vsel %vm1410_vm1, %v8596_v46, -inf  ;;  %v8629_v8 = vsel %vm1410_vm1, %v8600_v26, -inf  ;;  %v8638_v62 = vsel %vm3153_vm0, -inf, %v8489_v1 }
 0x3f7   :  { %v8631_v23 = vpop.eup %5719  ;;  %v2108_v18 = vrot.slane %v2107_v0, 4  ;;  %v2114_v37 = vsel %vm1410_vm1, %v8616_v20, 0.0  ;;  %v8646_v63 = vsel %vm1410_vm1, %v8608_v61, -inf  ;;  %v8650_v38 = vsel %vm1410_vm1, %v8611_v12, -inf }
 0x3f8   :  { %v5722_v24 = vpop.eup %5721  ;;  %v2115_v40 = vrot.slane %v2114_v37, 4  ;;  %v2121_v53 = vsel %vm1410_vm1, %v8631_v23, 0.0  ;;  %vm3154_vm2 = vcmp.eq.f32.partialorder %v8493_v55, 0.0 }
 0x3f9   :  { %v4711_v60 = vmul.f32 %v5722_v24, %v8491_v52  ;;  %v4712_v33 = vmul.f32 %v5722_v24, %v8503_v39  ;;  %v4713_v10 = vmul.f32 %v5722_v24, %v8509_v41  ;;  %v4714_v34 = vmul.f32 %v5722_v24, %v8515_v15  ;;  %v8656_v56 = vpop.eup %5723 }
 0x3fa   :  { %v4715_v27 = vmul.f32 %v5722_v24, %v8521_v6  ;;  %v4716_v54 = vmul.f32 %v5722_v24, %v8527_v58  ;;  %v4717_v42 = vmul.f32 %v5722_v24, %v8533_v9  ;;  %v4718_v16 = vmul.f32 %v5722_v24, %v8538_v45  ;;  %v8662_v31 = vpop.eup %5725 }
 0x3fb   :  { %v4778_v52 = vmul.f32 %v4711_v60, %v8256_v57  ;;  %v4779_v39 = vmul.f32 %v4712_v33, %v8259_v21  ;;  %v4780_v41 = vmul.f32 %v4713_v10, %v8270_v44  ;;  %v4781_v15 = vmul.f32 %v4714_v34, %v8280_v28 }
 0x3fc   :  { %v8668_v36 = vpop.eup %5727  ;;  %v4782_v6 = vmul.f32 %v4715_v27, %v8284_v3  ;;  %v4783_v58 = vmul.f32 %v4716_v54, %v8291_v30  ;;  %v4784_v9 = vmul.f32 %v4717_v42, %v8298_v32  ;;  %v4785_v45 = vmul.f32 %v4718_v16, %v8300_v19 }
 0x3fd   :  { %v8674_v24 = vpop.eup %5729  ;;  %v4930_v22 = vrot.slane %v4779_v39, 7  ;;  %v4932_v57 = vrot.slane %v4780_v41, 6  ;;  %v4934_v60 = vrot.slane %v4781_v15, 5  ;;  %v2109_v21 = vadd.f32 %v2108_v18, %v2107_v0 }
 0x3fe   :  { %v8676_v33 = vpop.eup %5731  ;;  %v4936_v44 = vrot.slane %v4782_v6, 4  ;;  %v4938_v28 = vrot.slane %v4783_v58, 3  ;;  %v4940_v10 = vrot.slane %v4784_v9, 2  ;;  %v4942_v34 = vrot.slane %v4785_v45, 1 }
 0x3ff   :  { %v8678_v4 = vpop.eup %5733  ;;  %v4931_v3 = vsel %vm4460_vm3, %v4930_v22, %v4778_v52  ;;  %v5158_v30 = vsel %vm1410_vm1, %v8676_v33, 0.0  ;;  %v2110_v32 = vrot.slane %v2109_v21, 2  ;;  %v2116_v19 = vadd.f32 %v2115_v40, %v2114_v37 }
 0x400   :  { %v4933_v16 = vsel %vm4463_vm4, %v4932_v57, %v4931_v3  ;;  %v5159_v27 = vrot.slane %v5158_v30, 4  ;;  %v2122_v54 = vrot.slane %v2121_v53, 4  ;;  %v2128_v0 = vsel %vm1410_vm1, %v8656_v56, 0.0 }
 0x401   :  { %v4935_v18 = vsel %vm4466_vm5, %v4934_v60, %v4933_v16  ;;  %v2111_v42 = vadd.f32 %v2110_v32, %v2109_v21  ;;  %v2117_v39 = vrot.slane %v2116_v19, 2  ;;  %v2129_v41 = vrot.slane %v2128_v0, 4 }
 0x402   :  { %v4937_v15 = vsel %vm4469_vm6, %v4936_v44, %v4935_v18  ;;  %v5160_v22 = vadd.f32 %v5159_v27, %v5158_v30  ;;  %v2123_v52 = vadd.f32 %v2122_v54, %v2121_v53  ;;  %v2135_v6 = vsel %vm1410_vm1, %v8662_v31, 0.0 }
 0x403   :  { %v4939_v37 = vsel %vm4472_vm7, %v4938_v28, %v4937_v15  ;;  %v2112_v40 = vrot.slane %v2111_v42, 1  ;;  %v2118_v58 = vadd.f32 %v2117_v39, %v2116_v19  ;;  %v2130_v9 = vadd.f32 %v2129_v41, %v2128_v0 }
 0x404   :  { %v4941_v45 = vsel %vm4475_vm8, %v4940_v10, %v4939_v37  ;;  %v5161_v57 = vrot.slane %v5160_v22, 2  ;;  %v2124_v3 = vrot.slane %v2123_v52, 2  ;;  %v2136_v60 = vrot.slane %v2135_v6, 4 }
 0x405   :  { %v4943_v21 = vsel %vm4478_vm9, %v4942_v34, %v4941_v45  ;;  %v2113_v32 = vadd.f32 %v2112_v40, %v2111_v42  ;;  %v2119_v16 = vrot.slane %v2118_v58, 1  ;;  %v2131_v44 = vrot.slane %v2130_v9, 2 }
 0x406   :  { %v5022_v53 = vsel %vm1410_vm1, %v4943_v21, 0.0  ;;  %v5162_v30 = vadd.f32 %v5161_v57, %v5160_v22  ;;  %v2125_v27 = vadd.f32 %v2124_v3, %v2123_v52  ;;  %v2137_v28 = vadd.f32 %v2136_v60, %v2135_v6  ;;  %v189_v52 = vpop.permute.xlu0 %188  ;;  %v261_v21 = vpop.permute.xlu1 %260 }
 0x407   :  { %v5023_v54 = vrot.slane %v5022_v53, 4  ;;  %v2120_v19 = vadd.f32 %v2119_v16, %v2118_v58  ;;  %v2132_v0 = vadd.f32 %v2131_v44, %v2130_v9  ;;  %v2142_v10 = vsel %vm1410_vm1, %v8668_v36, 0.0 }
 0x408   :  { %v5163_v18 = vrot.slane %v5162_v30, 1  ;;  %v2126_v39 = vrot.slane %v2125_v27, 1  ;;  %v2138_v41 = vrot.slane %v2137_v28, 2  ;;  %v2143_v34 = vrot.slane %v2142_v10, 4 }
 0x409   :  { %v5024_v42 = vadd.f32 %v5023_v54, %v5022_v53  ;;  %v2133_v15 = vrot.slane %v2132_v0, 1  ;;  %v2149_v37 = vsel %vm1410_vm1, %v8674_v24, 0.0  ;;  %v2156_v22 = vsel %vm1410_vm1, %v8678_v4, 0.0 }
 0x40a   :  { %v5164_v6 = vadd.f32 %v5163_v18, %v5162_v30  ;;  %v2127_v40 = vadd.f32 %v2126_v39, %v2125_v27  ;;  %v2139_v58 = vadd.f32 %v2138_v41, %v2137_v28  ;;  %v2144_v9 = vadd.f32 %v2143_v34, %v2142_v10  ;;  %v8708_v39 = vpop.permute.xlu0 %236 }
 0x40b   :  { %v5025_v45 = vrot.slane %v5024_v42, 2  ;;  %v2134_v57 = vadd.f32 %v2133_v15, %v2132_v0  ;;  %v2150_v3 = vrot.slane %v2149_v37, 4  ;;  %v2157_v60 = vrot.slane %v2156_v22, 4 }
 0x40c   :  { %5735 = vrcp.f32 %v5164_v6  ;;  %v2140_v16 = vrot.slane %v2139_v58, 1  ;;  %v2145_v44 = vrot.slane %v2144_v9, 2  ;;  %v10096_v53 = vmax.f32 %v8625_v11, %v8629_v8 }
 0x40d   :  { %v5026_v50 = vadd.f32 %v5025_v45, %v5024_v42  ;;  %v2151_v7 = vadd.f32 %v2150_v3, %v2149_v37  ;;  %v2158_v1 = vadd.f32 %v2157_v60, %v2156_v22  ;;  %5737 = vrcp.f32 %v2113_v32 }
 0x40e   :  { %v3286_v54 = vmax.f32 %v10096_v53, %v8646_v63  ;;  %v2141_v30 = vadd.f32 %v2140_v16, %v2139_v58  ;;  %v2146_v27 = vadd.f32 %v2145_v44, %v2144_v9  ;;  %5739 = vrcp.f32 %v2120_v19  ;;  %v309_v19 = vpop.permute.xlu1 %308  ;;  %v8726_v44 = vpop.permute.xlu0 %284 }
 0x40f   :  { %v2152_v0 = vrot.slane %v2151_v7, 2  ;;  %v2159_v10 = vrot.slane %v2158_v1, 2  ;;  %5741 = vrcp.f32 %v2127_v40  ;;  %v3289_v18 = vsel %vm1410_vm1, %v8614_v35, -inf  ;;  %v10097_v40 = vld [vmem:[#allocation7_spill] sm:$0xff] }
 0x410   :  { %v3288_v28 = vmax.f32 %v3286_v54, %v8650_v38  ;;  %v2147_v41 = vrot.slane %v2146_v27, 1  ;;  %5743 = vrcp.f32 %v2134_v57  ;;  %v8713_v11 = vsel %vm3154_vm2, -inf, %v8493_v55 }
 0x411   :  { %v2153_v63 = vadd.f32 %v2152_v0, %v2151_v7  ;;  %v2160_v32 = vadd.f32 %v2159_v10, %v2158_v1  ;;  %5745 = vrcp.f32 %v2141_v30  ;;  %v3291_v38 = vsel %vm1410_vm1, %v8621_v14, -inf }
 0x412   :  { %v3290_v8 = vmax.f32 %v3288_v28, %v3289_v18  ;;  %v5027_v34 = vrot.slane %v5026_v50, 1  ;;  %v2148_v42 = vadd.f32 %v2147_v41, %v2146_v27  ;;  %v3293_v37 = vsel %vm1410_vm1, %v8638_v62, -inf }
 0x413   :  { %v2154_v22 = vrot.slane %v2153_v63, 1  ;;  %v2161_v6 = vrot.slane %v2160_v32, 1  ;;  %v1002_v58 = vcombine.low %v10097_v40, %v189_v52  ;;  %v1003_v9 = vcombine.high %v10097_v40, %v189_v52 }
 0x414   :  { %v3292_v15 = vmax.f32 %v3290_v8, %v3291_v38  ;;  %5747 = vrcp.f32 %v2148_v42  ;;  %v1050_v1 = vcombine.low %v261_v21, %v309_v19  ;;  %v1051_v45 = vcombine.high %v261_v21, %v309_v19 }
 0x415   :  { %v2155_v57 = vadd.f32 %v2154_v22, %v2153_v63  ;;  %v2162_v3 = vadd.f32 %v2161_v6, %v2160_v32  ;;  %v3295_v60 = vsel %vm1410_vm1, %v8713_v11, -inf  ;;  %v8724_v16 = vrot.slane %v1002_v58, %v10085_v43 }
 0x416   :  { %v3294_v7 = vmax.f32 %v3292_v15, %v3293_v37  ;;  %v5736_v53 = vpop.eup %5735  ;;  %v8728_v54 = vadd.f32 %v5027_v34, %v5026_v50  ;;  %v10098_v52 = vcombine.high %v8569_v29, %v8576_v48  ;;  %v8739_v27 = vrot.slane %v1003_v9, %v10085_v43 }
 0x417   :  { %v5738_v28 = vpop.eup %5737  ;;  %v5195_v0 = vmul.f32 %v5736_v53, %v8676_v33  ;;  %5749 = vrcp.f32 %v2155_v57  ;;  %v8743_v10 = vrot.slane %v1050_v1, %v10085_v43  ;;  %v8746_v50 = vrot.slane %v1051_v45, %v10085_v43 }
 0x418   :  { %v8730_v30 = vmax.f32 %v3294_v7, %v3295_v60  ;;  %v8736_v21 = vrot.slane %v10098_v52, %v10085_v43  ;;  %v5740_v18 = vpop.eup %5739  ;;  %5751 = vrcp.f32 %v2162_v3  ;;  %v2571_v41 = vmul.f32 %v5738_v28, %v8605_v49 }
 0x419   :  { %v1066_v29 = vcombine.low %v8724_v16, %v8603_v25  ;;  %v5742_v8 = vpop.eup %5741  ;;  %v5206_v33 = vmul.f32 %v5195_v0, %v8559_v2  ;;  %v2572_v63 = vmul.f32 %v5740_v18, %v8616_v20 }
 0x41a   :  { %v3395_v32 = vsub.f32 %v8596_v46, %v8730_v30  ;;  %v5744_v19 = vpop.eup %5743  ;;  %v2573_v49 = vmul.f32 %v5742_v8, %v8631_v23  ;;  %v2635_v34 = vmul.f32 %v2571_v41, %v8477_v13  ;;  %v3396_v42 = vsub.f32 %v8600_v26, %v8730_v30 }
 0x41b   :  { %v3397_v15 = vsub.f32 %v8608_v61, %v8730_v30  ;;  %v5746_v2 = vpop.eup %5745  ;;  %v5238_v20 = vsel %vm1410_vm1, %v5206_v33, 0.0  ;;  %v2574_v37 = vmul.f32 %v5744_v19, %v8656_v56  ;;  %v2636_v22 = vmul.f32 %v2572_v63, %v8479_v17 }
 0x41c   :  { %v3398_v6 = vsub.f32 %v8611_v12, %v8730_v30  ;;  %v5239_v40 = vrot.slane %v5238_v20, 4  ;;  %v2575_v23 = vmul.f32 %v5746_v2, %v8662_v31  ;;  %v2637_v58 = vmul.f32 %v2573_v49, %v8481_v47 }
 0x41d   :  { %v2747_v9 = vsel %vm1410_vm1, %v2635_v34, 0.0  ;;  %v2638_v7 = vmul.f32 %v2574_v37, %v8483_v59  ;;  %v2754_v45 = vsel %vm1410_vm1, %v2636_v22, 0.0  ;;  %v3399_v56 = vsub.f32 %v8614_v35, %v8730_v30 }
 0x41e   :  { %v2748_v1 = vrot.slane %v2747_v9, 4  ;;  %v5748_v57 = vpop.eup %5747  ;;  %v5240_v3 = vadd.f32 %v5239_v40, %v5238_v20  ;;  %v2639_v60 = vmul.f32 %v2575_v23, %v8485_v51  ;;  %v2755_v53 = vrot.slane %v2754_v45, 4 }
 0x41f   :  { %v2761_v52 = vsel %vm1410_vm1, %v2637_v58, 0.0  ;;  %v2576_v31 = vmul.f32 %v5748_v57, %v8668_v36  ;;  %v2768_v18 = vsel %vm1410_vm1, %v2638_v7, 0.0  ;;  %v10099_v57 = vld [vmem:[#allocation12_spill] sm:$0xff] }
 0x420   :  { %v2749_v28 = vadd.f32 %v2748_v1, %v2747_v9  ;;  %v2762_v0 = vrot.slane %v2761_v52, 4  ;;  %v5241_v41 = vrot.slane %v5240_v3, 2  ;;  %v2756_v8 = vadd.f32 %v2755_v53, %v2754_v45 }
 0x421   :  { %v2769_v33 = vrot.slane %v2768_v18, 4  ;;  %v2775_v63 = vsel %vm1410_vm1, %v2639_v60, 0.0  ;;  %v5750_v19 = vpop.eup %5749  ;;  %v2640_v49 = vmul.f32 %v2576_v31, %v8487_v5 }
 0x422   :  { %v2750_v34 = vrot.slane %v2749_v28, 2  ;;  %v2763_v2 = vadd.f32 %v2762_v0, %v2761_v52  ;;  %v2776_v20 = vrot.slane %v2775_v63, 4  ;;  %v5752_v37 = vpop.eup %5751  ;;  %v5242_v22 = vadd.f32 %v5241_v41, %v5240_v3 }
 0x423   :  { %v2577_v40 = vmul.f32 %v5750_v19, %v8674_v24  ;;  %v2757_v36 = vrot.slane %v2756_v8, 2  ;;  %v2770_v23 = vadd.f32 %v2769_v33, %v2768_v18  ;;  %v2578_v58 = vmul.f32 %v5752_v37, %v8678_v4 }
 0x424   :  { %v2751_v9 = vadd.f32 %v2750_v34, %v2749_v28  ;;  %v2764_v7 = vrot.slane %v2763_v2, 2  ;;  %v2777_v1 = vadd.f32 %v2776_v20, %v2775_v63  ;;  %v5243_v45 = vrot.slane %v5242_v22, 1 }
 0x425   :  { %v2641_v60 = vmul.f32 %v2577_v40, %v10099_v57  ;;  %v2758_v53 = vadd.f32 %v2757_v36, %v2756_v8  ;;  %v2771_v48 = vrot.slane %v2770_v23, 2  ;;  %v3400_v3 = vsub.f32 %v8621_v14, %v8730_v30 }
 0x426   :  { %v2752_v31 = vrot.slane %v2751_v9, 1  ;;  %v2765_v38 = vadd.f32 %v2764_v7, %v2763_v2  ;;  %v2778_v52 = vrot.slane %v2777_v1, 2  ;;  %v2642_v24 = vmul.f32 %v2578_v58, %v8493_v55 }
 0x427   :  { %v2759_v0 = vrot.slane %v2758_v53, 1  ;;  %v2772_v18 = vadd.f32 %v2771_v48, %v2770_v23  ;;  %v2782_v4 = vsel %vm1410_vm1, %v2640_v49, 0.0  ;;  %v3401_v63 = vsub.f32 %v8638_v62, %v8730_v30 }
 0x428   :  { %v2766_v28 = vrot.slane %v2765_v38, 1  ;;  %v2779_v41 = vadd.f32 %v2778_v52, %v2777_v1  ;;  %v2783_v33 = vrot.slane %v2782_v4, 4  ;;  %v5244_v8 = vadd.f32 %v5243_v45, %v5242_v22 }
 0x429   :  { %v2773_v19 = vrot.slane %v2772_v18, 1  ;;  %v2789_v34 = vsel %vm1410_vm1, %v2641_v60, 0.0  ;;  %v3402_v2 = vsub.f32 %v8713_v11, %v8730_v30  ;;  %v8795_v14 = vadd.f32 %v2752_v31, %v2751_v9 }
 0x42a   :  { %v2780_v20 = vrot.slane %v2779_v41, 1  ;;  %v2784_v37 = vadd.f32 %v2783_v33, %v2782_v4  ;;  %v2790_v48 = vrot.slane %v2789_v34, 4  ;;  %v8797_v40 = vadd.f32 %v2759_v0, %v2758_v53 }
 0x42b   :  { %v8799_v49 = vadd.f32 %v2766_v28, %v2765_v38  ;;  %v2796_v36 = vsel %vm1410_vm1, %v2642_v24, 0.0  ;;  %v3467_v62 = vmul.f32 1.442695, %v3395_v32  ;;  %v8805_v22 = vadd.f32 %v2773_v19, %v2772_v18 }
 0x42c   :  { %v2785_v23 = vrot.slane %v2784_v37, 2  ;;  %v2791_v58 = vadd.f32 %v2790_v48, %v2789_v34  ;;  %v2797_v11 = vrot.slane %v2796_v36, 4  ;;  %v8807_v9 = vadd.f32 %v2780_v20, %v2779_v41 }
 0x42d   :  { %5753 = vpow2.f32 %v3467_v62  ;;  %v3469_v7 = vmul.f32 1.442695, %v3396_v42  ;;  %v3471_v38 = vmul.f32 1.442695, %v3397_v15  ;;  %v3473_v32 = vmul.f32 1.442695, %v3398_v6 }
 0x42e   :  { %v2786_v1 = vadd.f32 %v2785_v23, %v2784_v37  ;;  %v2792_v45 = vrot.slane %v2791_v58, 2  ;;  %v2798_v46 = vadd.f32 %v2797_v11, %v2796_v36  ;;  %v3475_v60 = vmul.f32 1.442695, %v3399_v56 }
 0x42f   :  { %5755 = vpow2.f32 %v3469_v7  ;;  %v3477_v53 = vmul.f32 1.442695, %v3400_v3  ;;  %v3479_v31 = vmul.f32 1.442695, %v3401_v63  ;;  %v3481_v61 = vmul.f32 1.442695, %v3402_v2 }
 0x430   :  { %v2787_v26 = vrot.slane %v2786_v1, 1  ;;  %v2793_v42 = vadd.f32 %v2792_v45, %v2791_v58  ;;  %v2799_v52 = vrot.slane %v2798_v46, 2  ;;  %5757 = vpow2.f32 %v3471_v38 }
 0x431   :  { %5759 = vpow2.f32 %v3473_v32  ;;  %vm3963_vm10 = vcmp.eq.f32.partialorder %v8795_v14, 0.0  ;;  %vm3964_vm11 = vcmp.eq.f32.partialorder %v8797_v40, 0.0  ;;  %vm3965_vm12 = vcmp.eq.f32.partialorder %v8799_v49, 0.0 }
 0x432   :  { %v8823_v15 = vadd.f32 %v2787_v26, %v2786_v1  ;;  %v2794_v12 = vrot.slane %v2793_v42, 1  ;;  %v2800_v6 = vadd.f32 %v2799_v52, %v2798_v46  ;;  %5761 = vpow2.f32 %v3475_v60 }
 0x433   :  { %5763 = vpow2.f32 %v3477_v53  ;;  %vm3966_vm13 = vcmp.eq.f32.partialorder %v8805_v22, 0.0  ;;  %vm3967_vm14 = vcmp.eq.f32.partialorder %v8807_v9, 0.0  ;;  %v5270_v56 = vadd.f32 %v5244_v8, %v8728_v54 }
 0x434   :  { %v8828_v35 = vadd.f32 %v2794_v12, %v2793_v42  ;;  %v2801_v30 = vrot.slane %v2800_v6, 1  ;;  %5765 = vpow2.f32 %v3479_v31  ;;  %vm3968_vm15 = vcmp.eq.f32.partialorder %v8823_v15, 0.0  ;;  %v10102_v31 = vld [vmem:[#allocation10_spill] sm:$0xff] }
 0x435   :  { %5767 = vpow2.f32 %v3481_v61  ;;  %v8835_v3 = vsel %vm3963_vm10, -inf, %v8795_v14  ;;  %v8840_v24 = vsel %vm3964_vm11, -inf, %v8797_v40  ;;  %v8846_v18 = vsel %vm3965_vm12, -inf, %v8799_v49 }
 0x436   :  { %v8842_v0 = vadd.f32 %v2801_v30, %v2800_v6  ;;  %vm3969_vm0 = vcmp.eq.f32.partialorder %v8828_v35, 0.0  ;;  %v8849_v54 = vsel %vm3966_vm13, -inf, %v8805_v22  ;;  %v8854_v28 = vsel %vm3967_vm14, -inf, %v8807_v9 }
 0x437   :  { %v8851_v4 = vpop.eup %5753  ;;  %v8857_v41 = vsel %vm3968_vm15, -inf, %v8823_v15  ;;  %v4098_v33 = vsel %vm1410_vm1, %v8835_v3, -inf  ;;  %v4099_v63 = vsel %vm1410_vm1, %v8840_v24, -inf  ;;  %v8867_v19 = vsel %vm3969_vm0, -inf, %v8828_v35 }
 0x438   :  { %10100 = vst [vmem:[#allocation2_spill] sm:$0xff] %v8842_v0  ;;  %v3594_v8 = vsel %vm1410_vm1, %v8851_v4, 0.0  ;;  %vm3970_vm2 = vcmp.eq.f32.partialorder %v8842_v0, 0.0  ;;  %v4100_v34 = vmax.f32 %v4098_v33, %v4099_v63  ;;  %v8871_v20 = vmul.f32 0.005, %v5270_v56 }
 0x439   :  { %v8869_v2 = vpop.eup %5755  ;;  %v8874_v37 = vsel %vm3970_vm2, -inf, %v8842_v0  ;;  %v4101_v48 = vsel %vm1410_vm1, %v8846_v18, -inf  ;;  %v4103_v36 = vsel %vm1410_vm1, %v8849_v54, -inf  ;;  %v4105_v11 = vsel %vm1410_vm1, %v8854_v28, -inf }
 0x43a   :  { %10101 = vst [vmem:[#allocation5_spill] sm:$0xff] %v8871_v20  ;;  %v8880_v62 = vpop.eup %5757  ;;  %v3595_v23 = vsel %vm1410_vm1, %v8869_v2, 0.0  ;;  %v4102_v58 = vmax.f32 %v4100_v34, %v4101_v48  ;;  %v4107_v7 = vsel %vm1410_vm1, %v8857_v41, -inf  ;;  %v4109_v46 = vsel %vm1410_vm1, %v8867_v19, -inf }
 0x43b   :  { %v8888_v38 = vpop.eup %5759  ;;  %v3596_v1 = vadd.f32 %v3595_v23, %v3594_v8  ;;  %v3597_v45 = vsel %vm1410_vm1, %v8880_v62, 0.0  ;;  %v4111_v32 = vsel %vm1410_vm1, %v8874_v37, -inf  ;;  %v1074_v26 = vrot.slane %v1066_v29, %v10102_v31 }
 0x43c   :  { %v8896_v60 = vpop.eup %5761  ;;  %v4104_v53 = vmax.f32 %v4102_v58, %v4103_v36  ;;  %v1082_v42 = vcombine.low %v8739_v27, %v8736_v21  ;;  %v1083_v52 = vcombine.high %v8739_v27, %v8736_v21  ;;  %v10103_v6 = vcombine.high %v8724_v16, %v8603_v25  ;;  %v8931_v36 = vpop.permute.xlu1 %312 }
 0x43d   :  { %v8906_v61 = vpop.eup %5763  ;;  %v3598_v12 = vadd.f32 %v3597_v45, %v3596_v1  ;;  %v1035_v56 = vcombine.high %v8708_v39, %v8726_v44  ;;  %v10104_v29 = vcombine.low %v8708_v39, %v8726_v44  ;;  %v3599_v21 = vsel %vm1410_vm1, %v8888_v38, 0.0  ;;  %10105 = vst [vmem:[#allocation14_spill] sm:$0xff] %v8931_v36 }
 0x43e   :  { %v1081_v30 = vrot.slane %v10103_v6, %v10102_v31  ;;  %v8918_v63 = vpop.eup %5765  ;;  %v3601_v27 = vsel %vm1410_vm1, %v8896_v60, 0.0  ;;  %v3603_v25 = vsel %vm1410_vm1, %v8906_v61, 0.0  ;;  %v4106_v16 = vmax.f32 %v4104_v53, %v4105_v11 }
 0x43f   :  { %v1042_v33 = vrot.slane %v10104_v29, %v10085_v43  ;;  %v8926_v8 = vpop.eup %5767  ;;  %v3600_v34 = vadd.f32 %v3599_v21, %v3598_v12  ;;  %v1090_v48 = vrot.slane %v1082_v42, %v10102_v31  ;;  %v1049_v39 = vrot.slane %v1035_v56, %v10085_v43 }
 0x440   :  { %v3605_v23 = vsel %vm1410_vm1, %v8918_v63, 0.0  ;;  %v4108_v58 = vmax.f32 %v4106_v16, %v4107_v7  ;;  %v1097_v1 = vrot.slane %v1083_v52, %v10102_v31  ;;  %v3607_v6 = vsel %vm1410_vm1, %v8926_v8, 0.0 }
 0x441   :  { %v1098_v44 = vcombine.low %v1042_v33, %v8743_v10  ;;  %v1099_v45 = vcombine.high %v1042_v33, %v8743_v10  ;;  %v3602_v11 = vadd.f32 %v3601_v27, %v3600_v34  ;;  %v1114_v12 = vcombine.low %v1049_v39, %v8746_v50 }
 0x442   :  { %v1115_v42 = vcombine.high %v1049_v39, %v8746_v50  ;;  %v4110_v56 = vmax.f32 %v4108_v58, %v4109_v46 }
 0x443   :  { %v1106_v53 = vrot.slane %v1098_v44, %v10102_v31  ;;  %v1113_v29 = vrot.slane %v1099_v45, %v10102_v31  ;;  %v3604_v16 = vadd.f32 %v3603_v25, %v3602_v11  ;;  %v1122_v52 = vrot.slane %v1114_v12, %v10102_v31 }
 0x444   :  { %v1129_v10 = vrot.slane %v1115_v42, %v10102_v31  ;;  %v4112_v27 = vmax.f32 %v4110_v56, %v4111_v32 }
 0x445   :  { %v8947_v33 = vcombine.low %v1074_v26, %v1106_v53  ;;  %v8949_v34 = vcombine.high %v1074_v26, %v1106_v53  ;;  %v8951_v50 = vcombine.low %v1081_v30, %v1113_v29  ;;  %v8953_v39 = vcombine.high %v1081_v30, %v1113_v29 }
 0x446   :  { %v3606_v46 = vadd.f32 %v3605_v23, %v3604_v16  ;;  %v8955_v44 = vcombine.low %v1090_v48, %v1122_v52  ;;  %v8957_v58 = vcombine.high %v1090_v48, %v1122_v52  ;;  %v8959_v45 = vcombine.low %v1097_v1, %v1129_v10 }
 0x447   :  { %v4211_v25 = vsub.f32 %v8835_v3, %v4112_v27  ;;  %v4212_v11 = vsub.f32 %v8840_v24, %v4112_v27  ;;  %v4213_v12 = vsub.f32 %v8846_v18, %v4112_v27  ;;  %v4214_v32 = vsub.f32 %v8849_v54, %v4112_v27 }
 0x448   :  { %10107 = vst [vmem:[#allocation8_spill] sm:$0xff] %v8959_v45  ;;  %v3608_v26 = vadd.f32 %v3607_v6, %v3606_v46  ;;  %v4215_v53 = vsub.f32 %v8854_v28, %v4112_v27  ;;  %v4216_v30 = vsub.f32 %v8857_v41, %v4112_v27  ;;  %v4217_v23 = vsub.f32 %v8867_v19, %v4112_v27 }
 0x449   :  { %v4218_v48 = vsub.f32 %v8874_v37, %v4112_v27  ;;  %v4283_v42 = vmul.f32 1.442695, %v4211_v25  ;;  %v4285_v56 = vmul.f32 1.442695, %v4212_v11  ;;  %v4287_v29 = vmul.f32 1.442695, %v4213_v12 }
 0x44a   :  { %5769 = vrcp.f32 %v3608_v26  ;;  %v4289_v3 = vmul.f32 1.442695, %v4214_v32  ;;  %v4291_v16 = vmul.f32 1.442695, %v4215_v53  ;;  %v4293_v24 = vmul.f32 1.442695, %v4216_v30 }
 0x44b   :  { %5771 = vpow2.f32 %v4283_v42  ;;  %v4295_v18 = vmul.f32 1.442695, %v4217_v23  ;;  %v4297_v52 = vmul.f32 1.442695, %v4218_v48  ;;  %v8969_v54 = vcombine.high %v1097_v1, %v1129_v10 }
 0x44c   :  { %5773 = vpow2.f32 %v4285_v56  ;;  %v1691_v28 = vsel %vm1410_vm1, %v8947_v33, -inf  ;;  %v1698_v41 = vsel %vm1410_vm1, %v8949_v34, -inf  ;;  %v1705_v19 = vsel %vm1410_vm1, %v8951_v50, -inf }
 0x44d   :  { %10108 = vst [vmem:[#allocation15_spill] sm:$0xff] %v8969_v54  ;;  %5775 = vpow2.f32 %v4287_v29  ;;  %v1692_v37 = vrot.slane %v1691_v28, 4  ;;  %v1699_v6 = vrot.slane %v1698_v41, 4  ;;  %v1706_v27 = vrot.slane %v1705_v19, 4 }
 0x44e   :  { %5777 = vpow2.f32 %v4289_v3  ;;  %v1712_v46 = vsel %vm1410_vm1, %v8953_v39, -inf  ;;  %v1719_v1 = vsel %vm1410_vm1, %v8955_v44, -inf  ;;  %v1726_v10 = vsel %vm1410_vm1, %v8957_v58, -inf }
 0x44f   :  { %5779 = vpow2.f32 %v4291_v16  ;;  %v1693_v25 = vmax.f32 %v1691_v28, %v1692_v37  ;;  %v1700_v11 = vmax.f32 %v1698_v41, %v1699_v6  ;;  %v1707_v12 = vmax.f32 %v1705_v19, %v1706_v27 }
 0x450   :  { %5781 = vpow2.f32 %v4293_v24  ;;  %v1713_v32 = vrot.slane %v1712_v46, 4  ;;  %v1720_v26 = vrot.slane %v1719_v1, 4  ;;  %v1727_v53 = vrot.slane %v1726_v10, 4 }
 0x451   :  { %5783 = vpow2.f32 %v4295_v18  ;;  %v1694_v30 = vrot.slane %v1693_v25, 2  ;;  %v1701_v23 = vrot.slane %v1700_v11, 2  ;;  %v1708_v48 = vrot.slane %v1707_v12, 2 }
 0x452   :  { %5785 = vpow2.f32 %v4297_v52  ;;  %v1714_v42 = vmax.f32 %v1712_v46, %v1713_v32  ;;  %v1721_v56 = vmax.f32 %v1719_v1, %v1720_v26  ;;  %v8983_v29 = vmax.f32 %v1726_v10, %v1727_v53 }
 0x453   :  { %v1695_v3 = vmax.f32 %v1693_v25, %v1694_v30  ;;  %v1702_v7 = vmax.f32 %v1700_v11, %v1701_v23  ;;  %v1709_v43 = vmax.f32 %v1707_v12, %v1708_v48  ;;  %v8987_v16 = vsel %vm1410_vm1, %v8959_v45, -inf }
 0x454   :  { %v5770_v24 = vpop.eup %5769  ;;  %v1715_v28 = vrot.slane %v1714_v42, 2  ;;  %v1722_v41 = vrot.slane %v1721_v56, 2  ;;  %v1729_v18 = vrot.slane %v8983_v29, 2  ;;  %v1734_v19 = vrot.slane %v8987_v16, 4 }
 0x455   :  { %v8991_v37 = vpop.eup %5771  ;;  %v3715_v52 = vmul.f32 %v5770_v24, %v8851_v4  ;;  %v3716_v6 = vmul.f32 %v5770_v24, %v8869_v2  ;;  %v3717_v27 = vmul.f32 %v5770_v24, %v8880_v62  ;;  %v3718_v46 = vmul.f32 %v5770_v24, %v8888_v38 }
 0x456   :  { %v8997_v1 = vpop.eup %5773  ;;  %v3719_v10 = vmul.f32 %v5770_v24, %v8896_v60  ;;  %v3720_v25 = vmul.f32 %v5770_v24, %v8906_v61  ;;  %v3721_v11 = vmul.f32 %v5770_v24, %v8918_v63  ;;  %v3722_v12 = vmul.f32 %v5770_v24, %v8926_v8 }
 0x457   :  { %v9003_v32 = vpop.eup %5775  ;;  %v3779_v4 = vmul.f32 %v3715_v52, %v8477_v13  ;;  %v3780_v2 = vmul.f32 %v3716_v6, %v8479_v17  ;;  %v3781_v62 = vmul.f32 %v3717_v27, %v8481_v47  ;;  %v3782_v38 = vmul.f32 %v3718_v46, %v8483_v59 }
 0x458   :  { %v9009_v26 = vpop.eup %5777  ;;  %v3783_v60 = vmul.f32 %v3719_v10, %v8485_v51  ;;  %v3784_v61 = vmul.f32 %v3720_v25, %v8487_v5  ;;  %v3785_v63 = vmul.f32 %v3721_v11, %v10099_v57  ;;  %v3786_v8 = vmul.f32 %v3722_v12, %v8493_v55 }
 0x459   :  { %v9015_v53 = vpop.eup %5779  ;;  %v3850_v13 = vsel %vm1410_vm1, %v3779_v4, 0.0  ;;  %v3851_v17 = vsel %vm1410_vm1, %v3780_v2, 0.0  ;;  %v3853_v47 = vsel %vm1410_vm1, %v3781_v62, 0.0  ;;  %v3855_v59 = vsel %vm1410_vm1, %v3782_v38, 0.0 }
 0x45a   :  { %v9021_v30 = vpop.eup %5781  ;;  %v3852_v23 = vadd.f32 %v3851_v17, %v3850_v13  ;;  %v3857_v51 = vsel %vm1410_vm1, %v3783_v60, 0.0  ;;  %v3859_v5 = vsel %vm1410_vm1, %v3784_v61, 0.0  ;;  %v3861_v57 = vsel %vm1410_vm1, %v3785_v63, 0.0 }
 0x45b   :  { %v9026_v55 = vpop.eup %5783  ;;  %v3863_v48 = vsel %vm1410_vm1, %v3786_v8, 0.0  ;;  %v4480_v24 = vrot.slane %v8997_v1, 7  ;;  %v4482_v52 = vrot.slane %v9003_v32, 6  ;;  %v4484_v6 = vrot.slane %v9009_v26, 5 }
 0x45c   :  { %v9032_v27 = vpop.eup %5785  ;;  %v3854_v46 = vadd.f32 %v3853_v47, %v3852_v23  ;;  %v4486_v10 = vrot.slane %v9015_v53, 4  ;;  %v4488_v25 = vrot.slane %v9021_v30, 3  ;;  %v4490_v11 = vrot.slane %v9026_v55, 2 }
 0x45d   :  { %v4481_v12 = vsel %vm4460_vm3, %v4480_v24, %v8991_v37  ;;  %v4492_v4 = vrot.slane %v9032_v27, 1  ;;  %v1696_v2 = vrot.slane %v1695_v3, 1  ;;  %v1703_v62 = vrot.slane %v1702_v7, 1 }
 0x45e   :  { %v3856_v38 = vadd.f32 %v3855_v59, %v3854_v46  ;;  %v4483_v60 = vsel %vm4463_vm4, %v4482_v52, %v4481_v12  ;;  %v1710_v61 = vrot.slane %v1709_v43, 1  ;;  %v1716_v63 = vmax.f32 %v1714_v42, %v1715_v28 }
 0x45f   :  { %v4485_v8 = vsel %vm4466_vm5, %v4484_v6, %v4483_v60  ;;  %v1697_v13 = vmax.f32 %v1695_v3, %v1696_v2  ;;  %v1704_v17 = vmax.f32 %v1702_v7, %v1703_v62  ;;  %v1723_v47 = vmax.f32 %v1721_v56, %v1722_v41 }
 0x460   :  { %v3858_v23 = vadd.f32 %v3857_v51, %v3856_v38  ;;  %v4487_v20 = vsel %vm4469_vm6, %v4486_v10, %v4485_v8  ;;  %v1711_v31 = vmax.f32 %v1709_v43, %v1710_v61  ;;  %v1717_v21 = vrot.slane %v1716_v63, 1 }
 0x461   :  { %v4489_v24 = vsel %vm4472_vm7, %v4488_v25, %v4487_v20  ;;  %v1724_v36 = vrot.slane %v1723_v47, 1  ;;  %v1730_v0 = vmax.f32 %v8983_v29, %v1729_v18  ;;  %v1735_v59 = vmax.f32 %v8987_v16, %v1734_v19 }
 0x462   :  { %v3860_v52 = vadd.f32 %v3859_v5, %v3858_v23  ;;  %v4491_v42 = vsel %vm4475_vm8, %v4490_v11, %v4489_v24  ;;  %v1718_v28 = vmax.f32 %v1716_v63, %v1717_v21  ;;  %v1740_v7 = vsel %vm1410_vm1, %v8969_v54, -inf }
 0x463   :  { %v4493_v56 = vsel %vm4478_vm9, %v4492_v4, %v4491_v42  ;;  %v1725_v3 = vmax.f32 %v1723_v47, %v1724_v36  ;;  %v1731_v41 = vrot.slane %v1730_v0, 1  ;;  %v1736_v43 = vrot.slane %v1735_v59, 2 }
 0x464   :  { %v3862_v51 = vadd.f32 %v3861_v57, %v3860_v52  ;;  %v4593_v20 = vsel %vm1410_vm1, %v4493_v56, 0.0  ;;  %v1741_v6 = vrot.slane %v1740_v7, 4  ;;  %v1899_v29 = vsub.f32 %v8947_v33, %v1697_v13 }
 0x465   :  { %v4594_v18 = vrot.slane %v4593_v20, 4  ;;  %v1732_v16 = vmax.f32 %v1730_v0, %v1731_v41  ;;  %v1737_v19 = vmax.f32 %v1735_v59, %v1736_v43  ;;  %v1900_v5 = vsub.f32 %v8949_v34, %v1704_v17  ;;  %v10109_v41 = vld [vmem:[#allocation13_spill] sm:$0xff] }
 0x466   :  { %v9053_v21 = vadd.f32 %v3863_v48, %v3862_v51  ;;  %v1742_v46 = vmax.f32 %v1740_v7, %v1741_v6  ;;  %v1901_v10 = vsub.f32 %v8951_v50, %v1711_v31  ;;  %v1902_v36 = vsub.f32 %v8953_v39, %v1718_v28 }
 0x467   :  { %v4595_v25 = vadd.f32 %v4594_v18, %v4593_v20  ;;  %v1738_v11 = vrot.slane %v1737_v19, 1  ;;  %v1903_v57 = vsub.f32 %v8955_v44, %v1725_v3  ;;  %v1904_v12 = vsub.f32 %v8957_v58, %v1732_v16 }
 0x468   :  { %v5057_v4 = vsel %vm1410_vm1, %v9053_v21, -inf  ;;  %v1743_v0 = vrot.slane %v1742_v46, 2  ;;  %v2003_v2 = vmul.f32 1.442695, %v1899_v29  ;;  %v2005_v62 = vmul.f32 1.442695, %v1900_v5 }
 0x469   :  { %v4596_v38 = vrot.slane %v4595_v25, 2  ;;  %v5058_v48 = vrot.slane %v5057_v4, 4  ;;  %v1739_v60 = vmax.f32 %v1737_v19, %v1738_v11  ;;  %v2007_v61 = vmul.f32 1.442695, %v1901_v10 }
 0x46a   :  { %v1744_v63 = vmax.f32 %v1742_v46, %v1743_v0  ;;  %5787 = vpow2.f32 %v2003_v2  ;;  %v2009_v31 = vmul.f32 1.442695, %v1902_v36  ;;  %v2011_v8 = vmul.f32 1.442695, %v1903_v57 }
 0x46b   :  { %v4597_v13 = vadd.f32 %v4596_v38, %v4595_v25  ;;  %v5059_v17 = vmax.f32 %v5057_v4, %v5058_v48  ;;  %v1905_v47 = vsub.f32 %v8959_v45, %v1739_v60  ;;  %5789 = vpow2.f32 %v2005_v62 }
 0x46c   :  { %v1745_v23 = vrot.slane %v1744_v63, 1  ;;  %5791 = vpow2.f32 %v2007_v61  ;;  %v2013_v24 = vmul.f32 1.442695, %v1904_v12  ;;  %vm3179_vm10 = vcmp.eq.f32.partialorder %v8947_v33, 0.0 }
 0x46d   :  { %v4598_v59 = vrot.slane %v4597_v13, 1  ;;  %v5060_v52 = vrot.slane %v5059_v17, 2  ;;  %5793 = vpow2.f32 %v2009_v31  ;;  %v2015_v42 = vmul.f32 1.442695, %v1905_v47 }
 0x46e   :  { %v1746_v28 = vmax.f32 %v1744_v63, %v1745_v23  ;;  %5795 = vpow2.f32 %v2011_v8  ;;  %vm3180_vm11 = vcmp.eq.f32.partialorder %v8949_v34, 0.0  ;;  %vm3181_vm12 = vcmp.eq.f32.partialorder %v8951_v50, 0.0 }
 0x46f   :  { %v4599_v7 = vadd.f32 %v4598_v59, %v4597_v13  ;;  %v5061_v56 = vmax.f32 %v5059_v17, %v5060_v52  ;;  %5797 = vpow2.f32 %v2013_v24  ;;  %vm3182_vm13 = vcmp.eq.f32.partialorder %v8953_v39, 0.0 }
 0x470   :  { %v1906_v3 = vsub.f32 %v8969_v54, %v1746_v28  ;;  %5799 = vpow2.f32 %v2015_v42  ;;  %vm3183_vm14 = vcmp.eq.f32.partialorder %v8955_v44, 0.0  ;;  %vm3184_vm15 = vcmp.eq.f32.partialorder %v8957_v58, 0.0 }
 0x471   :  { %v4649_v43 = vrot.slane %v4599_v7, %v10109_v41  ;;  %v5062_v51 = vrot.slane %v5061_v56, 1  ;;  %vm3185_vm0 = vcmp.eq.f32.partialorder %v8959_v45, 0.0  ;;  %vm3186_vm2 = vcmp.eq.f32.partialorder %v8969_v54, 0.0 }
 0x472   :  { %v2017_v20 = vmul.f32 1.442695, %v1906_v3  ;;  %v9075_v6 = vsel %vm3179_vm10, -inf, %v8947_v33  ;;  %v9080_v29 = vsel %vm3180_vm11, -inf, %v8949_v34  ;;  %v9085_v18 = vsel %vm3181_vm12, -inf, %v8951_v50 }
 0x473   :  { %5801 = vrcp.f32 %v4649_v43  ;;  %v5063_v16 = vmax.f32 %v5061_v56, %v5062_v51  ;;  %v9088_v19 = vsel %vm3182_vm13, -inf, %v8953_v39  ;;  %v9091_v5 = vsel %vm3183_vm14, -inf, %v8955_v44 }
 0x474   :  { %v9093_v46 = vpop.eup %5787  ;;  %5803 = vpow2.f32 %v2017_v20  ;;  %v9096_v10 = vsel %vm3184_vm15, -inf, %v8957_v58  ;;  %v9099_v36 = vsel %vm3185_vm0, -inf, %v8959_v45  ;;  %v9102_v25 = vsel %vm3186_vm2, -inf, %v8969_v54 }
 0x475   :  { %v9104_v11 = vpop.eup %5789  ;;  %v5107_v57 = vsub.f32 %v9053_v21, %v5063_v16  ;;  %v2331_v12 = vsel %vm1410_vm1, %v9093_v46, 0.0  ;;  %v3342_v4 = vsel %vm1410_vm1, %v9075_v6, -inf  ;;  %v3343_v0 = vsel %vm1410_vm1, %v9080_v29, -inf }
 0x476   :  { %v9113_v2 = vpop.eup %5791  ;;  %v2332_v62 = vrot.slane %v2331_v12, 4  ;;  %v2338_v38 = vsel %vm1410_vm1, %v9104_v11, 0.0  ;;  %v3344_v48 = vmax.f32 %v3342_v4, %v3343_v0  ;;  %v3345_v60 = vsel %vm1410_vm1, %v9085_v18, -inf }
 0x477   :  { %v9119_v61 = vpop.eup %5793  ;;  %v5116_v63 = vmul.f32 1.442695, %v5107_v57  ;;  %v2339_v31 = vrot.slane %v2338_v38, 4  ;;  %v2345_v8 = vsel %vm1410_vm1, %v9113_v2, 0.0  ;;  %v9125_v13 = vsel %vm1410_vm1, %v9088_v19, -inf }
 0x478   :  { %v9127_v17 = vpop.eup %5795  ;;  %v2333_v47 = vadd.f32 %v2332_v62, %v2331_v12  ;;  %v2346_v23 = vrot.slane %v2345_v8, 4  ;;  %v2352_v24 = vsel %vm1410_vm1, %v9119_v61, 0.0  ;;  %v9131_v59 = vmax.f32 %v3344_v48, %v3345_v60 }
 0x479   :  { %v9133_v52 = vpop.eup %5797  ;;  %5805 = vpow2.f32 %v5116_v63  ;;  %v2340_v42 = vadd.f32 %v2339_v31, %v2338_v38  ;;  %v2353_v28 = vrot.slane %v2352_v24, 4  ;;  %v2359_v7 = vsel %vm1410_vm1, %v9127_v17, 0.0 }
 0x47a   :  { %v9137_v56 = vpop.eup %5799  ;;  %v2334_v3 = vrot.slane %v2333_v47, 2  ;;  %v2347_v43 = vadd.f32 %v2346_v23, %v2345_v8  ;;  %v2360_v51 = vrot.slane %v2359_v7, 4  ;;  %v2366_v20 = vsel %vm1410_vm1, %v9133_v52, 0.0 }
 0x47b   :  { %v2341_v16 = vrot.slane %v2340_v42, 2  ;;  %v2354_v57 = vadd.f32 %v2353_v28, %v2352_v24  ;;  %v2367_v12 = vrot.slane %v2366_v20, 4  ;;  %v2373_v4 = vsel %vm1410_vm1, %v9137_v56, 0.0 }
 0x47c   :  { %v2335_v0 = vadd.f32 %v2334_v3, %v2333_v47  ;;  %v2348_v62 = vrot.slane %v2347_v43, 2  ;;  %v2361_v38 = vadd.f32 %v2360_v51, %v2359_v7  ;;  %v2374_v48 = vrot.slane %v2373_v4, 4 }
 0x47d   :  { %v5802_v60 = vpop.eup %5801  ;;  %v2342_v63 = vadd.f32 %v2341_v16, %v2340_v42  ;;  %v2355_v31 = vrot.slane %v2354_v57, 2  ;;  %v2368_v41 = vadd.f32 %v2367_v12, %v2366_v20  ;;  %v10110_v12 = vld [vmem:[#allocation2_spill] sm:$0xff] }
 0x47e   :  { %v9145_v23 = vpop.eup %5803  ;;  %v4684_v54 = vmul.f32 %v5802_v60, %v8991_v37  ;;  %v4685_v24 = vmul.f32 %v5802_v60, %v8997_v1  ;;  %v4686_v28 = vmul.f32 %v5802_v60, %v9003_v32  ;;  %v4687_v47 = vmul.f32 %v5802_v60, %v9009_v26 }
 0x47f   :  { %v4688_v7 = vmul.f32 %v5802_v60, %v9015_v53  ;;  %v4689_v3 = vmul.f32 %v5802_v60, %v9021_v30  ;;  %v4690_v42 = vmul.f32 %v5802_v60, %v9026_v55  ;;  %v4691_v51 = vmul.f32 %v5802_v60, %v9032_v27 }
 0x480   :  { %v4754_v20 = vmul.f32 %v4684_v54, %v8795_v14  ;;  %v4755_v16 = vmul.f32 %v4685_v24, %v8797_v40  ;;  %v4756_v37 = vmul.f32 %v4686_v28, %v8799_v49  ;;  %v4757_v1 = vmul.f32 %v4687_v47, %v8805_v22 }
 0x481   :  { %v4758_v32 = vmul.f32 %v4688_v7, %v8807_v9  ;;  %v4759_v26 = vmul.f32 %v4689_v3, %v8823_v15  ;;  %v4760_v53 = vmul.f32 %v4690_v42, %v8828_v35  ;;  %v4761_v30 = vmul.f32 %v4691_v51, %v10110_v12 }
 0x482   :  { %v4888_v8 = vrot.slane %v4755_v16, 7  ;;  %v4890_v55 = vrot.slane %v4756_v37, 6  ;;  %v4892_v45 = vrot.slane %v4757_v1, 5  ;;  %v2336_v27 = vrot.slane %v2335_v0, 1 }
 0x483   :  { %v9163_v60 = vpop.eup %5805  ;;  %v4894_v14 = vrot.slane %v4758_v32, 4  ;;  %v4896_v40 = vrot.slane %v4759_v26, 3  ;;  %v4898_v54 = vrot.slane %v4760_v53, 2  ;;  %v4900_v49 = vrot.slane %v4761_v30, 1 }
 0x484   :  { %v4889_v22 = vsel %vm4460_vm3, %v4888_v8, %v4754_v20  ;;  %v5137_v9 = vsel %vm1410_vm1, %v9163_v60, 0.0  ;;  %v2337_v15 = vadd.f32 %v2336_v27, %v2335_v0  ;;  %v2343_v24 = vrot.slane %v2342_v63, 1 }
 0x485   :  { %v4891_v35 = vsel %vm4463_vm4, %v4890_v55, %v4889_v22  ;;  %v5138_v28 = vrot.slane %v5137_v9, 4  ;;  %v2349_v47 = vadd.f32 %v2348_v62, %v2347_v43  ;;  %v2356_v7 = vadd.f32 %v2355_v31, %v2354_v57 }
 0x486   :  { %v4893_v3 = vsel %vm4466_vm5, %v4892_v45, %v4891_v35  ;;  %v2344_v42 = vadd.f32 %v2343_v24, %v2342_v63  ;;  %v2362_v51 = vrot.slane %v2361_v38, 2  ;;  %v2369_v16 = vrot.slane %v2368_v41, 2 }
 0x487   :  { %v4895_v37 = vsel %vm4469_vm6, %v4894_v14, %v4893_v3  ;;  %v5139_v1 = vadd.f32 %v5138_v28, %v5137_v9  ;;  %v2350_v32 = vrot.slane %v2349_v47, 1  ;;  %v2357_v8 = vrot.slane %v2356_v7, 1 }
 0x488   :  { %v4897_v20 = vsel %vm4472_vm7, %v4896_v40, %v4895_v37  ;;  %v2363_v26 = vadd.f32 %v2362_v51, %v2361_v38  ;;  %v2370_v0 = vadd.f32 %v2369_v16, %v2368_v41  ;;  %v2375_v53 = vadd.f32 %v2374_v48, %v2373_v4  ;;  %v9184_v51 = vpop.permute.xlu0 %288 }
 0x489   :  { %v4899_v12 = vsel %vm4475_vm8, %v4898_v54, %v4897_v20  ;;  %v5140_v30 = vrot.slane %v5139_v1, 2  ;;  %v2351_v43 = vadd.f32 %v2350_v32, %v2349_v47  ;;  %v2358_v57 = vadd.f32 %v2357_v8, %v2356_v7  ;;  %v10114_v32 = vld [vmem:[#allocation10_spill] sm:$0xff]  ;;  %v10116_v20 = vld [vmem:[#allocation27_spill] sm:$0xff] }
 0x48a   :  { %v4901_v45 = vsel %vm4478_vm9, %v4900_v49, %v4899_v12  ;;  %v2364_v62 = vrot.slane %v2363_v26, 1  ;;  %v2371_v63 = vrot.slane %v2370_v0, 1  ;;  %v2376_v31 = vrot.slane %v2375_v53, 2  ;;  %v10115_v8 = vld [vmem:[#allocation26_spill] sm:$0xff] }
 0x48b   :  { %v5001_v55 = vsel %vm1410_vm1, %v4901_v45, 0.0  ;;  %v5141_v27 = vadd.f32 %v5140_v30, %v5139_v1  ;;  %v2380_v14 = vsel %vm1410_vm1, %v9145_v23, 0.0  ;;  %5807 = vrcp.f32 %v2337_v15  ;;  %v10112_v1 = vld [vmem:[#allocation14_spill] sm:$0xff] }
 0x48c   :  { %v5002_v38 = vrot.slane %v5001_v55, 4  ;;  %v2365_v41 = vadd.f32 %v2364_v62, %v2363_v26  ;;  %v2372_v4 = vadd.f32 %v2371_v63, %v2370_v0  ;;  %v2377_v48 = vadd.f32 %v2376_v31, %v2375_v53  ;;  %v10119_v62 = vld [vmem:[#allocation5_spill] sm:$0xff] }
 0x48d   :  { %v5142_v40 = vrot.slane %v5141_v27, 1  ;;  %v2381_v54 = vrot.slane %v2380_v14, 4  ;;  %5809 = vrcp.f32 %v2344_v42  ;;  %v3349_v49 = vsel %vm1410_vm1, %v9091_v5, -inf }
 0x48e   :  { %v5003_v22 = vadd.f32 %v5002_v38, %v5001_v55  ;;  %v2378_v9 = vrot.slane %v2377_v48, 1  ;;  %5811 = vrcp.f32 %v2351_v43  ;;  %v10111_v24 = vmax.f32 %v9131_v59, %v9125_v13  ;;  %v10113_v13 = vld [vmem:[#allocation16_spill] sm:$0xff] }
 0x48f   :  { %v5143_v28 = vadd.f32 %v5142_v40, %v5141_v27  ;;  %v2382_v47 = vadd.f32 %v2381_v54, %v2380_v14  ;;  %5813 = vrcp.f32 %v2358_v57  ;;  %v3351_v15 = vsel %vm1410_vm1, %v9096_v10, -inf  ;;  %v10118_v57 = vld [vmem:[#allocation23_spill] sm:$0xff]  ;;  %v10120_v27 = vld [vmem:[#allocation9_spill] sm:$0xff] }
 0x490   :  { %v3350_v35 = vmax.f32 %v10111_v24, %v3349_v49  ;;  %v5004_v7 = vrot.slane %v5003_v22, 2  ;;  %v2379_v3 = vadd.f32 %v2378_v9, %v2377_v48  ;;  %5815 = vrcp.f32 %v2365_v41 }
 0x491   :  { %5817 = vrcp.f32 %v5143_v28  ;;  %v2383_v16 = vrot.slane %v2382_v47, 2  ;;  %v3353_v37 = vsel %vm1410_vm1, %v9099_v36, -inf  ;;  %v1323_v59 = vcombine.high %v10113_v13, %v10112_v1 }
 0x492   :  { %v3352_v42 = vmax.f32 %v3350_v35, %v3351_v15  ;;  %v10117_v26 = vcombine.high %v10115_v8, %v10116_v20  ;;  %v5005_v53 = vadd.f32 %v5004_v7, %v5003_v22  ;;  %5819 = vrcp.f32 %v2372_v4 }
 0x493   :  { %v2384_v30 = vadd.f32 %v2383_v16, %v2382_v47  ;;  %5821 = vrcp.f32 %v2379_v3  ;;  %v3355_v43 = vsel %vm1410_vm1, %v9102_v25, -inf  ;;  %v1306_v45 = vcombine.low %v10118_v57, %v9184_v51 }
 0x494   :  { %v9194_v0 = vrot.slane %v10117_v26, %v10114_v32  ;;  %v3354_v12 = vmax.f32 %v3352_v42, %v3353_v37  ;;  %v5006_v31 = vrot.slane %v5005_v53, 1  ;;  %v10121_v14 = vcombine.low %v10113_v13, %v10112_v1 }
 0x495   :  { %v5808_v41 = vpop.eup %5807  ;;  %v2385_v4 = vrot.slane %v2384_v30, 1  ;;  %v9210_v48 = vrot.slane %v1323_v59, %v10120_v27  ;;  %v1307_v40 = vcombine.high %v10118_v57, %v9184_v51  ;;  %v9215_v54 = vrot.slane %v1306_v45, %v10120_v27 }
 0x496   :  { %v9201_v55 = vmax.f32 %v3354_v12, %v3355_v43  ;;  %v9207_v38 = vrot.slane %v10121_v14, %v10120_v27  ;;  %v9217_v49 = vadd.f32 %v5006_v31, %v5005_v53  ;;  %v2603_v22 = vmul.f32 %v5808_v41, %v9093_v46 }
 0x497   :  { %v5810_v35 = vpop.eup %5809  ;;  %v2386_v28 = vadd.f32 %v2385_v4, %v2384_v30 }
 0x498   :  { %v3427_v9 = vsub.f32 %v9075_v6, %v9201_v55  ;;  %v3428_v24 = vsub.f32 %v9080_v29, %v9201_v55  ;;  %v3429_v47 = vsub.f32 %v9085_v18, %v9201_v55  ;;  %v3430_v15 = vsub.f32 %v9088_v19, %v9201_v55  ;;  %v5812_v3 = vpop.eup %5811 }
 0x499   :  { %v3431_v7 = vsub.f32 %v9091_v5, %v9201_v55  ;;  %v2604_v46 = vmul.f32 %v5810_v35, %v9104_v11  ;;  %v2667_v42 = vmul.f32 %v2603_v22, %v8947_v33  ;;  %v3432_v6 = vsub.f32 %v9096_v10, %v9201_v55  ;;  %v5814_v16 = vpop.eup %5813 }
 0x49a   :  { %v3433_v29 = vsub.f32 %v9099_v36, %v9201_v55  ;;  %5823 = vrcp.f32 %v2386_v28  ;;  %v2605_v37 = vmul.f32 %v5812_v3, %v9113_v2  ;;  %v3434_v1 = vsub.f32 %v9102_v25, %v9201_v55  ;;  %v5816_v59 = vpop.eup %5815  ;;  %v10125_v25 = vld [vmem:[#allocation24_spill] sm:$0xff] }
 0x49b   :  { %v3531_v13 = vmul.f32 1.442695, %v3427_v9  ;;  %v2606_v8 = vmul.f32 %v5814_v16, %v9119_v61  ;;  %v2668_v11 = vmul.f32 %v2604_v46, %v8949_v34  ;;  %v2971_v20 = vsel %vm1410_vm1, %v2667_v42, 0.0  ;;  %v5818_v53 = vpop.eup %5817 }
 0x49c   :  { %v3533_v26 = vmul.f32 1.442695, %v3428_v24  ;;  %v2607_v12 = vmul.f32 %v5816_v59, %v9127_v17  ;;  %v2669_v30 = vmul.f32 %v2605_v37, %v8951_v50  ;;  %v2972_v43 = vrot.slane %v2971_v20, 4  ;;  %v5820_v2 = vpop.eup %5819 }
 0x49d   :  { %5825 = vpow2.f32 %v3531_v13  ;;  %v5189_v45 = vmul.f32 %v5818_v53, %v9163_v60  ;;  %v2670_v31 = vmul.f32 %v2606_v8, %v8953_v39  ;;  %v2978_v14 = vsel %vm1410_vm1, %v2668_v11, 0.0  ;;  %v5822_v61 = vpop.eup %5821 }
 0x49e   :  { %5827 = vpow2.f32 %v3533_v26  ;;  %v2608_v41 = vmul.f32 %v5820_v2, %v9133_v52  ;;  %v2671_v4 = vmul.f32 %v2607_v12, %v8955_v44  ;;  %v2973_v22 = vadd.f32 %v2972_v43, %v2971_v20  ;;  %v10122_v52 = vld [vmem:[#allocation8_spill] sm:$0xff] }
 0x49f   :  { %v2979_v9 = vrot.slane %v2978_v14, 4  ;;  %v5203_v17 = vmul.f32 %v5189_v45, %v9053_v21  ;;  %v2609_v24 = vmul.f32 %v5822_v61, %v9137_v56  ;;  %v2985_v35 = vsel %vm1410_vm1, %v2669_v30, 0.0 }
 0x4a0   :  { %v2992_v60 = vsel %vm1410_vm1, %v2670_v31, 0.0  ;;  %v2672_v28 = vmul.f32 %v2608_v41, %v8957_v58  ;;  %v2974_v3 = vrot.slane %v2973_v22, 2  ;;  %v2986_v42 = vrot.slane %v2985_v35, 4 }
 0x4a1   :  { %v2980_v46 = vadd.f32 %v2979_v9, %v2978_v14  ;;  %v5217_v16 = vsel %vm1410_vm1, %v5203_v17, 0.0  ;;  %v2673_v37 = vmul.f32 %v2609_v24, %v10122_v52  ;;  %v2993_v13 = vrot.slane %v2992_v60, 4 }
 0x4a2   :  { %v2999_v59 = vsel %vm1410_vm1, %v2671_v4, 0.0  ;;  %v5218_v8 = vrot.slane %v5217_v16, 4  ;;  %v2975_v21 = vadd.f32 %v2974_v3, %v2973_v22  ;;  %v2987_v56 = vadd.f32 %v2986_v42, %v2985_v35 }
 0x4a3   :  { %v2981_v11 = vrot.slane %v2980_v46, 2  ;;  %v2994_v20 = vadd.f32 %v2993_v13, %v2992_v60  ;;  %v3000_v26 = vrot.slane %v2999_v59, 4  ;;  %v3006_v53 = vsel %vm1410_vm1, %v2672_v28, 0.0  ;;  %v10123_v28 = vld [vmem:[#allocation15_spill] sm:$0xff] }
 0x4a4   :  { %v3013_v12 = vsel %vm1410_vm1, %v2673_v37, 0.0  ;;  %v5824_v30 = vpop.eup %5823  ;;  %v5219_v43 = vadd.f32 %v5218_v8, %v5217_v16  ;;  %v2976_v2 = vrot.slane %v2975_v21, 1  ;;  %v2988_v31 = vrot.slane %v2987_v56, 2 }
 0x4a5   :  { %v2982_v45 = vadd.f32 %v2981_v11, %v2980_v46  ;;  %v2610_v14 = vmul.f32 %v5824_v30, %v9145_v23  ;;  %v2995_v61 = vrot.slane %v2994_v20, 2  ;;  %v3001_v41 = vadd.f32 %v3000_v26, %v2999_v59 }
 0x4a6   :  { %v3007_v4 = vrot.slane %v3006_v53, 4  ;;  %v5220_v22 = vrot.slane %v5219_v43, 2  ;;  %v9262_v17 = vadd.f32 %v2976_v2, %v2975_v21  ;;  %v2989_v35 = vadd.f32 %v2988_v31, %v2987_v56 }
 0x4a7   :  { %v9260_v9 = vpop.eup %5825  ;;  %v2983_v24 = vrot.slane %v2982_v45, 1  ;;  %v2674_v3 = vmul.f32 %v2610_v14, %v10123_v28  ;;  %v2996_v42 = vadd.f32 %v2995_v61, %v2994_v20  ;;  %v3002_v16 = vrot.slane %v3001_v41, 2 }
 0x4a8   :  { %v9264_v60 = vpop.eup %5827  ;;  %v3008_v46 = vadd.f32 %v3007_v4, %v3006_v53  ;;  %v5221_v37 = vadd.f32 %v5220_v22, %v5219_v43  ;;  %v2990_v23 = vrot.slane %v2989_v35, 1  ;;  %v3014_v59 = vrot.slane %v3013_v12, 4 }
 0x4a9   :  { %v9267_v13 = vadd.f32 %v2983_v24, %v2982_v45  ;;  %v2997_v8 = vrot.slane %v2996_v42, 1  ;;  %v3003_v11 = vadd.f32 %v3002_v16, %v3001_v41  ;;  %v3020_v21 = vsel %vm1410_vm1, %v2674_v3, 0.0 }
 0x4aa   :  { %v3009_v26 = vrot.slane %v3008_v46, 2  ;;  %v5222_v30 = vrot.slane %v5221_v37, 1  ;;  %v9270_v2 = vadd.f32 %v2990_v23, %v2989_v35  ;;  %v3015_v56 = vadd.f32 %v3014_v59, %v3013_v12 }
 0x4ab   :  { %v3021_v31 = vrot.slane %v3020_v21, 4  ;;  %v9272_v63 = vadd.f32 %v2997_v8, %v2996_v42  ;;  %v3004_v20 = vrot.slane %v3003_v11, 1  ;;  %v3535_v53 = vmul.f32 1.442695, %v3429_v47  ;;  %v10129_v8 = vld [vmem:[#allocation22_spill] sm:$0xff] }
 0x4ac   :  { %v3010_v14 = vadd.f32 %v3009_v26, %v3008_v46  ;;  %v5223_v43 = vadd.f32 %v5222_v30, %v5221_v37  ;;  %v3016_v45 = vrot.slane %v3015_v56, 2  ;;  %v3537_v41 = vmul.f32 1.442695, %v3430_v15  ;;  %v10127_v46 = vld [vmem:[#allocation11_spill] sm:$0xff] }
 0x4ad   :  { %v3022_v61 = vadd.f32 %v3021_v31, %v3020_v21  ;;  %v9280_v4 = vadd.f32 %v3004_v20, %v3003_v11  ;;  %5829 = vpow2.f32 %v3535_v53  ;;  %v3539_v12 = vmul.f32 1.442695, %v3431_v7 }
 0x4ae   :  { %v3011_v22 = vrot.slane %v3010_v14, 1  ;;  %v5267_v24 = vadd.f32 %v5223_v43, %v9217_v49  ;;  %v3017_v35 = vadd.f32 %v3016_v45, %v3015_v56  ;;  %5831 = vpow2.f32 %v3537_v41 }
 0x4af   :  { %v3023_v18 = vrot.slane %v3022_v61, 2  ;;  %5833 = vpow2.f32 %v3539_v12  ;;  %v3541_v19 = vmul.f32 1.442695, %v3432_v6  ;;  %v3543_v15 = vmul.f32 1.442695, %v3433_v29 }
 0x4b0   :  { %v9286_v47 = vadd.f32 %v3011_v22, %v3010_v14  ;;  %v5275_v3 = vmul.f32 0.005, %v5267_v24  ;;  %v3018_v42 = vrot.slane %v3017_v35, 1  ;;  %v3545_v49 = vmul.f32 1.442695, %v3434_v1 }
 0x4b1   :  { %v3024_v5 = vadd.f32 %v3023_v18, %v3022_v61  ;;  %5835 = vpow2.f32 %v3541_v19  ;;  %v3654_v7 = vsel %vm1410_vm1, %v9260_v9, 0.0  ;;  %v3655_v16 = vsel %vm1410_vm1, %v9264_v60, 0.0 }
 0x4b2   :  { %vm3995_vm10 = vcmp.eq.f32.partialorder %v9262_v17, 0.0  ;;  %v5290_v10 = vrot.slane %v5275_v3, 7  ;;  %v9302_v6 = vadd.f32 %v3018_v42, %v3017_v35  ;;  %5837 = vpow2.f32 %v3543_v15 }
 0x4b3   :  { %v3025_v36 = vrot.slane %v3024_v5, 1  ;;  %5839 = vpow2.f32 %v3545_v49  ;;  %v3656_v29 = vadd.f32 %v3655_v16, %v3654_v7  ;;  %vm3996_vm11 = vcmp.eq.f32.partialorder %v9267_v13, 0.0 }
 0x4b4   :  { %10124 = vst [vmem:[#allocation17_spill] sm:$0xff] %v9302_v6  ;;  %vm3997_vm12 = vcmp.eq.f32.partialorder %v9270_v2, 0.0  ;;  %v5291_v55 = vsel %vm4460_vm3, %v5290_v10, %v10125_v25  ;;  %vm3998_vm13 = vcmp.eq.f32.partialorder %v9272_v63, 0.0  ;;  %vm3999_vm14 = vcmp.eq.f32.partialorder %v9280_v4, 0.0 }
 0x4b5   :  { %v9308_v1 = vadd.f32 %v3025_v36, %v3024_v5  ;;  %v10128_v37 = vrot.slane %v10127_v46, 6  ;;  %vm4000_vm15 = vcmp.eq.f32.partialorder %v9286_v47, 0.0  ;;  %vm4001_vm0 = vcmp.eq.f32.partialorder %v9302_v6, 0.0 }
 0x4b6   :  { %v9320_v59 = vsel %vm3995_vm10, -inf, %v9262_v17  ;;  %v10130_v11 = vrot.slane %v10129_v8, 5  ;;  %v9327_v21 = vsel %vm3996_vm11, -inf, %v9267_v13  ;;  %v1321_v30 = vrot.slane %v1307_v40, %v10120_v27 }
 0x4b7   :  { %10126 = vst [vmem:[#allocation18_spill] sm:$0xff] %v9308_v1  ;;  %v5293_v23 = vsel %vm4463_vm4, %v10128_v37, %v5291_v55  ;;  %vm4002_vm2 = vcmp.eq.f32.partialorder %v9308_v1, 0.0  ;;  %v9333_v56 = vpop.eup %5829  ;;  %v10131_v31 = vrot.slane %v10119_v62, 4  ;;  %v9341_v14 = vsel %vm3997_vm12, -inf, %v9270_v2 }
 0x4b8   :  { %v5295_v26 = vsel %vm4466_vm5, %v10130_v11, %v5293_v23  ;;  %v9344_v53 = vsel %vm3998_vm13, -inf, %v9272_v63  ;;  %v9347_v43 = vsel %vm3999_vm14, -inf, %v9280_v4  ;;  %v9349_v45 = vpop.eup %5831  ;;  %v3657_v51 = vsel %vm1410_vm1, %v9333_v56, 0.0 }
 0x4b9   :  { %v9338_v20 = vsel %vm4469_vm6, %v10131_v31, %v5295_v26  ;;  %v9354_v57 = vsel %vm4000_vm15, -inf, %v9286_v47  ;;  %v9357_v62 = vsel %vm4001_vm0, -inf, %v9302_v6  ;;  %v4158_v27 = vsel %vm1410_vm1, %v9320_v59, -inf  ;;  %v9361_v40 = vpop.eup %5833 }
 0x4ba   :  { %10132 = vst [vmem:[#allocation19_spill] sm:$0xff] %v9338_v20  ;;  %v3658_v61 = vadd.f32 %v3657_v51, %v3656_v29  ;;  %v3659_v41 = vsel %vm1410_vm1, %v9349_v45, 0.0  ;;  %v9368_v22 = vsel %vm4002_vm2, -inf, %v9308_v1  ;;  %v4159_v12 = vsel %vm1410_vm1, %v9327_v21, -inf }
 0x4bb   :  { %v3661_v24 = vsel %vm1410_vm1, %v9361_v40, 0.0  ;;  %v4160_v35 = vmax.f32 %v4158_v27, %v4159_v12  ;;  %v4161_v18 = vsel %vm1410_vm1, %v9341_v14, -inf  ;;  %v4163_v19 = vsel %vm1410_vm1, %v9344_v53, -inf  ;;  %v9378_v15 = vpop.eup %5835 }
 0x4bc   :  { %v3660_v3 = vadd.f32 %v3659_v41, %v3658_v61  ;;  %v4165_v42 = vsel %vm1410_vm1, %v9347_v43, -inf  ;;  %v4167_v5 = vsel %vm1410_vm1, %v9354_v57, -inf  ;;  %v4169_v49 = vsel %vm1410_vm1, %v9357_v62, -inf  ;;  %v9386_v7 = vpop.eup %5837  ;;  %v10133_v41 = vld [vmem:[#allocation3_spill] sm:$0xff] }
 0x4bd   :  { %v4162_v16 = vmax.f32 %v4160_v35, %v4161_v18  ;;  %v4171_v10 = vsel %vm1410_vm1, %v9368_v22, -inf  ;;  %v1370_v36 = vcombine.low %v9215_v54, %v9207_v38  ;;  %v1371_v29 = vcombine.high %v9215_v54, %v9207_v38  ;;  %v9394_v25 = vpop.eup %5839 }
 0x4be   :  { %v3662_v55 = vadd.f32 %v3661_v24, %v3660_v3  ;;  %v3663_v46 = vsel %vm1410_vm1, %v9378_v15, 0.0  ;;  %v1386_v37 = vcombine.low %v1321_v30, %v9210_v48  ;;  %v1387_v23 = vcombine.high %v1321_v30, %v9210_v48  ;;  %v10134_v30 = vld [vmem:[#allocation4_spill] sm:$0xff] }
 0x4bf   :  { %v3665_v8 = vsel %vm1410_vm1, %v9386_v7, 0.0  ;;  %v4164_v11 = vmax.f32 %v4162_v16, %v4163_v19  ;;  %v1378_v26 = vrot.slane %v1370_v36, %v10114_v32  ;;  %v1385_v31 = vrot.slane %v1371_v29, %v10114_v32  ;;  %v10135_v19 = vld [vmem:[#allocation25_spill] sm:$0xff] }
 0x4c0   :  { %v3664_v51 = vadd.f32 %v3663_v46, %v3662_v55  ;;  %v3667_v38 = vsel %vm1410_vm1, %v9394_v25, 0.0  ;;  %v1394_v54 = vrot.slane %v1386_v37, %v10114_v32  ;;  %v1401_v27 = vrot.slane %v1387_v23, %v10114_v32 }
 0x4c1   :  { %v4166_v61 = vmax.f32 %v4164_v11, %v4165_v42  ;;  %v9409_v12 = vcombine.low %v10133_v41, %v1378_v26  ;;  %v9412_v48 = vcombine.high %v10133_v41, %v1378_v26  ;;  %v9415_v24 = vcombine.low %v10134_v30, %v1385_v31 }
 0x4c2   :  { %v3666_v35 = vadd.f32 %v3665_v8, %v3664_v51  ;;  %v9418_v18 = vcombine.high %v10134_v30, %v1385_v31  ;;  %v9421_v3 = vcombine.low %v10135_v19, %v1394_v54  ;;  %v9424_v16 = vcombine.high %v10135_v19, %v1394_v54 }
 0x4c3   :  { %v4168_v32 = vmax.f32 %v4166_v61, %v4167_v5  ;;  %v9427_v42 = vcombine.low %v9194_v0, %v1401_v27  ;;  %v9430_v36 = vcombine.high %v9194_v0, %v1401_v27  ;;  %v1803_v29 = vsel %vm1410_vm1, %v9409_v12, -inf }
 0x4c4   :  { %v3668_v55 = vadd.f32 %v3667_v38, %v3666_v35  ;;  %v1804_v46 = vrot.slane %v1803_v29, 4  ;;  %v1810_v37 = vsel %vm1410_vm1, %v9412_v48, -inf  ;;  %v1817_v23 = vsel %vm1410_vm1, %v9415_v24, -inf }
 0x4c5   :  { %v4170_v8 = vmax.f32 %v4168_v32, %v4169_v49  ;;  %v1811_v11 = vrot.slane %v1810_v37, 4  ;;  %v1818_v5 = vrot.slane %v1817_v23, 4  ;;  %v1824_v26 = vsel %vm1410_vm1, %v9418_v18, -inf }
 0x4c6   :  { %5841 = vrcp.f32 %v3668_v55  ;;  %v1805_v0 = vmax.f32 %v1803_v29, %v1804_v46  ;;  %v1825_v31 = vrot.slane %v1824_v26, 4  ;;  %v1831_v51 = vsel %vm1410_vm1, %v9421_v3, -inf }
 0x4c7   :  { %v4172_v38 = vmax.f32 %v4170_v8, %v4171_v10  ;;  %v1812_v54 = vmax.f32 %v1810_v37, %v1811_v11  ;;  %v1819_v27 = vmax.f32 %v1817_v23, %v1818_v5  ;;  %v1832_v61 = vrot.slane %v1831_v51, 4 }
 0x4c8   :  { %v1806_v41 = vrot.slane %v1805_v0, 2  ;;  %v1826_v30 = vmax.f32 %v1824_v26, %v1825_v31  ;;  %v9444_v49 = vsel %vm1410_vm1, %v9424_v16, -inf  ;;  %v9448_v35 = vsel %vm1410_vm1, %v9427_v42, -inf }
 0x4c9   :  { %v4243_v19 = vsub.f32 %v9320_v59, %v4172_v38  ;;  %v4244_v32 = vsub.f32 %v9327_v21, %v4172_v38  ;;  %v4245_v29 = vsub.f32 %v9341_v14, %v4172_v38  ;;  %v4246_v10 = vsub.f32 %v9344_v53, %v4172_v38 }
 0x4ca   :  { %v4247_v55 = vsub.f32 %v9347_v43, %v4172_v38  ;;  %v4248_v46 = vsub.f32 %v9354_v57, %v4172_v38  ;;  %v4249_v37 = vsub.f32 %v9357_v62, %v4172_v38  ;;  %v4250_v23 = vsub.f32 %v9368_v22, %v4172_v38 }
 0x4cb   :  { %v4347_v8 = vmul.f32 1.442695, %v4243_v19  ;;  %v4349_v11 = vmul.f32 1.442695, %v4244_v32  ;;  %v4351_v5 = vmul.f32 1.442695, %v4245_v29  ;;  %v1807_v26 = vmax.f32 %v1805_v0, %v1806_v41 }
 0x4cc   :  { %v4353_v31 = vmul.f32 1.442695, %v4246_v10  ;;  %v4355_v59 = vmul.f32 1.442695, %v4247_v55  ;;  %v4357_v20 = vmul.f32 1.442695, %v4248_v46  ;;  %v1833_v21 = vmax.f32 %v1831_v51, %v1832_v61 }
 0x4cd   :  { %5843 = vpow2.f32 %v4347_v8  ;;  %v4359_v14 = vmul.f32 1.442695, %v4249_v37  ;;  %v4361_v1 = vmul.f32 1.442695, %v4250_v23  ;;  %v1808_v53 = vrot.slane %v1807_v26, 1 }
 0x4ce   :  { %5845 = vpow2.f32 %v4349_v11  ;;  %v1813_v43 = vrot.slane %v1812_v54, 2  ;;  %v1820_v6 = vrot.slane %v1819_v27, 2  ;;  %v1827_v57 = vrot.slane %v1826_v30, 2 }
 0x4cf   :  { %5847 = vpow2.f32 %v4351_v5  ;;  %v9458_v62 = vmax.f32 %v1807_v26, %v1808_v53  ;;  %v1834_v22 = vrot.slane %v1833_v21, 2  ;;  %v1839_v38 = vrot.slane %v9444_v49, 4 }
 0x4d0   :  { %v5842_v19 = vpop.eup %5841  ;;  %5849 = vpow2.f32 %v4353_v31  ;;  %v1814_v0 = vmax.f32 %v1812_v54, %v1813_v43  ;;  %v1821_v41 = vmax.f32 %v1819_v27, %v1820_v6  ;;  %v1828_v32 = vmax.f32 %v1826_v30, %v1827_v57 }
 0x4d1   :  { %v3747_v51 = vmul.f32 %v5842_v19, %v9260_v9  ;;  %v3748_v61 = vmul.f32 %v5842_v19, %v9264_v60  ;;  %v3749_v29 = vmul.f32 %v5842_v19, %v9333_v56  ;;  %v3750_v10 = vmul.f32 %v5842_v19, %v9349_v45 }
 0x4d2   :  { %v3751_v55 = vmul.f32 %v5842_v19, %v9361_v40  ;;  %v3752_v46 = vmul.f32 %v5842_v19, %v9378_v15  ;;  %v3753_v37 = vmul.f32 %v5842_v19, %v9386_v7  ;;  %v3754_v23 = vmul.f32 %v5842_v19, %v9394_v25 }
 0x4d3   :  { %v3811_v54 = vmul.f32 %v3747_v51, %v8947_v33  ;;  %v3812_v6 = vmul.f32 %v3748_v61, %v8949_v34  ;;  %v3813_v9 = vmul.f32 %v3749_v29, %v8951_v50  ;;  %v3814_v60 = vmul.f32 %v3750_v10, %v8953_v39 }
 0x4d4   :  { %v3815_v56 = vmul.f32 %v3751_v55, %v8955_v44  ;;  %v3816_v45 = vmul.f32 %v3752_v46, %v8957_v58  ;;  %v3817_v40 = vmul.f32 %v3753_v37, %v10122_v52  ;;  %v3818_v15 = vmul.f32 %v3754_v23, %v10123_v28 }
 0x4d5   :  { %v3910_v7 = vsel %vm1410_vm1, %v3811_v54, 0.0  ;;  %v3911_v25 = vsel %vm1410_vm1, %v3812_v6, 0.0  ;;  %v3913_v33 = vsel %vm1410_vm1, %v3813_v9, 0.0  ;;  %v3915_v34 = vsel %vm1410_vm1, %v3814_v60, 0.0 }
 0x4d6   :  { %v3912_v27 = vadd.f32 %v3911_v25, %v3910_v7  ;;  %v3917_v50 = vsel %vm1410_vm1, %v3815_v56, 0.0  ;;  %v3919_v39 = vsel %vm1410_vm1, %v3816_v45, 0.0  ;;  %v3921_v44 = vsel %vm1410_vm1, %v3817_v40, 0.0 }
 0x4d7   :  { %v9484_v58 = vpop.eup %5843  ;;  %v3923_v52 = vsel %vm1410_vm1, %v3818_v15, 0.0  ;;  %5851 = vpow2.f32 %v4355_v59  ;;  %v1815_v28 = vrot.slane %v1814_v0, 1  ;;  %v1822_v30 = vrot.slane %v1821_v41, 1 }
 0x4d8   :  { %v9487_v8 = vpop.eup %5845  ;;  %v3914_v11 = vadd.f32 %v3913_v33, %v3912_v27  ;;  %5853 = vpow2.f32 %v4357_v20  ;;  %v1829_v5 = vrot.slane %v1828_v32, 1  ;;  %v1835_v26 = vmax.f32 %v1833_v21, %v1834_v22 }
 0x4d9   :  { %v9489_v31 = vpop.eup %5847  ;;  %5855 = vpow2.f32 %v4359_v14  ;;  %v4536_v53 = vrot.slane %v9487_v8, 7  ;;  %v1816_v43 = vmax.f32 %v1814_v0, %v1815_v28  ;;  %v1823_v57 = vmax.f32 %v1821_v41, %v1822_v30 }
 0x4da   :  { %v9492_v19 = vpop.eup %5849  ;;  %v3916_v51 = vadd.f32 %v3915_v34, %v3914_v11  ;;  %5857 = vpow2.f32 %v4361_v1  ;;  %v4538_v59 = vrot.slane %v9489_v31, 6  ;;  %v1830_v61 = vmax.f32 %v1828_v32, %v1829_v5 }
 0x4db   :  { %v4537_v29 = vsel %vm4460_vm3, %v4536_v53, %v9484_v58  ;;  %v4540_v20 = vrot.slane %v9492_v19, 5  ;;  %v1836_v21 = vrot.slane %v1835_v26, 1  ;;  %v1840_v22 = vmax.f32 %v9444_v49, %v1839_v38 }
 0x4dc   :  { %v3918_v14 = vadd.f32 %v3917_v50, %v3916_v51  ;;  %v4539_v10 = vsel %vm4463_vm4, %v4538_v59, %v4537_v29  ;;  %v1846_v0 = vrot.slane %v9448_v35, 4  ;;  %v1852_v41 = vsel %vm1410_vm1, %v9430_v36, -inf }
 0x4dd   :  { %v4541_v1 = vsel %vm4466_vm5, %v4540_v20, %v4539_v10  ;;  %v1837_v55 = vmax.f32 %v1835_v26, %v1836_v21  ;;  %v1841_v32 = vrot.slane %v1840_v22, 2  ;;  %v1853_v46 = vrot.slane %v1852_v41, 4 }
 0x4de   :  { %v3920_v37 = vadd.f32 %v3919_v39, %v3918_v14  ;;  %v1847_v23 = vmax.f32 %v9448_v35, %v1846_v0  ;;  %v1915_v54 = vsub.f32 %v9409_v12, %v9458_v62  ;;  %v1916_v49 = vsub.f32 %v9412_v48, %v1816_v43 }
 0x4df   :  { %v1842_v38 = vmax.f32 %v1840_v22, %v1841_v32  ;;  %v1854_v6 = vmax.f32 %v1852_v41, %v1853_v46  ;;  %v1917_v9 = vsub.f32 %v9415_v24, %v1823_v57  ;;  %v1918_v60 = vsub.f32 %v9418_v18, %v1830_v61 }
 0x4e0   :  { %v3922_v56 = vadd.f32 %v3921_v44, %v3920_v37  ;;  %v1848_v45 = vrot.slane %v1847_v23, 2  ;;  %v1919_v40 = vsub.f32 %v9421_v3, %v1837_v55  ;;  %v2035_v15 = vmul.f32 1.442695, %v1915_v54  ;;  %v10136_v54 = vld [vmem:[#allocation28_spill] sm:$0xff] }
 0x4e1   :  { %v9511_v7 = vpop.eup %5851  ;;  %v1843_v25 = vrot.slane %v1842_v38, 1  ;;  %v1855_v35 = vrot.slane %v1854_v6, 2  ;;  %v2037_v33 = vmul.f32 1.442695, %v1916_v49  ;;  %v2039_v34 = vmul.f32 1.442695, %v1917_v9 }
 0x4e2   :  { %v9513_v62 = vpop.eup %5853  ;;  %v9515_v27 = vadd.f32 %v3923_v52, %v3922_v56  ;;  %v4542_v50 = vrot.slane %v9511_v7, 4  ;;  %v1849_v39 = vmax.f32 %v1847_v23, %v1848_v45  ;;  %5859 = vpow2.f32 %v2035_v15  ;;  %v10137_v45 = vld [vmem:[#allocation29_spill] sm:$0xff] }
 0x4e3   :  { %v9518_v28 = vpop.eup %5855  ;;  %v4544_v44 = vrot.slane %v9513_v62, 3  ;;  %v1844_v30 = vmax.f32 %v1842_v38, %v1843_v25  ;;  %v1856_v11 = vmax.f32 %v1854_v6, %v1855_v35  ;;  %5861 = vpow2.f32 %v2037_v33 }
 0x4e4   :  { %v9521_v5 = vpop.eup %5857  ;;  %v4543_v26 = vsel %vm4469_vm6, %v4542_v50, %v4541_v1  ;;  %v4546_v53 = vrot.slane %v9518_v28, 2  ;;  %v5085_v52 = vsel %vm1410_vm1, %v9515_v27, -inf  ;;  %v1850_v43 = vrot.slane %v1849_v39, 1 }
 0x4e5   :  { %v4545_v57 = vsel %vm4472_vm7, %v4544_v44, %v4543_v26  ;;  %v4548_v51 = vrot.slane %v9521_v5, 1  ;;  %v5086_v59 = vrot.slane %v5085_v52, 4  ;;  %v1857_v61 = vrot.slane %v1856_v11, 1 }
 0x4e6   :  { %v4547_v29 = vsel %vm4475_vm8, %v4546_v53, %v4545_v57  ;;  %v1851_v20 = vmax.f32 %v1849_v39, %v1850_v43  ;;  %v1920_v21 = vsub.f32 %v9424_v16, %v1844_v30  ;;  %5863 = vpow2.f32 %v2039_v34 }
 0x4e7   :  { %v4549_v22 = vsel %vm4478_vm9, %v4548_v51, %v4547_v29  ;;  %v5087_v14 = vmax.f32 %v5085_v52, %v5086_v59  ;;  %v1858_v10 = vmax.f32 %v1856_v11, %v1857_v61  ;;  %v2041_v0 = vmul.f32 1.442695, %v1918_v60 }
 0x4e8   :  { %v4621_v41 = vsel %vm1410_vm1, %v4549_v22, 0.0  ;;  %v1921_v1 = vsub.f32 %v9427_v42, %v1851_v20  ;;  %v2043_v55 = vmul.f32 1.442695, %v1919_v40  ;;  %v2045_v32 = vmul.f32 1.442695, %v1920_v21 }
 0x4e9   :  { %v4622_v46 = vrot.slane %v4621_v41, 4  ;;  %v5088_v37 = vrot.slane %v5087_v14, 2  ;;  %v1922_v23 = vsub.f32 %v9430_v36, %v1858_v10  ;;  %5865 = vpow2.f32 %v2041_v0 }
 0x4ea   :  { %v5041_v49 = vrot.slane %v10136_v54, 1  ;;  %5867 = vpow2.f32 %v2043_v55  ;;  %v2047_v38 = vmul.f32 1.442695, %v1921_v1  ;;  %v5257_v15 = vrot.slane %v10137_v45, 1 }
 0x4eb   :  { %v4623_v6 = vadd.f32 %v4622_v46, %v4621_v41  ;;  %v5089_v9 = vmax.f32 %v5087_v14, %v5088_v37  ;;  %5869 = vpow2.f32 %v2045_v32  ;;  %v2049_v56 = vmul.f32 1.442695, %v1922_v23  ;;  %v10138_v23 = vld [vmem:[#allocation13_spill] sm:$0xff] }
 0x4ec   :  { %v9536_v60 = vpop.eup %5859  ;;  %5871 = vpow2.f32 %v2047_v38  ;;  %v5042_v34 = vadd.f32 %v5041_v49, %v10136_v54  ;;  %v5258_v53 = vadd.f32 %v5257_v15, %v10137_v45  ;;  %vm3195_vm10 = vcmp.eq.f32.partialorder %v9409_v12, 0.0 }
 0x4ed   :  { %v9539_v40 = vpop.eup %5861  ;;  %v4624_v25 = vrot.slane %v4623_v6, 2  ;;  %v5090_v35 = vrot.slane %v5089_v9, 1  ;;  %5873 = vpow2.f32 %v2049_v56  ;;  %v2443_v33 = vsel %vm1410_vm1, %v9536_v60, 0.0 }
 0x4ee   :  { %v2444_v50 = vrot.slane %v2443_v33, 4  ;;  %v2450_v39 = vsel %vm1410_vm1, %v9539_v40, 0.0  ;;  %vm3196_vm11 = vcmp.eq.f32.partialorder %v9412_v48, 0.0  ;;  %v9554_v61 = vadd.f32 %v5258_v53, %v5042_v34 }
 0x4ef   :  { %v4625_v44 = vadd.f32 %v4624_v25, %v4623_v6  ;;  %v5091_v30 = vmax.f32 %v5089_v9, %v5090_v35  ;;  %v2451_v11 = vrot.slane %v2450_v39, 4  ;;  %v9559_v0 = vsel %vm3195_vm10, -inf, %v9409_v12 }
 0x4f0   :  { %v9546_v26 = vpop.eup %5863  ;;  %v2445_v52 = vadd.f32 %v2444_v50, %v2443_v33  ;;  %v9568_v46 = vsel %vm3196_vm11, -inf, %v9412_v48  ;;  %vm3197_vm12 = vcmp.eq.f32.partialorder %v9415_v24, 0.0  ;;  %vm3198_vm13 = vcmp.eq.f32.partialorder %v9418_v18, 0.0 }
 0x4f1   :  { %v4626_v43 = vrot.slane %v4625_v44, 1  ;;  %v5111_v57 = vsub.f32 %v9515_v27, %v5091_v30  ;;  %v2452_v51 = vadd.f32 %v2451_v11, %v2450_v39  ;;  %v2457_v59 = vsel %vm1410_vm1, %v9546_v26, 0.0 }
 0x4f2   :  { %v2446_v29 = vrot.slane %v2445_v52, 2  ;;  %v2458_v20 = vrot.slane %v2457_v59, 4  ;;  %vm3199_vm14 = vcmp.eq.f32.partialorder %v9421_v3, 0.0  ;;  %vm3200_vm15 = vcmp.eq.f32.partialorder %v9424_v16, 0.0 }
 0x4f3   :  { %v9556_v21 = vpop.eup %5865  ;;  %v4627_v22 = vadd.f32 %v4626_v43, %v4625_v44  ;;  %v5124_v14 = vmul.f32 1.442695, %v5111_v57  ;;  %v2453_v10 = vrot.slane %v2452_v51, 2  ;;  %vm3201_vm0 = vcmp.eq.f32.partialorder %v9427_v42, 0.0 }
 0x4f4   :  { %v9561_v41 = vpop.eup %5867  ;;  %v2447_v1 = vadd.f32 %v2446_v29, %v2445_v52  ;;  %v2459_v55 = vadd.f32 %v2458_v20, %v2457_v59  ;;  %v2464_v32 = vsel %vm1410_vm1, %v9556_v21, 0.0  ;;  %vm3202_vm2 = vcmp.eq.f32.partialorder %v9430_v36, 0.0 }
 0x4f5   :  { %v9570_v37 = vpop.eup %5869  ;;  %v4665_v54 = vrot.slane %v4627_v22, %v10138_v23  ;;  %5875 = vpow2.f32 %v5124_v14  ;;  %v2454_v49 = vadd.f32 %v2453_v10, %v2452_v51  ;;  %v2465_v38 = vrot.slane %v2464_v32, 4 }
 0x4f6   :  { %v9573_v6 = vpop.eup %5871  ;;  %v2448_v9 = vrot.slane %v2447_v1, 1  ;;  %v2460_v56 = vrot.slane %v2459_v55, 2  ;;  %v2471_v45 = vsel %vm1410_vm1, %v9561_v41, 0.0  ;;  %v2478_v15 = vsel %vm1410_vm1, %v9570_v37, 0.0 }
 0x4f7   :  { %v9579_v25 = vpop.eup %5873  ;;  %5877 = vrcp.f32 %v4665_v54  ;;  %v2455_v35 = vrot.slane %v2454_v49, 1  ;;  %v2466_v33 = vadd.f32 %v2465_v38, %v2464_v32  ;;  %v2472_v34 = vrot.slane %v2471_v45, 4 }
 0x4f8   :  { %v2449_v50 = vadd.f32 %v2448_v9, %v2447_v1  ;;  %v2461_v39 = vadd.f32 %v2460_v56, %v2459_v55  ;;  %v2479_v44 = vrot.slane %v2478_v15, 4  ;;  %v2485_v30 = vsel %vm1410_vm1, %v9573_v6, 0.0 }
 0x4f9   :  { %v2456_v11 = vadd.f32 %v2455_v35, %v2454_v49  ;;  %v2467_v53 = vrot.slane %v2466_v33, 2  ;;  %v2473_v52 = vadd.f32 %v2472_v34, %v2471_v45  ;;  %v2486_v43 = vrot.slane %v2485_v30, 4 }
 0x4fa   :  { %v2462_v57 = vrot.slane %v2461_v39, 1  ;;  %v2480_v51 = vadd.f32 %v2479_v44, %v2478_v15  ;;  %v2492_v59 = vsel %vm1410_vm1, %v9579_v25, 0.0  ;;  %5879 = vrcp.f32 %v2449_v50 }
 0x4fb   :  { %v2468_v29 = vadd.f32 %v2467_v53, %v2466_v33  ;;  %v2474_v20 = vrot.slane %v2473_v52, 2  ;;  %v2487_v22 = vadd.f32 %v2486_v43, %v2485_v30  ;;  %v2493_v14 = vrot.slane %v2492_v59, 4 }
 0x4fc   :  { %v2463_v10 = vadd.f32 %v2462_v57, %v2461_v39  ;;  %v2481_v1 = vrot.slane %v2480_v51, 2  ;;  %5881 = vrcp.f32 %v2456_v11  ;;  %v9588_v9 = vsel %vm1410_vm1, %v9559_v0, -inf }
 0x4fd   :  { %v2469_v55 = vrot.slane %v2468_v29, 1  ;;  %v2475_v32 = vadd.f32 %v2474_v20, %v2473_v52  ;;  %v2488_v54 = vrot.slane %v2487_v22, 2  ;;  %v2494_v49 = vadd.f32 %v2493_v14, %v2492_v59 }
 0x4fe   :  { %v2482_v38 = vadd.f32 %v2481_v1, %v2480_v51  ;;  %5883 = vrcp.f32 %v2463_v10  ;;  %v9592_v56 = vsel %vm1410_vm1, %v9568_v46, -inf  ;;  %v9597_v34 = vsel %vm3197_vm12, -inf, %v9415_v24 }
 0x4ff   :  { %v9594_v45 = vpop.eup %5875  ;;  %v2476_v15 = vrot.slane %v2475_v32, 1  ;;  %v2489_v35 = vadd.f32 %v2488_v54, %v2487_v22  ;;  %v2495_v33 = vrot.slane %v2494_v49, 2  ;;  %v2470_v39 = vadd.f32 %v2469_v55, %v2468_v29 }
 0x500   :  { %v5165_v50 = vsel %vm1410_vm1, %v9594_v45, 0.0  ;;  %v2483_v44 = vrot.slane %v2482_v38, 1 }
 0x501   :  { %v5878_v11 = vpop.eup %5877  ;;  %v5166_v53 = vrot.slane %v5165_v50, 4  ;;  %v2477_v52 = vadd.f32 %v2476_v15, %v2475_v32  ;;  %v2490_v43 = vrot.slane %v2489_v35, 1  ;;  %v2496_v57 = vadd.f32 %v2495_v33, %v2494_v49 }
 0x502   :  { %v4720_v51 = vmul.f32 %v5878_v11, %v9484_v58  ;;  %v4721_v59 = vmul.f32 %v5878_v11, %v9487_v8  ;;  %v4722_v20 = vmul.f32 %v5878_v11, %v9489_v31  ;;  %v4723_v22 = vmul.f32 %v5878_v11, %v9492_v19 }
 0x503   :  { %v4724_v14 = vmul.f32 %v5878_v11, %v9511_v7  ;;  %v4725_v29 = vmul.f32 %v5878_v11, %v9513_v62  ;;  %v4726_v10 = vmul.f32 %v5878_v11, %v9518_v28  ;;  %v4727_v1 = vmul.f32 %v5878_v11, %v9521_v5  ;;  %v10139_v7 = vld [vmem:[#allocation17_spill] sm:$0xff]  ;;  %v10140_v62 = vld [vmem:[#allocation18_spill] sm:$0xff] }
 0x504   :  { %v5880_v55 = vpop.eup %5879  ;;  %v4786_v32 = vmul.f32 %v4720_v51, %v9262_v17  ;;  %v4787_v54 = vmul.f32 %v4721_v59, %v9267_v13  ;;  %v4788_v58 = vmul.f32 %v4722_v20, %v9270_v2  ;;  %v4789_v8 = vmul.f32 %v4723_v22, %v9272_v63 }
 0x505   :  { %v4790_v31 = vmul.f32 %v4724_v14, %v9280_v4  ;;  %v4791_v19 = vmul.f32 %v4725_v29, %v9286_v47  ;;  %v4792_v49 = vmul.f32 %v4726_v10, %v10139_v7  ;;  %v4793_v15 = vmul.f32 %v4727_v1, %v10140_v62 }
 0x506   :  { %v5882_v28 = vpop.eup %5881  ;;  %v4944_v33 = vrot.slane %v4787_v54, 7  ;;  %v4946_v5 = vrot.slane %v4788_v58, 6  ;;  %v4948_v11 = vrot.slane %v4789_v8, 5  ;;  %v5167_v30 = vadd.f32 %v5166_v53, %v5165_v50 }
 0x507   :  { %v4950_v17 = vrot.slane %v4790_v31, 4  ;;  %v4952_v13 = vrot.slane %v4791_v19, 3  ;;  %v4954_v2 = vrot.slane %v4792_v49, 2  ;;  %v4956_v51 = vrot.slane %v4793_v15, 1 }
 0x508   :  { %v5884_v63 = vpop.eup %5883  ;;  %v4945_v4 = vsel %vm4460_vm3, %v4944_v33, %v4786_v32  ;;  %v5168_v59 = vrot.slane %v5167_v30, 2  ;;  %v2484_v47 = vadd.f32 %v2483_v44, %v2482_v38  ;;  %v2491_v20 = vadd.f32 %v2490_v43, %v2489_v35 }
 0x509   :  { %v4947_v22 = vsel %vm4463_vm4, %v4946_v5, %v4945_v4  ;;  %v2497_v14 = vrot.slane %v2496_v57, 1  ;;  %5885 = vrcp.f32 %v2470_v39  ;;  %v2619_v50 = vmul.f32 %v5880_v55, %v9536_v60 }
 0x50a   :  { %v4949_v53 = vsel %vm4466_vm5, %v4948_v11, %v4947_v22  ;;  %v5169_v29 = vadd.f32 %v5168_v59, %v5167_v30  ;;  %5887 = vrcp.f32 %v2477_v52  ;;  %v2620_v10 = vmul.f32 %v5882_v28, %v9539_v40 }
 0x50b   :  { %v4951_v1 = vsel %vm4469_vm6, %v4950_v17, %v4949_v53  ;;  %v2498_v38 = vadd.f32 %v2497_v14, %v2496_v57  ;;  %5889 = vrcp.f32 %v2484_v47  ;;  %v2621_v35 = vmul.f32 %v5884_v63, %v9546_v26 }
 0x50c   :  { %v4953_v44 = vsel %vm4472_vm7, %v4952_v13, %v4951_v1  ;;  %v5170_v43 = vrot.slane %v5169_v29, 1  ;;  %5891 = vrcp.f32 %v2491_v20  ;;  %v2683_v60 = vmul.f32 %v2619_v50, %v9409_v12 }
 0x50d   :  { %v4955_v39 = vsel %vm4475_vm8, %v4954_v2, %v4953_v44  ;;  %5893 = vrcp.f32 %v2498_v38  ;;  %v2684_v30 = vmul.f32 %v2620_v10, %v9412_v48  ;;  %v2685_v52 = vmul.f32 %v2621_v35, %v9415_v24 }
 0x50e   :  { %v4957_v40 = vsel %vm4478_vm9, %v4956_v51, %v4955_v39  ;;  %v5171_v55 = vadd.f32 %v5170_v43, %v5169_v29  ;;  %v3083_v57 = vsel %vm1410_vm1, %v2683_v60, 0.0  ;;  %v3375_v19 = vsel %vm1410_vm1, %v9597_v34, -inf }
 0x50f   :  { %v5029_v26 = vsel %vm1410_vm1, %v4957_v40, 0.0  ;;  %v3084_v32 = vrot.slane %v3083_v57, 4  ;;  %v3090_v54 = vsel %vm1410_vm1, %v2684_v30, 0.0  ;;  %v3097_v58 = vsel %vm1410_vm1, %v2685_v52, 0.0 }
 0x510   :  { %v5030_v8 = vrot.slane %v5029_v26, 4  ;;  %5895 = vrcp.f32 %v5171_v55  ;;  %v3091_v31 = vrot.slane %v3090_v54, 4  ;;  %v3098_v49 = vrot.slane %v3097_v58, 4 }
 0x511   :  { %v3085_v7 = vadd.f32 %v3084_v32, %v3083_v57  ;;  %v9645_v62 = vsel %vm3198_vm13, -inf, %v9418_v18  ;;  %v10141_v15 = vmax.f32 %v9588_v9, %v9592_v56  ;;  %v9652_v17 = vmul.f32 0.005, %v9554_v61 }
 0x512   :  { %v5031_v33 = vadd.f32 %v5030_v8, %v5029_v26  ;;  %v3092_v5 = vadd.f32 %v3091_v31, %v3090_v54  ;;  %v9657_v2 = vsel %vm3199_vm14, -inf, %v9421_v3  ;;  %v9663_v9 = vsel %vm3200_vm15, -inf, %v9424_v16 }
 0x513   :  { %v3376_v28 = vmax.f32 %v10141_v15, %v3375_v19  ;;  %v5886_v11 = vpop.eup %5885  ;;  %v3086_v13 = vrot.slane %v3085_v7, 2  ;;  %v9668_v56 = vsel %vm3201_vm0, -inf, %v9427_v42  ;;  %v3377_v61 = vsel %vm1410_vm1, %v9645_v62, -inf }
 0x514   :  { %v5888_v51 = vpop.eup %5887  ;;  %v2622_v63 = vmul.f32 %v5886_v11, %v9556_v21  ;;  %v3099_v47 = vadd.f32 %v3098_v49, %v3097_v58  ;;  %v9674_v20 = vsel %vm3202_vm2, -inf, %v9430_v36  ;;  %v5032_v14 = vrot.slane %v5031_v33, 2 }
 0x515   :  { %v5890_v4 = vpop.eup %5889  ;;  %v2623_v59 = vmul.f32 %v5888_v51, %v9561_v41  ;;  %v3378_v21 = vmax.f32 %v3376_v28, %v3377_v61  ;;  %v3093_v29 = vrot.slane %v3092_v5, 2  ;;  %v3087_v35 = vadd.f32 %v3086_v13, %v3085_v7 }
 0x516   :  { %v5892_v22 = vpop.eup %5891  ;;  %v2624_v50 = vmul.f32 %v5890_v4, %v9570_v37  ;;  %v2686_v53 = vmul.f32 %v2622_v63, %v9418_v18  ;;  %v3379_v41 = vsel %vm1410_vm1, %v9657_v2, -inf  ;;  %v3381_v60 = vsel %vm1410_vm1, %v9663_v9, -inf }
 0x517   :  { %v5894_v10 = vpop.eup %5893  ;;  %v2625_v1 = vmul.f32 %v5892_v22, %v9573_v6  ;;  %v2687_v38 = vmul.f32 %v2623_v59, %v9421_v3  ;;  %v3383_v37 = vsel %vm1410_vm1, %v9668_v56, -inf  ;;  %v3100_v30 = vrot.slane %v3099_v47, 2 }
 0x518   :  { %v2626_v44 = vmul.f32 %v5894_v10, %v9579_v25  ;;  %v2688_v43 = vmul.f32 %v2624_v50, %v9424_v16  ;;  %v3104_v6 = vsel %vm1410_vm1, %v2686_v53, 0.0  ;;  %v3380_v52 = vmax.f32 %v3378_v21, %v3379_v41 }
 0x519   :  { %v2689_v39 = vmul.f32 %v2625_v1, %v9427_v42  ;;  %v5033_v55 = vadd.f32 %v5032_v14, %v5031_v33  ;;  %v3094_v26 = vadd.f32 %v3093_v29, %v3092_v5  ;;  %v3105_v25 = vrot.slane %v3104_v6, 4 }
 0x51a   :  { %v5896_v40 = vpop.eup %5895  ;;  %v2690_v57 = vmul.f32 %v2626_v44, %v9430_v36  ;;  %v3088_v54 = vrot.slane %v3087_v35, 1  ;;  %v3111_v58 = vsel %vm1410_vm1, %v2687_v38, 0.0  ;;  %v3118_v8 = vsel %vm1410_vm1, %v2688_v43, 0.0 }
 0x51b   :  { %v5197_v32 = vmul.f32 %v5896_v40, %v9594_v45  ;;  %v3106_v31 = vadd.f32 %v3105_v25, %v3104_v6  ;;  %v3112_v19 = vrot.slane %v3111_v58, 4  ;;  %v3119_v7 = vrot.slane %v3118_v8, 4 }
 0x51c   :  { %v3125_v49 = vsel %vm1410_vm1, %v2689_v39, 0.0  ;;  %v3132_v33 = vsel %vm1410_vm1, %v2690_v57, 0.0  ;;  %v3382_v11 = vmax.f32 %v3380_v52, %v3381_v60  ;;  %v3101_v5 = vadd.f32 %v3100_v30, %v3099_v47 }
 0x51d   :  { %v5207_v15 = vmul.f32 %v5197_v32, %v9515_v27  ;;  %v3126_v28 = vrot.slane %v3125_v49, 4  ;;  %v3107_v13 = vrot.slane %v3106_v31, 2  ;;  %v3113_v51 = vadd.f32 %v3112_v19, %v3111_v58 }
 0x51e   :  { %v3133_v45 = vrot.slane %v3132_v33, 4  ;;  %v3095_v61 = vrot.slane %v3094_v26, 1  ;;  %v3120_v4 = vadd.f32 %v3119_v7, %v3118_v8  ;;  %v3384_v59 = vmax.f32 %v3382_v11, %v3383_v37 }
 0x51f   :  { %v5245_v63 = vsel %vm1410_vm1, %v5207_v15, 0.0  ;;  %v3127_v22 = vadd.f32 %v3126_v28, %v3125_v49  ;;  %v3385_v14 = vsel %vm1410_vm1, %v9674_v20, -inf  ;;  %v5034_v50 = vrot.slane %v5033_v55, 1 }
 0x520   :  { %v5246_v21 = vrot.slane %v5245_v63, 4  ;;  %v3114_v27 = vrot.slane %v3113_v51, 2  ;;  %v3386_v53 = vmax.f32 %v3384_v59, %v3385_v14  ;;  %v3102_v10 = vrot.slane %v3101_v5, 1 }
 0x521   :  { %v3108_v1 = vadd.f32 %v3107_v13, %v3106_v31  ;;  %v3134_v47 = vadd.f32 %v3133_v45, %v3132_v33  ;;  %v5300_v38 = vrot.slane %v9652_v17, 2  ;;  %v9701_v41 = vadd.f32 %v3088_v54, %v3087_v35 }
 0x522   :  { %v5247_v29 = vadd.f32 %v5246_v21, %v5245_v63  ;;  %v9703_v44 = vadd.f32 %v3095_v61, %v3094_v26  ;;  %v3121_v43 = vrot.slane %v3120_v4, 2  ;;  %v3128_v37 = vrot.slane %v3127_v22, 2 }
 0x523   :  { %v3443_v39 = vsub.f32 %v9559_v0, %v3386_v53  ;;  %v3444_v30 = vsub.f32 %v9568_v46, %v3386_v53  ;;  %v5035_v6 = vadd.f32 %v5034_v50, %v5033_v55  ;;  %v3115_v52 = vadd.f32 %v3114_v27, %v3113_v51 }
 0x524   :  { %v5248_v60 = vrot.slane %v5247_v29, 2  ;;  %v3445_v40 = vsub.f32 %v9597_v34, %v3386_v53  ;;  %v3446_v57 = vsub.f32 %v9645_v62, %v3386_v53  ;;  %v9709_v32 = vadd.f32 %v3102_v10, %v3101_v5 }
 0x525   :  { %v3109_v35 = vrot.slane %v3108_v1, 1  ;;  %v3135_v54 = vrot.slane %v3134_v47, 2  ;;  %v3122_v26 = vadd.f32 %v3121_v43, %v3120_v4  ;;  %v3447_v58 = vsub.f32 %v9657_v2, %v3386_v53 }
 0x526   :  { %v5249_v25 = vadd.f32 %v5248_v60, %v5247_v29  ;;  %vm4011_vm10 = vcmp.eq.f32.partialorder %v9701_v41, 0.0  ;;  %vm4012_vm11 = vcmp.eq.f32.partialorder %v9703_v44, 0.0  ;;  %v3129_v46 = vadd.f32 %v3128_v37, %v3127_v22 }
 0x527   :  { %v3563_v55 = vmul.f32 1.442695, %v3443_v39  ;;  %v3565_v8 = vmul.f32 1.442695, %v3444_v30  ;;  %v3116_v31 = vrot.slane %v3115_v52, 1  ;;  %v3448_v34 = vsub.f32 %v9663_v9, %v3386_v53 }
 0x528   :  { %v5250_v0 = vrot.slane %v5249_v25, 1  ;;  %v3567_v62 = vmul.f32 1.442695, %v3445_v40  ;;  %v3569_v19 = vmul.f32 1.442695, %v3446_v57  ;;  %v9715_v49 = vadd.f32 %v3109_v35, %v3108_v1 }
 0x529   :  { %v3136_v15 = vadd.f32 %v3135_v54, %v3134_v47  ;;  %5897 = vpow2.f32 %v3563_v55  ;;  %v3123_v28 = vrot.slane %v3122_v26, 1  ;;  %v3449_v2 = vsub.f32 %v9668_v56, %v3386_v53 }
 0x52a   :  { %v5251_v7 = vadd.f32 %v5250_v0, %v5249_v25  ;;  %5899 = vpow2.f32 %v3565_v8  ;;  %v3571_v33 = vmul.f32 1.442695, %v3447_v58  ;;  %v3130_v5 = vrot.slane %v3129_v46, 1 }
 0x52b   :  { %v3450_v13 = vsub.f32 %v9674_v20, %v3386_v53  ;;  %5901 = vpow2.f32 %v3567_v62  ;;  %v9719_v51 = vadd.f32 %v3116_v31, %v3115_v52  ;;  %v3573_v9 = vmul.f32 1.442695, %v3448_v34  ;;  %v10142_v53 = vld [vmem:[#allocation19_spill] sm:$0xff] }
 0x52c   :  { %v5271_v11 = vadd.f32 %v5251_v7, %v5035_v6  ;;  %5903 = vpow2.f32 %v3569_v19  ;;  %vm4013_vm12 = vcmp.eq.f32.partialorder %v9709_v32, 0.0  ;;  %v3137_v63 = vrot.slane %v3136_v15, 1 }
 0x52d   :  { %v9725_v61 = vsel %vm4011_vm10, -inf, %v9701_v41  ;;  %v9730_v56 = vsel %vm4012_vm11, -inf, %v9703_v44  ;;  %v9732_v20 = vadd.f32 %v3123_v28, %v3122_v26  ;;  %5905 = vpow2.f32 %v3571_v33 }
 0x52e   :  { %v5279_v45 = vmul.f32 0.005, %v5271_v11  ;;  %v3575_v4 = vmul.f32 1.442695, %v3449_v2  ;;  %vm4014_vm13 = vcmp.eq.f32.partialorder %v9715_v49, 0.0  ;;  %v9735_v21 = vadd.f32 %v3130_v5, %v3129_v46 }
 0x52f   :  { %v3577_v22 = vmul.f32 1.442695, %v3450_v13  ;;  %v4077_v14 = vsel %vm4013_vm12, -inf, %v9709_v32  ;;  %5907 = vpow2.f32 %v3573_v9  ;;  %vm4015_vm14 = vcmp.eq.f32.partialorder %v9719_v51, 0.0 }
 0x530   :  { %v5298_v59 = vrot.slane %v5279_v45, 3  ;;  %v4188_v50 = vsel %vm1410_vm1, %v9725_v61, -inf  ;;  %v4189_v27 = vsel %vm1410_vm1, %v9730_v56, -inf  ;;  %v9745_v10 = vadd.f32 %v3137_v63, %v3136_v15 }
 0x531   :  { %v4078_v1 = vsel %vm4014_vm13, -inf, %v9715_v49  ;;  %v4190_v47 = vmax.f32 %v4188_v50, %v4189_v27  ;;  %5909 = vpow2.f32 %v3575_v4  ;;  %vm4016_vm15 = vcmp.eq.f32.partialorder %v9732_v20, 0.0 }
 0x532   :  { %v5299_v29 = vsel %vm4472_vm7, %v5298_v59, %v10142_v53  ;;  %v4191_v60 = vsel %vm1410_vm1, %v4077_v14, -inf  ;;  %v4079_v39 = vsel %vm4015_vm14, -inf, %v9719_v51  ;;  %5911 = vpow2.f32 %v3577_v22 }
 0x533   :  { %v9751_v43 = vsel %vm4475_vm8, %v5300_v38, %v5299_v29  ;;  %v9755_v37 = vpop.eup %5897  ;;  %v4192_v30 = vmax.f32 %v4190_v47, %v4191_v60  ;;  %vm4017_vm0 = vcmp.eq.f32.partialorder %v9735_v21, 0.0  ;;  %v4193_v17 = vsel %vm1410_vm1, %v4078_v1, -inf }
 0x534   :  { %v9758_v6 = vpop.eup %5899  ;;  %v3684_v52 = vsel %vm1410_vm1, %v9755_v37, 0.0  ;;  %v4080_v57 = vsel %vm4016_vm15, -inf, %v9732_v20  ;;  %vm4018_vm2 = vcmp.eq.f32.partialorder %v9745_v10, 0.0  ;;  %v4195_v26 = vsel %vm1410_vm1, %v4079_v39, -inf }
 0x535   :  { %v5902_v38 = vpop.eup %5901  ;;  %v3685_v40 = vsel %vm1410_vm1, %v9758_v6, 0.0  ;;  %v4194_v25 = vmax.f32 %v4192_v30, %v4193_v17  ;;  %v4081_v0 = vsel %vm4017_vm0, -inf, %v9735_v21  ;;  %v4197_v31 = vsel %vm1410_vm1, %v4080_v57, -inf }
 0x536   :  { %v5904_v35 = vpop.eup %5903  ;;  %v3686_v54 = vadd.f32 %v3685_v40, %v3684_v52  ;;  %v3687_v58 = vsel %vm1410_vm1, %v5902_v38, 0.0  ;;  %v4082_v62 = vsel %vm4018_vm2, -inf, %v9745_v10  ;;  %v4199_v28 = vsel %vm1410_vm1, %v4081_v0, -inf }
 0x537   :  { %v4196_v46 = vmax.f32 %v4194_v25, %v4195_v26  ;;  %v5906_v55 = vpop.eup %5905  ;;  %v3689_v34 = vsel %vm1410_vm1, %v5904_v35, 0.0  ;;  %v4201_v13 = vsel %vm1410_vm1, %v4082_v62, -inf }
 0x538   :  { %v3688_v8 = vadd.f32 %v3687_v58, %v3686_v54  ;;  %v3691_v2 = vsel %vm1410_vm1, %v5906_v55, 0.0 }
 0x539   :  { %v4198_v19 = vmax.f32 %v4196_v46, %v4197_v31  ;;  %v5908_v7 = vpop.eup %5907 }
 0x53a   :  { %v3690_v15 = vadd.f32 %v3689_v34, %v3688_v8  ;;  %v3693_v9 = vsel %vm1410_vm1, %v5908_v7, 0.0 }
 0x53b   :  { %v4200_v33 = vmax.f32 %v4198_v19, %v4199_v28  ;;  %v5910_v11 = vpop.eup %5909 }
 0x53c   :  { %v3692_v5 = vadd.f32 %v3691_v2, %v3690_v15  ;;  %v5912_v63 = vpop.eup %5911  ;;  %v3695_v59 = vsel %vm1410_vm1, %v5910_v11, 0.0 }
 0x53d   :  { %v4202_v45 = vmax.f32 %v4200_v33, %v4201_v13  ;;  %v3697_v53 = vsel %vm1410_vm1, %v5912_v63, 0.0 }
 0x53e   :  { %v3694_v4 = vadd.f32 %v3693_v9, %v3692_v5 }
 0x53f   :  { %v4260_v22 = vsub.f32 %v9730_v56, %v4202_v45  ;;  %v4261_v27 = vsub.f32 %v4077_v14, %v4202_v45  ;;  %v4259_v29 = vsub.f32 %v9725_v61, %v4202_v45  ;;  %v4262_v60 = vsub.f32 %v4078_v1, %v4202_v45 }
 0x540   :  { %v3696_v50 = vadd.f32 %v3695_v59, %v3694_v4  ;;  %v4263_v30 = vsub.f32 %v4079_v39, %v4202_v45  ;;  %v4264_v17 = vsub.f32 %v4080_v57, %v4202_v45  ;;  %v4265_v25 = vsub.f32 %v4081_v0, %v4202_v45 }
 0x541   :  { %v4381_v52 = vmul.f32 1.442695, %v4260_v22  ;;  %v4383_v40 = vmul.f32 1.442695, %v4261_v27  ;;  %v4379_v54 = vmul.f32 1.442695, %v4259_v29  ;;  %v4266_v26 = vsub.f32 %v4082_v62, %v4202_v45 }
 0x542   :  { %v3698_v47 = vadd.f32 %v3697_v53, %v3696_v50  ;;  %v4385_v58 = vmul.f32 1.442695, %v4262_v60  ;;  %v4387_v46 = vmul.f32 1.442695, %v4263_v30  ;;  %v4389_v56 = vmul.f32 1.442695, %v4264_v17 }
 0x543   :  { %v4391_v14 = vmul.f32 1.442695, %v4265_v25  ;;  %v4393_v8 = vmul.f32 1.442695, %v4266_v26 }
 0x544   :  { %5913 = vrcp.f32 %v3698_v47 }
 0x545   :  { %5915 = vpow2.f32 %v4381_v52 }
 0x546   :  { %5917 = vpow2.f32 %v4383_v40 }
 0x547   :  { %5919 = vpow2.f32 %v4379_v54 }
 0x548   :  { %5921 = vpow2.f32 %v4385_v58 }
 0x549   :  { %5923 = vpow2.f32 %v4387_v46 }
 0x54a   :  { %5925 = vpow2.f32 %v4389_v56 }
 0x54b   :  { %5927 = vpow2.f32 %v4391_v14 }
 0x54c   :  { %5929 = vpow2.f32 %v4393_v8 }
 0x54e   :  { %v5914_v61 = vpop.eup %5913 }
 0x54f   :  { %v3763_v1 = vmul.f32 %v5914_v61, %v9755_v37  ;;  %v3764_v39 = vmul.f32 %v5914_v61, %v9758_v6  ;;  %v3765_v57 = vmul.f32 %v5914_v61, %v5902_v38  ;;  %v3766_v0 = vmul.f32 %v5914_v61, %v5904_v35  ;;  %v9784_v31 = vpop.eup %5915 }
 0x550   :  { %v3767_v34 = vmul.f32 %v5914_v61, %v5906_v55  ;;  %v9789_v28 = vpop.eup %5917  ;;  %v3768_v33 = vmul.f32 %v5914_v61, %v5908_v7  ;;  %v3769_v5 = vmul.f32 %v5914_v61, %v5910_v11  ;;  %v3770_v7 = vmul.f32 %v5914_v61, %v5912_v63 }
 0x551   :  { %v3827_v62 = vmul.f32 %v3763_v1, %v9409_v12  ;;  %v3828_v19 = vmul.f32 %v3764_v39, %v9412_v48  ;;  %v3829_v15 = vmul.f32 %v3765_v57, %v9415_v24  ;;  %v9791_v2 = vpop.eup %5919  ;;  %v3830_v37 = vmul.f32 %v3766_v0, %v9418_v18 }
 0x552   :  { %v5922_v35 = vpop.eup %5921  ;;  %v3831_v12 = vmul.f32 %v3767_v34, %v9421_v3  ;;  %v4564_v24 = vrot.slane %v9784_v31, 7  ;;  %v4566_v9 = vrot.slane %v9789_v28, 6  ;;  %v3832_v59 = vmul.f32 %v3768_v33, %v9424_v16 }
 0x553   :  { %v3940_v6 = vsel %vm1410_vm1, %v3827_v62, 0.0  ;;  %v3941_v38 = vsel %vm1410_vm1, %v3828_v19, 0.0  ;;  %v5924_v13 = vpop.eup %5923  ;;  %v3943_v48 = vsel %vm1410_vm1, %v3829_v15, 0.0  ;;  %v3945_v22 = vsel %vm1410_vm1, %v3830_v37, 0.0 }
 0x554   :  { %v3942_v55 = vadd.f32 %v3941_v38, %v3940_v6  ;;  %v5926_v45 = vpop.eup %5925  ;;  %v4565_v11 = vsel %vm4460_vm3, %v4564_v24, %v9791_v2  ;;  %v4568_v50 = vrot.slane %v5922_v35, 5  ;;  %v4570_v29 = vrot.slane %v5924_v13, 4 }
 0x555   :  { %v5928_v18 = vpop.eup %5927  ;;  %v4567_v53 = vsel %vm4463_vm4, %v4566_v9, %v4565_v11  ;;  %v3833_v47 = vmul.f32 %v3769_v5, %v9427_v42  ;;  %v3947_v60 = vsel %vm1410_vm1, %v3831_v12, 0.0  ;;  %v4572_v30 = vrot.slane %v5926_v45, 3 }
 0x556   :  { %v3944_v4 = vadd.f32 %v3943_v48, %v3942_v55  ;;  %v5930_v27 = vpop.eup %5929  ;;  %v4569_v63 = vsel %vm4466_vm5, %v4568_v50, %v4567_v53  ;;  %v4574_v17 = vrot.slane %v5928_v18, 2  ;;  %v3834_v40 = vmul.f32 %v3770_v7, %v9430_v36 }
 0x557   :  { %v4571_v16 = vsel %vm4469_vm6, %v4570_v29, %v4569_v63  ;;  %v3949_v25 = vsel %vm1410_vm1, %v3832_v59, 0.0  ;;  %v4576_v26 = vrot.slane %v5930_v27, 1  ;;  %v3951_v42 = vsel %vm1410_vm1, %v3833_v47, 0.0 }
 0x558   :  { %v3946_v3 = vadd.f32 %v3945_v22, %v3944_v4  ;;  %v4573_v54 = vsel %vm4472_vm7, %v4572_v30, %v4571_v16  ;;  %v3953_v61 = vsel %vm1410_vm1, %v3834_v40, 0.0 }
 0x559   :  { %v4575_v46 = vsel %vm4475_vm8, %v4574_v17, %v4573_v54 }
 0x55a   :  { %v3948_v52 = vadd.f32 %v3947_v60, %v3946_v3  ;;  %v4577_v56 = vsel %vm4478_vm9, %v4576_v26, %v4575_v46 }
 0x55b   :  { %v4635_v8 = vsel %vm1410_vm1, %v4577_v56, 0.0 }
 0x55c   :  { %v3950_v58 = vadd.f32 %v3949_v25, %v3948_v52  ;;  %v4636_v1 = vrot.slane %v4635_v8, 4 }
 0x55e   :  { %v3952_v14 = vadd.f32 %v3951_v42, %v3950_v58  ;;  %v4637_v36 = vadd.f32 %v4636_v1, %v4635_v8 }
 0x560   :  { %v9817_v39 = vadd.f32 %v3953_v61, %v3952_v14  ;;  %v4638_v0 = vrot.slane %v4637_v36, 2 }
 0x562   :  { %v5099_v57 = vsel %vm1410_vm1, %v9817_v39, -inf  ;;  %v4639_v62 = vadd.f32 %v4638_v0, %v4637_v36 }
 0x563   :  { %v5100_v34 = vrot.slane %v5099_v57, 4 }
 0x564   :  { %v4640_v15 = vrot.slane %v4639_v62, 1 }
 0x565   :  { %v5101_v19 = vmax.f32 %v5099_v57, %v5100_v34 }
 0x566   :  { %v4641_v37 = vadd.f32 %v4640_v15, %v4639_v62 }
 0x567   :  { %v5102_v33 = vrot.slane %v5101_v19, 2 }
 0x568   :  { %v4673_v38 = vrot.slane %v4641_v37, %v10138_v23 }
 0x569   :  { %v5103_v6 = vmax.f32 %v5101_v19, %v5102_v33 }
 0x56a   :  { %5931 = vrcp.f32 %v4673_v38 }
 0x56b   :  { %v5104_v5 = vrot.slane %v5103_v6, 1 }
 0x56d   :  { %v5105_v55 = vmax.f32 %v5103_v6, %v5104_v5 }
 0x56f   :  { %v5113_v12 = vsub.f32 %v9817_v39, %v5105_v55 }
 0x571   :  { %v5128_v48 = vmul.f32 1.442695, %v5113_v12 }
 0x573   :  { %5933 = vpow2.f32 %v5128_v48 }
 0x574   :  { %v5932_v24 = vpop.eup %5931 }
 0x575   :  { %v4738_v9 = vmul.f32 %v5932_v24, %v9791_v2  ;;  %v4739_v7 = vmul.f32 %v5932_v24, %v9784_v31  ;;  %v4740_v4 = vmul.f32 %v5932_v24, %v9789_v28  ;;  %v4741_v59 = vmul.f32 %v5932_v24, %v5922_v35 }
 0x576   :  { %v4742_v22 = vmul.f32 %v5932_v24, %v5924_v13  ;;  %v4743_v11 = vmul.f32 %v5932_v24, %v5926_v45  ;;  %v4744_v50 = vmul.f32 %v5932_v24, %v5928_v18  ;;  %v4745_v3 = vmul.f32 %v5932_v24, %v5930_v27 }
 0x577   :  { %v4803_v23 = vmul.f32 %v4739_v7, %v9703_v44  ;;  %v4804_v53 = vmul.f32 %v4740_v4, %v9709_v32  ;;  %v4805_v29 = vmul.f32 %v4741_v59, %v9715_v49  ;;  %v4802_v31 = vmul.f32 %v4738_v9, %v9701_v41 }
 0x578   :  { %v4806_v47 = vmul.f32 %v4742_v22, %v9719_v51  ;;  %v4808_v60 = vmul.f32 %v4744_v50, %v9735_v21  ;;  %v4809_v2 = vmul.f32 %v4745_v3, %v9745_v10  ;;  %v4807_v28 = vmul.f32 %v4743_v11, %v9732_v20 }
 0x579   :  { %v4972_v35 = vrot.slane %v4803_v23, 7  ;;  %v4974_v13 = vrot.slane %v4804_v53, 6  ;;  %v4976_v44 = vrot.slane %v4805_v29, 5 }
 0x57a   :  { %v4978_v27 = vrot.slane %v4806_v47, 4  ;;  %v4980_v63 = vrot.slane %v4807_v28, 3  ;;  %v4982_v41 = vrot.slane %v4808_v60, 2  ;;  %v4984_v52 = vrot.slane %v4809_v2, 1 }
 0x57b   :  { %v4973_v18 = vsel %vm4460_vm3, %v4972_v35, %v4802_v31 }
 0x57c   :  { %v4975_v49 = vsel %vm4463_vm4, %v4974_v13, %v4973_v18 }
 0x57d   :  { %v5934_v45 = vpop.eup %5933  ;;  %v4977_v21 = vsel %vm4466_vm5, %v4976_v44, %v4975_v49 }
 0x57e   :  { %v5179_v32 = vsel %vm1410_vm1, %v5934_v45, 0.0  ;;  %v4979_v10 = vsel %vm4469_vm6, %v4978_v27, %v4977_v21 }
 0x57f   :  { %v5180_v51 = vrot.slane %v5179_v32, 4  ;;  %v4981_v20 = vsel %vm4472_vm7, %v4980_v63, %v4979_v10 }
 0x580   :  { %v4983_v16 = vsel %vm4475_vm8, %v4982_v41, %v4981_v20 }
 0x581   :  { %v5181_v30 = vadd.f32 %v5180_v51, %v5179_v32  ;;  %v4985_v40 = vsel %vm4478_vm9, %v4984_v52, %v4983_v16 }
 0x582   :  { %v5043_v58 = vsel %vm1410_vm1, %v4985_v40, 0.0 }
 0x583   :  { %v5182_v17 = vrot.slane %v5181_v30, 2  ;;  %v5044_v46 = vrot.slane %v5043_v58, 4 }
 0x585   :  { %v5183_v25 = vadd.f32 %v5182_v17, %v5181_v30  ;;  %v5045_v42 = vadd.f32 %v5044_v46, %v5043_v58 }
 0x587   :  { %v5184_v54 = vrot.slane %v5183_v25, 1  ;;  %v5046_v8 = vrot.slane %v5045_v42, 2 }
 0x589   :  { %v5185_v26 = vadd.f32 %v5184_v54, %v5183_v25  ;;  %v5047_v36 = vadd.f32 %v5046_v8, %v5045_v42 }
 0x58b   :  { %5935 = vrcp.f32 %v5185_v26  ;;  %v5048_v34 = vrot.slane %v5047_v36, 1 }
 0x58d   :  { %v5049_v15 = vadd.f32 %v5048_v34, %v5047_v36 }
 0x595   :  { %v5936_v56 = vpop.eup %5935 }
 0x596   :  { %v5201_v14 = vmul.f32 %v5936_v56, %v5934_v45 }
 0x598   :  { %v5209_v61 = vmul.f32 %v5201_v14, %v9817_v39 }
 0x59a   :  { %v5259_v1 = vsel %vm1410_vm1, %v5209_v61, 0.0 }
 0x59b   :  { %v5260_v57 = vrot.slane %v5259_v1, 4 }
 0x59d   :  { %v5261_v0 = vadd.f32 %v5260_v57, %v5259_v1 }
 0x59f   :  { %v5262_v62 = vrot.slane %v5261_v0, 2 }
 0x5a1   :  { %v5263_v19 = vadd.f32 %v5262_v62, %v5261_v0 }
 0x5a3   :  { %v5264_v33 = vrot.slane %v5263_v19, 1 }
 0x5a5   :  { %v5265_v37 = vadd.f32 %v5264_v33, %v5263_v19 }
 0x5a7   :  { %v5273_v6 = vadd.f32 %v5265_v37, %v5049_v15 }
 0x5a9   :  { %v5281_v38 = vmul.f32 0.005, %v5273_v6 }
 0x5ab   :  { %v5302_v5 = vrot.slane %v5281_v38, 1 }
 0x5ad   :  { %v5303_v55 = vsel %vm4478_vm9, %v5302_v5, %v9751_v43 }
 0x5ae   :  { %5305 = vst.msk [vmem:[%s9853_s2] sm:$0xff] %vm1410_vm1, %v5303_v55 }

</bundles_post_ra>
